<compile_context>
chip_gen: v5e
topology: v5e:2x2
jax: 0.10.0
libtpu: 0.0.40
codegen_flags: <defaults>
</compile_context>

<pallas_src>
import math
import functools

import jax
import jax.numpy as jnp
from jax.experimental import pallas as pl
from jax.experimental.pallas import tpu as pltpu

ALPHA = 0.2  # simple_GC_DEC default


def _round_up(a, b):
    return ((a + b - 1) // b) * b


def _pick_tile(n, requested, align):
    """Balanced tile size (multiple of `align`) and padded extent for n elems.

    Picks the number of tiles implied by `requested`, then evens the tile size
    out so padding is bounded by `align * n_tiles` instead of `requested`.
    """
    requested = max(align, (requested // align) * align)
    n_tiles = -(-n // requested)                 # ceil(n / requested)
    tile = _round_up(-(-n // n_tiles), align)    # balanced, aligned tile
    return tile, n_tiles * tile


# ---------------------------------------------------------------------------
# z = adj @ support + b ; q = student-t soft assignment (per-row-tile epilogue)
# ---------------------------------------------------------------------------
def _gc_dec_kernel(adj_ref, sup_ref, b_ref, mu_ref,   # inputs
                   z_ref, q_ref,                      # outputs
                   acc_ref,                           # VMEM f32 accumulator
                   *, alpha):
    k = pl.program_id(1)

    @pl.when(k == 0)
    def _init():
        acc_ref[...] = jnp.zeros_like(acc_ref)

    # Main (HBM-bound) loop body: one MXU tile of adj @ support, f32 accum.
    acc_ref[...] += jnp.dot(adj_ref[...], sup_ref[...],
                            preferred_element_type=jnp.float32)

    @pl.when(k == pl.num_programs(1) - 1)
    def _epilogue():
        z = acc_ref[...] + b_ref[...]                    # (tm, nhid) f32
        z_ref[...] = z.astype(z_ref.dtype)

        # Exact squared distance: sum((z - mu)^2) -- nhid/K are tiny, so this
        # is negligible VPU work and avoids cancellation of the norm expansion.
        mu = mu_ref[...].astype(jnp.float32)             # (K, nhid)
        diff = z[:, None, :] - mu[None, :, :]            # (tm, K, nhid)
        d2 = jnp.sum(diff * diff, axis=-1)               # (tm, K)

        q = 1.0 / (1.0 + d2 / alpha + 1e-8)              # exact divide
        q = jnp.exp((alpha + 1.0) * jnp.log(q))          # q ** (alpha + 1)
        # the "/2.0" of the reference cancels in the row normalization below
        q = q / jnp.sum(q, axis=1, keepdims=True)        # exact divide
        q_ref[...] = q.astype(q_ref.dtype)


# ---------------------------------------------------------------------------
# Wrapper
# ---------------------------------------------------------------------------
def simple_gc_dec_forward(x, adj, weight, bias, mu, *,
                          alpha=ALPHA,
                          tm=512, tk=4096,
                          compute_dtype=jnp.bfloat16,
                          vmem_limit_bytes=48 * 1024 * 1024):
    """x:(N,nfeat), adj:(N,N), weight:(nfeat,nhid), bias:(nhid,), mu:(K,nhid).

    Returns (z:(N,nhid), q:(N,K)) in float32.

    compute_dtype is the dtype of the streamed adj / support operands
    (bfloat16 default: ~2x HBM traffic reduction on the dominant adj stream);
    accumulation and the softmax-like epilogue are always float32.
    """
    f32 = jnp.float32
    N, nfeat = x.shape
    nhid = weight.shape[1]
    K = mu.shape[0]

    # Balanced tiles: rows aligned to 8 sublanes, cols (contraction) to 128
    # lanes; rows and cols padded independently (no lcm blow-up).
    tm, rpad = _pick_tile(N, tm, 8)
    tk, cpad = _pick_tile(N, tk, 128)

    # support = x @ W : O(N*nfeat*nhid) -- noise next to the N^2*nhid adj
    # matmul, so a plain XLA dot; the compute_dtype cast fuses into it.
    support = jnp.dot(x.astype(f32), weight.astype(f32),
                      preferred_element_type=f32)
    sup_in = support.astype(compute_dtype)
    if cpad != N:
        sup_in = jnp.pad(sup_in, ((0, cpad - N), (0, 0)))

    # adj streamed in compute_dtype; single cast+pad pass.  NOTE: adj is
    # static across a DEC training run -- callers should hoist this cast/pad
    # out of the training step (pass adj already in compute_dtype) so the
    # extra HBM pass is paid once, not per forward.
    adj_in = adj if adj.dtype == compute_dtype else adj.astype(compute_dtype)
    if rpad != N or cpad != N:
        adj_in = jnp.pad(adj_in, ((0, rpad - N), (0, cpad - N)))

    bias2d = bias.reshape(1, nhid).astype(f32)
    mu_in = mu.astype(f32)

    itemsize = jnp.dtype(compute_dtype).itemsize
    grid = (rpad // tm, cpad // tk)   # (row tiles, contraction tiles)

    kernel = functools.partial(_gc_dec_kernel, alpha=float(alpha))

    z_pad, q_pad = pl.pallas_call(
        kernel,
        out_shape=(
            jax.ShapeDtypeStruct((rpad, nhid), f32),
            jax.ShapeDtypeStruct((rpad, K), f32),
        ),
        grid_spec=pltpu.PrefetchScalarGridSpec(
            num_scalar_prefetch=0,
            grid=grid,
            in_specs=[
                pl.BlockSpec((tm, tk), lambda i, k: (i, k)),     # adj (streamed)
                pl.BlockSpec((tk, nhid), lambda i, k: (k, 0)),   # support (streamed)
                pl.BlockSpec((1, nhid), lambda i, k: (0, 0)),    # bias (tiny, resident)
                pl.BlockSpec((K, nhid), lambda i, k: (0, 0)),    # mu (tiny, resident)
            ],
            out_specs=(
                pl.BlockSpec((tm, nhid), lambda i, k: (i, 0)),   # z
                pl.BlockSpec((tm, K), lambda i, k: (i, 0)),      # q
            ),
            scratch_shapes=[pltpu.VMEM((tm, nhid), jnp.float32)],  # accumulator
        ),
        compiler_params=pltpu.CompilerParams(
            dimension_semantics=("parallel", "arbitrary"),
            vmem_limit_bytes=vmem_limit_bytes,
        ),
        cost_estimate=pl.CostEstimate(
            flops=int(2 * rpad * cpad * nhid + 3 * rpad * K * nhid),
            transcendentals=int(2 * rpad * K),
            bytes_accessed=int(rpad * cpad * itemsize
                               + grid[0] * cpad * nhid * itemsize
                               + 4 * (rpad * nhid + rpad * K + nhid + K * nhid)),
        ),
    )(adj_in, sup_in, bias2d, mu_in)

    return z_pad[:N], q_pad[:N]


# ---------------------------------------------------------------------------
# Pure-JAX reference (mirrors the PyTorch forward)
# ---------------------------------------------------------------------------
def _reference_forward(x, adj, weight, bias, mu, alpha=ALPHA):
    z = adj @ (x @ weight) + bias
    d2 = jnp.sum((z[:, None, :] - mu[None, :, :]) ** 2, axis=2)
    q = 1.0 / (1.0 + d2 / alpha + 1e-8)
    q = q ** (alpha + 1.0) / 2.0
    q = q / jnp.sum(q, axis=1, keepdims=True)
    return z, q


if __name__ == "__main__":
    # Small problem: N nodes (non-multiple of the tiles to exercise padding),
    # nfeat input dim, nhid hidden dim, K clusters.
    N, nfeat, nhid, K = 500, 64, 32, 8

    key = jax.random.PRNGKey(0)
    kx, kadj, kw, kb, kmu = jax.random.split(key, 5)

    x = jax.random.normal(kx, (N, nfeat), dtype=jnp.float32)

    # Row-normalized dense adjacency (what spmm sees after SpaGCN preprocessing).
    adj_raw = jax.random.uniform(kadj, (N, N), dtype=jnp.float32)
    adj = adj_raw / jnp.sum(adj_raw, axis=1, keepdims=True)

    # GraphConvolution.reset_parameters(): uniform(-stdv, stdv), stdv=1/sqrt(nhid)
    stdv = 1.0 / math.sqrt(nhid)
    weight = jax.random.uniform(kw, (nfeat, nhid), minval=-stdv, maxval=stdv,
                                dtype=jnp.float32)
    bias = jax.random.uniform(kb, (nhid,), minval=-stdv, maxval=stdv,
                              dtype=jnp.float32)
    # mu is set in fit() from cluster centers; init deterministically here.
    mu = jax.random.normal(kmu, (K, nhid), dtype=jnp.float32)

    z_ref, q_ref = _reference_forward(x, adj, weight, bias, mu)

    # 1) f32 path with small tiles so both grid axes (row + contraction) run.
    z, q = simple_gc_dec_forward(x, adj, weight, bias, mu,
                                 tm=128, tk=128, compute_dtype=jnp.float32)
    jax.block_until_ready((z, q))
    assert z.shape == (N, nhid) and q.shape == (N, K)
    assert jnp.allclose(z, z_ref, atol=1e-4, rtol=1e-4)
    assert jnp.allclose(q, q_ref, atol=1e-5, rtol=1e-3)
    assert jnp.allclose(jnp.sum(q, axis=1), 1.0, atol=1e-5)

    # 2) Default fast path: bf16 adj/support stream, f32 accumulate + epilogue.
    z16, q16 = simple_gc_dec_forward(x, adj, weight, bias, mu)
    jax.block_until_ready((z16, q16))
    assert z16.shape == (N, nhid) and q16.shape == (N, K)
    assert jnp.allclose(z16, z_ref, atol=5e-3, rtol=5e-2)
    assert jnp.allclose(q16, q_ref, atol=5e-3, rtol=5e-2)
    assert jnp.allclose(jnp.sum(q16, axis=1), 1.0, atol=1e-5)

    # TODO(synk): loss_function / target_distribution / fit() training loop are
    # host-side utilities, not part of the forward pass translated here.
    print("KERNEL_OK")
</pallas_src>

<mosaic_0001>
module attributes {stable_mosaic.version = 11 : i64} {
  func.func @_gc_dec_kernel(%arg0: i32, %arg1: i32, %arg2: memref<128x128xf32, #tpu.memory_space<vmem>>, %arg3: memref<128x32xf32, #tpu.memory_space<vmem>>, %arg4: memref<1x32xf32, #tpu.memory_space<vmem>>, %arg5: memref<8x32xf32, #tpu.memory_space<vmem>>, %arg6: memref<128x32xf32, #tpu.memory_space<vmem>>, %arg7: memref<128x8xf32, #tpu.memory_space<vmem>>, %arg8: memref<128x32xf32, #tpu.memory_space<vmem>>) attributes {dimension_semantics = [#tpu.dimension_semantics<parallel>, #tpu.dimension_semantics<arbitrary>], iteration_bounds = array<i64: 4, 4>, scalar_prefetch = 0 : i64, scratch_operands = 1 : i64, tpu.core_type = #tpu.core_type<tc>, window_params = [{transform_indices = @transform_0, window_bounds = array<i64: 128, 128>}, {transform_indices = @transform_1, window_bounds = array<i64: 128, 32>}, {pipeline_mode = #tpu.pipeline_mode<synchronous>, transform_indices = @transform_2, window_bounds = array<i64: 1, 32>}, {pipeline_mode = #tpu.pipeline_mode<synchronous>, transform_indices = @transform_3, window_bounds = array<i64: 8, 32>}, {transform_indices = @transform_4, window_bounds = array<i64: 128, 32>}, {transform_indices = @transform_5, window_bounds = array<i64: 128, 8>}]} {
    %c0_i32 = arith.constant 0 : i32
    %0 = arith.cmpi eq, %arg1, %c0_i32 : i32
    %1 = arith.extui %0 : i1 to i32
    %c0_i32_0 = arith.constant 0 : i32
    %2 = arith.cmpi ne, %1, %c0_i32_0 : i32
    scf.if %2 {
      %cst_9 = arith.constant 0.000000e+00 : f32
      %12 = vector.broadcast %cst_9 : f32 to vector<128x32xf32>
      %c0_10 = arith.constant 0 : index
      %c0_11 = arith.constant 0 : index
      %13 = vector.load %arg8[%c0_10, %c0_11] : memref<128x32xf32, #tpu.memory_space<vmem>>, vector<128x32xf32>
      tpu.vector_store %arg8[%c0_10, %c0_11], %12 {strides = array<i32>} : memref<128x32xf32, #tpu.memory_space<vmem>>, vector<128x32xf32>,
    } else {
    }
    %c0 = arith.constant 0 : index
    %c0_1 = arith.constant 0 : index
    %3 = vector.load %arg8[%c0, %c0_1] : memref<128x32xf32, #tpu.memory_space<vmem>>, vector<128x32xf32>
    %c0_2 = arith.constant 0 : index
    %c0_3 = arith.constant 0 : index
    %4 = vector.load %arg2[%c0_2, %c0_3] : memref<128x128xf32, #tpu.memory_space<vmem>>, vector<128x128xf32>
    %c0_4 = arith.constant 0 : index
    %c0_5 = arith.constant 0 : index
    %5 = vector.load %arg3[%c0_4, %c0_5] : memref<128x32xf32, #tpu.memory_space<vmem>>, vector<128x32xf32>
    %cst = arith.constant dense<0.000000e+00> : vector<128x32xf32>
    %6 = tpu.matmul %4, %5, %cst {dimension_numbers = #tpu.dot_dimension_numbers<[1], [0], [0], [1], [0, 0, 1, 1], [], []>} : vector<128x128xf32>, vector<128x32xf32>, vector<128x32xf32> -> vector<128x32xf32>
    %7 = arith.addf %3, %6 : vector<128x32xf32>
    %c0_6 = arith.constant 0 : index
    %c0_7 = arith.constant 0 : index
    %8 = vector.load %arg8[%c0_6, %c0_7] : memref<128x32xf32, #tpu.memory_space<vmem>>, vector<128x32xf32>
    tpu.vector_store %arg8[%c0_6, %c0_7], %7 {strides = array<i32>} : memref<128x32xf32, #tpu.memory_space<vmem>>, vector<128x32xf32>,
    %c3_i32 = arith.constant 3 : i32
    %9 = arith.cmpi eq, %arg1, %c3_i32 : i32
    %10 = arith.extui %9 : i1 to i32
    %c0_i32_8 = arith.constant 0 : i32
    %11 = arith.cmpi ne, %10, %c0_i32_8 : i32
    scf.if %11 {
      %c0_9 = arith.constant 0 : index
      %c0_10 = arith.constant 0 : index
      %12 = vector.load %arg8[%c0_9, %c0_10] : memref<128x32xf32, #tpu.memory_space<vmem>>, vector<128x32xf32>
      %c0_11 = arith.constant 0 : index
      %c0_12 = arith.constant 0 : index
      %13 = vector.load %arg4[%c0_11, %c0_12] : memref<1x32xf32, #tpu.memory_space<vmem>>, vector<1x32xf32>
      %14 = vector.broadcast %13 : vector<1x32xf32> to vector<128x32xf32>
      %15 = arith.addf %12, %14 : vector<128x32xf32>
      %c0_13 = arith.constant 0 : index
      %c0_14 = arith.constant 0 : index
      %16 = vector.load %arg6[%c0_13, %c0_14] : memref<128x32xf32, #tpu.memory_space<vmem>>, vector<128x32xf32>
      tpu.vector_store %arg6[%c0_13, %c0_14], %15 {strides = array<i32>} : memref<128x32xf32, #tpu.memory_space<vmem>>, vector<128x32xf32>,
      %c0_15 = arith.constant 0 : index
      %c0_16 = arith.constant 0 : index
      %17 = vector.load %arg5[%c0_15, %c0_16] : memref<8x32xf32, #tpu.memory_space<vmem>>, vector<8x32xf32>
      %18 = vector.shape_cast %15 : vector<128x32xf32> to vector<128x1x32xf32>
      %19 = vector.shape_cast %17 : vector<8x32xf32> to vector<1x8x32xf32>
      %20 = vector.broadcast %18 : vector<128x1x32xf32> to vector<128x8x32xf32>
      %21 = vector.broadcast %19 : vector<1x8x32xf32> to vector<128x8x32xf32>
      %22 = arith.subf %20, %21 : vector<128x8x32xf32>
      %23 = arith.mulf %22, %22 : vector<128x8x32xf32>
      %cst_17 = arith.constant dense<0.000000e+00> : vector<128x8xf32>
      %24 = vector.multi_reduction <add>, %23, %cst_17 [2] : vector<128x8x32xf32> to vector<128x8xf32>
      %cst_18 = arith.constant 2.000000e-01 : f32
      %25 = vector.broadcast %cst_18 : f32 to vector<128x8xf32>
      %26 = arith.divf %24, %25 : vector<128x8xf32>
      %cst_19 = arith.constant 1.000000e+00 : f32
      %27 = vector.broadcast %cst_19 : f32 to vector<128x8xf32>
      %28 = arith.addf %27, %26 : vector<128x8xf32>
      %cst_20 = arith.constant 9.99999993E-9 : f32
      %29 = vector.broadcast %cst_20 : f32 to vector<128x8xf32>
      %30 = arith.addf %28, %29 : vector<128x8xf32>
      %cst_21 = arith.constant 1.000000e+00 : f32
      %31 = vector.broadcast %cst_21 : f32 to vector<128x8xf32>
      %32 = arith.divf %31, %30 : vector<128x8xf32>
      %33 = math.log %32 : vector<128x8xf32>
      %cst_22 = arith.constant 1.200000e+00 : f32
      %34 = vector.broadcast %cst_22 : f32 to vector<128x8xf32>
      %35 = arith.mulf %34, %33 : vector<128x8xf32>
      %36 = math.exp %35 : vector<128x8xf32>
      %cst_23 = arith.constant dense<0.000000e+00> : vector<128xf32>
      %37 = vector.multi_reduction <add>, %36, %cst_23 [1] : vector<128x8xf32> to vector<128xf32>
      %38 = vector.shape_cast %37 : vector<128xf32> to vector<128x1xf32>
      %39 = vector.broadcast %38 : vector<128x1xf32> to vector<128x8xf32>
      %40 = arith.divf %36, %39 : vector<128x8xf32>
      %c0_24 = arith.constant 0 : index
      %c0_25 = arith.constant 0 : index
      %41 = vector.load %arg7[%c0_24, %c0_25] : memref<128x8xf32, #tpu.memory_space<vmem>>, vector<128x8xf32>
      tpu.vector_store %arg7[%c0_24, %c0_25], %40 {strides = array<i32>} : memref<128x8xf32, #tpu.memory_space<vmem>>, vector<128x8xf32>,
    } else {
    }
    return
  }
  func.func @transform_0(%arg0: i32, %arg1: i32) -> (i32, i32) {
    %c0_i32 = arith.constant 0 : i32
    return %arg0, %arg1 : i32, i32
  }
  func.func @transform_1(%arg0: i32, %arg1: i32) -> (i32, i32) {
    %c0_i32 = arith.constant 0 : i32
    %c0_i32_0 = arith.constant 0 : i32
    return %arg1, %c0_i32 : i32, i32
  }
  func.func @transform_2(%arg0: i32, %arg1: i32) -> (i32, i32) {
    %c0_i32 = arith.constant 0 : i32
    %c0_i32_0 = arith.constant 0 : i32
    %c0_i32_1 = arith.constant 0 : i32
    return %c0_i32, %c0_i32_0 : i32, i32
  }
  func.func @transform_3(%arg0: i32, %arg1: i32) -> (i32, i32) {
    %c0_i32 = arith.constant 0 : i32
    %c0_i32_0 = arith.constant 0 : i32
    %c0_i32_1 = arith.constant 0 : i32
    return %c0_i32, %c0_i32_0 : i32, i32
  }
  func.func @transform_4(%arg0: i32, %arg1: i32) -> (i32, i32) {
    %c0_i32 = arith.constant 0 : i32
    %c0_i32_0 = arith.constant 0 : i32
    return %arg0, %c0_i32 : i32, i32
  }
  func.func @transform_5(%arg0: i32, %arg1: i32) -> (i32, i32) {
    %c0_i32 = arith.constant 0 : i32
    %c0_i32_0 = arith.constant 0 : i32
    return %arg0, %c0_i32 : i32, i32
  }
}

</mosaic_0001>

<bundles_post_ra>
// kernel: tpu_custom_call.1
= control target key start
LH: loop header
LB: loop body
LE: loop exit
PB: predicated region body
PF: predicated region fallthrough
CT: control target
= control target key end

     0   :  { %11 = vsyncpa [#allocation4], 0  ;;  %s17669_s0 = inlined_call_operand.hbm [shape: f32[512,512], index: 0, kind: input, shape index: {}]   ;;  %s17670_s1 = inlined_call_operand.vmem [shape: f32[512,32], index: 1, kind: input, shape index: {}]   ;;  %s17671_s2 = inlined_call_operand.vmem [shape: f32[1,32], index: 2, kind: input, shape index: {}]   ;;  %s17672_s3 = inlined_call_operand.vmem [shape: f32[8,32], index: 3, kind: input, shape index: {}]   ;;  %s17673_s4 = inlined_call_operand.vmem [shape: f32[512,32], index: 4, kind: output, shape index: {0}]   ;;  %s17674_s5 = inlined_call_operand.vmem [shape: f32[512,8], index: 5, kind: output, shape index: {1}]  }
   0x1   :  { %13 = vsyncpa [#allocation4 + $0x1], 0  ;;  %s9362_s18 = smov 0   ;;  %s9364_s19 = smov 0  }
   0x2   :  { %s9366_s20 = smov 0   ;;  %s9368_s21 = smov 0  }
   0x3   :  { %s9370_s22 = smov 0   ;;  %s9372_s23 = smov 0  }
   0x4   :  { %s9374_s24 = smov 0   ;;  %s9376_s25 = smov 0  }
   0x5 LB: > { %s8045_s26 = sadd.s32 4294967295, %s9324_s25   ;;  %s28_s27 = sadd.s32 1, %s9316_s23  ;;  %s9324_s25 = sphi %s9376_s25, %s19_s25   ;;  %s9320_s24 = sphi %s9374_s24, %s19549_s24   ;;  %s9316_s23 = sphi %s9372_s23, %s19548_s23   ;;  %s9312_s22 = sphi %s9370_s22, %s19547_s22   ;;  %s9308_s21 = sphi %s9368_s21, %s19546_s21   ;;  %s9304_s20 = sphi %s9366_s20, %s19545_s20   ;;  %s9300_s19 = sphi %s9364_s19, %s19544_s19   ;;  %s9296_s18 = sphi %s9362_s18, %s19543_s18  }
   0x6   : > { %p29_p0 = scmp.ge.s32.totalorder %s28_s27, 4  ;;  %s31_s28 = sadd.s32 1, %s9320_s24 }
   0x7   : > { %s40_s29 = sadd.s32 1, %s9304_s20  ;;  %p47_p1 = scmp.ne.s32.totalorder %s9304_s20, %s9300_s19 }
   0x8   : > { %s19551_s27 = smov (%p29_p0, %s28_s27), 0  ;;  %s19553_s28 = smov (!%p29_p0, %s31_s28), %s9320_s24 }
   0x9   : > { %18129 = sst [smem:[#allocation6_spill]] %s19551_s27  ;;  %s36_s30 = ssub.s32 %s9316_s23, %s19551_s27 }
   0xa   : > { %p48_p2 = scmp.eq.s32.totalorder %s9324_s25, 0  ;;  %p33_p3 = scmp.ge.s32.totalorder %s19553_s28, 4 }
   0xb   : > { %p53_p4 = scmp.ne.s32.totalorder %s9300_s19, %s9296_s18  ;;  %p54_p6 = scmp.eq.s32.totalorder %s8045_s26, 0 }
   0xc   : > { %p9413_p5 = por %p48_p2, %p47_p1  ;;  %s19555_s28 = smov (%p33_p3, %s19553_s28), 0 }
   0xd   : > { %18131 = sst [smem:[#allocation7_spill]] %s19555_s28  ;;  %p9419_p7 = por %p54_p6, %p53_p4 }
   0xe   : > { %s35_s8 = ssub.s32 %s9320_s24, %s19555_s28  ;;  %p8120_p8 = scmp.lt.s32.totalorder %s9324_s25, 16 }
   0xf   : > { %s37_s9 = sor.u32 %s36_s30, %s35_s8  ;;  %s203_s10 = sand.u32 1, %s9304_s20  }
  0x10   : > { %p38_p9 = scmp.eq.s32.totalorder %s37_s9, 0  ;;  %s8049_s11 = sshll.u32 %s203_s10, 7 }
  0x11   : > { %s8065_s12 = sshll.u32 %s9320_s24, 6  ;;  %s207_s16 = scalar_lea.vmem [#allocation3], %s8049_s11 }
  0x12   : > { %s9429_s13 = scalar_select %p38_p9, %s9304_s20, %s40_s29  }
  0x13   : > { %s212_s14 = sadd.s32 %s9316_s23, %s8065_s12  ;;  %s217_s17 = sshll.u32 %s207_s16, 4  ;;  %s218_s17 = int_to_ptr.vmem [resolvable:$true] %s217_s17 }
  0x14   : > { %s8052_s15 = sshll.u32 %s212_s14, 3  ;;  %p8117_p10 = pnand %p8120_p8, %p9413_p5 }
  0x15   : > { %s214_s27 = scalar_lea.hbm %s17669_s0, %s8052_s15  ;;  %p8053_p11 = scmp.ge.s32.totalorder %s9324_s25, 1 }
  0x16   : > { %s215_s28 = sshll.u32 %s214_s27, 4  ;;  %s204_s30 = scalar_lea.sflag [#allocation4], %s203_s10  ;;  %s216_s28 = int_to_ptr.hbm [resolvable:$true] %s215_s28 }
  0x17   : > { %s9326_s8 = smov 512   ;;  %s9327_s29 = smov 128  }
  0x18   : > { %s9328_s9 = smov 8   ;;  %p234_p12 = scmp.lt.s32.totalorder %s9324_s25, 17 }
  0x19   : > { %8119 = dma.hbm_to_vmem [thread:$0]  (!%p8117_p10), %s216_s28, 2048, %s218_s17, %s204_s30, %s9326_s8, %s9327_s29, %s9328_s9  }
  0x1a   : > { %p235_p13 = pnand %p8053_p11, %p234_p12 }
  0x1b   : > { %s240_s11 = sand.u32 (!%p235_p13), 1, %s9300_s19  }
  0x1c   : > { %238 = sbr.rel (%p235_p13) target bundleno = 1915 (0x77b), region = 36  ;;  %s8054_s12 = sshll.u32 (!%p235_p13), %s240_s11, 7 }
  0x1d   : > { %s241_s14 = scalar_lea.sflag (!%p235_p13), [#allocation4], %s240_s11  ;;  %s9442_s15 = scalar_lea.vmem (!%p235_p13), [#allocation3], %s8054_s12 }
  0x21   : > { %9291 = dma.done.wait (%p9419_p7), %s241_s14, 2048  }
  0x22   : > { %9293 = vsyncadd (%p9419_p7), %s241_s14, 4294965248  ;;  %s8055_s27 = sshll.u32 %s9308_s21, 4  ;;  %s8057_s6 = sshll.u32 %s9312_s22, 4 }
  0x23   : > { %p284_p0 = scmp.lt.s32.totalorder %s8055_s27, 63  ;;  %p290_p1 = scmp.lt.s32.totalorder %s8057_s6, 63 }
  0x24   : > { %p8061_p2 = scmp.ne.s32.totalorder %s9308_s21, 0 }
  0x25   : > { %s19557_s27 = smov (!%p284_p0, %s8055_s27), 63  ;;  %s19559_s6 = smov (!%p290_p1, %s8057_s6), 63 }
  0x26   : > { %s8056_s28 = sshll.u32 %s19557_s27, 3  ;;  %s8058_s18 = sshll.u32 %s19559_s6, 3 }
  0x27   : > { %s9453_s17 = scalar_lea.vmem %s17670_s1, %s8056_s28  ;;  %s9458_s7 = scalar_lea.vmem %s17673_s4, %s8058_s18 }
  0x28   : > { %s9463_s22 = scalar_lea.vmem %s17674_s5, %s8058_s18  ;;  %304 = sbr.rel (%p8061_p2) target bundleno = 62 (0x3e), region = 44 }
  0x2d   : > { %vm305_vm0 = vcmask 261120   ;;  %v9329_v0 = vmov 0.0  }
  0x2e   : > { %306 = vst.msk [vmem:[#allocation2] sm:$0xff] %vm305_vm0, %v9329_v0 }
  0x2f   : > { %307 = vst.msk [vmem:[#allocation2 + $0x8] sm:$0xff] %vm305_vm0, %v9329_v0 }
  0x30   : > { %308 = vst.msk [vmem:[#allocation2 + $0x10] sm:$0xff] %vm305_vm0, %v9329_v0 }
  0x31   : > { %309 = vst.msk [vmem:[#allocation2 + $0x18] sm:$0xff] %vm305_vm0, %v9329_v0 }
  0x32   : > { %310 = vst.msk [vmem:[#allocation2 + $0x20] sm:$0xff] %vm305_vm0, %v9329_v0 }
  0x33   : > { %311 = vst.msk [vmem:[#allocation2 + $0x28] sm:$0xff] %vm305_vm0, %v9329_v0 }
  0x34   : > { %312 = vst.msk [vmem:[#allocation2 + $0x30] sm:$0xff] %vm305_vm0, %v9329_v0 }
  0x35   : > { %313 = vst.msk [vmem:[#allocation2 + $0x38] sm:$0xff] %vm305_vm0, %v9329_v0 }
  0x36   : > { %314 = vst.msk [vmem:[#allocation2 + $0x40] sm:$0xff] %vm305_vm0, %v9329_v0 }
  0x37   : > { %315 = vst.msk [vmem:[#allocation2 + $0x48] sm:$0xff] %vm305_vm0, %v9329_v0 }
  0x38   : > { %316 = vst.msk [vmem:[#allocation2 + $0x50] sm:$0xff] %vm305_vm0, %v9329_v0 }
  0x39   : > { %317 = vst.msk [vmem:[#allocation2 + $0x58] sm:$0xff] %vm305_vm0, %v9329_v0 }
  0x3a   : > { %318 = vst.msk [vmem:[#allocation2 + $0x60] sm:$0xff] %vm305_vm0, %v9329_v0 }
  0x3b   : > { %319 = vst.msk [vmem:[#allocation2 + $0x68] sm:$0xff] %vm305_vm0, %v9329_v0 }
  0x3c   : > { %320 = vst.msk [vmem:[#allocation2 + $0x70] sm:$0xff] %vm305_vm0, %v9329_v0 }
  0x3d   : > { %321 = vst.msk [vmem:[#allocation2 + $0x78] sm:$0xff] %vm305_vm0, %v9329_v0 }
  0x3e PF: > { %v369_v1 = vld [vmem:[%s9453_s17 + $0x78] sm:$0xff]  ;;  %v368_v2 = vld [vmem:[%s9453_s17 + $0x70] sm:$0xff]  ;;  %v367_v3 = vld [vmem:[%s9453_s17 + $0x68] sm:$0xff]  ;;  %vm17704_vm1 = vcmask 261120   ;;  %p8062_p3 = scmp.ne.s32.totalorder %s9308_s21, 3 }
  0x3f   : > { %8067 = vmatpush.msra.mxu2 %v369_v1  ;;  %8068 = vmatpush.msra.mxu3 %v369_v1  ;;  %v366_v4 = vld [vmem:[%s9453_s17 + $0x60] sm:$0xff]  ;;  %v365_v5 = vld [vmem:[%s9453_s17 + $0x58] sm:$0xff]  ;;  %v364_v6 = vld [vmem:[%s9453_s17 + $0x50] sm:$0xff] }
  0x40   : > { %370 = vmatpush.msra.mxu0 %v369_v1  ;;  %8066 = vmatpush.msra.mxu1 %v369_v1  ;;  %v363_v7 = vld [vmem:[%s9453_s17 + $0x48] sm:$0xff]  ;;  %v362_v8 = vld [vmem:[%s9453_s17 + $0x40] sm:$0xff]  ;;  %v361_v9 = vld [vmem:[%s9453_s17 + $0x38] sm:$0xff] }
  0x41   : > { %8070 = vmatpush.msra.mxu2 %v368_v2  ;;  %8071 = vmatpush.msra.mxu3 %v368_v2  ;;  %v360_v10 = vld [vmem:[%s9453_s17 + $0x30] sm:$0xff]  ;;  %v359_v11 = vld [vmem:[%s9453_s17 + $0x28] sm:$0xff]  ;;  %v358_v12 = vld [vmem:[%s9453_s17 + $0x20] sm:$0xff] }
  0x42   : > { %371 = vmatpush.msra.mxu0 %v368_v2  ;;  %8069 = vmatpush.msra.mxu1 %v368_v2  ;;  %v357_v13 = vld [vmem:[%s9453_s17 + $0x18] sm:$0xff]  ;;  %v356_v14 = vld [vmem:[%s9453_s17 + $0x10] sm:$0xff]  ;;  %v355_v15 = vld [vmem:[%s9453_s17 + $0x8] sm:$0xff] }
  0x43   : > { %8073 = vmatpush.msra.mxu2 %v367_v3  ;;  %8074 = vmatpush.msra.mxu3 %v367_v3  ;;  %v354_v16 = vld [vmem:[%s9453_s17] sm:$0xff]  ;;  %v347_v21 = vld [vmem:[%s9442_s15 + $0x48] sm:$0xff]  ;;  %v348_v25 = vld [vmem:[%s9442_s15 + $0x50] sm:$0xff] }
  0x44   : > { %372 = vmatpush.msra.mxu0 %v367_v3  ;;  %8072 = vmatpush.msra.mxu1 %v367_v3  ;;  %v346_v17 = vld [vmem:[%s9442_s15 + $0x40] sm:$0xff]  ;;  %v351_v22 = vld [vmem:[%s9442_s15 + $0x68] sm:$0xff]  ;;  %v352_v26 = vld [vmem:[%s9442_s15 + $0x70] sm:$0xff] }
  0x45   : > { %8076 = vmatpush.msra.mxu2 %v366_v4  ;;  %8077 = vmatpush.msra.mxu3 %v366_v4  ;;  %v350_v18 = vld [vmem:[%s9442_s15 + $0x60] sm:$0xff]  ;;  %v339_v23 = vld [vmem:[%s9442_s15 + $0x8] sm:$0xff]  ;;  %v340_v27 = vld [vmem:[%s9442_s15 + $0x10] sm:$0xff] }
  0x46   : > { %373 = vmatpush.msra.mxu0 %v366_v4  ;;  %8075 = vmatpush.msra.mxu1 %v366_v4  ;;  %v338_v19 = vld [vmem:[%s9442_s15] sm:$0xff]  ;;  %v343_v24 = vld [vmem:[%s9442_s15 + $0x28] sm:$0xff]  ;;  %v344_v28 = vld [vmem:[%s9442_s15 + $0x30] sm:$0xff] }
  0x47   : > { %8079 = vmatpush.msra.mxu2 %v365_v5  ;;  %8080 = vmatpush.msra.mxu3 %v365_v5  ;;  %v342_v20 = vld [vmem:[%s9442_s15 + $0x20] sm:$0xff]  ;;  %v349_v29 = vld [vmem:[%s9442_s15 + $0x58] sm:$0xff]  ;;  %v323_v45 = vld [vmem:[#allocation2 + $0x8] sm:$0xff] }
  0x48   : > { %374 = vmatpush.msra.mxu0 %v365_v5  ;;  %8078 = vmatpush.msra.mxu1 %v365_v5  ;;  %v353_v30 = vld [vmem:[%s9442_s15 + $0x78] sm:$0xff]  ;;  %v322_v33 = vld [vmem:[#allocation2] sm:$0xff]  ;;  %v327_v46 = vld [vmem:[#allocation2 + $0x28] sm:$0xff] }
  0x49   : > { %8082 = vmatpush.msra.mxu2 %v364_v6  ;;  %8083 = vmatpush.msra.mxu3 %v364_v6  ;;  %v341_v31 = vld [vmem:[%s9442_s15 + $0x18] sm:$0xff]  ;;  %v326_v34 = vld [vmem:[#allocation2 + $0x20] sm:$0xff]  ;;  %v331_v51 = vld [vmem:[#allocation2 + $0x48] sm:$0xff] }
  0x4a   : > { %375 = vmatpush.msra.mxu0 %v364_v6  ;;  %8081 = vmatpush.msra.mxu1 %v364_v6  ;;  %v345_v32 = vld [vmem:[%s9442_s15 + $0x38] sm:$0xff]  ;;  %v330_v39 = vld [vmem:[#allocation2 + $0x40] sm:$0xff]  ;;  %v335_v52 = vld [vmem:[#allocation2 + $0x68] sm:$0xff] }
  0x4b   : > { %8085 = vmatpush.msra.mxu2 %v363_v7  ;;  %8086 = vmatpush.msra.mxu3 %v363_v7  ;;  %v334_v40 = vld [vmem:[#allocation2 + $0x60] sm:$0xff]  ;;  %v324_v57 = vld [vmem:[#allocation2 + $0x10] sm:$0xff]  ;;  %v325_v5 = vld [vmem:[#allocation2 + $0x18] sm:$0xff] }
  0x4c   : > { %376 = vmatpush.msra.mxu0 %v363_v7  ;;  %8084 = vmatpush.msra.mxu1 %v363_v7  ;;  %v328_v58 = vld [vmem:[#allocation2 + $0x30] sm:$0xff]  ;;  %v329_v6 = vld [vmem:[#allocation2 + $0x38] sm:$0xff] }
  0x4d   : > { %8088 = vmatpush.msra.mxu2 %v362_v8  ;;  %8089 = vmatpush.msra.mxu3 %v362_v8  ;;  %v332_v63 = vld [vmem:[#allocation2 + $0x50] sm:$0xff] }
  0x4e   : > { %377 = vmatpush.msra.mxu0 %v362_v8  ;;  %8087 = vmatpush.msra.mxu1 %v362_v8  ;;  %v336_v0 = vld [vmem:[#allocation2 + $0x70] sm:$0xff] }
  0x4f   : > { %8091 = vmatpush.msra.mxu2 %v361_v9  ;;  %8092 = vmatpush.msra.mxu3 %v361_v9 }
  0x50   : > { %378 = vmatpush.msra.mxu0 %v361_v9  ;;  %8090 = vmatpush.msra.mxu1 %v361_v9 }
  0x51   : > { %8094 = vmatpush.msra.mxu2 %v360_v10  ;;  %8095 = vmatpush.msra.mxu3 %v360_v10 }
  0x52   : > { %379 = vmatpush.msra.mxu0 %v360_v10  ;;  %8093 = vmatpush.msra.mxu1 %v360_v10 }
  0x53   : > { %8097 = vmatpush.msra.mxu2 %v359_v11  ;;  %8098 = vmatpush.msra.mxu3 %v359_v11 }
  0x54   : > { %380 = vmatpush.msra.mxu0 %v359_v11  ;;  %8096 = vmatpush.msra.mxu1 %v359_v11  ;;  %v333_v11 = vld [vmem:[#allocation2 + $0x58] sm:$0xff] }
  0x55   : > { %8100 = vmatpush.msra.mxu2 %v358_v12  ;;  %8101 = vmatpush.msra.mxu3 %v358_v12 }
  0x56   : > { %381 = vmatpush.msra.mxu0 %v358_v12  ;;  %8099 = vmatpush.msra.mxu1 %v358_v12  ;;  %v337_v12 = vld [vmem:[#allocation2 + $0x78] sm:$0xff] }
  0x57   : > { %8103 = vmatpush.msra.mxu2 %v357_v13  ;;  %8104 = vmatpush.msra.mxu3 %v357_v13 }
  0x58   : > { %382 = vmatpush.msra.mxu0 %v357_v13  ;;  %8102 = vmatpush.msra.mxu1 %v357_v13 }
  0x59   : > { %8106 = vmatpush.msra.mxu2 %v356_v14  ;;  %8107 = vmatpush.msra.mxu3 %v356_v14 }
  0x5a   : > { %383 = vmatpush.msra.mxu0 %v356_v14  ;;  %8105 = vmatpush.msra.mxu1 %v356_v14 }
  0x5b   : > { %8109 = vmatpush.msra.mxu2 %v355_v15  ;;  %8110 = vmatpush.msra.mxu3 %v355_v15 }
  0x5c   : > { %384 = vmatpush.msra.mxu0 %v355_v15  ;;  %8108 = vmatpush.msra.mxu1 %v355_v15 }
  0x5d   : > { %8112 = vmatpush.msra.mxu2 %v354_v16  ;;  %8113 = vmatpush.msra.mxu3 %v354_v16 }
  0x5e   : > { %410 = vmatmul.f32.vlgmr.msra.gmra.mxu2 %v346_v17  ;;  %422 = vmatmul.f32.vlgmr.msra.gmra.mxu3 %v350_v18 }
  0x5f   : > { %385 = vmatpush.msra.mxu0 %v354_v16  ;;  %8111 = vmatpush.msra.mxu1 %v354_v16 }
  0x60   : > { %386 = vmatmul.f32.vlgmr.msra.gmra.mxu0 %v338_v19  ;;  %398 = vmatmul.f32.vlgmr.msra.gmra.mxu1 %v342_v20 }
  0x66   : > { %413 = vmatmul.f32.gmra.mxu2 %v347_v21  ;;  %425 = vmatmul.f32.gmra.mxu3 %v351_v22 }
  0x68   : > { %389 = vmatmul.f32.gmra.mxu0 %v339_v23  ;;  %401 = vmatmul.f32.gmra.mxu1 %v343_v24 }
  0x6e   : > { %416 = vmatmul.f32.gmra.mxu2 %v348_v25  ;;  %428 = vmatmul.f32.gmra.mxu3 %v352_v26 }
  0x70   : > { %392 = vmatmul.f32.gmra.mxu0 %v340_v27  ;;  %404 = vmatmul.f32.gmra.mxu1 %v344_v28 }
  0x76   : > { %419 = vmatmul.f32.gmra.mxu2 %v349_v29  ;;  %431 = vmatmul.f32.gmra.mxu3 %v353_v30 }
  0x78   : > { %395 = vmatmul.f32.gmra.mxu0 %v341_v31  ;;  %407 = vmatmul.f32.gmra.mxu1 %v345_v32 }
  0xdd   : > { %v387_v35 = vpop.f32.mrf.mxu0  ;;  %v399_v36 = vpop.f32.mrf.mxu1 }
  0xde   : > { %v435_v37 = vadd.f32 %v387_v35, %v322_v33  ;;  %v439_v38 = vadd.f32 %v399_v36, %v326_v34 }
  0xe0   : > { %452 = vst.msk [vmem:[#allocation2] sm:$0xff] %vm17704_vm1, %v435_v37 }
  0xe1   : > { %456 = vst.msk [vmem:[#allocation2 + $0x20] sm:$0xff] %vm17704_vm1, %v439_v38  ;;  %v411_v41 = vpop.f32.mrf.mxu2  ;;  %v423_v42 = vpop.f32.mrf.mxu3 }
  0xe2   : > { %v443_v43 = vadd.f32 %v411_v41, %v330_v39  ;;  %v447_v44 = vadd.f32 %v423_v42, %v334_v40 }
  0xe4   : > { %460 = vst.msk [vmem:[#allocation2 + $0x40] sm:$0xff] %vm17704_vm1, %v443_v43 }
  0xe5   : > { %464 = vst.msk [vmem:[#allocation2 + $0x60] sm:$0xff] %vm17704_vm1, %v447_v44  ;;  %v390_v47 = vpop.f32.mrf.mxu0  ;;  %v402_v48 = vpop.f32.mrf.mxu1 }
  0xe6   : > { %v436_v49 = vadd.f32 %v390_v47, %v323_v45  ;;  %v440_v50 = vadd.f32 %v402_v48, %v327_v46 }
  0xe8   : > { %453 = vst.msk [vmem:[#allocation2 + $0x8] sm:$0xff] %vm17704_vm1, %v436_v49 }
  0xe9   : > { %457 = vst.msk [vmem:[#allocation2 + $0x28] sm:$0xff] %vm17704_vm1, %v440_v50  ;;  %v414_v53 = vpop.f32.mrf.mxu2  ;;  %v426_v54 = vpop.f32.mrf.mxu3 }
  0xea   : > { %v444_v55 = vadd.f32 %v414_v53, %v331_v51  ;;  %v448_v56 = vadd.f32 %v426_v54, %v335_v52 }
  0xec   : > { %461 = vst.msk [vmem:[#allocation2 + $0x48] sm:$0xff] %vm17704_vm1, %v444_v55 }
  0xed   : > { %465 = vst.msk [vmem:[#allocation2 + $0x68] sm:$0xff] %vm17704_vm1, %v448_v56  ;;  %v393_v59 = vpop.f32.mrf.mxu0  ;;  %v405_v60 = vpop.f32.mrf.mxu1 }
  0xee   : > { %v437_v61 = vadd.f32 %v393_v59, %v324_v57  ;;  %v441_v62 = vadd.f32 %v405_v60, %v328_v58 }
  0xf0   : > { %454 = vst.msk [vmem:[#allocation2 + $0x10] sm:$0xff] %vm17704_vm1, %v437_v61 }
  0xf1   : > { %458 = vst.msk [vmem:[#allocation2 + $0x30] sm:$0xff] %vm17704_vm1, %v441_v62  ;;  %v417_v1 = vpop.f32.mrf.mxu2  ;;  %v429_v2 = vpop.f32.mrf.mxu3 }
  0xf2   : > { %v445_v3 = vadd.f32 %v417_v1, %v332_v63  ;;  %v449_v4 = vadd.f32 %v429_v2, %v336_v0 }
  0xf4   : > { %462 = vst.msk [vmem:[#allocation2 + $0x50] sm:$0xff] %vm17704_vm1, %v445_v3 }
  0xf5   : > { %466 = vst.msk [vmem:[#allocation2 + $0x70] sm:$0xff] %vm17704_vm1, %v449_v4  ;;  %v396_v7 = vpop.f32.mrf.mxu0  ;;  %v408_v8 = vpop.f32.mrf.mxu1 }
  0xf6   : > { %v438_v9 = vadd.f32 %v396_v7, %v325_v5  ;;  %v442_v10 = vadd.f32 %v408_v8, %v329_v6 }
  0xf8   : > { %455 = vst.msk [vmem:[#allocation2 + $0x18] sm:$0xff] %vm17704_vm1, %v438_v9 }
  0xf9   : > { %459 = vst.msk [vmem:[#allocation2 + $0x38] sm:$0xff] %vm17704_vm1, %v442_v10  ;;  %v420_v13 = vpop.f32.mrf.mxu2  ;;  %v432_v14 = vpop.f32.mrf.mxu3  ;;  %471 = sbr.rel (%p8062_p3) target bundleno = 1915 (0x77b), region = 48 }
  0xfa   : > { %v446_v15 = vadd.f32 %v420_v13, %v333_v11  ;;  %v450_v16 = vadd.f32 %v432_v14, %v337_v12 }
  0xfc   : > { %463 = vst.msk [vmem:[#allocation2 + $0x58] sm:$0xff] %vm17704_vm1, %v446_v15 }
  0xfd   : > { %467 = vst.msk [vmem:[#allocation2 + $0x78] sm:$0xff] %vm17704_vm1, %v450_v16 }
  0xfe   : > { %v472_v17 = vld [vmem:[#allocation2] sm:$0xff]  ;;  %v473_v19 = vld [vmem:[#allocation2 + $0x8] sm:$0xff]  ;;  %v474_v63 = vld [vmem:[#allocation2 + $0x10] sm:$0xff] }
  0xff   : > { %v9534_v18 = vld [vmem:[%s17671_s2] ss:$0 sm:$0xff] }
 0x100   : > { %v492_v20 = vadd.f32 %v9534_v18, %v472_v17  ;;  %v9540_v21 = vld [vmem:[%s17672_s3] sm:$0xff]  ;;  %v9543_v22 = vadd.f32 %v9534_v18, %v473_v19  ;;  %v9570_v6 = vadd.f32 %v9534_v18, %v474_v63 }
 0x102   : > { %v653_v23 = vperm.slane %v492_v20, 0  ;;  %508 = vst.msk [vmem:[%s9458_s7] sm:$0xff] %vm17704_vm1, %v492_v20  ;;  %v544_v24 = vrot.slane %v492_v20, 4  ;;  %v542_v25 = vrot.slane %v492_v20, 2  ;;  %v541_v26 = vrot.slane %v492_v20, 1 }
 0x103   : > { %v545_v27 = vrot.slane %v492_v20, 5  ;;  %v543_v28 = vrot.slane %v492_v20, 3  ;;  %509 = vst.msk [vmem:[%s9458_s7 + $0x8] sm:$0xff] %vm17704_vm1, %v9543_v22  ;;  %v546_v35 = vrot.slane %v492_v20, 6  ;;  %v547_v49 = vrot.slane %v492_v20, 7 }
 0x104   : > { %v909_v29 = vsub.f32 %v653_v23, %v9540_v21  ;;  %v657_v30 = vperm.slane %v544_v24, 0  ;;  %v655_v31 = vperm.slane %v542_v25, 0  ;;  %v654_v32 = vperm.slane %v541_v26, 0  ;;  %510 = vst.msk [vmem:[%s9458_s7 + $0x10] sm:$0xff] %vm17704_vm1, %v9570_v6 }
 0x105   : > { %v658_v33 = vperm.slane %v545_v27, 0  ;;  %v656_v34 = vperm.slane %v543_v28, 0  ;;  %v659_v45 = vperm.slane %v546_v35, 0  ;;  %v661_v51 = vperm.slane %v9543_v22, 0 }
 0x106   : > { %v1037_v36 = vmul.f32 %v909_v29, %v909_v29  ;;  %v913_v37 = vsub.f32 %v657_v30, %v9540_v21  ;;  %v911_v38 = vsub.f32 %v655_v31, %v9540_v21  ;;  %v910_v39 = vsub.f32 %v654_v32, %v9540_v21  ;;  %v475_v30 = vld [vmem:[#allocation2 + $0x18] sm:$0xff] }
 0x107   : > { %v914_v40 = vsub.f32 %v658_v33, %v9540_v21  ;;  %v912_v44 = vsub.f32 %v656_v34, %v9540_v21  ;;  %v660_v53 = vperm.slane %v547_v49, 0  ;;  %v915_v55 = vsub.f32 %v659_v45, %v9540_v21 }
 0x108   : > { %v1165_v41 = vsel %vm17704_vm1, %v1037_v36, 0.0  ;;  %v1041_v42 = vmul.f32 %v913_v37, %v913_v37  ;;  %v1039_v43 = vmul.f32 %v911_v38, %v911_v38  ;;  %v1038_v48 = vmul.f32 %v910_v39, %v910_v39 }
 0x109   : > { %1166 = vadd.xlane.f32.xlu0 %v1165_v41  ;;  %v1042_v50 = vmul.f32 %v914_v40, %v914_v40  ;;  %v1040_v52 = vmul.f32 %v912_v44, %v912_v44  ;;  %v548_v56 = vrot.slane %v9543_v22, 1  ;;  %v917_v58 = vsub.f32 %v661_v51, %v9540_v21 }
 0x10a   : > { %v1177_v46 = vsel %vm17704_vm1, %v1041_v42, 0.0  ;;  %v1171_v47 = vsel %vm17704_vm1, %v1039_v43, 0.0  ;;  %v1168_v54 = vsel %vm17704_vm1, %v1038_v48, 0.0  ;;  %v916_v60 = vsub.f32 %v660_v53, %v9540_v21 }
 0x10b   : > { %1178 = vadd.xlane.f32.xlu2 %v1177_v46  ;;  %1172 = vadd.xlane.f32.xlu1 %v1171_v47  ;;  %v1180_v57 = vsel %vm17704_vm1, %v1042_v50, 0.0  ;;  %v1174_v59 = vsel %vm17704_vm1, %v1040_v52, 0.0  ;;  %v550_v61 = vrot.slane %v9543_v22, 3  ;;  %v549_v62 = vrot.slane %v9543_v22, 2 }
 0x10c   : > { %v1043_v0 = vmul.f32 %v915_v55, %v915_v55  ;;  %v662_v1 = vperm.slane %v548_v56, 0  ;;  %v1045_v2 = vmul.f32 %v917_v58, %v917_v58  ;;  %v1044_v3 = vmul.f32 %v916_v60, %v916_v60 }
 0x10d   : > { %v664_v4 = vperm.slane %v550_v61, 0  ;;  %v663_v5 = vperm.slane %v549_v62, 0  ;;  %v551_v9 = vrot.slane %v9543_v22, 4  ;;  %v553_v10 = vrot.slane %v9543_v22, 6 }
 0x10e   : > { %v1183_v7 = vsel %vm17704_vm1, %v1043_v0, 0.0  ;;  %v918_v8 = vsub.f32 %v662_v1, %v9540_v21  ;;  %v552_v11 = vrot.slane %v9543_v22, 5  ;;  %v1189_v12 = vsel %vm17704_vm1, %v1045_v2, 0.0  ;;  %v476_v0 = vld [vmem:[#allocation2 + $0x20] sm:$0xff] }
 0x10f   : > { %v1186_v13 = vsel %vm17704_vm1, %v1044_v3, 0.0  ;;  %v920_v14 = vsub.f32 %v664_v4, %v9540_v21  ;;  %v919_v15 = vsub.f32 %v663_v5, %v9540_v21  ;;  %v665_v17 = vperm.slane %v551_v9, 0 }
 0x110   : > { %v1046_v16 = vmul.f32 %v918_v8, %v918_v8  ;;  %v667_v19 = vperm.slane %v553_v10, 0  ;;  %v666_v20 = vperm.slane %v552_v11, 0  ;;  %v554_v27 = vrot.slane %v9543_v22, 7 }
 0x111   : > { %1169 = vadd.xlane.f32.xlu0 %v1168_v54  ;;  %v1048_v23 = vmul.f32 %v920_v14, %v920_v14  ;;  %v1047_v24 = vmul.f32 %v919_v15, %v919_v15  ;;  %v921_v26 = vsub.f32 %v665_v17, %v9540_v21  ;;  %v555_v33 = vrot.slane %v9570_v6, 1 }
 0x112   : > { %v1192_v25 = vsel %vm17704_vm1, %v1046_v16, 0.0  ;;  %v923_v28 = vsub.f32 %v667_v19, %v9540_v21  ;;  %v922_v29 = vsub.f32 %v666_v20, %v9540_v21  ;;  %v9593_v34 = vadd.f32 %v9534_v18, %v475_v30 }
 0x113   : > { %1181 = vadd.xlane.f32.xlu2 %v1180_v57  ;;  %1175 = vadd.xlane.f32.xlu1 %v1174_v59  ;;  %v1198_v31 = vsel %vm17704_vm1, %v1048_v23, 0.0  ;;  %v1195_v32 = vsel %vm17704_vm1, %v1047_v24, 0.0  ;;  %v1049_v35 = vmul.f32 %v921_v26, %v921_v26  ;;  %v668_v36 = vperm.slane %v554_v27, 0 }
 0x114   : > { %511 = vst.msk [vmem:[%s9458_s7 + $0x18] sm:$0xff] %vm17704_vm1, %v9593_v34  ;;  %v1051_v22 = vmul.f32 %v923_v28, %v923_v28  ;;  %v1050_v37 = vmul.f32 %v922_v29, %v922_v29  ;;  %v670_v38 = vperm.slane %v555_v33, 0  ;;  %v669_v39 = vperm.slane %v9570_v6, 0 }
 0x115   : > { %v1201_v40 = vsel %vm17704_vm1, %v1049_v35, 0.0  ;;  %v924_v41 = vsub.f32 %v668_v36, %v9540_v21  ;;  %v556_v42 = vrot.slane %v9570_v6, 2  ;;  %v558_v43 = vrot.slane %v9570_v6, 4 }
 0x116   : > { %v557_v44 = vrot.slane %v9570_v6, 3  ;;  %v1207_v45 = vsel %vm17704_vm1, %v1051_v22, 0.0  ;;  %v1204_v46 = vsel %vm17704_vm1, %v1050_v37, 0.0  ;;  %v926_v47 = vsub.f32 %v670_v38, %v9540_v21 }
 0x117   : > { %v925_v48 = vsub.f32 %v669_v39, %v9540_v21  ;;  %v1052_v49 = vmul.f32 %v924_v41, %v924_v41  ;;  %v671_v50 = vperm.slane %v556_v42, 0  ;;  %v673_v51 = vperm.slane %v558_v43, 0 }
 0x118   : > { %v672_v52 = vperm.slane %v557_v44, 0  ;;  %v1054_v53 = vmul.f32 %v926_v47, %v926_v47  ;;  %v559_v57 = vrot.slane %v9570_v6, 5  ;;  %v561_v62 = vrot.slane %v9570_v6, 7 }
 0x119   : > { %1184 = vadd.xlane.f32.xlu0 %v1183_v7  ;;  %v1053_v54 = vmul.f32 %v925_v48, %v925_v48  ;;  %v1210_v55 = vsel %vm17704_vm1, %v1052_v49, 0.0  ;;  %v927_v56 = vsub.f32 %v671_v50, %v9540_v21  ;;  %v929_v58 = vsub.f32 %v673_v51, %v9540_v21 }
 0x11a   : > { %v928_v59 = vsub.f32 %v672_v52, %v9540_v21  ;;  %v1216_v60 = vsel %vm17704_vm1, %v1054_v53, 0.0  ;;  %v560_v63 = vrot.slane %v9570_v6, 6  ;;  %v674_v2 = vperm.slane %v559_v57, 0 }
 0x11b   : > { %1190 = vadd.xlane.f32.xlu2 %v1189_v12  ;;  %1187 = vadd.xlane.f32.xlu1 %v1186_v13  ;;  %v1213_v61 = vsel %vm17704_vm1, %v1053_v54, 0.0  ;;  %v1055_v1 = vmul.f32 %v927_v56, %v927_v56  ;;  %v9618_v3 = vadd.f32 %v9534_v18, %v476_v0  ;;  %v1057_v4 = vmul.f32 %v929_v58, %v929_v58 }
 0x11c   : > { %v1056_v5 = vmul.f32 %v928_v59, %v928_v59  ;;  %v676_v7 = vperm.slane %v561_v62, 0  ;;  %v675_v8 = vperm.slane %v560_v63, 0  ;;  %v930_v6 = vsub.f32 %v674_v2, %v9540_v21 }
 0x11d   : > { %512 = vst.msk [vmem:[%s9458_s7 + $0x20] sm:$0xff] %vm17704_vm1, %v9618_v3  ;;  %v1219_v9 = vsel %vm17704_vm1, %v1055_v1, 0.0  ;;  %v1225_v10 = vsel %vm17704_vm1, %v1057_v4, 0.0  ;;  %v563_v14 = vrot.slane %v9593_v34, 2  ;;  %v562_v15 = vrot.slane %v9593_v34, 1 }
 0x11e   : > { %v1222_v11 = vsel %vm17704_vm1, %v1056_v5, 0.0  ;;  %v932_v12 = vsub.f32 %v676_v7, %v9540_v21  ;;  %v931_v13 = vsub.f32 %v675_v8, %v9540_v21  ;;  %v1058_v16 = vmul.f32 %v930_v6, %v930_v6 }
 0x11f   : > { %v677_v17 = vperm.slane %v9593_v34, 0  ;;  %v679_v23 = vperm.slane %v563_v14, 0  ;;  %v678_v24 = vperm.slane %v562_v15, 0  ;;  %v564_v27 = vrot.slane %v9593_v34, 3 }
 0x120   : > { %v1060_v19 = vmul.f32 %v932_v12, %v932_v12  ;;  %v1059_v20 = vmul.f32 %v931_v13, %v931_v13  ;;  %v566_v28 = vrot.slane %v9593_v34, 5  ;;  %v565_v29 = vrot.slane %v9593_v34, 4 }
 0x121   : > { %1193 = vadd.xlane.f32.xlu0 %v1192_v25  ;;  %v1228_v25 = vsel %vm17704_vm1, %v1058_v16, 0.0  ;;  %v933_v26 = vsub.f32 %v677_v17, %v9540_v21  ;;  %v934_v33 = vsub.f32 %v678_v24, %v9540_v21  ;;  %v680_v36 = vperm.slane %v564_v27, 0 }
 0x122   : > { %v1234_v30 = vsel %vm17704_vm1, %v1060_v19, 0.0  ;;  %v682_v22 = vperm.slane %v566_v28, 0  ;;  %v681_v37 = vperm.slane %v565_v29, 0  ;;  %v567_v42 = vrot.slane %v9593_v34, 6 }
 0x123   : > { %1199 = vadd.xlane.f32.xlu2 %v1198_v31  ;;  %1196 = vadd.xlane.f32.xlu1 %v1195_v32  ;;  %v1231_v31 = vsel %vm17704_vm1, %v1059_v20, 0.0  ;;  %v935_v32 = vsub.f32 %v679_v23, %v9540_v21  ;;  %v1061_v35 = vmul.f32 %v933_v26, %v933_v26  ;;  %v1062_v39 = vmul.f32 %v934_v33, %v934_v33 }
 0x124   : > { %v936_v41 = vsub.f32 %v680_v36, %v9540_v21  ;;  %v938_v43 = vsub.f32 %v682_v22, %v9540_v21  ;;  %v937_v44 = vsub.f32 %v681_v37, %v9540_v21  ;;  %v568_v48 = vrot.slane %v9593_v34, 7 }
 0x125   : > { %v1063_v38 = vmul.f32 %v935_v32, %v935_v32  ;;  %v1240_v47 = vsel %vm17704_vm1, %v1062_v39, 0.0  ;;  %v683_v51 = vperm.slane %v567_v42, 0  ;;  %v685_v54 = vperm.slane %v9618_v3, 0 }
 0x126   : > { %v1064_v50 = vmul.f32 %v936_v41, %v936_v41  ;;  %v1066_v52 = vmul.f32 %v938_v43, %v938_v43  ;;  %v1065_v53 = vmul.f32 %v937_v44, %v937_v44  ;;  %v569_v57 = vrot.slane %v9618_v3, 1 }
 0x127   : > { %v939_v34 = vsub.f32 %v683_v51, %v9540_v21  ;;  %v571_v62 = vrot.slane %v9618_v3, 3  ;;  %v570_v63 = vrot.slane %v9618_v3, 2  ;;  %v572_v6 = vrot.slane %v9618_v3, 4 }
 0x128   : > { %v1246_v56 = vsel %vm17704_vm1, %v1064_v50, 0.0  ;;  %v1252_v58 = vsel %vm17704_vm1, %v1066_v52, 0.0  ;;  %v1249_v59 = vsel %vm17704_vm1, %v1065_v53, 0.0  ;;  %v686_v1 = vperm.slane %v569_v57, 0 }
 0x129   : > { %1202 = vadd.xlane.f32.xlu0 %v1201_v40  ;;  %v1237_v40 = vsel %vm17704_vm1, %v1061_v35, 0.0  ;;  %v1067_v0 = vmul.f32 %v939_v34, %v939_v34  ;;  %v688_v5 = vperm.slane %v571_v62, 0  ;;  %v687_v7 = vperm.slane %v570_v63, 0 }
 0x12a   : > { %v689_v17 = vperm.slane %v572_v6, 0  ;;  %v575_v27 = vrot.slane %v9618_v3, 7 }
 0x12b   : > { %1208 = vadd.xlane.f32.xlu2 %v1207_v45  ;;  %1205 = vadd.xlane.f32.xlu1 %v1204_v46  ;;  %v477_v45 = vld [vmem:[#allocation2 + $0x28] sm:$0xff]  ;;  %v1243_v46 = vsel %vm17704_vm1, %v1063_v38, 0.0  ;;  %v1255_v8 = vsel %vm17704_vm1, %v1067_v0, 0.0  ;;  %v944_v14 = vsub.f32 %v688_v5, %v9540_v21  ;;  %v943_v15 = vsub.f32 %v687_v7, %v9540_v21 }
 0x12c   : > { %v9650_v49 = vadd.f32 %v9534_v18, %v477_v45  ;;  %v945_v26 = vsub.f32 %v689_v17, %v9540_v21  ;;  %v692_v35 = vperm.slane %v575_v27, 0 }
 0x12d   : > { %v1072_v23 = vmul.f32 %v944_v14, %v944_v14  ;;  %v1071_v24 = vmul.f32 %v943_v15, %v943_v15  ;;  %v9330_v14 = vmov 0.2  }
 0x12e   : > { %513 = vst.msk [vmem:[%s9458_s7 + $0x28] sm:$0xff] %vm17704_vm1, %v9650_v49  ;;  %v576_v32 = vrot.slane %v9650_v49, 1  ;;  %v1073_v33 = vmul.f32 %v945_v26, %v945_v26  ;;  %v948_v39 = vsub.f32 %v692_v35, %v9540_v21  ;;  %v579_v45 = vrot.slane %v9650_v49, 4 }
 0x12f   : > { %v580_v57 = vrot.slane %v9650_v49, 5  ;;  %8195 = vrcp.f32 %v9330_v14 }
 0x130   : > { %v694_v37 = vperm.slane %v576_v32, 0  ;;  %v1273_v38 = vsel %vm17704_vm1, %v1073_v33, 0.0  ;;  %v1076_v50 = vmul.f32 %v948_v39, %v948_v39 }
 0x131   : > { %1211 = vadd.xlane.f32.xlu0 %v1210_v55  ;;  %v684_v55 = vperm.slane %v568_v48, 0 }
 0x132   : > { %v950_v43 = vsub.f32 %v694_v37, %v9540_v21 }
 0x133   : > { %1217 = vadd.xlane.f32.xlu2 %v1216_v60  ;;  %1214 = vadd.xlane.f32.xlu1 %v1213_v61  ;;  %v941_v60 = vsub.f32 %v685_v54, %v9540_v21  ;;  %v940_v61 = vsub.f32 %v684_v55, %v9540_v21  ;;  %v697_v54 = vperm.slane %v579_v45, 0 }
 0x134   : > { %v1078_v52 = vmul.f32 %v950_v43, %v950_v43 }
 0x135   : > { %v1069_v2 = vmul.f32 %v941_v60, %v941_v60  ;;  %v1068_v4 = vmul.f32 %v940_v61, %v940_v61  ;;  %v953_v62 = vsub.f32 %v697_v54, %v9540_v21  ;;  %v8196_v27 = vpop.eup %8195 }
 0x136   : > { %v1288_v60 = vsel %vm17704_vm1, %v1078_v52, 0.0  ;;  %v1550_v35 = vmul.f32 0.2, %v8196_v27  ;;  %vm1554_vm2 = vweird.f32 %v8196_v27 }
 0x137   : > { %v1261_v12 = vsel %vm17704_vm1, %v1069_v2, 0.0  ;;  %v1258_v13 = vsel %vm17704_vm1, %v1068_v4, 0.0  ;;  %v1081_v5 = vmul.f32 %v953_v62, %v953_v62 }
 0x139   : > { %1220 = vadd.xlane.f32.xlu0 %v1219_v9  ;;  %v942_v9 = vsub.f32 %v686_v1, %v9540_v21  ;;  %v698_v1 = vperm.slane %v580_v57, 0 }
 0x13b   : > { %1226 = vadd.xlane.f32.xlu2 %v1225_v10  ;;  %1223 = vadd.xlane.f32.xlu1 %v1222_v11  ;;  %v574_v10 = vrot.slane %v9618_v3, 6  ;;  %v573_v11 = vrot.slane %v9618_v3, 5  ;;  %v1070_v16 = vmul.f32 %v942_v9, %v942_v9  ;;  %v693_v3 = vperm.slane %v9650_v49, 0 }
 0x13d   : > { %v691_v19 = vperm.slane %v574_v10, 0  ;;  %v690_v20 = vperm.slane %v573_v11, 0  ;;  %v949_v44 = vsub.f32 %v693_v3, %v9540_v21  ;;  %v1297_v10 = vsel %vm17704_vm1, %v1081_v5, 0.0 }
 0x13f   : > { %v947_v28 = vsub.f32 %v691_v19, %v9540_v21  ;;  %v946_v29 = vsub.f32 %v690_v20, %v9540_v21  ;;  %v1077_v53 = vmul.f32 %v949_v44, %v949_v44 }
 0x141   : > { %1229 = vadd.xlane.f32.xlu0 %v1228_v25  ;;  %v1264_v25 = vsel %vm17704_vm1, %v1070_v16, 0.0  ;;  %v1075_v36 = vmul.f32 %v947_v28, %v947_v28  ;;  %v1074_v22 = vmul.f32 %v946_v29, %v946_v29  ;;  %v1285_v61 = vsel %vm17704_vm1, %v1077_v53, 0.0 }
 0x143   : > { %1235 = vadd.xlane.f32.xlu2 %v1234_v30  ;;  %1232 = vadd.xlane.f32.xlu1 %v1231_v31  ;;  %v1270_v30 = vsel %vm17704_vm1, %v1072_v23, 0.0  ;;  %v1267_v31 = vsel %vm17704_vm1, %v1071_v24, 0.0  ;;  %v1279_v41 = vsel %vm17704_vm1, %v1075_v36, 0.0  ;;  %v1276_v42 = vsel %vm17704_vm1, %v1074_v22, 0.0 }
 0x149   : > { %1238 = vadd.xlane.f32.xlu0 %v1237_v40  ;;  %v577_v40 = vrot.slane %v9650_v49, 2 }
 0x14b   : > { %1244 = vadd.xlane.f32.xlu2 %v1243_v46  ;;  %1241 = vadd.xlane.f32.xlu1 %v1240_v47  ;;  %v578_v46 = vrot.slane %v9650_v49, 3  ;;  %v478_v47 = vld [vmem:[#allocation2 + $0x30] sm:$0xff]  ;;  %v695_v51 = vperm.slane %v577_v40, 0  ;;  %v1551_v40 = vsub.f32 1.0, %v1550_v35 }
 0x14c   : > { %v9693_v48 = vadd.f32 %v9534_v18, %v478_v47 }
 0x14d   : > { %v696_v55 = vperm.slane %v578_v46, 0  ;;  %v951_v34 = vsub.f32 %v695_v51, %v9540_v21  ;;  %v1552_v47 = vmul.f32 %v8196_v27, %v1551_v40 }
 0x14e   : > { %514 = vst.msk [vmem:[%s9458_s7 + $0x30] sm:$0xff] %vm17704_vm1, %v9693_v48  ;;  %v701_v16 = vperm.slane %v9693_v48, 0  ;;  %v585_v26 = vrot.slane %v9693_v48, 3  ;;  %v587_v32 = vrot.slane %v9693_v48, 5  ;;  %v586_v33 = vrot.slane %v9693_v48, 4 }
 0x14f   : > { %v952_v63 = vsub.f32 %v696_v55, %v9540_v21  ;;  %v1079_v0 = vmul.f32 %v951_v34, %v951_v34  ;;  %v1553_v53 = vadd.f32 %v8196_v27, %v1552_v47 }
 0x150   : > { %v704_v22 = vperm.slane %v585_v26, 0  ;;  %v705_v39 = vperm.slane %v586_v33, 0 }
 0x151   : > { %1247 = vadd.xlane.f32.xlu0 %v1246_v56  ;;  %v1282_v56 = vsel %vm17704_vm1, %v1076_v50, 0.0  ;;  %v1080_v7 = vmul.f32 %v952_v63, %v952_v63  ;;  %v9734_v34 = vsel %vm1554_vm2, %v8196_v27, %v1553_v53 }
 0x152   : > { %v961_v46 = vsub.f32 %v705_v39, %v9540_v21 }
 0x153   : > { %1253 = vadd.xlane.f32.xlu2 %v1252_v58  ;;  %1250 = vadd.xlane.f32.xlu1 %v1249_v59  ;;  %v582_v58 = vrot.slane %v9650_v49, 7  ;;  %v581_v59 = vrot.slane %v9650_v49, 6  ;;  %v954_v49 = vsub.f32 %v698_v1, %v9540_v21  ;;  %v1294_v11 = vsel %vm17704_vm1, %v1080_v7, 0.0 }
 0x154   : > { %v1089_v52 = vmul.f32 %v961_v46, %v961_v46 }
 0x155   : > { %v700_v2 = vperm.slane %v582_v58, 0  ;;  %v699_v4 = vperm.slane %v581_v59, 0  ;;  %v1082_v15 = vmul.f32 %v954_v49, %v954_v49 }
 0x157   : > { %v956_v9 = vsub.f32 %v700_v2, %v9540_v21  ;;  %v955_v6 = vsub.f32 %v699_v4, %v9540_v21  ;;  %v1300_v24 = vsel %vm17704_vm1, %v1082_v15, 0.0  ;;  %v479_v15 = vld [vmem:[#allocation2 + $0x38] sm:$0xff] }
 0x159   : > { %1256 = vadd.xlane.f32.xlu0 %v1255_v8  ;;  %v1291_v8 = vsel %vm17704_vm1, %v1079_v0, 0.0  ;;  %v1084_v17 = vmul.f32 %v956_v9, %v956_v9  ;;  %v1083_v19 = vmul.f32 %v955_v6, %v955_v6 }
 0x15b   : > { %1262 = vadd.xlane.f32.xlu2 %v1261_v12  ;;  %1259 = vadd.xlane.f32.xlu1 %v1258_v13  ;;  %v584_v12 = vrot.slane %v9693_v48, 2  ;;  %v583_v13 = vrot.slane %v9693_v48, 1  ;;  %v1306_v28 = vsel %vm17704_vm1, %v1084_v17, 0.0  ;;  %v1303_v29 = vsel %vm17704_vm1, %v1083_v19, 0.0 }
 0x15d   : > { %v703_v20 = vperm.slane %v584_v12, 0  ;;  %v702_v23 = vperm.slane %v583_v13, 0 }
 0x161   : > { %1265 = vadd.xlane.f32.xlu0 %v1264_v25  ;;  %v957_v25 = vsub.f32 %v701_v16, %v9540_v21 }
 0x163   : > { %1271 = vadd.xlane.f32.xlu2 %v1270_v30  ;;  %1268 = vadd.xlane.f32.xlu1 %v1267_v31  ;;  %v959_v30 = vsub.f32 %v703_v20, %v9540_v21  ;;  %v958_v31 = vsub.f32 %v702_v23, %v9540_v21  ;;  %v1085_v36 = vmul.f32 %v957_v25, %v957_v25 }
 0x165   : > { %v1087_v37 = vmul.f32 %v959_v30, %v959_v30  ;;  %v1086_v3 = vmul.f32 %v958_v31, %v958_v31 }
 0x167   : > { %v1315_v43 = vsel %vm17704_vm1, %v1087_v37, 0.0  ;;  %v1312_v44 = vsel %vm17704_vm1, %v1086_v3, 0.0 }
 0x169   : > { %1274 = vadd.xlane.f32.xlu0 %v1273_v38  ;;  %v706_v38 = vperm.slane %v587_v32, 0  ;;  %v589_v32 = vrot.slane %v9693_v48, 7 }
 0x16b   : > { %1280 = vadd.xlane.f32.xlu2 %v1279_v41  ;;  %1277 = vadd.xlane.f32.xlu1 %v1276_v42  ;;  %v1309_v41 = vsel %vm17704_vm1, %v1085_v36, 0.0  ;;  %v960_v42 = vsub.f32 %v704_v22, %v9540_v21  ;;  %v962_v45 = vsub.f32 %v706_v38, %v9540_v21 }
 0x16d   : > { %v1088_v50 = vmul.f32 %v960_v42, %v960_v42  ;;  %v1090_v51 = vmul.f32 %v962_v45, %v962_v45  ;;  %v708_v42 = vperm.slane %v589_v32, 0 }
 0x16f   : > { %v1318_v54 = vsel %vm17704_vm1, %v1088_v50, 0.0  ;;  %v1324_v55 = vsel %vm17704_vm1, %v1090_v51, 0.0  ;;  %v964_v51 = vsub.f32 %v708_v42, %v9540_v21 }
 0x171   : > { %1283 = vadd.xlane.f32.xlu0 %v1282_v56  ;;  %v1321_v56 = vsel %vm17704_vm1, %v1089_v52, 0.0 }
 0x173   : > { %1289 = vadd.xlane.f32.xlu2 %v1288_v60  ;;  %1286 = vadd.xlane.f32.xlu1 %v1285_v61 }
 0x179   : > { %1292 = vadd.xlane.f32.xlu0 %v1291_v8 }
 0x17b   : > { %1298 = vadd.xlane.f32.xlu2 %v1297_v10  ;;  %1295 = vadd.xlane.f32.xlu1 %v1294_v11  ;;  %v588_v10 = vrot.slane %v9693_v48, 6 }
 0x17c   : > { %v1167_v57 = vpop.xlane.xlu0 %1166 }
 0x17d   : > { %v1556_v58 = vmul.f32 %v9734_v34, %v1167_v57  ;;  %v707_v14 = vperm.slane %v588_v10, 0 }
 0x17e   : > { %v1179_v60 = vpop.xlane.xlu2 %1178  ;;  %v1173_v61 = vpop.xlane.xlu1 %1172 }
 0x17f   : > { %v1684_v59 = vadd.f32 1.0, %v1556_v58  ;;  %v1560_v62 = vmul.f32 %v9734_v34, %v1179_v60  ;;  %v1558_v0 = vmul.f32 %v9734_v34, %v1173_v61  ;;  %v1092_v60 = vmul.f32 %v964_v51, %v964_v51 }
 0x181   : > { %1301 = vadd.xlane.f32.xlu0 %v1300_v24  ;;  %v1812_v63 = vadd.f32 1e-08, %v1684_v59  ;;  %v1688_v1 = vadd.f32 1.0, %v1560_v62  ;;  %v1686_v2 = vadd.f32 1.0, %v1558_v0  ;;  %v9758_v24 = vadd.f32 %v9534_v18, %v479_v15 }
 0x183   : > { %1307 = vadd.xlane.f32.xlu2 %v1306_v28  ;;  %1304 = vadd.xlane.f32.xlu1 %v1303_v29  ;;  %8197 = vrcp.f32 %v1812_v63  ;;  %v9739_v5 = vadd.f32 1e-08, %v1688_v1  ;;  %v9741_v7 = vadd.f32 1e-08, %v1686_v2  ;;  %v963_v28 = vsub.f32 %v707_v14, %v9540_v21  ;;  %515 = vst.msk [vmem:[%s9458_s7 + $0x38] sm:$0xff] %vm17704_vm1, %v9758_v24 }
 0x184   : > { %v1170_v4 = vpop.xlane.xlu0 %1169  ;;  %v1949_v33 = vand.u32 2147483647, %v1812_v63  ;;  %v1951_v35 = vand.u32 2147483648, %v1812_v63  ;;  %v709_v40 = vperm.slane %v9758_v24, 0  ;;  %vm1945_vm4 = vweird.f32 %v1812_v63 }
 0x185   : > { %v1557_v8 = vmul.f32 %v9734_v34, %v1170_v4  ;;  %8199 = vrcp.f32 %v9739_v5  ;;  %v1091_v37 = vmul.f32 %v963_v28, %v963_v28  ;;  %vm2005_vm7 = vweird.f32 %v9739_v5 }
 0x186   : > { %v1182_v49 = vpop.xlane.xlu2 %1181  ;;  %8201 = vrcp.f32 %v9741_v7  ;;  %v1176_v20 = vpop.xlane.xlu1 %1175  ;;  %vm9784_vm5 = vcmp.eq.f32.partialorder %v1949_v33, 8.507059e+37  ;;  %v965_v45 = vsub.f32 %v709_v40, %v9540_v21  ;;  %v2009_v57 = vand.u32 2147483647, %v9739_v5 }
 0x187   : > { %v1561_v6 = vmul.f32 %v9734_v34, %v1182_v49  ;;  %v1685_v12 = vadd.f32 1.0, %v1557_v8  ;;  %v1559_v27 = vmul.f32 %v9734_v34, %v1176_v20  ;;  %v2011_v58 = vand.u32 2147483648, %v9739_v5 }
 0x188   : > { %vm1975_vm9 = vweird.f32 %v9741_v7  ;;  %v590_v62 = vrot.slane %v9758_v24, 1  ;;  %v1330_v1 = vsel %vm17704_vm1, %v1092_v60, 0.0  ;;  %vm9836_vm12 = vcmp.eq.f32.partialorder %v2009_v57, 8.507059e+37 }
 0x189   : > { %1310 = vadd.xlane.f32.xlu0 %v1309_v41  ;;  %v9744_v9 = vpop.eup %8197  ;;  %v1689_v13 = vadd.f32 1.0, %v1561_v6  ;;  %v9753_v19 = vadd.f32 1e-08, %v1685_v12  ;;  %v1687_v22 = vadd.f32 1.0, %v1559_v27  ;;  %v1327_v41 = vsel %vm17704_vm1, %v1091_v37, 0.0 }
 0x18a   : > { %v1941_v11 = vmul.f32 %v9744_v9, %v1812_v63  ;;  %vm1946_vm3 = vweird.f32 %v9744_v9  ;;  %v1981_v6 = vand.u32 2147483648, %v9741_v7  ;;  %v592_v20 = vrot.slane %v9758_v24, 3 }
 0x18b   : > { %1316 = vadd.xlane.f32.xlu2 %v1315_v43  ;;  %1313 = vadd.xlane.f32.xlu1 %v1312_v44  ;;  %v9751_v16 = vpop.eup %8199  ;;  %v9762_v26 = vadd.f32 1e-08, %v1689_v13  ;;  %8203 = vrcp.f32 %v9753_v19  ;;  %v1952_v44 = vor.u32 1.1754944e-38, %v1951_v35  ;;  %vm9791_vm6 = vmor %vm1945_vm4, %vm1946_vm3  ;;  %v9797_v50 = vadd.f32 1e-08, %v1687_v22  ;;  %v9930_v13 = vld [vmem:[%s17672_s3] sm:$0xff] }
 0x18c   : > { %v1942_v17 = vsub.f32 1.0, %v1941_v11  ;;  %v9755_v23 = vpop.eup %8201  ;;  %v2001_v25 = vmul.f32 %v9751_v16, %v9739_v5  ;;  %v9770_v31 = vpop.xlane.xlu0 %1184  ;;  %vm2006_vm8 = vweird.f32 %v9751_v16  ;;  %v1964_v27 = vand.u32 2147483647, %v9753_v19 }
 0x18d   : > { %v1971_v30 = vmul.f32 %v9755_v23, %v9741_v7  ;;  %8205 = vrcp.f32 %v9762_v26  ;;  %vm1976_vm10 = vweird.f32 %v9755_v23  ;;  %vm9832_vm11 = vmor %vm2005_vm7, %vm2006_vm8  ;;  %v1966_v28 = vand.u32 2147483648, %v9753_v19 }
 0x18e   : > { %v1943_v29 = vmul.f32 %v9744_v9, %v1942_v17  ;;  %v1191_v18 = vpop.xlane.xlu2 %1190  ;;  %v2002_v36 = vsub.f32 1.0, %v2001_v25  ;;  %8207 = vrcp.f32 %v9797_v50  ;;  %v9840_v14 = vpop.xlane.xlu1 %1187  ;;  %v710_v17 = vperm.slane %v590_v62, 0  ;;  %vm9847_vm13 = vmor %vm1975_vm9, %vm1976_vm10 }
 0x18f   : > { %v1972_v38 = vsub.f32 1.0, %v1971_v30  ;;  %v1564_v39 = vmul.f32 %v9734_v34, %v1191_v18  ;;  %v2012_v25 = vor.u32 1.1754944e-38, %v2011_v58  ;;  %v1982_v22 = vor.u32 1.1754944e-38, %v1981_v6 }
 0x190   : > { %v1944_v3 = vadd.f32 %v9744_v9, %v1943_v29  ;;  %v2003_v47 = vmul.f32 %v9751_v16, %v2002_v36  ;;  %v1562_v29 = vmul.f32 %v9734_v34, %v9770_v31  ;;  %v966_v31 = vsub.f32 %v710_v17, %v9540_v21 }
 0x191   : > { %1319 = vadd.xlane.f32.xlu0 %v1318_v54  ;;  %v9782_v48 = vpop.eup %8203  ;;  %v1973_v53 = vmul.f32 %v9755_v23, %v1972_v38  ;;  %v1692_v54 = vadd.f32 1.0, %v1564_v39  ;;  %vm1960_vm15 = vweird.f32 %v9753_v19  ;;  %vm9870_vm0 = vcmp.eq.f32.partialorder %v1964_v27, 8.507059e+37 }
 0x192   : > { %v1948_v52 = vsel %vm9791_vm6, %v9744_v9, %v1944_v3  ;;  %v1956_v59 = vmul.f32 %v9782_v48, %v9753_v19  ;;  %v2004_v2 = vadd.f32 %v9751_v16, %v2003_v47  ;;  %v1979_v9 = vand.u32 2147483647, %v9741_v7 }
 0x193   : > { %1325 = vadd.xlane.f32.xlu2 %v1324_v55  ;;  %1322 = vadd.xlane.f32.xlu1 %v1321_v56  ;;  %v1093_v55 = vmul.f32 %v965_v45, %v965_v45  ;;  %v9804_v56 = vpop.eup %8205  ;;  %v1953_v63 = vsel %vm9784_vm5, %v1952_v44, %v1948_v52  ;;  %v1974_v4 = vadd.f32 %v9755_v23, %v1973_v53  ;;  %v9823_v49 = vadd.f32 1e-08, %v1692_v54 }
 0x194   : > { %v1194_v61 = vpop.xlane.xlu0 %1193  ;;  %v2016_v8 = vmul.f32 %v9804_v56, %v9762_v26  ;;  %v1957_v10 = vsub.f32 1.0, %v1956_v59  ;;  %8209 = vlog2.f32 %v1953_v63  ;;  %v2008_v30 = vsel %vm9832_vm11, %v9751_v16, %v2004_v2  ;;  %v9862_v32 = vpop.eup %8207 }
 0x195   : > { %v1333_v0 = vsel %vm17704_vm1, %v1093_v55, 0.0  ;;  %v1565_v11 = vmul.f32 %v9734_v34, %v1194_v61  ;;  %v1978_v18 = vsel %vm9847_vm13, %v9755_v23, %v1974_v4  ;;  %8211 = vrcp.f32 %v9823_v49 }
 0x196   : > { %v1200_v15 = vpop.xlane.xlu2 %1199  ;;  %v2017_v7 = vsub.f32 1.0, %v2016_v8  ;;  %v1958_v33 = vmul.f32 %v9782_v48, %v1957_v10  ;;  %vm1980_vm14 = vcmp.eq.f32.partialorder %v1979_v9, 8.507059e+37  ;;  %v712_v16 = vperm.slane %v592_v20, 0 }
 0x197   : > { %v1693_v35 = vadd.f32 1.0, %v1565_v11  ;;  %v1567_v36 = vmul.f32 %v9734_v34, %v1200_v15  ;;  %v2013_v23 = vsel %vm9836_vm12, %v2012_v25, %v2008_v30  ;;  %v1967_v3 = vor.u32 1.1754944e-38, %v1966_v28 }
 0x198   : > { %vm2020_vm2 = vweird.f32 %v9762_v26  ;;  %v1690_v38 = vadd.f32 1.0, %v1562_v29  ;;  %v1983_v40 = vsel %vm1980_vm14, %v1982_v22, %v1978_v18  ;;  %vm1961_vm3 = vweird.f32 %v9782_v48 }
 0x199   : > { %1328 = vadd.xlane.f32.xlu0 %v1327_v41  ;;  %v2018_v41 = vmul.f32 %v9804_v56, %v2017_v7  ;;  %v1986_v42 = vmul.f32 %v9862_v32, %v9797_v50  ;;  %v1959_v43 = vadd.f32 %v9782_v48, %v1958_v33  ;;  %v9880_v44 = vadd.f32 1e-08, %v1693_v35  ;;  %vm9894_vm5 = vmor %vm1960_vm15, %vm1961_vm3 }
 0x19a   : > { %v8210_v39 = vpop.eup %8209  ;;  %v1695_v45 = vadd.f32 1.0, %v1567_v36  ;;  %v1094_v46 = vmul.f32 %v966_v31, %v966_v31  ;;  %8213 = vlog2.f32 %v2013_v23  ;;  %v2026_v51 = vand.u32 2147483648, %v9762_v26 }
 0x19b   : > { %1334 = vadd.xlane.f32.xlu2 %v1333_v0  ;;  %1331 = vadd.xlane.f32.xlu1 %v1330_v1  ;;  %v9882_v47 = vpop.eup %8211  ;;  %v968_v52 = vsub.f32 %v712_v16, %v9540_v21  ;;  %v591_v53 = vrot.slane %v9758_v24, 2  ;;  %v3861_v54 = vmul.f32 0.6931472, %v8210_v39  ;;  %8215 = vlog2.f32 %v1983_v40  ;;  %v1197_v21 = vpop.xlane.xlu1 %1196 }
 0x19c   : > { %vm2021_vm4 = vweird.f32 %v9804_v56  ;;  %v9888_v55 = vadd.f32 1e-08, %v1690_v38  ;;  %v2019_v58 = vadd.f32 %v9804_v56, %v2018_v41  ;;  %v1987_v59 = vsub.f32 1.0, %v1986_v42 }
 0x19d   : > { %v1336_v60 = vsel %vm17704_vm1, %v1094_v46, 0.0  ;;  %v1096_v61 = vmul.f32 %v968_v52, %v968_v52  ;;  %v1963_v62 = vsel %vm9894_vm5, %v9782_v48, %v1959_v43  ;;  %v2061_v63 = vmul.f32 %v9882_v47, %v9823_v49  ;;  %vm9914_vm6 = vmor %vm2020_vm2, %vm2021_vm4 }
 0x19e   : > { %8217 = vrcp.f32 %v9880_v44  ;;  %v9906_v19 = vadd.f32 1e-08, %v1695_v45  ;;  %v2024_v0 = vand.u32 2147483647, %v9762_v26  ;;  %v2027_v1 = vor.u32 1.1754944e-38, %v2026_v51 }
 0x19f   : > { %v1342_v2 = vsel %vm17704_vm1, %v1096_v61, 0.0  ;;  %v711_v4 = vperm.slane %v591_v53, 0  ;;  %v4116_v8 = vmul.f32 1.2, %v3861_v54  ;;  %v1994_v9 = vand.u32 2147483647, %v9797_v50 }
 0x1a0   : > { %8219 = vrcp.f32 %v9888_v55  ;;  %v1566_v6 = vmul.f32 %v9734_v34, %v1197_v21  ;;  %v8214_v10 = vpop.eup %8213  ;;  %v1968_v11 = vsel %vm9870_vm0, %v1967_v3, %v1963_v62  ;;  %v2023_v12 = vsel %vm9914_vm6, %v9804_v56, %v2019_v58 }
 0x1a1   : > { %1337 = vadd.xlane.f32.xlu0 %v1336_v60  ;;  %v1988_v26 = vmul.f32 %v9862_v32, %v1987_v59  ;;  %v967_v15 = vsub.f32 %v711_v4, %v9930_v13  ;;  %v8216_v17 = vpop.eup %8215  ;;  %v1996_v20 = vand.u32 2147483648, %v9797_v50  ;;  %v2062_v25 = vsub.f32 1.0, %v2061_v63  ;;  %v1203_v4 = vpop.xlane.xlu0 %1202 }
 0x1a2   : > { %v1563_v5 = vmul.f32 %v9734_v34, %v9840_v14  ;;  %8221 = vrcp.f32 %v9906_v19  ;;  %vm2025_vm7 = vcmp.eq.f32.partialorder %v2024_v0, 8.507059e+37  ;;  %vm1990_vm8 = vweird.f32 %v9797_v50 }
 0x1a3   : > { %1343 = vadd.xlane.f32.xlu2 %v1342_v2  ;;  %v1095_v56 = vmul.f32 %v967_v15, %v967_v15  ;;  %v4244_v28 = vmul.f32 1.442695, %v4116_v8  ;;  %v3869_v29 = vmul.f32 0.6931472, %v8214_v10  ;;  %8223 = vlog2.f32 %v1968_v11 }
 0x1a4   : > { %v9938_v27 = vpop.eup %8217  ;;  %v2028_v30 = vsel %vm2025_vm7, %v2027_v1, %v2023_v12  ;;  %vm9940_vm9 = vcmp.eq.f32.partialorder %v1994_v9, 8.507059e+37  ;;  %v1989_v7 = vadd.f32 %v9862_v32, %v1988_v26  ;;  %vm1991_vm10 = vweird.f32 %v9862_v32 }
 0x1a5   : > { %v1694_v14 = vadd.f32 1.0, %v1566_v6  ;;  %v1339_v33 = vsel %vm17704_vm1, %v1095_v56, 0.0  ;;  %v1997_v36 = vor.u32 1.1754944e-38, %v1996_v20  ;;  %v2063_v31 = vmul.f32 %v9882_v47, %v2062_v25  ;;  %vm9962_vm11 = vmor %vm1990_vm8, %vm1991_vm10 }
 0x1a6   : > { %v9947_v35 = vpop.eup %8219  ;;  %v1691_v22 = vadd.f32 1.0, %v1563_v5  ;;  %1340 = vadd.xlane.f32.xlu1 %v1339_v33  ;;  %v593_v16 = vrot.slane %v9758_v24, 4  ;;  %v3865_v23 = vmul.f32 0.6931472, %v8216_v17  ;;  %8225 = vlog2.f32 %v2028_v30 }
 0x1a7   : > { %v2039_v37 = vand.u32 2147483647, %v9888_v55  ;;  %v2076_v3 = vmul.f32 %v9938_v27, %v9880_v44  ;;  %8227 = vpow2.f32 %v4244_v28  ;;  %v9956_v39 = vmul.f32 1.2, %v3869_v29 }
 0x1a8   : > { %v9954_v38 = vpop.eup %8221  ;;  %v2041_v41 = vand.u32 2147483648, %v9888_v55  ;;  %vm2065_vm12 = vweird.f32 %v9823_v49  ;;  %v1993_v42 = vsel %vm9962_vm11, %v9862_v32, %v1989_v7  ;;  %v2031_v43 = vmul.f32 %v9947_v35, %v9888_v55  ;;  %v1209_v7 = vpop.xlane.xlu2 %1208 }
 0x1a9   : > { %vm2066_vm13 = vweird.f32 %v9882_v47  ;;  %v9974_v45 = vadd.f32 1e-08, %v1694_v14  ;;  %v8224_v50 = vpop.eup %8223  ;;  %v2064_v46 = vadd.f32 %v9882_v47, %v2063_v31  ;;  %v713_v51 = vperm.slane %v593_v16, 0 }
 0x1aa   : > { %v595_v52 = vrot.slane %v9758_v24, 6  ;;  %v594_v53 = vrot.slane %v9758_v24, 5  ;;  %v4118_v54 = vmul.f32 1.2, %v3865_v23  ;;  %v2071_v57 = vand.u32 2147483648, %v9823_v49  ;;  %vm9994_vm14 = vmor %vm2065_vm12, %vm2066_vm13 }
 0x1ab   : > { %v2077_v58 = vsub.f32 1.0, %v2076_v3  ;;  %v2106_v32 = vmul.f32 %v9954_v38, %v9906_v19  ;;  %v2069_v59 = vand.u32 2147483647, %v9823_v49  ;;  %v9983_v21 = vadd.f32 1e-08, %v1691_v22 }
 0x1ac   : > { %v969_v60 = vsub.f32 %v713_v51, %v9930_v13  ;;  %v715_v61 = vperm.slane %v595_v52, 0  ;;  %v9986_v62 = vpop.eup %8225  ;;  %v3863_v63 = vmul.f32 0.6931472, %v8224_v50  ;;  %v1998_v0 = vsel %vm9940_vm9, %v1997_v36, %v1993_v42  ;;  %v480_v50 = vld [vmem:[#allocation2 + $0x40] sm:$0xff] }
 0x1ad   : > { %v2032_v1 = vsub.f32 1.0, %v2031_v43  ;;  %8229 = vrcp.f32 %v9974_v45  ;;  %v9999_v8 = vpop.eup %8227  ;;  %v2068_v48 = vsel %vm9994_vm14, %v9882_v47, %v2064_v46  ;;  %v714_v10 = vperm.slane %v594_v53, 0  ;;  %v1206_v43 = vpop.xlane.xlu1 %1205 }
 0x1ae   : > { %v1097_v9 = vmul.f32 %v969_v60, %v969_v60  ;;  %v971_v6 = vsub.f32 %v715_v61, %v9930_v13  ;;  %v10005_v11 = vor.u32 1.1754944e-38, %v2041_v41  ;;  %v2072_v49 = vor.u32 1.1754944e-38, %v2071_v57 }
 0x1af   : > { %v2078_v12 = vmul.f32 %v9938_v27, %v2077_v58  ;;  %v2107_v26 = vsub.f32 1.0, %v2106_v32  ;;  %v4248_v15 = vmul.f32 1.442695, %v4118_v54  ;;  %vm2035_vm15 = vweird.f32 %v9888_v55 }
 0x1b0   : > { %vm2070_vm0 = vcmp.eq.f32.partialorder %v2069_v59, 8.507059e+37  ;;  %v1568_v17 = vmul.f32 %v9734_v34, %v1203_v4  ;;  %v1345_v20 = vsel %vm17704_vm1, %v1097_v9, 0.0  ;;  %8231 = vlog2.f32 %v1998_v0  ;;  %v10065_v59 = vld [vmem:[%s17671_s2] ss:$0 sm:$0xff]  ;;  %v10079_v4 = vpop.xlane.xlu0 %1211 }
 0x1b1   : > { %v2073_v47 = vsel %vm2070_vm0, %v2072_v49, %v2068_v48  ;;  %1346 = vadd.xlane.f32.xlu0 %v1345_v20  ;;  %v1099_v25 = vmul.f32 %v971_v6, %v971_v6  ;;  %v970_v5 = vsub.f32 %v714_v10, %v9930_v13  ;;  %v4117_v56 = vmul.f32 1.2, %v3863_v63  ;;  %v1218_v20 = vpop.xlane.xlu2 %1217 }
 0x1b2   : > { %v2033_v28 = vmul.f32 %v9947_v35, %v2032_v1  ;;  %8233 = vrcp.f32 %v9983_v21  ;;  %vm2081_vm2 = vweird.f32 %v9938_v27  ;;  %v2079_v30 = vadd.f32 %v9938_v27, %v2078_v12 }
 0x1b3   : > { %v10015_v29 = vpop.eup %8229  ;;  %v2108_v18 = vmul.f32 %v9954_v38, %v2107_v26  ;;  %v1351_v14 = vsel %vm17704_vm1, %v1099_v25, 0.0  ;;  %v1098_v33 = vmul.f32 %v970_v5, %v970_v5  ;;  %vm2036_vm3 = vweird.f32 %v9947_v35 }
 0x1b4   : > { %8235 = vlog2.f32 %v2073_v47  ;;  %v2086_v36 = vand.u32 2147483648, %v9880_v44  ;;  %v1696_v31 = vadd.f32 1.0, %v1568_v17  ;;  %1352 = vadd.xlane.f32.xlu2 %v1351_v14  ;;  %vm2080_vm4 = vweird.f32 %v9880_v44  ;;  %vm10057_vm9 = vmor %vm2035_vm15, %vm2036_vm3 }
 0x1b5   : > { %v2084_v22 = vand.u32 2147483647, %v9880_v44  ;;  %v1348_v16 = vsel %vm17704_vm1, %v1098_v33, 0.0  ;;  %v596_v23 = vrot.slane %v9758_v24, 7  ;;  %v4246_v3 = vmul.f32 1.442695, %v4117_v56  ;;  %vm10035_vm6 = vmor %vm2080_vm4, %vm2081_vm2  ;;  %v1215_v14 = vpop.xlane.xlu1 %1214 }
 0x1b6   : > { %v2034_v40 = vadd.f32 %v9947_v35, %v2033_v28  ;;  %vm10029_vm5 = vcmp.eq.f32.partialorder %v2039_v37, 8.507059e+37  ;;  %v2091_v44 = vmul.f32 %v10015_v29, %v9974_v45  ;;  %v1570_v24 = vmul.f32 %v9734_v34, %v1209_v7  ;;  %1349 = vadd.xlane.f32.xlu1 %v1348_v16  ;;  %v8232_v46 = vpop.eup %8231 }
 0x1b7   : > { %v2083_v37 = vsel %vm10035_vm6, %v9938_v27, %v2079_v30  ;;  %v2109_v51 = vadd.f32 %v9954_v38, %v2108_v18  ;;  %vm2110_vm7 = vweird.f32 %v9906_v19  ;;  %vm2111_vm8 = vweird.f32 %v9954_v38 }
 0x1b8   : > { %v10048_v52 = vpop.eup %8233  ;;  %8237 = vpow2.f32 %v4248_v15  ;;  %v2087_v53 = vor.u32 1.1754944e-38, %v2086_v36  ;;  %v2116_v54 = vand.u32 2147483648, %v9906_v19  ;;  %v10051_v57 = vadd.f32 1e-08, %v1696_v31  ;;  %vm10075_vm11 = vmor %vm2110_vm7, %vm2111_vm8 }
 0x1b9   : > { %vm2085_vm10 = vcmp.eq.f32.partialorder %v2084_v22, 8.507059e+37  ;;  %v2114_v58 = vand.u32 2147483647, %v9906_v19  ;;  %v716_v32 = vperm.slane %v596_v23, 0  ;;  %v10068_v60 = vadd.f32 %v10065_v59, %v480_v50 }
 0x1ba   : > { %v8236_v61 = vpop.eup %8235  ;;  %v2056_v55 = vand.u32 2147483648, %v9983_v21  ;;  %v2088_v63 = vsel %vm2085_vm10, %v2087_v53, %v2083_v37  ;;  %v2092_v1 = vsub.f32 1.0, %v2091_v44  ;;  %v1698_v2 = vadd.f32 1.0, %v1570_v24 }
 0x1bb   : > { %8239 = vpow2.f32 %v4246_v3  ;;  %v3867_v48 = vmul.f32 0.6931472, %v8232_v46  ;;  %v2038_v9 = vsel %vm10057_vm9, %v9947_v35, %v2034_v40  ;;  %v2113_v6 = vsel %vm10075_vm11, %v9954_v38, %v2109_v51  ;;  %516 = vst.msk [vmem:[%s9458_s7 + $0x40] sm:$0xff] %vm17704_vm1, %v10068_v60  ;;  %v1221_v46 = vpop.xlane.xlu0 %1220 }
 0x1bc   : > { %v2046_v19 = vmul.f32 %v10048_v52, %v9983_v21  ;;  %v2117_v10 = vor.u32 1.1754944e-38, %v2116_v54  ;;  %8241 = vrcp.f32 %v10051_v57  ;;  %v1569_v49 = vmul.f32 %v9734_v34, %v1206_v43 }
 0x1bd   : > { %v3877_v12 = vmul.f32 0.6931472, %v8236_v61  ;;  %8243 = vlog2.f32 %v2088_v63  ;;  %vm2115_vm12 = vcmp.eq.f32.partialorder %v2114_v58, 8.507059e+37  ;;  %v972_v35 = vsub.f32 %v716_v32, %v9930_v13 }
 0x1be   : > { %v10095_v26 = vpop.eup %8237  ;;  %v2118_v15 = vsel %vm2115_vm12, %v2117_v10, %v2113_v6  ;;  %v2093_v38 = vmul.f32 %v10015_v29, %v2092_v1  ;;  %v10098_v17 = vadd.f32 1e-08, %v1698_v2  ;;  %v597_v47 = vrot.slane %v10068_v60, 1 }
 0x1bf   : > { %18163 = vst [vmem:[#allocation8_spill] sm:$0xff] %v10095_v26  ;;  %v4119_v25 = vmul.f32 1.2, %v3867_v48  ;;  %v2043_v5 = vsel %vm10029_vm5, %v10005_v11, %v2038_v9  ;;  %v1100_v56 = vmul.f32 %v972_v35, %v972_v35  ;;  %v717_v28 = vperm.slane %v10068_v60, 0 }
 0x1c0   : > { %v2047_v30 = vsub.f32 1.0, %v2046_v19  ;;  %v2101_v18 = vand.u32 2147483648, %v9974_v45  ;;  %v1697_v7 = vadd.f32 1.0, %v1569_v49  ;;  %v718_v33 = vperm.slane %v597_v47, 0 }
 0x1c1   : > { %v10106_v36 = vpop.eup %8239  ;;  %8245 = vlog2.f32 %v2118_v15  ;;  %v1573_v31 = vmul.f32 %v9734_v34, %v1218_v20  ;;  %v1354_v22 = vsel %vm17704_vm1, %v1100_v56, 0.0  ;;  %v973_v16 = vsub.f32 %v717_v28, %v9930_v13  ;;  %v1224_v28 = vpop.xlane.xlu1 %1223 }
 0x1c2   : > { %18164 = vst [vmem:[#allocation9_spill] sm:$0xff] %v10106_v36  ;;  %v10111_v23 = vpop.eup %8241  ;;  %v4124_v11 = vmul.f32 1.2, %v3877_v12  ;;  %v2094_v3 = vadd.f32 %v10015_v29, %v2093_v38  ;;  %vm2096_vm13 = vweird.f32 %v10015_v29  ;;  %8247 = vrcp.f32 %v10098_v17  ;;  %1355 = vadd.xlane.f32.xlu0 %v1354_v22 }
 0x1c3   : > { %v8244_v40 = vpop.eup %8243  ;;  %8249 = vlog2.f32 %v2043_v5  ;;  %v1572_v41 = vmul.f32 %v9734_v34, %v1215_v14  ;;  %v974_v42 = vsub.f32 %v718_v33, %v9930_v13  ;;  %v1101_v44 = vmul.f32 %v973_v16, %v973_v16 }
 0x1c4   : > { %v4250_v24 = vmul.f32 1.442695, %v4119_v25  ;;  %vm2095_vm14 = vweird.f32 %v9974_v45  ;;  %v2099_v43 = vand.u32 2147483647, %v9974_v45  ;;  %v10120_v50 = vadd.f32 1e-08, %v1697_v7 }
 0x1c5   : > { %v2048_v37 = vmul.f32 %v10048_v52, %v2047_v30  ;;  %vm10123_vm15 = vmor %vm2095_vm14, %vm2096_vm13  ;;  %v2121_v53 = vmul.f32 %v10111_v23, %v10051_v57  ;;  %v1701_v54 = vadd.f32 1.0, %v1573_v31  ;;  %v1102_v27 = vmul.f32 %v974_v42, %v974_v42 }
 0x1c6   : > { %v4260_v58 = vmul.f32 1.442695, %v4124_v11  ;;  %v2098_v32 = vsel %vm10123_vm15, %v10015_v29, %v2094_v3  ;;  %v2102_v45 = vor.u32 1.1754944e-38, %v2101_v18  ;;  %v1357_v61 = vsel %vm17704_vm1, %v1101_v44, 0.0 }
 0x1c7   : > { %v8246_v63 = vpop.eup %8245  ;;  %v3879_v0 = vmul.f32 0.6931472, %v8244_v40  ;;  %v1700_v1 = vadd.f32 1.0, %v1572_v41  ;;  %v1574_v2 = vmul.f32 %v9734_v34, %v1221_v46  ;;  %v1360_v48 = vsel %vm17704_vm1, %v1102_v27, 0.0  ;;  %1358 = vadd.xlane.f32.xlu1 %v1357_v61 }
 0x1c8   : > { %v10135_v9 = vpop.eup %8247  ;;  %v10140_v19 = vor.u32 1.1754944e-38, %v2056_v55  ;;  %vm2100_vm0 = vcmp.eq.f32.partialorder %v2099_v43, 8.507059e+37  ;;  %8251 = vrcp.f32 %v10120_v50  ;;  %1361 = vadd.xlane.f32.xlu2 %v1360_v48  ;;  %v2122_v49 = vsub.f32 1.0, %v2121_v53  ;;  %v1227_v55 = vpop.xlane.xlu2 %1226 }
 0x1c9   : > { %v10143_v29 = vpop.eup %8249  ;;  %8253 = vpow2.f32 %v4250_v24  ;;  %v2103_v10 = vsel %vm2100_vm0, %v2102_v45, %v2098_v32  ;;  %v10145_v12 = vadd.f32 1e-08, %v1701_v54  ;;  %v10148_v35 = vadd.f32 %v10048_v52, %v2048_v37 }
 0x1ca   : > { %8255 = vpow2.f32 %v4260_v58  ;;  %v3883_v15 = vmul.f32 0.6931472, %v8246_v63  ;;  %v2131_v38 = vand.u32 2147483648, %v10051_v57  ;;  %v4125_v20 = vmul.f32 1.2, %v3879_v0 }
 0x1cb   : > { %vm2125_vm2 = vweird.f32 %v10051_v57  ;;  %v2151_v47 = vmul.f32 %v10135_v9, %v10098_v17  ;;  %v10154_v25 = vadd.f32 1e-08, %v1700_v1  ;;  %v1702_v5 = vadd.f32 1.0, %v1574_v2 }
 0x1cc   : > { %8257 = vlog2.f32 %v2103_v10  ;;  %v1571_v56 = vmul.f32 %v9734_v34, %v10079_v4  ;;  %v598_v30 = vrot.slane %v10068_v60, 2  ;;  %v600_v18 = vrot.slane %v10068_v60, 4 }
 0x1cd   : > { %vm2051_vm3 = vweird.f32 %v10048_v52  ;;  %v2123_v7 = vmul.f32 %v10111_v23, %v2122_v49  ;;  %v2129_v14 = vand.u32 2147483647, %v10051_v57  ;;  %8259 = vrcp.f32 %v10145_v12 }
 0x1ce   : > { %v1576_v33 = vmul.f32 %v9734_v34, %v1227_v55  ;;  %v10165_v31 = vpop.eup %8251  ;;  %v4127_v22 = vmul.f32 1.2, %v3883_v15  ;;  %vm2126_vm4 = vweird.f32 %v10111_v23  ;;  %v2132_v4 = vor.u32 1.1754944e-38, %v2131_v38 }
 0x1cf   : > { %v2159_v16 = vand.u32 2147483647, %v10098_v17  ;;  %v10169_v11 = vpop.eup %8253  ;;  %vm2050_vm5 = vweird.f32 %v9983_v21  ;;  %v2152_v3 = vsub.f32 1.0, %v2151_v47  ;;  %vm2155_vm6 = vweird.f32 %v10098_v17  ;;  %vm10194_vm7 = vmor %vm2125_vm2, %vm2126_vm4 }
 0x1d0   : > { %18167 = vst [vmem:[#allocation10_spill] sm:$0xff] %v10169_v11  ;;  %8261 = vrcp.f32 %v10154_v25  ;;  %v10174_v40 = vadd.f32 1e-08, %v1702_v5  ;;  %v1575_v41 = vmul.f32 %v9734_v34, %v1224_v28  ;;  %v10177_v42 = vpop.eup %8255  ;;  %v4262_v44 = vmul.f32 1.442695, %v4125_v20  ;;  %vm10220_vm9 = vmor %vm2050_vm5, %vm2051_vm3 }
 0x1d1   : > { %18168 = vst [vmem:[#allocation11_spill] sm:$0xff] %v10177_v42  ;;  %v1699_v24 = vadd.f32 1.0, %v1571_v56  ;;  %v719_v43 = vperm.slane %v598_v30, 0  ;;  %v721_v46 = vperm.slane %v600_v18, 0  ;;  %v2124_v37 = vadd.f32 %v10111_v23, %v2123_v7 }
 0x1d2   : > { %v2136_v51 = vmul.f32 %v10165_v31, %v10120_v50  ;;  %v1704_v53 = vadd.f32 1.0, %v1576_v33  ;;  %v599_v54 = vrot.slane %v10068_v60, 3  ;;  %v8258_v27 = vpop.eup %8257  ;;  %v4266_v58 = vmul.f32 1.442695, %v4127_v22 }
 0x1d3   : > { %v2161_v32 = vand.u32 2147483648, %v10098_v17  ;;  %v975_v45 = vsub.f32 %v719_v43, %v9930_v13  ;;  %v977_v61 = vsub.f32 %v721_v46, %v9930_v13  ;;  %v10186_v63 = vpop.eup %8259  ;;  %v2153_v0 = vmul.f32 %v10135_v9, %v2152_v3 }
 0x1d4   : > { %8263 = vrcp.f32 %v10174_v40  ;;  %v1703_v1 = vadd.f32 1.0, %v1575_v41  ;;  %v720_v2 = vperm.slane %v599_v54, 0  ;;  %v10198_v10 = vadd.f32 1e-08, %v1699_v24 }
 0x1d5   : > { %8265 = vpow2.f32 %v4262_v44  ;;  %v1103_v49 = vmul.f32 %v975_v45, %v975_v45  ;;  %v1105_v15 = vmul.f32 %v977_v61, %v977_v61  ;;  %v3881_v55 = vmul.f32 0.6931472, %v8258_v27 }
 0x1d6   : > { %v10200_v38 = vpop.eup %8261  ;;  %v2128_v20 = vsel %vm10194_vm7, %v10111_v23, %v2124_v37  ;;  %v2137_v47 = vsub.f32 1.0, %v2136_v51  ;;  %v10205_v5 = vadd.f32 1e-08, %v1704_v53  ;;  %v2196_v57 = vmul.f32 %v10186_v63, %v10145_v12 }
 0x1d7   : > { %v1363_v56 = vsel %vm17704_vm1, %v1103_v49, 0.0  ;;  %v1369_v28 = vsel %vm17704_vm1, %v1105_v15, 0.0  ;;  %v976_v30 = vsub.f32 %v720_v2, %v9930_v13  ;;  %8267 = vpow2.f32 %v4266_v58 }
 0x1d8   : > { %v2154_v18 = vadd.f32 %v10135_v9, %v2153_v0  ;;  %vm2156_vm8 = vweird.f32 %v10135_v9  ;;  %v10214_v7 = vadd.f32 1e-08, %v1703_v1  ;;  %1364 = vadd.xlane.f32.xlu0 %v1363_v56  ;;  %1370 = vadd.xlane.f32.xlu2 %v1369_v28  ;;  %vm2130_vm10 = vcmp.eq.f32.partialorder %v2129_v14, 8.507059e+37 }
 0x1d9   : > { %8269 = vrcp.f32 %v10198_v10  ;;  %v2181_v33 = vmul.f32 %v10200_v38, %v10154_v25  ;;  %v1104_v22 = vmul.f32 %v976_v30, %v976_v30  ;;  %v2133_v44 = vsel %vm2130_vm10, %v2132_v4, %v2128_v20  ;;  %vm10241_vm11 = vmor %vm2155_vm6, %vm2156_vm8 }
 0x1da   : > { %v10227_v3 = vpop.eup %8263  ;;  %v2146_v24 = vand.u32 2147483648, %v10120_v50  ;;  %8271 = vrcp.f32 %v10205_v5  ;;  %v4126_v14 = vmul.f32 1.2, %v3881_v55  ;;  %v2138_v37 = vmul.f32 %v10165_v31, %v2137_v47 }
 0x1db   : > { %v10235_v43 = vpop.eup %8265  ;;  %v2197_v51 = vsub.f32 1.0, %v2196_v57  ;;  %v1366_v4 = vsel %vm17704_vm1, %v1104_v22, 0.0  ;;  %v2158_v53 = vsel %vm10241_vm11, %v10135_v9, %v2154_v18  ;;  %vm10252_vm12 = vcmp.eq.f32.partialorder %v2159_v16, 8.507059e+37 }
 0x1dc   : > { %18173 = vst [vmem:[#allocation12_spill] sm:$0xff] %v10235_v43  ;;  %v2162_v27 = vor.u32 1.1754944e-38, %v2161_v32  ;;  %8273 = vrcp.f32 %v10214_v7  ;;  %1367 = vadd.xlane.f32.xlu1 %v1366_v4  ;;  %v2204_v58 = vand.u32 2147483647, %v10145_v12  ;;  %v2182_v45 = vsub.f32 1.0, %v2181_v33  ;;  %v1230_v4 = vpop.xlane.xlu0 %1229 }
 0x1dd   : > { %v2211_v61 = vmul.f32 %v10227_v3, %v10174_v40  ;;  %v601_v0 = vrot.slane %v10068_v60, 5  ;;  %v10261_v1 = vpop.eup %8267  ;;  %8275 = vlog2.f32 %v2133_v44  ;;  %v2144_v17 = vand.u32 2147483647, %v10120_v50 }
 0x1de   : > { %18178 = vst [vmem:[#allocation13_spill] sm:$0xff] %v10261_v1  ;;  %v10264_v9 = vor.u32 1.1754944e-38, %v2146_v24  ;;  %v2206_v16 = vand.u32 2147483648, %v10145_v12  ;;  %v4264_v2 = vmul.f32 1.442695, %v4126_v14  ;;  %v10270_v48 = vadd.f32 %v10165_v31, %v2138_v37 }
 0x1df   : > { %v10267_v32 = vpop.eup %8269  ;;  %v2198_v49 = vmul.f32 %v10186_v63, %v2197_v51  ;;  %v722_v15 = vperm.slane %v601_v0, 0  ;;  %v10277_v20 = vsel %vm10252_vm12, %v2162_v27, %v2158_v53  ;;  %vm2200_vm13 = vweird.f32 %v10145_v12 }
 0x1e0   : > { %v10273_v55 = vpop.eup %8271  ;;  %v603_v47 = vrot.slane %v10068_v60, 7  ;;  %v602_v57 = vrot.slane %v10068_v60, 6  ;;  %vm10282_vm14 = vcmp.eq.f32.partialorder %v2204_v58, 8.507059e+37  ;;  %v2183_v28 = vmul.f32 %v10200_v38, %v2182_v45 }
 0x1e1   : > { %v2212_v30 = vsub.f32 1.0, %v2211_v61  ;;  %v978_v18 = vsub.f32 %v722_v15, %v9930_v13  ;;  %v2207_v22 = vor.u32 1.1754944e-38, %v2206_v16  ;;  %v2191_v44 = vand.u32 2147483648, %v10154_v25  ;;  %v10308_v61 = vpop.xlane.xlu2 %1235  ;;  %v481_v16 = vld [vmem:[#allocation2 + $0x48] sm:$0xff] }
 0x1e2   : > { %v10288_v33 = vpop.eup %8273  ;;  %v724_v24 = vperm.slane %v603_v47, 0  ;;  %v723_v14 = vperm.slane %v602_v57, 0  ;;  %v10293_v46 = vmul.f32 %v10267_v32, %v10198_v10  ;;  %v2199_v60 = vadd.f32 %v10186_v63, %v2198_v49 }
 0x1e3   : > { %vm2201_vm15 = vweird.f32 %v10186_v63  ;;  %v2241_v37 = vmul.f32 %v10273_v55, %v10205_v5  ;;  %v10299_v51 = vpop.eup %8275  ;;  %vm2185_vm0 = vweird.f32 %v10154_v25  ;;  %vm2186_vm2 = vweird.f32 %v10200_v38 }
 0x1e4   : > { %v1106_v53 = vmul.f32 %v978_v18, %v978_v18  ;;  %v980_v54 = vsub.f32 %v724_v24, %v9930_v13  ;;  %v2184_v27 = vadd.f32 %v10200_v38, %v2183_v28  ;;  %v2213_v58 = vmul.f32 %v10227_v3, %v2212_v30  ;;  %vm10313_vm3 = vmor %vm2200_vm13, %vm2201_vm15 }
 0x1e5   : > { %v2226_v45 = vmul.f32 %v10288_v33, %v10214_v7  ;;  %v979_v0 = vsub.f32 %v723_v14, %v9930_v13  ;;  %v2189_v15 = vand.u32 2147483647, %v10154_v25  ;;  %v2192_v47 = vor.u32 1.1754944e-38, %v2191_v44  ;;  %v1233_v14 = vpop.xlane.xlu1 %1232  ;;  %vm10327_vm4 = vmor %vm2185_vm0, %vm2186_vm2 }
 0x1e6   : > { %v1372_v57 = vsel %vm17704_vm1, %v1106_v53, 0.0  ;;  %v1108_v28 = vmul.f32 %v980_v54, %v980_v54  ;;  %v2203_v30 = vsel %vm10313_vm3, %v10186_v63, %v2199_v60  ;;  %v2219_v18 = vand.u32 2147483647, %v10174_v40 }
 0x1e7   : > { %v2242_v24 = vsub.f32 1.0, %v2241_v37  ;;  %1373 = vadd.xlane.f32.xlu0 %v1372_v57  ;;  %v1107_v12 = vmul.f32 %v979_v0, %v979_v0  ;;  %vm2216_vm5 = vweird.f32 %v10227_v3  ;;  %v1577_v53 = vmul.f32 %v9734_v34, %v1230_v4 }
 0x1e8   : > { %v1378_v63 = vsel %vm17704_vm1, %v1108_v28, 0.0  ;;  %v10335_v60 = vadd.f32 %v10065_v59, %v481_v16  ;;  %v2188_v37 = vsel %vm10327_vm4, %v10200_v38, %v2184_v27  ;;  %v2214_v25 = vadd.f32 %v10227_v3, %v2213_v58 }
 0x1e9   : > { %v2227_v54 = vsub.f32 1.0, %v2226_v45  ;;  %1379 = vadd.xlane.f32.xlu2 %v1378_v63  ;;  %v1375_v0 = vsel %vm17704_vm1, %v1107_v12, 0.0  ;;  %v2208_v49 = vsel %vm10282_vm14, %v2207_v22, %v2203_v30  ;;  %v2221_v4 = vand.u32 2147483648, %v10174_v40  ;;  %v1239_v30 = vpop.xlane.xlu0 %1238 }
 0x1ea   : > { %v2249_v57 = vand.u32 2147483647, %v10205_v5  ;;  %v2251_v16 = vand.u32 2147483648, %v10205_v5  ;;  %1376 = vadd.xlane.f32.xlu1 %v1375_v0  ;;  %517 = vst.msk [vmem:[%s9458_s7 + $0x48] sm:$0xff] %vm17704_vm1, %v10335_v60  ;;  %8277 = vpow2.f32 %v4264_v2  ;;  %vm2190_vm6 = vcmp.eq.f32.partialorder %v2189_v15, 8.507059e+37 }
 0x1eb   : > { %vm2215_vm7 = vweird.f32 %v10174_v40  ;;  %v2243_v38 = vmul.f32 %v10273_v55, %v2242_v24  ;;  %v2167_v27 = vsub.f32 1.0, %v10293_v46  ;;  %v2193_v56 = vsel %vm2190_vm6, %v2192_v47, %v2188_v37 }
 0x1ec   : > { %vm10355_vm8 = vmor %vm2215_vm7, %vm2216_vm5  ;;  %vm2245_vm10 = vweird.f32 %v10205_v5  ;;  %v1705_v58 = vadd.f32 1.0, %v1577_v53  ;;  %8279 = vlog2.f32 %v2208_v49  ;;  %vm2220_vm11 = vcmp.eq.f32.partialorder %v2219_v18, 8.507059e+37 }
 0x1ed   : > { %v2218_v2 = vsel %vm10355_vm8, %v10227_v3, %v2214_v25  ;;  %v2228_v40 = vmul.f32 %v10288_v33, %v2227_v54  ;;  %vm2141_vm12 = vweird.f32 %v10165_v31  ;;  %v2222_v45 = vor.u32 1.1754944e-38, %v2221_v4  ;;  %v1245_v3 = vpop.xlane.xlu2 %1244  ;;  %v1242_v25 = vpop.xlane.xlu1 %1241 }
 0x1ee   : > { %vm10365_vm13 = vcmp.eq.f32.partialorder %v2249_v57, 8.507059e+37  ;;  %v2252_v47 = vor.u32 1.1754944e-38, %v2251_v16  ;;  %v2234_v28 = vand.u32 2147483647, %v10214_v7  ;;  %8281 = vlog2.f32 %v2193_v56 }
 0x1ef   : > { %v2244_v24 = vadd.f32 %v10273_v55, %v2243_v38  ;;  %vm2246_vm14 = vweird.f32 %v10273_v55  ;;  %vm2230_vm15 = vweird.f32 %v10214_v7  ;;  %vm2140_vm0 = vweird.f32 %v10120_v50 }
 0x1f0   : > { %v2223_v18 = vsel %vm2220_vm11, %v2222_v45, %v2218_v2  ;;  %vm2231_vm2 = vweird.f32 %v10288_v33  ;;  %v10375_v12 = vadd.f32 1e-08, %v1705_v58  ;;  %v1578_v44 = vmul.f32 %v9734_v34, %v1233_v14  ;;  %v10378_v53 = vpop.eup %8277  ;;  %vm10386_vm3 = vmor %vm2245_vm10, %vm2246_vm14 }
 0x1f1   : > { %18189 = vst [vmem:[#allocation14_spill] sm:$0xff] %v10378_v53  ;;  %v2229_v63 = vadd.f32 %v10288_v33, %v2228_v40  ;;  %v1580_v37 = vmul.f32 %v9734_v34, %v1239_v30  ;;  %v725_v54 = vperm.slane %v10335_v60, 0  ;;  %v605_v0 = vrot.slane %v10335_v60, 2  ;;  %vm10412_vm6 = vmor %vm2230_vm15, %vm2231_vm2 }
 0x1f2   : > { %vm10390_vm4 = vcmp.eq.f32.partialorder %v2234_v28, 8.507059e+37  ;;  %v2236_v14 = vand.u32 2147483648, %v10214_v7  ;;  %v1579_v57 = vmul.f32 %v9734_v34, %v10308_v61  ;;  %v1582_v16 = vmul.f32 %v9734_v34, %v1245_v3  ;;  %v8280_v38 = vpop.eup %8279  ;;  %vm10435_vm7 = vmor %vm2140_vm0, %vm2141_vm12 }
 0x1f3   : > { %8283 = vlog2.f32 %v2223_v18  ;;  %v2248_v5 = vsel %vm10386_vm3, %v10273_v55, %v2244_v24  ;;  %v981_v56 = vsub.f32 %v725_v54, %v9930_v13  ;;  %v727_v22 = vperm.slane %v605_v0, 0 }
 0x1f4   : > { %vm10404_vm5 = vcmp.eq.f32.partialorder %v2144_v17, 8.507059e+37  ;;  %8285 = vrcp.f32 %v10375_v12  ;;  %v1706_v55 = vadd.f32 1.0, %v1578_v44  ;;  %v1581_v2 = vmul.f32 %v9734_v34, %v1242_v25  ;;  %v8282_v45 = vpop.eup %8281 }
 0x1f5   : > { %v604_v40 = vrot.slane %v10335_v60, 1  ;;  %v2233_v17 = vsel %vm10412_vm6, %v10288_v33, %v2229_v63  ;;  %v1708_v28 = vadd.f32 1.0, %v1580_v37  ;;  %v1109_v30 = vmul.f32 %v981_v56, %v981_v56  ;;  %v1251_v53 = vpop.xlane.xlu1 %1250 }
 0x1f6   : > { %v983_v7 = vsub.f32 %v727_v22, %v9930_v13  ;;  %v3895_v24 = vmul.f32 0.6931472, %v8280_v38  ;;  %v2237_v3 = vor.u32 1.1754944e-38, %v2236_v14  ;;  %v1710_v18 = vadd.f32 1.0, %v1582_v16 }
 0x1f7   : > { %v726_v54 = vperm.slane %v604_v40, 0  ;;  %v2253_v44 = vsel %vm10365_vm13, %v2252_v47, %v2248_v5  ;;  %v1707_v0 = vadd.f32 1.0, %v1579_v57  ;;  %v1381_v25 = vsel %vm17704_vm1, %v1109_v30, 0.0 }
 0x1f8   : > { %v1111_v49 = vmul.f32 %v983_v7, %v983_v7  ;;  %v3893_v41 = vmul.f32 0.6931472, %v8282_v45  ;;  %v2238_v61 = vsel %vm10390_vm4, %v2237_v3, %v2233_v17  ;;  %v10428_v33 = vadd.f32 1e-08, %v1706_v55  ;;  %1382 = vadd.xlane.f32.xlu0 %v1381_v25 }
 0x1f9   : > { %v1709_v63 = vadd.f32 1.0, %v1581_v2  ;;  %v8284_v37 = vpop.eup %8283  ;;  %8287 = vlog2.f32 %v10277_v20  ;;  %v10439_v47 = vadd.f32 1e-08, %v1708_v28  ;;  %v982_v14 = vsub.f32 %v726_v54, %v9930_v13  ;;  %v1248_v28 = vpop.xlane.xlu0 %1247 }
 0x1fa   : > { %v1387_v4 = vsel %vm17704_vm1, %v1111_v49, 0.0  ;;  %v10443_v57 = vpop.eup %8285  ;;  %v2143_v20 = vsel %vm10435_vm7, %v10165_v31, %v10270_v48  ;;  %v2168_v50 = vmul.f32 %v10267_v32, %v2167_v27  ;;  %8289 = vlog2.f32 %v2253_v44 }
 0x1fb   : > { %v10452_v16 = vadd.f32 1e-08, %v1710_v18  ;;  %1388 = vadd.xlane.f32.xlu2 %v1387_v4  ;;  %v4133_v38 = vmul.f32 1.2, %v3895_v24  ;;  %8291 = vlog2.f32 %v2238_v61  ;;  %v10454_v5 = vadd.f32 1e-08, %v1707_v0 }
 0x1fc   : > { %v1110_v13 = vmul.f32 %v982_v14, %v982_v14  ;;  %vm2170_vm8 = vweird.f32 %v10198_v10  ;;  %v4132_v56 = vmul.f32 1.2, %v3893_v41  ;;  %8293 = vrcp.f32 %v10428_v33 }
 0x1fd   : > { %v10458_v22 = vadd.f32 1e-08, %v1709_v63  ;;  %v2148_v31 = vsel %vm10404_vm5, %v10264_v9, %v2143_v20  ;;  %v2176_v48 = vand.u32 2147483648, %v10198_v10  ;;  %8295 = vrcp.f32 %v10439_v47 }
 0x1fe   : > { %v1384_v46 = vsel %vm17704_vm1, %v1110_v13, 0.0  ;;  %v3885_v27 = vmul.f32 0.6931472, %v10299_v51  ;;  %v3897_v55 = vmul.f32 0.6931472, %v8284_v37  ;;  %v2256_v41 = vmul.f32 %v10443_v57, %v10375_v12 }
 0x1ff   : > { %8297 = vrcp.f32 %v10452_v16  ;;  %1385 = vadd.xlane.f32.xlu1 %v1384_v46  ;;  %v10470_v2 = vpop.eup %8287  ;;  %v10473_v58 = vadd.f32 %v10267_v32, %v2168_v50  ;;  %vm2171_vm10 = vweird.f32 %v10267_v32  ;;  %v4278_v9 = vmul.f32 1.442695, %v4133_v38 }
 0x200   : > { %18200 = vst [vmem:[#allocation15_spill] sm:$0xff] %v10470_v2  ;;  %8299 = vrcp.f32 %v10454_v5  ;;  %v8290_v40 = vpop.eup %8289  ;;  %v4276_v45 = vmul.f32 1.442695, %v4132_v56  ;;  %v2266_v17 = vand.u32 2147483648, %v10375_v12  ;;  %v10480_v7 = vor.u32 1.1754944e-38, %v2176_v48  ;;  %vm10492_vm11 = vmor %vm2170_vm8, %vm2171_vm10 }
 0x201   : > { %8301 = vrcp.f32 %v10458_v22  ;;  %v8292_v30 = vpop.eup %8291  ;;  %v606_v24 = vrot.slane %v10335_v60, 3  ;;  %v608_v3 = vrot.slane %v10335_v60, 5  ;;  %v10486_v54 = vmul.f32 1.2, %v3885_v27 }
 0x202   : > { %8303 = vlog2.f32 %v2148_v31  ;;  %v10484_v18 = vpop.eup %8293  ;;  %v4134_v0 = vmul.f32 1.2, %v3897_v55  ;;  %v2257_v25 = vsub.f32 1.0, %v2256_v41  ;;  %v2296_v49 = vand.u32 2147483648, %v10454_v5 }
 0x203   : > { %18201 = vst [vmem:[#allocation16_spill] sm:$0xff] %v10486_v54  ;;  %v10497_v61 = vpop.eup %8295  ;;  %8305 = vpow2.f32 %v4278_v9  ;;  %v1583_v15 = vmul.f32 %v9734_v34, %v1248_v28  ;;  %v10507_v14 = vmul.f32 0.6931472, %v8290_v40  ;;  %vm2260_vm12 = vweird.f32 %v10375_v12 }
 0x204   : > { %8307 = vpow2.f32 %v4276_v45  ;;  %v10510_v20 = vor.u32 1.1754944e-38, %v2266_v17  ;;  %v2271_v13 = vmul.f32 %v10484_v18, %v10428_v33  ;;  %v728_v56 = vperm.slane %v606_v24, 0 }
 0x205   : > { %v10505_v4 = vpop.eup %8297  ;;  %v730_v31 = vperm.slane %v608_v3, 0  ;;  %v607_v48 = vrot.slane %v10335_v60, 4  ;;  %v4280_v27 = vmul.f32 1.442695, %v4134_v0  ;;  %v2258_v55 = vmul.f32 %v10443_v57, %v2257_v25  ;;  %v1254_v3 = vpop.xlane.xlu2 %1253  ;;  %v10537_v25 = vld [vmem:[%s17672_s3] sm:$0xff] }
 0x206   : > { %v10513_v38 = vpop.eup %8299  ;;  %v10521_v41 = vor.u32 1.1754944e-38, %v2296_v49  ;;  %v2281_v9 = vand.u32 2147483648, %v10428_v33  ;;  %v2301_v17 = vmul.f32 %v10497_v61, %v10439_v47  ;;  %v2331_v28 = vmul.f32 %v10505_v4, %v10452_v16 }
 0x207   : > { %v10518_v46 = vpop.eup %8301  ;;  %v1711_v24 = vadd.f32 1.0, %v1583_v15  ;;  %v3899_v50 = vmul.f32 0.6931472, %v8292_v30  ;;  %vm2261_vm13 = vweird.f32 %v10443_v57  ;;  %v2286_v0 = vmul.f32 %v10513_v38, %v10454_v5 }
 0x208   : > { %18204 = vst [vmem:[#allocation17_spill] sm:$0xff] %v10521_v41  ;;  %v10524_v40 = vpop.eup %8303  ;;  %v984_v49 = vsub.f32 %v728_v56, %v10537_v25  ;;  %v2272_v51 = vsub.f32 1.0, %v2271_v13  ;;  %v2316_v15 = vmul.f32 %v10518_v46, %v10458_v22  ;;  %v986_v30 = vsub.f32 %v730_v31, %v10537_v25  ;;  %vm10563_vm15 = vmor %vm2260_vm12, %vm2261_vm13 }
 0x209   : > { %v10540_v63 = vpop.eup %8305  ;;  %v729_v6 = vperm.slane %v607_v48, 0  ;;  %8309 = vpow2.f32 %v4280_v27  ;;  %v10548_v37 = vadd.f32 %v10443_v57, %v2258_v55  ;;  %v10550_v1 = vor.u32 1.1754944e-38, %v2281_v9 }
 0x20a   : > { %18205 = vst [vmem:[#allocation18_spill] sm:$0xff] %v10540_v63  ;;  %v10545_v45 = vpop.eup %8307  ;;  %v1585_v41 = vmul.f32 %v9734_v34, %v1254_v3  ;;  %vm2275_vm14 = vweird.f32 %v10428_v33  ;;  %v2302_v56 = vsub.f32 1.0, %v2301_v17  ;;  %v2332_v13 = vsub.f32 1.0, %v2331_v28 }
 0x20b   : > { %18206 = vst [vmem:[#allocation19_spill] sm:$0xff] %v10545_v45  ;;  %v10554_v63 = vadd.f32 1e-08, %v1711_v24  ;;  %v1112_v42 = vmul.f32 %v984_v49, %v984_v49  ;;  %v10556_v31 = vmul.f32 1.2, %v3899_v50  ;;  %v2287_v48 = vsub.f32 1.0, %v2286_v0 }
 0x20c   : > { %v1114_v45 = vmul.f32 %v986_v30, %v986_v30  ;;  %v985_v27 = vsub.f32 %v729_v6, %v10537_v25  ;;  %v2273_v9 = vmul.f32 %v10484_v18, %v2272_v51  ;;  %vm2276_vm0 = vweird.f32 %v10484_v18  ;;  %v1257_v6 = vpop.xlane.xlu0 %1256 }
 0x20d   : > { %v2317_v17 = vsub.f32 1.0, %v2316_v15  ;;  %v1390_v50 = vsel %vm17704_vm1, %v1112_v42, 0.0  ;;  %v1584_v28 = vmul.f32 %v9734_v34, %v1251_v53  ;;  %v2303_v0 = vmul.f32 %v10497_v61, %v2302_v56  ;;  %vm10605_vm6 = vmor %vm2275_vm14, %vm2276_vm0 }
 0x20e   : > { %1391 = vadd.xlane.f32.xlu0 %v1390_v50  ;;  %v1396_v24 = vsel %vm17704_vm1, %v1114_v45, 0.0  ;;  %v1113_v3 = vmul.f32 %v985_v27, %v985_v27  ;;  %v2333_v51 = vmul.f32 %v10505_v4, %v2332_v13  ;;  %8311 = vrcp.f32 %v10554_v63  ;;  %v482_v50 = vld [vmem:[#allocation2 + $0x50] sm:$0xff] }
 0x20f   : > { %v1713_v49 = vadd.f32 1.0, %v1585_v41  ;;  %1397 = vadd.xlane.f32.xlu2 %v1396_v24  ;;  %v10579_v42 = vpop.eup %8309  ;;  %v10582_v15 = vmul.f32 %v10513_v38, %v2287_v48  ;;  %v2309_v30 = vand.u32 2147483647, %v10439_v47  ;;  %v2311_v53 = vand.u32 2147483648, %v10439_v47 }
 0x210   : > { %18209 = vst [vmem:[#allocation20_spill] sm:$0xff] %v10579_v42  ;;  %v1393_v45 = vsel %vm17704_vm1, %v1113_v3, 0.0  ;;  %v10588_v27 = vadd.f32 %v10484_v18, %v2273_v9  ;;  %vm2305_vm2 = vweird.f32 %v10439_v47  ;;  %vm2335_vm3 = vweird.f32 %v10452_v16 }
 0x211   : > { %v2318_v41 = vmul.f32 %v10518_v46, %v2317_v17  ;;  %1394 = vadd.xlane.f32.xlu1 %v1393_v45  ;;  %vm2306_vm4 = vweird.f32 %v10497_v61  ;;  %v2341_v56 = vand.u32 2147483648, %v10452_v16  ;;  %v1712_v13 = vadd.f32 1.0, %v1584_v28 }
 0x212   : > { %v609_v48 = vrot.slane %v10335_v60, 6  ;;  %v2304_v24 = vadd.f32 %v10497_v61, %v2303_v0  ;;  %v2334_v9 = vadd.f32 %v10505_v4, %v2333_v51  ;;  %vm2336_vm5 = vweird.f32 %v10505_v4  ;;  %vm10633_vm12 = vmor %vm2305_vm2, %vm2306_vm4 }
 0x213   : > { %v10599_v3 = vadd.f32 1e-08, %v1713_v49  ;;  %vm10609_vm7 = vcmp.eq.f32.partialorder %v2309_v30, 8.507059e+37  ;;  %v2312_v0 = vor.u32 1.1754944e-38, %v2311_v53  ;;  %v2339_v51 = vand.u32 2147483647, %v10452_v16  ;;  %vm10652_vm2 = vmor %vm2335_vm3, %vm2336_vm5 }
 0x214   : > { %v2324_v45 = vand.u32 2147483647, %v10458_v22  ;;  %v10615_v49 = vpop.eup %8311  ;;  %v18214_v42 = vand.u32 2147483647, %v10375_v12  ;;  %v18217_v54 = vand.u32 2147483647, %v10428_v33  ;;  %v2319_v12 = vadd.f32 %v10518_v46, %v2318_v41  ;;  %v1266_v28 = vpop.xlane.xlu0 %1265 }
 0x215   : > { %vm2321_vm13 = vweird.f32 %v10518_v46  ;;  %v731_v2 = vperm.slane %v609_v48, 0  ;;  %v10640_v33 = vadd.f32 %v10065_v59, %v482_v50  ;;  %vm2290_vm14 = vweird.f32 %v10454_v5 }
 0x216   : > { %vm10619_vm8 = vcmp.eq.f32.partialorder %v18214_v42, 8.507059e+37  ;;  %vm10625_vm10 = vcmp.eq.f32.partialorder %v18217_v54, 8.507059e+37  ;;  %v1263_v42 = vpop.xlane.xlu2 %1262  ;;  %vm2291_vm0 = vweird.f32 %v10513_v38  ;;  %v2278_v47 = vsel %vm10605_vm6, %v10484_v18, %v10588_v27 }
 0x217   : > { %v2342_v41 = vor.u32 1.1754944e-38, %v2341_v56  ;;  %v2326_v59 = vand.u32 2147483648, %v10458_v22  ;;  %v10657_v48 = vadd.f32 1e-08, %v1712_v13  ;;  %v2308_v50 = vsel %vm10633_vm12, %v10497_v61, %v2304_v24  ;;  %518 = vst.msk [vmem:[%s9458_s7 + $0x50] sm:$0xff] %vm17704_vm1, %v10640_v33 }
 0x218   : > { %v2338_v18 = vsel %vm10652_vm2, %v10505_v4, %v2334_v9  ;;  %vm2320_vm4 = vweird.f32 %v10458_v22  ;;  %8313 = vrcp.f32 %v10599_v3  ;;  %v2346_v61 = vmul.f32 %v10615_v49, %v10554_v63 }
 0x219   : > { %vm10672_vm3 = vmor %vm2320_vm4, %vm2321_vm13  ;;  %v1588_v27 = vmul.f32 %v9734_v34, %v1263_v42  ;;  %v987_v4 = vsub.f32 %v731_v2, %v10537_v25  ;;  %v733_v22 = vperm.slane %v10640_v33, 0  ;;  %vm2340_vm5 = vcmp.eq.f32.partialorder %v2339_v51, 8.507059e+37 }
 0x21a   : > { %v2323_v56 = vsel %vm10672_vm3, %v10518_v46, %v2319_v12  ;;  %vm2325_vm6 = vcmp.eq.f32.partialorder %v2324_v45, 8.507059e+37  ;;  %v610_v13 = vrot.slane %v10335_v60, 7  ;;  %v2313_v24 = vsel %vm10609_vm7, %v2312_v0, %v2308_v50  ;;  %v10693_v60 = vpop.xlane.xlu1 %1259 }
 0x21b   : > { %v2343_v9 = vsel %vm2340_vm5, %v2342_v41, %v2338_v18  ;;  %v2327_v17 = vor.u32 1.1754944e-38, %v2326_v59  ;;  %8315 = vrcp.f32 %v10657_v48  ;;  %v1586_v53 = vmul.f32 %v9734_v34, %v1257_v6 }
 0x21c   : > { %v1115_v2 = vmul.f32 %v987_v4, %v987_v4  ;;  %v989_v42 = vsub.f32 %v733_v22, %v10537_v25  ;;  %v732_v51 = vperm.slane %v610_v13, 0  ;;  %v4282_v54 = vmul.f32 1.442695, %v10556_v31 }
 0x21d   : > { %v2328_v16 = vsel %vm2325_vm6, %v2327_v17, %v2323_v56  ;;  %v2347_v46 = vsub.f32 1.0, %v2346_v61  ;;  %v1716_v45 = vadd.f32 1.0, %v1588_v27  ;;  %8317 = vlog2.f32 %v2313_v24 }
 0x21e   : > { %v10691_v12 = vpop.eup %8313  ;;  %v1399_v0 = vsel %vm17704_vm1, %v1115_v2, 0.0  ;;  %v1117_v41 = vmul.f32 %v989_v42, %v989_v42  ;;  %v988_v6 = vsub.f32 %v732_v51, %v10537_v25  ;;  %v18226_v59 = vsel %vm10563_vm15, %v10443_v57, %v10548_v37  ;;  %vm10723_vm15 = vmor %vm2290_vm14, %vm2291_vm0  ;;  %v1272_v13 = vpop.xlane.xlu2 %1271 }
 0x21f   : > { %v2268_v31 = vsel %vm10619_vm8, %v10510_v20, %v18226_v59  ;;  %v10707_v50 = vadd.f32 %v10513_v38, %v10582_v15  ;;  %v2283_v18 = vsel %vm10625_vm10, %v10550_v1, %v2278_v47  ;;  %8319 = vlog2.f32 %v2343_v9  ;;  %1400 = vadd.xlane.f32.xlu0 %v1399_v0 }
 0x220   : > { %8321 = vlog2.f32 %v2328_v16  ;;  %v1714_v61 = vadd.f32 1.0, %v1586_v53  ;;  %v1405_v55 = vsel %vm17704_vm1, %v1117_v41, 0.0  ;;  %v1116_v27 = vmul.f32 %v988_v6, %v988_v6 }
 0x221   : > { %18227 = vst [vmem:[#allocation21_spill] sm:$0xff] %v10707_v50  ;;  %v10713_v57 = vpop.eup %8315  ;;  %8323 = vpow2.f32 %v4282_v54  ;;  %v2348_v43 = vmul.f32 %v10615_v49, %v2347_v46  ;;  %v10716_v37 = vadd.f32 1e-08, %v1716_v45  ;;  %v1589_v20 = vmul.f32 %v9734_v34, %v1266_v28  ;;  %1406 = vadd.xlane.f32.xlu2 %v1405_v55 }
 0x222   : > { %8325 = vlog2.f32 %v2268_v31  ;;  %v2354_v15 = vand.u32 2147483647, %v10554_v63  ;;  %v2376_v30 = vmul.f32 %v10691_v12, %v10599_v3  ;;  %v1402_v47 = vsel %vm17704_vm1, %v1116_v27, 0.0 }
 0x223   : > { %v10732_v4 = vmul.f32 1.2, %v10507_v14  ;;  %8327 = vlog2.f32 %v2283_v18  ;;  %v2356_v56 = vand.u32 2147483648, %v10554_v63  ;;  %1403 = vadd.xlane.f32.xlu1 %v1402_v47  ;;  %v8318_v24 = vpop.eup %8317  ;;  %vm2350_vm7 = vweird.f32 %v10554_v63 }
 0x224   : > { %vm2351_vm8 = vweird.f32 %v10615_v49  ;;  %v2361_v9 = vmul.f32 %v10713_v57, %v10657_v48  ;;  %v10743_v14 = vadd.f32 1e-08, %v1714_v61  ;;  %v2349_v53 = vadd.f32 %v10615_v49, %v2348_v43  ;;  %v1269_v43 = vpop.xlane.xlu1 %1268 }
 0x225   : > { %18230 = vst [vmem:[#allocation22_spill] sm:$0xff] %v10732_v4  ;;  %v8320_v17 = vpop.eup %8319  ;;  %8329 = vrcp.f32 %v10716_v37  ;;  %v1717_v2 = vadd.f32 1.0, %v1589_v20  ;;  %v611_v42 = vrot.slane %v10640_v33, 1  ;;  %vm10748_vm10 = vcmp.eq.f32.partialorder %v2354_v15, 8.507059e+37  ;;  %vm10765_vm13 = vmor %vm2350_vm7, %vm2351_vm8 }
 0x226   : > { %v8322_v51 = vpop.eup %8321  ;;  %v2377_v16 = vsub.f32 1.0, %v2376_v30  ;;  %vm2380_vm12 = vweird.f32 %v10599_v3  ;;  %v2384_v46 = vand.u32 2147483647, %v10599_v3  ;;  %v1591_v45 = vmul.f32 %v9734_v34, %v1272_v13 }
 0x227   : > { %v10755_v28 = vpop.eup %8323  ;;  %v2357_v0 = vor.u32 1.1754944e-38, %v2356_v56  ;;  %v2386_v41 = vand.u32 2147483648, %v10599_v3  ;;  %v734_v6 = vperm.slane %v611_v42, 0  ;;  %v613_v59 = vrot.slane %v10640_v33, 3 }
 0x228   : > { %18233 = vst [vmem:[#allocation23_spill] sm:$0xff] %v10755_v28  ;;  %v10759_v31 = vpop.eup %8325  ;;  %v3909_v18 = vmul.f32 0.6931472, %v8318_v24  ;;  %v2362_v55 = vsub.f32 1.0, %v2361_v9  ;;  %v2369_v27 = vand.u32 2147483647, %v10657_v48  ;;  %8331 = vrcp.f32 %v10743_v14 }
 0x229   : > { %18234 = vst [vmem:[#allocation24_spill] sm:$0xff] %v10759_v31  ;;  %v10771_v20 = vpop.eup %8327  ;;  %v3913_v15 = vmul.f32 0.6931472, %v8320_v17  ;;  %v3911_v30 = vmul.f32 0.6931472, %v8322_v51  ;;  %v2353_v47 = vsel %vm10765_vm13, %v10615_v49, %v2349_v53  ;;  %v2378_v63 = vmul.f32 %v10691_v12, %v2377_v16 }
 0x22a   : > { %18237 = vst [vmem:[#allocation25_spill] sm:$0xff] %v10771_v20  ;;  %v10776_v56 = vadd.f32 1e-08, %v1717_v2  ;;  %vm2365_vm14 = vweird.f32 %v10657_v48  ;;  %v2371_v13 = vand.u32 2147483648, %v10657_v48  ;;  %v1719_v24 = vadd.f32 1.0, %v1591_v45 }
 0x22b   : > { %v990_v9 = vsub.f32 %v734_v6, %v10537_v25  ;;  %v10782_v42 = vpop.eup %8329  ;;  %v2387_v22 = vor.u32 1.1754944e-38, %v2386_v41  ;;  %v1590_v17 = vmul.f32 %v9734_v34, %v1269_v43  ;;  %v736_v51 = vperm.slane %v613_v59, 0 }
 0x22c   : > { %v612_v61 = vrot.slane %v10640_v33, 2  ;;  %v4140_v49 = vmul.f32 1.2, %v3909_v18  ;;  %v2358_v53 = vsel %vm10748_vm10, %v2357_v0, %v2353_v47  ;;  %vm10788_vm0 = vcmp.eq.f32.partialorder %v2384_v46, 8.507059e+37 }
 0x22d   : > { %v2363_v16 = vmul.f32 %v10713_v57, %v2362_v55  ;;  %v1118_v45 = vmul.f32 %v990_v9, %v990_v9  ;;  %v4142_v6 = vmul.f32 1.2, %v3913_v15  ;;  %v4141_v28 = vmul.f32 1.2, %v3911_v30 }
 0x22e   : > { %vm2381_vm2 = vweird.f32 %v10691_v12  ;;  %8333 = vrcp.f32 %v10776_v56  ;;  %v10795_v41 = vpop.eup %8331  ;;  %v2379_v59 = vadd.f32 %v10691_v12, %v2378_v63  ;;  %v2421_v54 = vmul.f32 %v10782_v42, %v10716_v37 }
 0x22f   : > { %v10800_v46 = vadd.f32 1e-08, %v1719_v24  ;;  %v1408_v0 = vsel %vm17704_vm1, %v1118_v45, 0.0  ;;  %8335 = vlog2.f32 %v2358_v53  ;;  %v1718_v18 = vadd.f32 1.0, %v1590_v17  ;;  %vm10812_vm3 = vmor %vm2380_vm12, %vm2381_vm2 }
 0x230   : > { %1409 = vadd.xlane.f32.xlu0 %v1408_v0  ;;  %v992_v55 = vsub.f32 %v736_v51, %v10537_v25  ;;  %v735_v43 = vperm.slane %v612_v61, 0  ;;  %v4292_v15 = vmul.f32 1.442695, %v4140_v49  ;;  %v2364_v30 = vadd.f32 %v10713_v57, %v2363_v16 }
 0x231   : > { %vm2366_vm4 = vweird.f32 %v10713_v57  ;;  %v1587_v47 = vmul.f32 %v9734_v34, %v10693_v60  ;;  %v4296_v63 = vmul.f32 1.442695, %v4142_v6  ;;  %v2391_v9 = vmul.f32 %v10795_v41, %v10743_v14 }
 0x232   : > { %v1120_v17 = vmul.f32 %v992_v55, %v992_v55  ;;  %v991_v51 = vsub.f32 %v735_v43, %v10537_v25  ;;  %v4294_v61 = vmul.f32 1.442695, %v4141_v28  ;;  %v2383_v60 = vsel %vm10812_vm3, %v10691_v12, %v2379_v59  ;;  %vm10827_vm5 = vmor %vm2365_vm14, %vm2366_vm4 }
 0x233   : > { %v2422_v49 = vsub.f32 1.0, %v2421_v54  ;;  %8337 = vrcp.f32 %v10800_v46  ;;  %vm10831_vm6 = vcmp.eq.f32.partialorder %v2369_v27, 8.507059e+37  ;;  %v2372_v28 = vor.u32 1.1754944e-38, %v2371_v13 }
 0x234   : > { %v10823_v53 = vpop.eup %8333  ;;  %v10835_v45 = vadd.f32 1e-08, %v1718_v18  ;;  %v1414_v12 = vsel %vm17704_vm1, %v1120_v17, 0.0  ;;  %8339 = vpow2.f32 %v4292_v15  ;;  %v2368_v6 = vsel %vm10827_vm5, %v10713_v57, %v2364_v30 }
 0x235   : > { %v1715_v59 = vadd.f32 1.0, %v1587_v47  ;;  %1415 = vadd.xlane.f32.xlu2 %v1414_v12  ;;  %v1119_v48 = vmul.f32 %v991_v51, %v991_v51  ;;  %v8336_v54 = vpop.eup %8335  ;;  %8341 = vpow2.f32 %v4296_v63  ;;  %v2388_v27 = vsel %vm10788_vm0, %v2387_v22, %v2383_v60  ;;  %v1275_v22 = vpop.xlane.xlu0 %1274 }
 0x236   : > { %v2392_v0 = vsub.f32 1.0, %v2391_v9  ;;  %v614_v13 = vrot.slane %v10640_v33, 4  ;;  %8343 = vpow2.f32 %v4294_v61  ;;  %v2423_v18 = vmul.f32 %v10782_v42, %v2422_v49 }
 0x237   : > { %v2436_v55 = vmul.f32 %v10823_v53, %v10776_v56  ;;  %v1411_v43 = vsel %vm17704_vm1, %v1119_v48, 0.0  ;;  %v2373_v57 = vsel %vm10831_vm6, %v2372_v28, %v2368_v6  ;;  %vm2395_vm7 = vweird.f32 %v10743_v14  ;;  %v1281_v6 = vpop.xlane.xlu2 %1280 }
 0x238   : > { %v2399_v15 = vand.u32 2147483647, %v10743_v14  ;;  %8345 = vrcp.f32 %v10835_v45  ;;  %1412 = vadd.xlane.f32.xlu1 %v1411_v43  ;;  %v3915_v30 = vmul.f32 0.6931472, %v8336_v54  ;;  %vm2425_vm8 = vweird.f32 %v10716_v37 }
 0x239   : > { %v10853_v2 = vpop.eup %8337  ;;  %8347 = vlog2.f32 %v2388_v27  ;;  %v10856_v47 = vadd.f32 1e-08, %v1715_v59  ;;  %v2393_v63 = vmul.f32 %v10795_v41, %v2392_v0  ;;  %v737_v24 = vperm.slane %v614_v13, 0 }
 0x23a   : > { %v616_v9 = vrot.slane %v10640_v33, 6  ;;  %v615_v17 = vrot.slane %v10640_v33, 5  ;;  %v10861_v51 = vpop.eup %8339  ;;  %v2424_v61 = vadd.f32 %v10782_v42, %v2423_v18  ;;  %vm2426_vm10 = vweird.f32 %v10782_v42 }
 0x23b   : > { %18246 = vst [vmem:[#allocation26_spill] sm:$0xff] %v10856_v47  ;;  %v2437_v60 = vsub.f32 1.0, %v2436_v55  ;;  %v1592_v49 = vmul.f32 %v9734_v34, %v1275_v22  ;;  %v10866_v3 = vpop.eup %8341  ;;  %8349 = vlog2.f32 %v2373_v57  ;;  %v2401_v16 = vand.u32 2147483648, %v10743_v14  ;;  %vm10888_vm14 = vmor %vm2425_vm8, %vm2426_vm10 }
 0x23c   : > { %18247 = vst [vmem:[#allocation27_spill] sm:$0xff] %v10861_v51  ;;  %v2429_v28 = vand.u32 2147483647, %v10716_v37  ;;  %v2466_v12 = vmul.f32 %v10853_v2, %v10800_v46  ;;  %v10872_v59 = vpop.eup %8343  ;;  %v4143_v48 = vmul.f32 1.2, %v3915_v30  ;;  %vm2396_vm12 = vweird.f32 %v10795_v41 }
 0x23d   : > { %18248 = vst [vmem:[#allocation28_spill] sm:$0xff] %v10866_v3  ;;  %v2431_v54 = vand.u32 2147483648, %v10716_v37  ;;  %8351 = vrcp.f32 %v10856_v47  ;;  %v2394_v0 = vadd.f32 %v10795_v41, %v2393_v63  ;;  %vm10880_vm13 = vcmp.eq.f32.partialorder %v2399_v15, 8.507059e+37  ;;  %vm10906_vm0 = vmor %vm2395_vm7, %vm2396_vm12 }
 0x23e   : > { %18249 = vst [vmem:[#allocation29_spill] sm:$0xff] %v10872_v59  ;;  %v10877_v27 = vpop.eup %8345  ;;  %v993_v55 = vsub.f32 %v737_v24, %v10537_v25  ;;  %v739_v43 = vperm.slane %v616_v9, 0  ;;  %v738_v57 = vperm.slane %v615_v17, 0  ;;  %v2428_v15 = vsel %vm10888_vm14, %v10782_v42, %v2424_v61 }
 0x23f   : > { %v10893_v22 = vpop.eup %8347  ;;  %v2438_v30 = vmul.f32 %v10823_v53, %v2437_v60  ;;  %v1720_v63 = vadd.f32 1.0, %v1592_v49  ;;  %v1594_v3 = vmul.f32 %v9734_v34, %v1281_v6  ;;  %v2467_v37 = vsub.f32 1.0, %v2466_v12 }
 0x240   : > { %18254 = vst [vmem:[#allocation30_spill] sm:$0xff] %v10893_v22  ;;  %v1121_v51 = vmul.f32 %v993_v55, %v993_v55  ;;  %v995_v59 = vsub.f32 %v739_v43, %v10537_v25  ;;  %v994_v4 = vsub.f32 %v738_v57, %v10537_v25  ;;  %v2402_v42 = vor.u32 1.1754944e-38, %v2401_v16 }
 0x241   : > { %vm2430_vm2 = vcmp.eq.f32.partialorder %v2429_v28, 8.507059e+37  ;;  %v2432_v9 = vor.u32 1.1754944e-38, %v2431_v54  ;;  %v2451_v17 = vmul.f32 %v10877_v27, %v10835_v45  ;;  %v8350_v61 = vpop.eup %8349  ;;  %v4298_v60 = vmul.f32 1.442695, %v4143_v48 }
 0x242   : > { %v2398_v49 = vsel %vm10906_vm0, %v10795_v41, %v2394_v0  ;;  %v2446_v12 = vand.u32 2147483648, %v10776_v56  ;;  %v1417_v14 = vsel %vm17704_vm1, %v1121_v51, 0.0  ;;  %vm2441_vm4 = vweird.f32 %v10823_v53  ;;  %v1278_v0 = vpop.xlane.xlu1 %1277 }
 0x243   : > { %v10917_v6 = vpop.eup %8351  ;;  %v2433_v18 = vsel %vm2430_vm2, %v2432_v9, %v2428_v15  ;;  %1418 = vadd.xlane.f32.xlu0 %v1417_v14  ;;  %v1123_v16 = vmul.f32 %v995_v59, %v995_v59  ;;  %v1122_v28 = vmul.f32 %v994_v4, %v994_v4  ;;  %v2439_v54 = vadd.f32 %v10823_v53, %v2438_v30  ;;  %v10951_v9 = vpop.xlane.xlu0 %1283  ;;  %v483_v14 = vld [vmem:[#allocation2 + $0x58] sm:$0xff] }
 0x244   : > { %18257 = vst [vmem:[#allocation31_spill] sm:$0xff] %v10917_v6  ;;  %v2468_v48 = vmul.f32 %v10853_v2, %v2467_v37  ;;  %v10922_v55 = vadd.f32 1e-08, %v1720_v63  ;;  %v1722_v43 = vadd.f32 1.0, %v1594_v3  ;;  %v2452_v41 = vsub.f32 1.0, %v2451_v17 }
 0x245   : > { %v1423_v57 = vsel %vm17704_vm1, %v1123_v16, 0.0  ;;  %v1420_v51 = vsel %vm17704_vm1, %v1122_v28, 0.0  ;;  %v617_v15 = vrot.slane %v10640_v33, 7  ;;  %8353 = vlog2.f32 %v2433_v18 }
 0x246   : > { %v2406_v59 = vmul.f32 %v10917_v6, %v10856_v47  ;;  %vm2440_vm3 = vweird.f32 %v10776_v56  ;;  %v2444_v4 = vand.u32 2147483647, %v10776_v56  ;;  %1424 = vadd.xlane.f32.xlu2 %v1423_v57  ;;  %1421 = vadd.xlane.f32.xlu1 %v1420_v51  ;;  %v2403_v3 = vsel %vm10880_vm13, %v2402_v42, %v2398_v49  ;;  %v10976_v51 = vld [vmem:[%s17671_s2] ss:$0 sm:$0xff] }
 0x247   : > { %v2416_v63 = vand.u32 2147483648, %v10856_v47  ;;  %vm10937_vm5 = vmor %vm2440_vm3, %vm2441_vm4  ;;  %v2447_v37 = vor.u32 1.1754944e-38, %v2446_v12  ;;  %vm2470_vm6 = vweird.f32 %v10800_v46  ;;  %8355 = vrcp.f32 %v10922_v55  ;;  %v1290_v12 = vpop.xlane.xlu2 %1289 }
 0x248   : > { %v2443_v56 = vsel %vm10937_vm5, %v10823_v53, %v2439_v54  ;;  %v10946_v13 = vadd.f32 1e-08, %v1722_v43  ;;  %v2469_v24 = vadd.f32 %v10853_v2, %v2468_v48  ;;  %vm2471_vm7 = vweird.f32 %v10853_v2 }
 0x249   : > { %v2453_v42 = vmul.f32 %v10877_v27, %v2452_v41  ;;  %v740_v17 = vperm.slane %v617_v15, 0  ;;  %8357 = vpow2.f32 %v4298_v60  ;;  %v2407_v49 = vsub.f32 1.0, %v2406_v59  ;;  %vm10960_vm10 = vmor %vm2470_vm6, %vm2471_vm7 }
 0x24a   : > { %vm2445_vm8 = vcmp.eq.f32.partialorder %v2444_v4, 8.507059e+37  ;;  %v2476_v53 = vand.u32 2147483648, %v10800_v46  ;;  %8359 = vlog2.f32 %v2403_v3  ;;  %v2474_v16 = vand.u32 2147483647, %v10800_v46 }
 0x24b   : > { %v2448_v18 = vsel %vm2445_vm8, %v2447_v37, %v2443_v56  ;;  %v2461_v28 = vand.u32 2147483648, %v10835_v45  ;;  %v8354_v54 = vpop.eup %8353  ;;  %vm2456_vm12 = vweird.f32 %v10877_v27  ;;  %8361 = vrcp.f32 %v10946_v13  ;;  %v1287_v37 = vpop.xlane.xlu1 %1286 }
 0x24c   : > { %v1593_v60 = vmul.f32 %v9734_v34, %v1278_v0  ;;  %v996_v43 = vsub.f32 %v740_v17, %v10537_v25  ;;  %v2473_v41 = vsel %vm10960_vm10, %v10853_v2, %v2469_v24  ;;  %v2454_v57 = vadd.f32 %v10877_v27, %v2453_v42 }
 0x24d   : > { %v1597_v46 = vmul.f32 %v9734_v34, %v1290_v12  ;;  %v10979_v15 = vadd.f32 %v10976_v51, %v483_v14  ;;  %v10981_v0 = vpop.eup %8355  ;;  %v3917_v59 = vmul.f32 0.6931472, %v8350_v61  ;;  %v2408_v4 = vmul.f32 %v10917_v6, %v2407_v49 }
 0x24e   : > { %8363 = vlog2.f32 %v2448_v18  ;;  %v2477_v2 = vor.u32 1.1754944e-38, %v2476_v53  ;;  %v3925_v3 = vmul.f32 0.6931472, %v8354_v54  ;;  %vm2410_vm13 = vweird.f32 %v10856_v47 }
 0x24f   : > { %vm2475_vm14 = vcmp.eq.f32.partialorder %v2474_v16, 8.507059e+37  ;;  %vm2455_vm0 = vweird.f32 %v10835_v45  ;;  %v2459_v33 = vand.u32 2147483647, %v10835_v45  ;;  %519 = vst.msk [vmem:[%s9458_s7 + $0x58] sm:$0xff] %vm17704_vm1, %v10979_v15  ;;  %v10990_v56 = vpop.eup %8357  ;;  %v1721_v42 = vadd.f32 1.0, %v1593_v60 }
 0x250   : > { %18262 = vst [vmem:[#allocation32_spill] sm:$0xff] %v10990_v56  ;;  %v2478_v24 = vsel %vm2475_vm14, %v2477_v2, %v2473_v41  ;;  %vm10994_vm2 = vmor %vm2455_vm0, %vm2456_vm12  ;;  %v1124_v17 = vmul.f32 %v996_v43, %v996_v43  ;;  %v618_v49 = vrot.slane %v10979_v15, 1  ;;  %v10999_v53 = vpop.eup %8359  ;;  %v2462_v12 = vor.u32 1.1754944e-38, %v2461_v28 }
 0x251   : > { %18265 = vst [vmem:[#allocation33_spill] sm:$0xff] %v10999_v53  ;;  %v2458_v45 = vsel %vm10994_vm2, %v10877_v27, %v2454_v57  ;;  %v2481_v14 = vmul.f32 %v10981_v0, %v10922_v55  ;;  %v1725_v18 = vadd.f32 1.0, %v1597_v46  ;;  %v11006_v16 = vpop.eup %8361  ;;  %v1596_v54 = vmul.f32 %v9734_v34, %v1287_v37  ;;  %v1293_v27 = vpop.xlane.xlu0 %1292 }
 0x252   : > { %v1426_v48 = vsel %vm17704_vm1, %v1124_v17, 0.0  ;;  %v742_v60 = vperm.slane %v618_v49, 0  ;;  %v741_v43 = vperm.slane %v10979_v15, 0  ;;  %v4148_v41 = vmul.f32 1.2, %v3925_v3 }
 0x253   : > { %vm2411_vm4 = vweird.f32 %v10917_v6  ;;  %8365 = vlog2.f32 %v2478_v24  ;;  %vm2460_vm3 = vcmp.eq.f32.partialorder %v2459_v33, 8.507059e+37  ;;  %1427 = vadd.xlane.f32.xlu0 %v1426_v48  ;;  %v11012_v2 = vadd.f32 1e-08, %v1721_v42  ;;  %v1296_v22 = vpop.xlane.xlu1 %1295 }
 0x254   : > { %v8364_v28 = vpop.eup %8363  ;;  %v2463_v57 = vsel %vm2460_vm3, %v2462_v12, %v2458_v45  ;;  %v998_v46 = vsub.f32 %v742_v60, %v10537_v25  ;;  %v997_v37 = vsub.f32 %v741_v43, %v10537_v25  ;;  %v11017_v61 = vadd.f32 %v10917_v6, %v2408_v4  ;;  %vm11029_vm5 = vmor %vm2410_vm13, %vm2411_vm4 }
 0x255   : > { %v2482_v17 = vsub.f32 1.0, %v2481_v14  ;;  %v2511_v3 = vmul.f32 %v11006_v16, %v10946_v13  ;;  %v11021_v49 = vadd.f32 1e-08, %v1725_v18  ;;  %v1724_v33 = vadd.f32 1.0, %v1596_v54 }
 0x256   : > { %18266 = vst [vmem:[#allocation34_spill] sm:$0xff] %v11017_v61  ;;  %v1598_v24 = vmul.f32 %v9734_v34, %v1293_v27  ;;  %v1126_v48 = vmul.f32 %v998_v46, %v998_v46  ;;  %v1125_v45 = vmul.f32 %v997_v37, %v997_v37  ;;  %v4308_v42 = vmul.f32 1.442695, %v4148_v41 }
 0x257   : > { %v3927_v12 = vmul.f32 0.6931472, %v8364_v28  ;;  %8367 = vlog2.f32 %v2463_v57  ;;  %v2489_v60 = vand.u32 2147483647, %v10922_v55  ;;  %v18267_v4 = vmov 0  ;;  %v1299_v57 = vpop.xlane.xlu2 %1298 }
 0x258   : > { %v18268_v4 = vsel %vm11029_vm5, 4294967295, %v18267_v4  ;;  %v2491_v14 = vand.u32 2147483648, %v10922_v55  ;;  %8369 = vrcp.f32 %v11012_v2  ;;  %v1432_v18 = vsel %vm17704_vm1, %v1126_v48, 0.0 }
 0x259   : > { %18269 = vst [vmem:[#allocation35_spill] sm:$0xff] %v18268_v4  ;;  %v1429_v54 = vsel %vm17704_vm1, %v1125_v45, 0.0  ;;  %v8366_v43 = vpop.eup %8365  ;;  %v11037_v41 = vmul.f32 1.2, %v3917_v59  ;;  %v11045_v28 = vor.u32 1.1754944e-38, %v2416_v63  ;;  %8371 = vrcp.f32 %v11021_v49  ;;  %1433 = vadd.xlane.f32.xlu2 %v1432_v18 }
 0x25a   : > { %1430 = vadd.xlane.f32.xlu1 %v1429_v54  ;;  %v2483_v46 = vmul.f32 %v10981_v0, %v2482_v17  ;;  %v2512_v37 = vsub.f32 1.0, %v2511_v3  ;;  %v11049_v48 = vadd.f32 1e-08, %v1724_v33  ;;  %v1726_v59 = vadd.f32 1.0, %v1598_v24 }
 0x25b   : > { %18270 = vst [vmem:[#allocation36_spill] sm:$0xff] %v11037_v41  ;;  %8373 = vpow2.f32 %v4308_v42  ;;  %v4149_v45 = vmul.f32 1.2, %v3927_v12  ;;  %vm2485_vm6 = vweird.f32 %v10922_v55  ;;  %v1595_v27 = vmul.f32 %v9734_v34, %v10951_v9  ;;  %v1305_v47 = vpop.xlane.xlu1 %1304 }
 0x25c   : > { %18271 = vst [vmem:[#allocation37_spill] sm:$0xff] %v11045_v28  ;;  %vm11054_vm7 = vcmp.eq.f32.partialorder %v2489_v60, 8.507059e+37  ;;  %v2492_v30 = vor.u32 1.1754944e-38, %v2491_v14  ;;  %v1600_v18 = vmul.f32 %v9734_v34, %v1299_v57  ;;  %v619_v17 = vrot.slane %v10979_v15, 2 }
 0x25d   : > { %v8368_v3 = vpop.eup %8367  ;;  %v3931_v33 = vmul.f32 0.6931472, %v8366_v43  ;;  %vm2486_vm8 = vweird.f32 %v10981_v0  ;;  %vm2515_vm10 = vweird.f32 %v10946_v13  ;;  %v2521_v24 = vand.u32 2147483648, %v10946_v13 }
 0x25e   : > { %v11063_v42 = vpop.eup %8369  ;;  %v2484_v9 = vadd.f32 %v10981_v0, %v2483_v46  ;;  %v2513_v12 = vmul.f32 %v11006_v16, %v2512_v37  ;;  %8375 = vrcp.f32 %v11049_v48  ;;  %v11068_v60 = vadd.f32 1e-08, %v1726_v59  ;;  %vm11081_vm12 = vmor %vm2485_vm6, %vm2486_vm8 }
 0x25f   : > { %v11070_v14 = vpop.eup %8371  ;;  %v4310_v54 = vmul.f32 1.442695, %v4149_v45  ;;  %v2519_v43 = vand.u32 2147483647, %v10946_v13  ;;  %v1723_v57 = vadd.f32 1.0, %v1595_v27  ;;  %v743_v56 = vperm.slane %v619_v17, 0 }
 0x260   : > { %v3929_v41 = vmul.f32 0.6931472, %v8368_v3  ;;  %v1728_v53 = vadd.f32 1.0, %v1600_v18  ;;  %v621_v28 = vrot.slane %v10979_v15, 4  ;;  %v620_v46 = vrot.slane %v10979_v15, 3 }
 0x261   : > { %v11075_v61 = vpop.eup %8373  ;;  %v4151_v37 = vmul.f32 1.2, %v3931_v33  ;;  %vm2516_vm13 = vweird.f32 %v11006_v16  ;;  %v2522_v27 = vor.u32 1.1754944e-38, %v2521_v24  ;;  %v2496_v45 = vmul.f32 %v11063_v42, %v11012_v2 }
 0x262   : > { %18274 = vst [vmem:[#allocation38_spill] sm:$0xff] %v11075_v61  ;;  %v2488_v18 = vsel %vm11081_vm12, %v10981_v0, %v2484_v9  ;;  %v2514_v17 = vadd.f32 %v11006_v16, %v2513_v12  ;;  %v2556_v3 = vmul.f32 %v11070_v14, %v11021_v49  ;;  %8377 = vrcp.f32 %v11068_v60  ;;  %vm11109_vm14 = vmor %vm2515_vm10, %vm2516_vm13 }
 0x263   : > { %8379 = vpow2.f32 %v4310_v54  ;;  %v11095_v55 = vadd.f32 1e-08, %v1723_v57  ;;  %v1599_v33 = vmul.f32 %v9734_v34, %v1296_v22  ;;  %v999_v24 = vsub.f32 %v743_v56, %v10537_v25 }
 0x264   : > { %v11099_v61 = vpop.eup %8375  ;;  %v4150_v6 = vmul.f32 1.2, %v3929_v41  ;;  %v11101_v4 = vadd.f32 1e-08, %v1728_v53  ;;  %v745_v0 = vperm.slane %v621_v28, 0  ;;  %v744_v9 = vperm.slane %v620_v46, 0 }
 0x265   : > { %18277 = vst [vmem:[#allocation39_spill] sm:$0xff] %v11095_v55  ;;  %v4314_v12 = vmul.f32 1.442695, %v4151_v37  ;;  %v2493_v59 = vsel %vm11054_vm7, %v2492_v30, %v2488_v18  ;;  %v2497_v22 = vsub.f32 1.0, %v2496_v45  ;;  %v1127_v56 = vmul.f32 %v999_v24, %v999_v24 }
 0x266   : > { %v2518_v53 = vsel %vm11109_vm14, %v11006_v16, %v2514_v17  ;;  %v2557_v41 = vsub.f32 1.0, %v2556_v3  ;;  %v1001_v28 = vsub.f32 %v745_v0, %v10537_v25  ;;  %v1000_v63 = vsub.f32 %v744_v9, %v10537_v25 }
 0x267   : > { %8381 = vrcp.f32 %v11095_v55  ;;  %v2541_v30 = vmul.f32 %v11099_v61, %v11049_v48  ;;  %v1727_v13 = vadd.f32 1.0, %v1599_v33  ;;  %v1435_v57 = vsel %vm17704_vm1, %v1127_v56, 0.0 }
 0x268   : > { %v11122_v46 = vpop.eup %8377  ;;  %v4312_v37 = vmul.f32 1.442695, %v4150_v6  ;;  %v2506_v45 = vand.u32 2147483648, %v11012_v2  ;;  %8383 = vrcp.f32 %v11101_v4  ;;  %1436 = vadd.xlane.f32.xlu0 %v1435_v57  ;;  %v1129_v16 = vmul.f32 %v1001_v28, %v1001_v28 }
 0x269   : > { %v11126_v18 = vpop.eup %8379  ;;  %8385 = vpow2.f32 %v4314_v12  ;;  %vm2520_vm0 = vcmp.eq.f32.partialorder %v2519_v43, 8.507059e+37  ;;  %v2498_v25 = vmul.f32 %v11063_v42, %v2497_v22  ;;  %v1128_v17 = vmul.f32 %v1000_v63, %v1000_v63 }
 0x26a   : > { %18280 = vst [vmem:[#allocation40_spill] sm:$0xff] %v11126_v18  ;;  %8387 = vlog2.f32 %v2493_v59  ;;  %v2523_v3 = vsel %vm2520_vm0, %v2522_v27, %v2518_v53  ;;  %v2558_v33 = vmul.f32 %v11070_v14, %v2557_v41  ;;  %v1441_v24 = vsel %vm17704_vm1, %v1129_v16, 0.0  ;;  %v1302_v16 = vpop.xlane.xlu0 %1301  ;;  %v1308_v18 = vpop.xlane.xlu2 %1307 }
 0x26b   : > { %v2542_v6 = vsub.f32 1.0, %v2541_v30  ;;  %v2571_v0 = vmul.f32 %v11122_v46, %v11068_v60  ;;  %v11133_v9 = vadd.f32 1e-08, %v1727_v13  ;;  %1442 = vadd.xlane.f32.xlu2 %v1441_v24  ;;  %v1438_v54 = vsel %vm17704_vm1, %v1128_v17, 0.0 }
 0x26c   : > { %8389 = vpow2.f32 %v4312_v37  ;;  %vm2500_vm2 = vweird.f32 %v11012_v2  ;;  %v2504_v43 = vand.u32 2147483647, %v11012_v2  ;;  %v11138_v12 = vor.u32 1.1754944e-38, %v2506_v45  ;;  %1439 = vadd.xlane.f32.xlu1 %v1438_v54 }
 0x26d   : > { %v11140_v27 = vpop.eup %8381  ;;  %8391 = vlog2.f32 %v2523_v3  ;;  %v11143_v59 = vadd.f32 %v11063_v42, %v2498_v25  ;;  %vm2501_vm4 = vweird.f32 %v11063_v42  ;;  %vm2560_vm3 = vweird.f32 %v11021_v49 }
 0x26e   : > { %18281 = vst [vmem:[#allocation41_spill] sm:$0xff] %v11140_v27  ;;  %v11147_v22 = vpop.eup %8383  ;;  %v2559_v56 = vadd.f32 %v11070_v14, %v2558_v33  ;;  %vm2561_vm6 = vweird.f32 %v11070_v14  ;;  %v2564_v53 = vand.u32 2147483647, %v11021_v49  ;;  %v2566_v41 = vand.u32 2147483648, %v11021_v49  ;;  %vm11162_vm7 = vmor %vm2500_vm2, %vm2501_vm4 }
 0x26f   : > { %v11153_v28 = vpop.eup %8385  ;;  %v2543_v63 = vmul.f32 %v11099_v61, %v2542_v6  ;;  %v2572_v30 = vsub.f32 1.0, %v2571_v0  ;;  %8393 = vrcp.f32 %v11133_v9  ;;  %v622_v13 = vrot.slane %v10979_v15, 5  ;;  %vm11186_vm8 = vmor %vm2560_vm3, %vm2561_vm6  ;;  %v11212_v0 = vld [vmem:[%s17672_s3] sm:$0xff] }
 0x270   : > { %18282 = vst [vmem:[#allocation42_spill] sm:$0xff] %v11153_v28  ;;  %v11158_v57 = vpop.eup %8387  ;;  %v2549_v25 = vand.u32 2147483647, %v11049_v48  ;;  %v2551_v17 = vand.u32 2147483648, %v11049_v48  ;;  %v11176_v2 = vmul.f32 %v11140_v27, %v11095_v55  ;;  %v2601_v33 = vmul.f32 %v11147_v22, %v11101_v4 }
 0x271   : > { %v746_v24 = vperm.slane %v622_v13, 0  ;;  %vm11190_vm10 = vcmp.eq.f32.partialorder %v2564_v53, 8.507059e+37  ;;  %v2567_v45 = vor.u32 1.1754944e-38, %v2566_v41  ;;  %v624_v3 = vrot.slane %v10979_v15, 7 }
 0x272   : > { %v11180_v6 = vpop.eup %8389  ;;  %v623_v13 = vrot.slane %v10979_v15, 6  ;;  %v2563_v49 = vsel %vm11186_vm8, %v11070_v14, %v2559_v56  ;;  %vm2546_vm12 = vweird.f32 %v11099_v61  ;;  %v2573_v53 = vmul.f32 %v11122_v46, %v2572_v30  ;;  %v484_v56 = vld [vmem:[#allocation2 + $0x60] sm:$0xff] }
 0x273   : > { %18285 = vst [vmem:[#allocation43_spill] sm:$0xff] %v11180_v6  ;;  %v11196_v28 = vpop.eup %8391  ;;  %v2544_v6 = vadd.f32 %v11099_v61, %v2543_v63  ;;  %vm2545_vm13 = vweird.f32 %v11049_v48  ;;  %vm11205_vm14 = vcmp.eq.f32.partialorder %v2549_v25, 8.507059e+37  ;;  %v2552_v15 = vor.u32 1.1754944e-38, %v2551_v17 }
 0x274   : > { %18290 = vst [vmem:[#allocation44_spill] sm:$0xff] %v11196_v28  ;;  %v1002_v14 = vsub.f32 %v746_v24, %v11212_v0  ;;  %v2527_v30 = vsub.f32 1.0, %v11176_v2  ;;  %v2581_v48 = vand.u32 2147483648, %v11068_v60  ;;  %v2602_v25 = vsub.f32 1.0, %v2601_v33  ;;  %vm11228_vm2 = vmor %vm2545_vm13, %vm2546_vm12 }
 0x275   : > { %v11215_v63 = vpop.eup %8393  ;;  %v1601_v28 = vmul.f32 %v9734_v34, %v1302_v16  ;;  %vm11220_vm0 = vcmp.eq.f32.partialorder %v2504_v43, 8.507059e+37  ;;  %v2568_v20 = vsel %vm11190_vm10, %v2567_v45, %v2563_v49  ;;  %v748_v2 = vperm.slane %v624_v3, 0 }
 0x276   : > { %v1130_v31 = vmul.f32 %v1002_v14, %v1002_v14  ;;  %v747_v50 = vperm.slane %v623_v13, 0  ;;  %v2548_v43 = vsel %vm11228_vm2, %v11099_v61, %v2544_v6  ;;  %v2574_v16 = vadd.f32 %v11122_v46, %v2573_v53 }
 0x277   : > { %vm2576_vm4 = vweird.f32 %v11122_v46  ;;  %v11238_v45 = vadd.f32 %v10976_v51, %v484_v56  ;;  %v2586_v33 = vmul.f32 %v11215_v63, %v11133_v9  ;;  %v1004_v49 = vsub.f32 %v748_v2, %v11212_v0 }
 0x278   : > { %v1444_v54 = vsel %vm17704_vm1, %v1130_v31, 0.0  ;;  %v1003_v3 = vsub.f32 %v747_v50, %v11212_v0  ;;  %vm2575_vm3 = vweird.f32 %v11068_v60  ;;  %v2579_v61 = vand.u32 2147483647, %v11068_v60 }
 0x279   : > { %v2603_v6 = vmul.f32 %v11147_v22, %v2602_v25  ;;  %v1729_v13 = vadd.f32 1.0, %v1601_v28  ;;  %1445 = vadd.xlane.f32.xlu0 %v1444_v54  ;;  %520 = vst.msk [vmem:[%s9458_s7 + $0x60] sm:$0xff] %vm17704_vm1, %v11238_v45  ;;  %8395 = vlog2.f32 %v2568_v20  ;;  %v2553_v53 = vsel %vm11205_vm14, %v2552_v15, %v2548_v43  ;;  %vm11255_vm6 = vmor %vm2575_vm3, %vm2576_vm4  ;;  %v1311_v15 = vpop.xlane.xlu0 %1310  ;;  %v1317_v43 = vpop.xlane.xlu2 %1316 }
 0x27a   : > { %v1132_v31 = vmul.f32 %v1004_v49, %v1004_v49  ;;  %v1131_v14 = vmul.f32 %v1003_v3, %v1003_v3  ;;  %v2582_v60 = vor.u32 1.1754944e-38, %v2581_v48  ;;  %vm2605_vm8 = vweird.f32 %v11101_v4 }
 0x27b   : > { %v2609_v28 = vand.u32 2147483647, %v11101_v4  ;;  %v1603_v56 = vmul.f32 %v9734_v34, %v1308_v18  ;;  %v2578_v20 = vsel %vm11255_vm6, %v11122_v46, %v2574_v16  ;;  %v2587_v41 = vsub.f32 1.0, %v2586_v33  ;;  %v1314_v33 = vpop.xlane.xlu1 %1313 }
 0x27c   : > { %v1450_v25 = vsel %vm17704_vm1, %v1132_v31, 0.0  ;;  %v1447_v24 = vsel %vm17704_vm1, %v1131_v14, 0.0  ;;  %8397 = vlog2.f32 %v2553_v53  ;;  %v2604_v2 = vadd.f32 %v11147_v22, %v2603_v6 }
 0x27d   : > { %vm2606_vm10 = vweird.f32 %v11147_v22  ;;  %v11269_v48 = vadd.f32 1e-08, %v1729_v13  ;;  %1451 = vadd.xlane.f32.xlu2 %v1450_v25  ;;  %1448 = vadd.xlane.f32.xlu1 %v1447_v24  ;;  %v11272_v18 = vmul.f32 0.6931472, %v11158_v57  ;;  %vm2580_vm12 = vcmp.eq.f32.partialorder %v2579_v61, 8.507059e+37 }
 0x27e   : > { %v2611_v46 = vand.u32 2147483648, %v11101_v4  ;;  %v1602_v16 = vmul.f32 %v9734_v34, %v1305_v47  ;;  %v18299_v54 = vsel %vm11162_vm7, %v11063_v42, %v11143_v59  ;;  %v2528_v3 = vmul.f32 %v11140_v27, %v2527_v30  ;;  %vm11292_vm13 = vmor %vm2605_vm8, %vm2606_vm10 }
 0x27f   : > { %v11284_v49 = vsel %vm11220_vm0, %v11138_v12, %v18299_v54  ;;  %v2583_v57 = vsel %vm2580_vm12, %v2582_v60, %v2578_v20  ;;  %v1604_v61 = vmul.f32 %v9734_v34, %v1311_v15  ;;  %v8396_v6 = vpop.eup %8395  ;;  %vm11296_vm7 = vcmp.eq.f32.partialorder %v2609_v28, 8.507059e+37 }
 0x280   : > { %v2588_v12 = vmul.f32 %v11215_v63, %v2587_v41  ;;  %v1731_v59 = vadd.f32 1.0, %v1603_v56  ;;  %v1606_v37 = vmul.f32 %v9734_v34, %v1317_v43  ;;  %v2608_v30 = vsel %vm11292_vm13, %v11147_v22, %v2604_v2 }
 0x281   : > { %8399 = vrcp.f32 %v11269_v48  ;;  %v1605_v4 = vmul.f32 %v9734_v34, %v1314_v33  ;;  %v749_v17 = vperm.slane %v11238_v45, 0  ;;  %v2612_v13 = vor.u32 1.1754944e-38, %v2611_v46 }
 0x282   : > { %8401 = vlog2.f32 %v2583_v57  ;;  %v2596_v53 = vand.u32 2147483648, %v11133_v9  ;;  %v1730_v31 = vadd.f32 1.0, %v1602_v16  ;;  %v8398_v14 = vpop.eup %8397  ;;  %v3943_v50 = vmul.f32 0.6931472, %v8396_v6 }
 0x283   : > { %vm2590_vm14 = vweird.f32 %v11133_v9  ;;  %vm2591_vm0 = vweird.f32 %v11215_v63  ;;  %v1732_v60 = vadd.f32 1.0, %v1604_v61  ;;  %v2613_v22 = vsel %vm11296_vm7, %v2612_v13, %v2608_v30 }
 0x284   : > { %v2589_v28 = vadd.f32 %v11215_v63, %v2588_v12  ;;  %v11314_v56 = vadd.f32 1e-08, %v1731_v59  ;;  %v1734_v20 = vadd.f32 1.0, %v1606_v37  ;;  %v2594_v41 = vand.u32 2147483647, %v11133_v9  ;;  %vm11328_vm2 = vmor %vm2590_vm14, %vm2591_vm0 }
 0x285   : > { %v1733_v15 = vadd.f32 1.0, %v1605_v4  ;;  %v1005_v25 = vsub.f32 %v749_v17, %v11212_v0  ;;  %v626_v24 = vrot.slane %v11238_v45, 2  ;;  %v3941_v2 = vmul.f32 0.6931472, %v8398_v14 }
 0x286   : > { %v2597_v43 = vor.u32 1.1754944e-38, %v2596_v53  ;;  %v11319_v46 = vadd.f32 1e-08, %v1730_v31  ;;  %v625_v16 = vrot.slane %v11238_v45, 1  ;;  %8403 = vlog2.f32 %v2613_v22  ;;  %v1320_v53 = vpop.xlane.xlu0 %1319 }
 0x287   : > { %v11322_v33 = vpop.eup %8399  ;;  %v11332_v57 = vadd.f32 1e-08, %v1732_v60  ;;  %v1133_v61 = vmul.f32 %v1005_v25, %v1005_v25  ;;  %v751_v6 = vperm.slane %v626_v24, 0  ;;  %v4157_v42 = vmul.f32 1.2, %v3943_v50 }
 0x288   : > { %v8402_v47 = vpop.eup %8401  ;;  %v2593_v12 = vsel %vm11328_vm2, %v11215_v63, %v2589_v28  ;;  %8405 = vrcp.f32 %v11314_v56  ;;  %v11338_v59 = vadd.f32 1e-08, %v1734_v20  ;;  %v11340_v37 = vadd.f32 1e-08, %v1733_v15 }
 0x289   : > { %v1453_v9 = vsel %vm17704_vm1, %v1133_v61, 0.0  ;;  %v1007_v30 = vsub.f32 %v751_v6, %v11212_v0  ;;  %v750_v4 = vperm.slane %v625_v16, 0  ;;  %v4156_v17 = vmul.f32 1.2, %v3941_v2 }
 0x28a   : > { %vm2595_vm4 = vcmp.eq.f32.partialorder %v2594_v41, 8.507059e+37  ;;  %v2616_v13 = vmul.f32 %v11322_v33, %v11269_v48  ;;  %8407 = vrcp.f32 %v11319_v46  ;;  %1454 = vadd.xlane.f32.xlu0 %v1453_v9  ;;  %v3945_v63 = vmul.f32 0.6931472, %v8402_v47 }
 0x28b   : > { %v2598_v31 = vsel %vm2595_vm4, %v2597_v43, %v2593_v12  ;;  %8409 = vrcp.f32 %v11332_v57  ;;  %v1135_v14 = vmul.f32 %v1007_v30, %v1007_v30  ;;  %v11349_v50 = vadd.f32 %v11140_v27, %v2528_v3 }
 0x28c   : > { %vm2531_vm3 = vweird.f32 %v11140_v27  ;;  %8411 = vrcp.f32 %v11338_v59  ;;  %v1006_v60 = vsub.f32 %v750_v4, %v11212_v0  ;;  %v8404_v22 = vpop.eup %8403  ;;  %v4326_v28 = vmul.f32 1.442695, %v4157_v42 }
 0x28d   : > { %18306 = vst [vmem:[#allocation45_spill] sm:$0xff] %v11349_v50  ;;  %8413 = vrcp.f32 %v11340_v37  ;;  %v1607_v20 = vmul.f32 %v9734_v34, %v1320_v53  ;;  %v1459_v41 = vsel %vm17704_vm1, %v1135_v14, 0.0  ;;  %v2617_v25 = vsub.f32 1.0, %v2616_v13 }
 0x28e   : > { %v11357_v15 = vpop.eup %8405  ;;  %8415 = vlog2.f32 %v2598_v31  ;;  %v2626_v3 = vand.u32 2147483648, %v11269_v48  ;;  %1460 = vadd.xlane.f32.xlu2 %v1459_v41  ;;  %v1134_v24 = vmul.f32 %v1006_v60, %v1006_v60  ;;  %vm2530_vm6 = vweird.f32 %v11095_v55 }
 0x28f   : > { %18307 = vst [vmem:[#allocation46_spill] sm:$0xff] %v11357_v15  ;;  %v18308_v2 = vand.u32 2147483648, %v11095_v55  ;;  %v4324_v16 = vmul.f32 1.442695, %v4156_v17  ;;  %v4158_v54 = vmul.f32 1.2, %v3945_v63  ;;  %8417 = vlog2.f32 %v11284_v49  ;;  %vm11370_vm8 = vmor %vm2530_vm6, %vm2531_vm3 }
 0x290   : > { %v11365_v61 = vpop.eup %8407  ;;  %v18310_v6 = vmov 0  ;;  %v2624_v47 = vand.u32 2147483647, %v11269_v48  ;;  %v2656_v42 = vand.u32 2147483648, %v11314_v56  ;;  %v1456_v12 = vsel %vm17704_vm1, %v1134_v24, 0.0 }
 0x291   : > { %v11363_v43 = vor.u32 1.1754944e-38, %v18308_v2  ;;  %v18311_v6 = vsel %vm11370_vm8, 4294967295, %v18310_v6  ;;  %v11377_v9 = vpop.eup %8409  ;;  %v11380_v30 = vmul.f32 1.2, %v11272_v18  ;;  %8419 = vpow2.f32 %v4326_v28  ;;  %1457 = vadd.xlane.f32.xlu1 %v1456_v12  ;;  %v1326_v2 = vpop.xlane.xlu2 %1325 }
 0x292   : > { %18312 = vst [vmem:[#allocation48_spill] sm:$0xff] %v18311_v6  ;;  %v1735_v4 = vadd.f32 1.0, %v1607_v20  ;;  %v11386_v17 = vpop.eup %8411  ;;  %v2618_v13 = vmul.f32 %v11322_v33, %v2617_v25  ;;  %vm2620_vm10 = vweird.f32 %v11269_v48  ;;  %v2627_v53 = vor.u32 1.1754944e-38, %v2626_v3 }
 0x293   : > { %18309 = vst [vmem:[#allocation47_spill] sm:$0xff] %v11363_v43  ;;  %v627_v63 = vrot.slane %v11238_v45, 3  ;;  %v11391_v31 = vpop.eup %8413  ;;  %8421 = vpow2.f32 %v4324_v16  ;;  %v4328_v18 = vmul.f32 1.442695, %v4158_v54  ;;  %v3949_v14 = vmul.f32 0.6931472, %v8404_v22  ;;  %v1323_v16 = vpop.xlane.xlu1 %1322 }
 0x294   : > { %18313 = vst [vmem:[#allocation49_spill] sm:$0xff] %v11380_v30  ;;  %v8416_v41 = vpop.eup %8415  ;;  %vm2621_vm12 = vweird.f32 %v11322_v33  ;;  %vm11395_vm13 = vcmp.eq.f32.partialorder %v2624_v47, 8.507059e+37  ;;  %v11399_v20 = vor.u32 1.1754944e-38, %v2656_v42  ;;  %v2661_v3 = vmul.f32 %v11377_v9, %v11332_v57 }
 0x295   : > { %v2691_v24 = vmul.f32 %v11386_v17, %v11338_v59  ;;  %v11406_v22 = vadd.f32 1e-08, %v1735_v4  ;;  %v752_v54 = vperm.slane %v627_v63, 0  ;;  %v629_v47 = vrot.slane %v11238_v45, 5  ;;  %v11409_v12 = vpop.eup %8417  ;;  %vm11434_vm7 = vmor %vm2620_vm10, %vm2621_vm12 }
 0x296   : > { %18316 = vst [vmem:[#allocation50_spill] sm:$0xff] %v11399_v20  ;;  %v2619_v42 = vadd.f32 %v11322_v33, %v2618_v13  ;;  %v2631_v60 = vmul.f32 %v11365_v61, %v11319_v46  ;;  %v2641_v49 = vand.u32 2147483648, %v11319_v46  ;;  %v2676_v25 = vmul.f32 %v11391_v31, %v11340_v37 }
 0x297   : > { %18317 = vst [vmem:[#allocation51_spill] sm:$0xff] %v11409_v12  ;;  %v11417_v20 = vpop.eup %8419  ;;  %8423 = vpow2.f32 %v4328_v18  ;;  %v11419_v4 = vmul.f32 1.2, %v3949_v14  ;;  %v3947_v63 = vmul.f32 0.6931472, %v8416_v41  ;;  %v11423_v30 = vmul.f32 %v11357_v15, %v11314_v56 }
 0x298   : > { %18318 = vst [vmem:[#allocation52_spill] sm:$0xff] %v11417_v20  ;;  %v2662_v12 = vsub.f32 1.0, %v2661_v3  ;;  %v1609_v13 = vmul.f32 %v9734_v34, %v1326_v2  ;;  %v1608_v43 = vmul.f32 %v9734_v34, %v1323_v16  ;;  %v1008_v50 = vsub.f32 %v752_v54, %v11212_v0 }
 0x299   : > { %18319 = vst [vmem:[#allocation53_spill] sm:$0xff] %v11419_v4  ;;  %v11428_v27 = vpop.eup %8421  ;;  %v2692_v14 = vsub.f32 1.0, %v2691_v24  ;;  %8425 = vrcp.f32 %v11406_v22  ;;  %v754_v41 = vperm.slane %v629_v47, 0  ;;  %v628_v3 = vrot.slane %v11238_v45, 4 }
 0x29a   : > { %18320 = vst [vmem:[#allocation54_spill] sm:$0xff] %v11428_v27  ;;  %v2623_v2 = vsel %vm11434_vm7, %v11322_v33, %v2619_v42  ;;  %v2632_v16 = vsub.f32 1.0, %v2631_v60  ;;  %v2677_v54 = vsub.f32 1.0, %v2676_v25  ;;  %v1136_v20 = vmul.f32 %v1008_v50, %v1008_v50 }
 0x29b   : > { %v2647_v27 = vsub.f32 1.0, %v11423_v30  ;;  %v11444_v48 = vor.u32 1.1754944e-38, %v2641_v49  ;;  %v1010_v4 = vsub.f32 %v754_v41, %v11212_v0  ;;  %v753_v6 = vperm.slane %v628_v3, 0 }
 0x29c   : > { %v11447_v24 = vmul.f32 1.2, %v3947_v63  ;;  %vm2636_vm14 = vweird.f32 %v11365_v61  ;;  %v2663_v47 = vmul.f32 %v11377_v9, %v2662_v12  ;;  %v1737_v55 = vadd.f32 1.0, %v1609_v13 }
 0x29d   : > { %v1462_v18 = vsel %vm17704_vm1, %v1136_v20, 0.0  ;;  %v11452_v33 = vpop.eup %8423  ;;  %v2628_v50 = vsel %vm11395_vm13, %v2627_v53, %v2623_v2  ;;  %v2693_v49 = vmul.f32 %v11386_v17, %v2692_v14  ;;  %v1736_v60 = vadd.f32 1.0, %v1608_v43  ;;  %v1329_v2 = vpop.xlane.xlu0 %1328 }
 0x29e   : > { %18323 = vst [vmem:[#allocation55_spill] sm:$0xff] %v11452_v33  ;;  %1463 = vadd.xlane.f32.xlu0 %v1462_v18  ;;  %v1138_v25 = vmul.f32 %v1010_v4, %v1010_v4  ;;  %v2633_v42 = vmul.f32 %v11365_v61, %v2632_v16  ;;  %vm2635_vm0 = vweird.f32 %v11319_v46  ;;  %vm2665_vm2 = vweird.f32 %v11332_v57  ;;  %v1335_v18 = vpop.xlane.xlu2 %1334 }
 0x29f   : > { %v2678_v12 = vmul.f32 %v11391_v31, %v2677_v54  ;;  %v1009_v20 = vsub.f32 %v753_v6, %v11212_v0  ;;  %v11462_v63 = vpop.eup %8425  ;;  %v2669_v28 = vand.u32 2147483647, %v11332_v57  ;;  %v2671_v53 = vand.u32 2147483648, %v11332_v57  ;;  %v11536_v57 = vpop.xlane.xlu1 %1331 }
 0x2a0   : > { %vm2695_vm4 = vweird.f32 %v11338_v59  ;;  %v1468_v43 = vsel %vm17704_vm1, %v1138_v25, 0.0  ;;  %v2664_v4 = vadd.f32 %v11377_v9, %v2663_v47  ;;  %vm2666_vm3 = vweird.f32 %v11377_v9 }
 0x2a1   : > { %v11470_v13 = vadd.f32 1e-08, %v1737_v55  ;;  %1469 = vadd.xlane.f32.xlu2 %v1468_v43  ;;  %v1137_v14 = vmul.f32 %v1009_v20, %v1009_v20  ;;  %v2694_v6 = vadd.f32 %v11386_v17, %v2693_v49  ;;  %vm2696_vm6 = vweird.f32 %v11386_v17  ;;  %vm11493_vm13 = vmor %vm2665_vm2, %vm2666_vm3 }
 0x2a2   : > { %v2701_v41 = vand.u32 2147483648, %v11338_v59  ;;  %v11475_v3 = vadd.f32 1e-08, %v1736_v60  ;;  %v18324_v16 = vand.u32 2147483647, %v11319_v46  ;;  %v2679_v55 = vadd.f32 %v11391_v31, %v2678_v12 }
 0x2a3   : > { %vm2681_vm12 = vweird.f32 %v11391_v31  ;;  %v2706_v47 = vmul.f32 %v11462_v63, %v11406_v22  ;;  %v1465_v49 = vsel %vm17704_vm1, %v1137_v14, 0.0  ;;  %v2634_v60 = vadd.f32 %v11365_v61, %v2633_v42  ;;  %vm11507_vm1 = vmor %vm2695_vm4, %vm2696_vm6 }
 0x2a4   : > { %vm11479_vm10 = vcmp.eq.f32.partialorder %v18324_v16, 8.507059e+37  ;;  %v2699_v12 = vand.u32 2147483647, %v11338_v59  ;;  %vm2680_vm7 = vweird.f32 %v11340_v37  ;;  %v2686_v20 = vand.u32 2147483648, %v11340_v37  ;;  %1466 = vadd.xlane.f32.xlu1 %v1465_v49 }
 0x2a5   : > { %v2668_v43 = vsel %vm11493_vm13, %v11377_v9, %v2664_v4  ;;  %v2684_v42 = vand.u32 2147483647, %v11340_v37  ;;  %8427 = vrcp.f32 %v11470_v13  ;;  %v630_v14 = vrot.slane %v11238_v45, 6  ;;  %vm11519_vm2 = vmor %vm2680_vm7, %vm2681_vm12  ;;  %v485_v37 = vld [vmem:[#allocation2 + $0x68] sm:$0xff] }
 0x2a6   : > { %v2672_v16 = vor.u32 1.1754944e-38, %v2671_v53  ;;  %v2698_v49 = vsel %vm11507_vm1, %v11386_v17, %v2694_v6  ;;  %8429 = vrcp.f32 %v11475_v3  ;;  %v1612_v59 = vmul.f32 %v9734_v34, %v1335_v18  ;;  %vm11532_vm1 = vmor %vm2635_vm0, %vm2636_vm14 }
 0x2a7   : > { %vm2670_vm4 = vcmp.eq.f32.partialorder %v2669_v28, 8.507059e+37  ;;  %v2702_v4 = vor.u32 1.1754944e-38, %v2701_v41  ;;  %v2683_v53 = vsel %vm11519_vm2, %v11391_v31, %v2679_v55  ;;  %v2707_v25 = vsub.f32 1.0, %v2706_v47 }
 0x2a8   : > { %v2673_v6 = vsel %vm2670_vm4, %v2672_v16, %v2668_v43  ;;  %vm2700_vm3 = vcmp.eq.f32.partialorder %v2699_v12, 8.507059e+37  ;;  %v2687_v18 = vor.u32 1.1754944e-38, %v2686_v20  ;;  %v755_v28 = vperm.slane %v630_v14, 0 }
 0x2a9   : > { %v2638_v31 = vsel %vm11532_vm1, %v11365_v61, %v2634_v60  ;;  %v2703_v41 = vsel %vm2700_vm3, %v2702_v4, %v2698_v49  ;;  %vm2685_vm6 = vcmp.eq.f32.partialorder %v2684_v42, 8.507059e+37  ;;  %v11542_v55 = vadd.f32 %v10976_v51, %v485_v37  ;;  %v1344_v49 = vpop.xlane.xlu2 %1343 }
 0x2aa   : > { %8431 = vlog2.f32 %v2628_v50  ;;  %v2648_v46 = vmul.f32 %v11357_v15, %v2647_v27  ;;  %v2688_v47 = vsel %vm2685_vm6, %v2687_v18, %v2683_v53  ;;  %v1740_v12 = vadd.f32 1.0, %v1612_v59  ;;  %v1338_v50 = vpop.xlane.xlu0 %1337 }
 0x2ab   : > { %v11547_v20 = vpop.eup %8427  ;;  %8433 = vlog2.f32 %v2673_v6  ;;  %v2708_v43 = vmul.f32 %v11462_v63, %v2707_v25  ;;  %v1011_v14 = vsub.f32 %v755_v28, %v11212_v0  ;;  %vm18335_vm14 = vcmask 261120  }
 0x2ac   : > { %521 = vst.msk [vmem:[%s9458_s7 + $0x68] sm:$0xff] %vm18335_vm14, %v11542_v55  ;;  %v757_v51 = vperm.slane %v11542_v55, 0  ;;  %v11555_v61 = vpop.eup %8429  ;;  %v4330_v30 = vmul.f32 1.442695, %v11447_v24  ;;  %v2643_v27 = vsel %vm11479_vm10, %v11444_v48, %v2638_v31  ;;  %8435 = vlog2.f32 %v2703_v41  ;;  %vm18337_vm10 = vmmov %vm18335_vm14 }
 0x2ad   : > { %v631_v60 = vrot.slane %v11238_v45, 7  ;;  %8437 = vlog2.f32 %v2688_v47  ;;  %vm2711_vm0 = vweird.f32 %v11462_v63  ;;  %v2716_v42 = vand.u32 2147483648, %v11406_v22  ;;  %vm18341_vm7 = vmmov %vm18337_vm10 }
 0x2ae   : > { %v1610_v16 = vmul.f32 %v9734_v34, %v1329_v2  ;;  %v11565_v9 = vadd.f32 1e-08, %v1740_v12  ;;  %v1139_v59 = vmul.f32 %v1011_v14, %v1011_v14  ;;  %v1013_v24 = vsub.f32 %v757_v51, %v11212_v0  ;;  %vm18342_vm2 = vmmov %vm18341_vm7 }
 0x2af   : > { %v756_v37 = vperm.slane %v631_v60, 0  ;;  %v2709_v48 = vadd.f32 %v11462_v63, %v2708_v43  ;;  %v2736_v54 = vmul.f32 %v11547_v20, %v11470_v13  ;;  %v2721_v45 = vmul.f32 %v11555_v61, %v11475_v3  ;;  %v1341_v43 = vpop.xlane.xlu1 %1340 }
 0x2b0   : > { %v1613_v4 = vmul.f32 %v9734_v34, %v1338_v50  ;;  %v11574_v53 = vpop.eup %8431  ;;  %v1615_v2 = vmul.f32 %v9734_v34, %v1344_v49  ;;  %v1471_v25 = vsel %vm18337_vm10, %v1139_v59, 0.0  ;;  %v1141_v17 = vmul.f32 %v1013_v24, %v1013_v24 }
 0x2b1   : > { %18336 = vst [vmem:[#allocation56_spill] sm:$0xff] %v11574_v53  ;;  %v1012_v6 = vsub.f32 %v756_v37, %v11212_v0  ;;  %v8434_v18 = vpop.eup %8433  ;;  %8439 = vpow2.f32 %v4330_v30  ;;  %v11580_v28 = vadd.f32 %v11357_v15, %v2648_v46  ;;  %vm2710_vm12 = vweird.f32 %v11406_v22  ;;  %1472 = vadd.xlane.f32.xlu0 %v1471_v25 }
 0x2b2   : > { %v2714_v31 = vand.u32 2147483647, %v11406_v22  ;;  %v8436_v41 = vpop.eup %8435  ;;  %vm11586_vm13 = vmor %vm2710_vm12, %vm2711_vm0  ;;  %v1738_v12 = vadd.f32 1.0, %v1610_v16  ;;  %8441 = vrcp.f32 %v11565_v9  ;;  %v1477_v14 = vsel %vm18341_vm7, %v1141_v17, 0.0 }
 0x2b3   : > { %18338 = vst [vmem:[#allocation57_spill] sm:$0xff] %v11580_v28  ;;  %v1140_v46 = vmul.f32 %v1012_v6, %v1012_v6  ;;  %v8438_v51 = vpop.eup %8437  ;;  %8443 = vlog2.f32 %v2643_v27  ;;  %v2713_v22 = vsel %vm11586_vm13, %v11462_v63, %v2709_v48  ;;  %v2737_v30 = vsub.f32 1.0, %v2736_v54  ;;  %1478 = vadd.xlane.f32.xlu2 %v1477_v14 }
 0x2b4   : > { %v1741_v50 = vadd.f32 1.0, %v1613_v4  ;;  %v2717_v60 = vor.u32 1.1754944e-38, %v2716_v42  ;;  %v2722_v49 = vsub.f32 1.0, %v2721_v45  ;;  %v1743_v59 = vadd.f32 1.0, %v1615_v2 }
 0x2b5   : > { %v1474_v16 = vsel %vm18342_vm2, %v1140_v46, 0.0  ;;  %vm2715_vm4 = vcmp.eq.f32.partialorder %v2714_v31, 8.507059e+37  ;;  %vm2740_vm1 = vweird.f32 %v11470_v13  ;;  %v2744_v24 = vand.u32 2147483647, %v11470_v13 }
 0x2b6   : > { %v1614_v37 = vmul.f32 %v9734_v34, %v1341_v43  ;;  %1475 = vadd.xlane.f32.xlu1 %v1474_v16  ;;  %v3957_v27 = vmul.f32 0.6931472, %v8434_v18  ;;  %v2718_v25 = vsel %vm2715_vm4, %v2717_v60, %v2713_v22  ;;  %v2746_v63 = vand.u32 2147483648, %v11470_v13 }
 0x2b7   : > { %v11600_v48 = vadd.f32 1e-08, %v1738_v12  ;;  %v11602_v54 = vpop.eup %8439  ;;  %v3961_v42 = vmul.f32 0.6931472, %v8436_v41  ;;  %v2738_v45 = vmul.f32 %v11547_v20, %v2737_v30  ;;  %vm2725_vm3 = vweird.f32 %v11475_v3  ;;  %v1350_v33 = vpop.xlane.xlu1 %1349 }
 0x2b8   : > { %18343 = vst [vmem:[#allocation58_spill] sm:$0xff] %v11602_v54  ;;  %v11606_v4 = vadd.f32 1e-08, %v1741_v50  ;;  %v632_v2 = vrot.slane %v11542_v55, 1  ;;  %v11609_v17 = vpop.eup %8441  ;;  %vm2650_vm6 = vweird.f32 %v11314_v56  ;;  %vm2651_vm14 = vweird.f32 %v11357_v15 }
 0x2b9   : > { %v3959_v6 = vmul.f32 0.6931472, %v8438_v51  ;;  %v2723_v18 = vmul.f32 %v11555_v61, %v2722_v49  ;;  %v2729_v31 = vand.u32 2147483647, %v11475_v3  ;;  %v11615_v41 = vadd.f32 1e-08, %v1743_v59  ;;  %v11617_v47 = vpop.eup %8443 }
 0x2ba   : > { %18344 = vst [vmem:[#allocation59_spill] sm:$0xff] %v11617_v47  ;;  %8445 = vlog2.f32 %v2718_v25  ;;  %v1742_v12 = vadd.f32 1.0, %v1614_v37  ;;  %v758_v43 = vperm.slane %v632_v2, 0  ;;  %v634_v14 = vrot.slane %v11542_v55, 3 }
 0x2bb   : > { %v4164_v46 = vmul.f32 1.2, %v3957_v27  ;;  %vm2741_vm0 = vweird.f32 %v11547_v20  ;;  %v2731_v22 = vand.u32 2147483648, %v11475_v3  ;;  %8447 = vrcp.f32 %v11600_v48 }
 0x2bc   : > { %v4166_v51 = vmul.f32 1.2, %v3961_v42  ;;  %v2739_v30 = vadd.f32 %v11547_v20, %v2738_v45  ;;  %v2781_v50 = vmul.f32 %v11609_v17, %v11565_v9  ;;  %8449 = vrcp.f32 %v11606_v4  ;;  %vm11638_vm12 = vmor %vm2740_vm1, %vm2741_vm0 }
 0x2bd   : > { %v4165_v60 = vmul.f32 1.2, %v3959_v6  ;;  %vm2726_vm10 = vweird.f32 %v11555_v61  ;;  %8451 = vrcp.f32 %v11615_v41  ;;  %v1014_v49 = vsub.f32 %v758_v43, %v11212_v0  ;;  %vm11681_vm1 = vmor %vm2650_vm6, %vm2651_vm14 }
 0x2be   : > { %v2724_v59 = vadd.f32 %v11555_v61, %v2723_v18  ;;  %v11631_v16 = vadd.f32 1e-08, %v1742_v12  ;;  %v760_v37 = vperm.slane %v634_v14, 0  ;;  %v633_v27 = vrot.slane %v11542_v55, 2  ;;  %vm11657_vm7 = vmor %vm2725_vm3, %vm2726_vm10 }
 0x2bf   : > { %v4340_v25 = vmul.f32 1.442695, %v4164_v46  ;;  %vm11642_vm13 = vcmp.eq.f32.partialorder %v2744_v24, 8.507059e+37  ;;  %v1611_v2 = vmul.f32 %v9734_v34, %v11536_v57  ;;  %v1142_v6 = vmul.f32 %v1014_v49, %v1014_v49 }
 0x2c0   : > { %v8446_v18 = vpop.eup %8445  ;;  %v4344_v12 = vmul.f32 1.442695, %v4166_v51  ;;  %v2743_v43 = vsel %vm11638_vm12, %v11547_v20, %v2739_v30  ;;  %v2747_v14 = vor.u32 1.1754944e-38, %v2746_v63  ;;  %v2782_v13 = vsub.f32 1.0, %v2781_v50 }
 0x2c1   : > { %v11651_v46 = vpop.eup %8447  ;;  %v4342_v54 = vmul.f32 1.442695, %v4165_v60  ;;  %vm11661_vm2 = vcmp.eq.f32.partialorder %v2729_v31, 8.507059e+37  ;;  %v2732_v51 = vor.u32 1.1754944e-38, %v2731_v22  ;;  %vm18353_vm4 = vcmask 261120  }
 0x2c2   : > { %v1480_v20 = vsel %vm18353_vm4, %v1142_v6, 0.0  ;;  %v11666_v63 = vpop.eup %8449  ;;  %v2728_v30 = vsel %vm11657_vm7, %v11555_v61, %v2724_v59  ;;  %8453 = vrcp.f32 %v11631_v16  ;;  %v1016_v3 = vsub.f32 %v760_v37, %v11212_v0  ;;  %vm18357_vm3 = vmmov %vm18353_vm4 }
 0x2c3   : > { %1481 = vadd.xlane.f32.xlu0 %v1480_v20  ;;  %v759_v50 = vperm.slane %v633_v27, 0  ;;  %v11673_v60 = vpop.eup %8451  ;;  %8455 = vpow2.f32 %v4340_v25  ;;  %v3963_v31 = vmul.f32 0.6931472, %v8446_v18  ;;  %v2748_v22 = vsel %vm11642_vm13, %v2747_v14, %v2743_v43  ;;  %v1347_v18 = vpop.xlane.xlu0 %1346  ;;  %vm18360_vm0 = vmmov %vm18357_vm3 }
 0x2c4   : > { %v1739_v49 = vadd.f32 1.0, %v1611_v2  ;;  %v18354_v61 = vmov 0  ;;  %8457 = vpow2.f32 %v4344_v12  ;;  %v2783_v59 = vmul.f32 %v11609_v17, %v2782_v13 }
 0x2c5   : > { %v18355_v61 = vsel %vm11681_vm1, 4294967295, %v18354_v61  ;;  %v1144_v37 = vmul.f32 %v1016_v3, %v1016_v3  ;;  %v1015_v27 = vsub.f32 %v759_v50, %v11212_v0  ;;  %8459 = vpow2.f32 %v4342_v54 }
 0x2c6   : > { %18356 = vst [vmem:[#allocation60_spill] sm:$0xff] %v18355_v61  ;;  %v2733_v42 = vsel %vm11661_vm2, %v2732_v51, %v2728_v30  ;;  %v2796_v45 = vmul.f32 %v11666_v63, %v11606_v4  ;;  %8461 = vlog2.f32 %v2748_v22  ;;  %v2751_v2 = vmul.f32 %v11651_v46, %v11600_v48 }
 0x2c7   : > { %v2826_v6 = vmul.f32 %v11673_v60, %v11615_v41  ;;  %v1486_v12 = vsel %vm18357_vm3, %v1144_v37, 0.0  ;;  %v4167_v43 = vmul.f32 1.2, %v3963_v31  ;;  %v2761_v14 = vand.u32 2147483648, %v11600_v48 }
 0x2c8   : > { %v11701_v54 = vadd.f32 1e-08, %v1739_v49  ;;  %1487 = vadd.xlane.f32.xlu2 %v1486_v12  ;;  %v1143_v13 = vmul.f32 %v1015_v27, %v1015_v27  ;;  %v11703_v24 = vpop.eup %8453  ;;  %v2784_v57 = vadd.f32 %v11609_v17, %v2783_v59  ;;  %vm2785_vm6 = vweird.f32 %v11565_v9 }
 0x2c9   : > { %vm2786_vm14 = vweird.f32 %v11609_v17  ;;  %v635_v51 = vrot.slane %v11542_v55, 4  ;;  %v11709_v20 = vpop.eup %8455  ;;  %v2791_v30 = vand.u32 2147483648, %v11565_v9  ;;  %v2797_v3 = vsub.f32 1.0, %v2796_v45 }
 0x2ca   : > { %18358 = vst [vmem:[#allocation61_spill] sm:$0xff] %v11701_v54  ;;  %v1616_v50 = vmul.f32 %v9734_v34, %v1347_v18  ;;  %v1483_v31 = vsel %vm18360_vm0, %v1143_v13, 0.0  ;;  %v11714_v22 = vpop.eup %8457  ;;  %8463 = vlog2.f32 %v2733_v42  ;;  %v2752_v49 = vsub.f32 1.0, %v2751_v2  ;;  %vm11726_vm10 = vmor %vm2785_vm6, %vm2786_vm14 }
 0x2cb   : > { %18359 = vst [vmem:[#allocation62_spill] sm:$0xff] %v11709_v20  ;;  %v2789_v59 = vand.u32 2147483647, %v11565_v9  ;;  %v2827_v37 = vsub.f32 1.0, %v2826_v6  ;;  %1484 = vadd.xlane.f32.xlu1 %v1483_v31  ;;  %v11717_v27 = vpop.eup %8459  ;;  %v11720_v25 = vor.u32 1.1754944e-38, %v2761_v14  ;;  %8465 = vrcp.f32 %v11701_v54  ;;  %vm18369_vm14 = vmmov %vm18360_vm0 }
 0x2cc   : > { %18361 = vst [vmem:[#allocation63_spill] sm:$0xff] %v11714_v22  ;;  %v2811_v42 = vmul.f32 %v11703_v24, %v11631_v16  ;;  %v11733_v2 = vpop.eup %8461  ;;  %v2788_v6 = vsel %vm11726_vm10, %v11609_v17, %v2784_v57  ;;  %v761_v18 = vperm.slane %v635_v51, 0  ;;  %v637_v14 = vrot.slane %v11542_v55, 6  ;;  %v1353_v17 = vpop.xlane.xlu2 %1352 }
 0x2cd   : > { %18362 = vst [vmem:[#allocation64_spill] sm:$0xff] %v11717_v27  ;;  %v636_v9 = vrot.slane %v11542_v55, 5  ;;  %v11740_v13 = vmul.f32 1.442695, %v4167_v43  ;;  %v2792_v31 = vor.u32 1.1754944e-38, %v2791_v30  ;;  %v2798_v12 = vmul.f32 %v11666_v63, %v2797_v3 }
 0x2ce   : > { %18365 = vst [vmem:[#allocation65_spill] sm:$0xff] %v11733_v2  ;;  %v1744_v22 = vadd.f32 1.0, %v1616_v50  ;;  %v11744_v20 = vmul.f32 %v11651_v46, %v2752_v49  ;;  %vm2790_vm12 = vcmp.eq.f32.partialorder %v2789_v59, 8.507059e+37  ;;  %v2828_v45 = vmul.f32 %v11673_v60, %v2827_v37 }
 0x2cf   : > { %v2793_v57 = vsel %vm2790_vm12, %v2792_v31, %v2788_v6  ;;  %v2806_v51 = vand.u32 2147483648, %v11606_v4  ;;  %vm2830_vm13 = vweird.f32 %v11615_v41  ;;  %v2812_v43 = vsub.f32 1.0, %v2811_v42  ;;  %vm18372_vm12 = vmmov %vm18369_vm14 }
 0x2d0   : > { %v8464_v30 = vpop.eup %8463  ;;  %vm2801_vm7 = vweird.f32 %v11666_v63  ;;  %v1017_v3 = vsub.f32 %v761_v18, %v11212_v0  ;;  %v763_v50 = vperm.slane %v637_v14, 0  ;;  %v762_v49 = vperm.slane %v636_v9, 0 }
 0x2d1   : > { %v11752_v59 = vpop.eup %8465  ;;  %v2799_v27 = vadd.f32 %v11666_v63, %v2798_v12  ;;  %vm2831_vm2 = vweird.f32 %v11673_v60  ;;  %v11756_v37 = vadd.f32 1e-08, %v1744_v22  ;;  %v1618_v6 = vmul.f32 %v9734_v34, %v1353_v17 }
 0x2d2   : > { %18366 = vst [vmem:[#allocation66_spill] sm:$0xff] %v11752_v59  ;;  %v2829_v42 = vadd.f32 %v11673_v60, %v2828_v45  ;;  %v1145_v31 = vmul.f32 %v1017_v3, %v1017_v3  ;;  %v1019_v2 = vsub.f32 %v763_v50, %v11212_v0  ;;  %v1018_v47 = vsub.f32 %v762_v49, %v11212_v0  ;;  %vm11782_vm0 = vmor %vm2830_vm13, %vm2831_vm2 }
 0x2d3   : > { %vm2800_vm4 = vweird.f32 %v11606_v4  ;;  %v2804_v18 = vand.u32 2147483647, %v11606_v4  ;;  %v2807_v14 = vor.u32 1.1754944e-38, %v2806_v51  ;;  %v2813_v12 = vmul.f32 %v11703_v24, %v2812_v43  ;;  %vm18373_vm13 = vmmov %vm18372_vm12 }
 0x2d4   : > { %vm2755_vm3 = vweird.f32 %v11600_v48  ;;  %8467 = vlog2.f32 %v2793_v57  ;;  %vm11768_vm6 = vmor %vm2800_vm4, %vm2801_vm7  ;;  %v2834_v9 = vand.u32 2147483647, %v11615_v41  ;;  %v2836_v0 = vand.u32 2147483648, %v11615_v41 }
 0x2d5   : > { %v1489_v45 = vsel %vm18369_vm14, %v1145_v31, 0.0  ;;  %v2803_v4 = vsel %vm11768_vm6, %v11666_v63, %v2799_v27  ;;  %v1746_v57 = vadd.f32 1.0, %v1618_v6  ;;  %v1147_v51 = vmul.f32 %v1019_v2, %v1019_v2  ;;  %v11799_v6 = vpop.xlane.xlu0 %1355 }
 0x2d6   : > { %1490 = vadd.xlane.f32.xlu0 %v1489_v45  ;;  %v1146_v43 = vmul.f32 %v1018_v47, %v1018_v47  ;;  %v2833_v3 = vsel %vm11782_vm0, %v11673_v60, %v2829_v42  ;;  %vm2816_vm10 = vweird.f32 %v11703_v24  ;;  %8469 = vrcp.f32 %v11756_v37  ;;  %v1362_v42 = vpop.xlane.xlu2 %1361 }
 0x2d7   : > { %v1617_v63 = vmul.f32 %v9734_v34, %v1350_v33  ;;  %v2814_v41 = vadd.f32 %v11703_v24, %v2813_v12  ;;  %v1495_v27 = vsel %vm18372_vm12, %v1147_v51, 0.0  ;;  %v638_v49 = vrot.slane %v11542_v55, 7 }
 0x2d8   : > { %v1492_v50 = vsel %vm18373_vm13, %v1146_v43, 0.0  ;;  %v2766_v47 = vmul.f32 %v11752_v59, %v11701_v54  ;;  %vm2805_vm7 = vcmp.eq.f32.partialorder %v2804_v18, 8.507059e+37  ;;  %v2837_v2 = vor.u32 1.1754944e-38, %v2836_v0  ;;  %1496 = vadd.xlane.f32.xlu2 %v1495_v27  ;;  %v1359_v18 = vpop.xlane.xlu1 %1358 }
 0x2d9   : > { %v2821_v60 = vand.u32 2147483648, %v11631_v16  ;;  %1493 = vadd.xlane.f32.xlu1 %v1492_v50  ;;  %v18374_v33 = vand.u32 2147483647, %v11600_v48  ;;  %v2808_v12 = vsel %vm2805_vm7, %v2807_v14, %v2803_v4  ;;  %vm2835_vm4 = vcmp.eq.f32.partialorder %v2834_v9, 8.507059e+37  ;;  %v486_v50 = vld [vmem:[#allocation2 + $0x70] sm:$0xff]  ;;  %v11840_v48 = vld [vmem:[%s17672_s3] sm:$0xff] }
 0x2da   : > { %vm2815_vm6 = vweird.f32 %v11631_v16  ;;  %v2819_v55 = vand.u32 2147483647, %v11631_v16  ;;  %v8468_v22 = vpop.eup %8467  ;;  %v2754_v0 = vadd.f32 %v11651_v46, %v11744_v20  ;;  %vm2756_vm14 = vweird.f32 %v11651_v46 }
 0x2db   : > { %vm11803_vm2 = vcmp.eq.f32.partialorder %v18374_v33, 8.507059e+37  ;;  %v2838_v45 = vsel %vm2835_vm4, %v2837_v2, %v2833_v3  ;;  %vm11814_vm0 = vmor %vm2815_vm6, %vm2816_vm10  ;;  %v11818_v14 = vadd.f32 1e-08, %v1746_v57  ;;  %v1745_v9 = vadd.f32 1.0, %v1617_v63 }
 0x2dc   : > { %v2818_v16 = vsel %vm11814_vm0, %v11703_v24, %v2814_v41  ;;  %v1621_v4 = vmul.f32 %v9734_v34, %v1362_v42  ;;  %v764_v51 = vperm.slane %v638_v49, 0  ;;  %v11824_v20 = vpop.eup %8469  ;;  %v3965_v43 = vmul.f32 0.6931472, %v8464_v30  ;;  %vm11829_vm10 = vmor %vm2755_vm3, %vm2756_vm14 }
 0x2dd   : > { %8471 = vlog2.f32 %v2808_v12  ;;  %v2822_v3 = vor.u32 1.1754944e-38, %v2821_v60  ;;  %v1620_v27 = vmul.f32 %v9734_v34, %v1359_v18  ;;  %v3973_v2 = vmul.f32 0.6931472, %v8468_v22  ;;  %vm18384_vm4 = vmmov %vm18373_vm13 }
 0x2de   : > { %v2767_v24 = vsub.f32 1.0, %v2766_v47  ;;  %8473 = vlog2.f32 %v2838_v45  ;;  %vm2820_vm12 = vcmp.eq.f32.partialorder %v2819_v55, 8.507059e+37  ;;  %v2758_v63 = vsel %vm11829_vm10, %v11651_v46, %v2754_v0  ;;  %v11850_v46 = vld [vmem:[%s17671_s2] ss:$0 sm:$0xff]  ;;  %vm18392_vm0 = vmmov %vm18384_vm4 }
 0x2df   : > { %v2823_v30 = vsel %vm2820_vm12, %v2822_v3, %v2818_v16  ;;  %8475 = vrcp.f32 %v11818_v14  ;;  %v1020_v41 = vsub.f32 %v764_v51, %v11840_v48  ;;  %v2841_v49 = vmul.f32 %v11824_v20, %v11756_v37  ;;  %v1365_v16 = vpop.xlane.xlu0 %1364  ;;  %vm18393_vm10 = vmmov %vm18392_vm0 }
 0x2e0   : > { %v11845_v47 = vadd.f32 1e-08, %v1745_v9  ;;  %v1749_v60 = vadd.f32 1.0, %v1621_v4  ;;  %v11853_v42 = vadd.f32 %v11850_v46, %v486_v50  ;;  %8477 = vpow2.f32 %v11740_v13 }
 0x2e1   : > { %vm2770_vm3 = vweird.f32 %v11701_v54  ;;  %v1748_v12 = vadd.f32 1.0, %v1620_v27  ;;  %v11858_v55 = vmul.f32 1.2, %v3965_v43  ;;  %v4172_v18 = vmul.f32 1.2, %v3973_v2 }
 0x2e2   : > { %v2768_v22 = vmul.f32 %v11752_v59, %v2767_v24  ;;  %v18382_v0 = vand.u32 2147483648, %v11701_v54  ;;  %522 = vst.msk [vmem:[%s9458_s7 + $0x70] sm:$0xff] %vm18373_vm13, %v11853_v42  ;;  %v2763_v13 = vsel %vm11803_vm2, %v11720_v25, %v2758_v63  ;;  %8479 = vlog2.f32 %v2823_v30 }
 0x2e3   : > { %18381 = vst [vmem:[#allocation67_spill] sm:$0xff] %v11858_v55  ;;  %v8472_v17 = vpop.eup %8471  ;;  %v1148_v9 = vmul.f32 %v1020_v41, %v1020_v41  ;;  %v639_v4 = vrot.slane %v11853_v42, 1  ;;  %vm2771_vm7 = vweird.f32 %v11752_v59  ;;  %v2842_v43 = vsub.f32 1.0, %v2841_v49 }
 0x2e4   : > { %v11863_v45 = vor.u32 1.1754944e-38, %v18382_v0  ;;  %v8474_v51 = vpop.eup %8473  ;;  %8481 = vrcp.f32 %v11845_v47  ;;  %v11874_v3 = vadd.f32 1e-08, %v1749_v60  ;;  %v11878_v50 = vadd.f32 1e-08, %v1748_v12  ;;  %vm11899_vm2 = vmor %vm2770_vm3, %vm2771_vm7 }
 0x2e5   : > { %v11876_v27 = vpop.eup %8475  ;;  %v1498_v31 = vsel %vm18384_vm4, %v1148_v9, 0.0  ;;  %v766_v25 = vperm.slane %v639_v4, 0  ;;  %v765_v57 = vperm.slane %v11853_v42, 0  ;;  %8483 = vlog2.f32 %v2763_v13 }
 0x2e6   : > { %18383 = vst [vmem:[#allocation68_spill] sm:$0xff] %v11863_v45  ;;  %v4356_v2 = vmul.f32 1.442695, %v4172_v18  ;;  %v11883_v24 = vadd.f32 %v11752_v59, %v2768_v22  ;;  %v1622_v63 = vmul.f32 %v9734_v34, %v1365_v16  ;;  %1499 = vadd.xlane.f32.xlu0 %v1498_v31  ;;  %v11886_v30 = vpop.eup %8477  ;;  %v2849_v41 = vand.u32 2147483647, %v11756_v37  ;;  %v1368_v59 = vpop.xlane.xlu1 %1367 }
 0x2e7   : > { %18386 = vst [vmem:[#allocation70_spill] sm:$0xff] %v11886_v30  ;;  %v2851_v49 = vand.u32 2147483648, %v11756_v37  ;;  %v1022_v60 = vsub.f32 %v766_v25, %v11840_v48  ;;  %v1021_v12 = vsub.f32 %v765_v57, %v11840_v48  ;;  %v3975_v0 = vmul.f32 0.6931472, %v8472_v17  ;;  %v1371_v57 = vpop.xlane.xlu2 %1370 }
 0x2e8   : > { %18385 = vst [vmem:[#allocation69_spill] sm:$0xff] %v11883_v24  ;;  %v3979_v9 = vmul.f32 0.6931472, %v8474_v51  ;;  %v2871_v18 = vmul.f32 %v11876_v27, %v11818_v14  ;;  %8485 = vrcp.f32 %v11874_v3  ;;  %v8480_v22 = vpop.eup %8479  ;;  %v18387_v13 = vmov 0 }
 0x2e9   : > { %v18388_v13 = vsel %vm11899_vm2, 4294967295, %v18387_v13  ;;  %v2843_v16 = vmul.f32 %v11824_v20, %v2842_v43  ;;  %8487 = vrcp.f32 %v11878_v50  ;;  %v1150_v17 = vmul.f32 %v1022_v60, %v1022_v60 }
 0x2ea   : > { %18389 = vst [vmem:[#allocation71_spill] sm:$0xff] %v18388_v13  ;;  %v1149_v4 = vmul.f32 %v1021_v12, %v1021_v12  ;;  %v11905_v51 = vpop.eup %8481  ;;  %8489 = vpow2.f32 %v4356_v2  ;;  %vm2845_vm6 = vweird.f32 %v11756_v37  ;;  %v1750_v25 = vadd.f32 1.0, %v1622_v63 }
 0x2eb   : > { %vm11912_vm14 = vcmp.eq.f32.partialorder %v2849_v41, 8.507059e+37  ;;  %v2881_v43 = vand.u32 2147483648, %v11818_v14  ;;  %v1504_v60 = vsel %vm18392_vm0, %v1150_v17, 0.0  ;;  %v11919_v2 = vpop.eup %8483  ;;  %v4173_v30 = vmul.f32 1.2, %v3975_v0 }
 0x2ec   : > { %v1501_v12 = vsel %vm18393_vm10, %v1149_v4, 0.0  ;;  %18394 = vst [vmem:[#allocation72_spill] sm:$0xff] %v11919_v2  ;;  %v4175_v55 = vmul.f32 1.2, %v3979_v9  ;;  %v2852_v45 = vor.u32 1.1754944e-38, %v2851_v49  ;;  %v2872_v31 = vsub.f32 1.0, %v2871_v18  ;;  %1505 = vadd.xlane.f32.xlu2 %v1504_v60 }
 0x2ed   : > { %1502 = vadd.xlane.f32.xlu1 %v1501_v12  ;;  %v3977_v63 = vmul.f32 0.6931472, %v8480_v22  ;;  %v2844_v41 = vadd.f32 %v11824_v20, %v2843_v16  ;;  %vm2846_vm12 = vweird.f32 %v11824_v20  ;;  %v1624_v24 = vmul.f32 %v9734_v34, %v1371_v57 }
 0x2ee   : > { %v11924_v13 = vpop.eup %8485  ;;  %vm2875_vm3 = vweird.f32 %v11818_v14  ;;  %v2879_v17 = vand.u32 2147483647, %v11818_v14  ;;  %v2856_v49 = vmul.f32 %v11905_v51, %v11845_v47  ;;  %v11930_v0 = vadd.f32 1e-08, %v1750_v25  ;;  %vm11946_vm13 = vmor %vm2845_vm6, %vm2846_vm12 }
 0x2ef   : > { %v11932_v9 = vpop.eup %8487  ;;  %v11934_v18 = vor.u32 1.1754944e-38, %v2881_v43  ;;  %v2864_v22 = vand.u32 2147483647, %v11845_v47  ;;  %v1619_v16 = vmul.f32 %v9734_v34, %v11799_v6  ;;  %v640_v4 = vrot.slane %v11853_v42, 2 }
 0x2f0   : > { %v11940_v57 = vpop.eup %8489  ;;  %v4358_v60 = vmul.f32 1.442695, %v4173_v30  ;;  %v4362_v12 = vmul.f32 1.442695, %v4175_v55  ;;  %v2873_v43 = vmul.f32 %v11876_v27, %v2872_v31  ;;  %v1623_v2 = vmul.f32 %v9734_v34, %v1368_v59 }
 0x2f1   : > { %18395 = vst [vmem:[#allocation73_spill] sm:$0xff] %v11940_v57  ;;  %v4174_v28 = vmul.f32 1.2, %v3977_v63  ;;  %v2848_v6 = vsel %vm11946_vm13, %v11824_v20, %v2844_v41  ;;  %v2916_v55 = vmul.f32 %v11924_v13, %v11874_v3  ;;  %v1752_v30 = vadd.f32 1.0, %v1624_v24 }
 0x2f2   : > { %v2857_v57 = vsub.f32 1.0, %v2856_v49  ;;  %v2901_v37 = vmul.f32 %v11932_v9, %v11878_v50  ;;  %8491 = vrcp.f32 %v11930_v0  ;;  %v767_v15 = vperm.slane %v640_v4, 0 }
 0x2f3   : > { %vm2876_vm7 = vweird.f32 %v11876_v27  ;;  %vm11961_vm4 = vcmp.eq.f32.partialorder %v2879_v17, 8.507059e+37  ;;  %v1747_v31 = vadd.f32 1.0, %v1619_v16  ;;  %v642_v20 = vrot.slane %v11853_v42, 4 }
 0x2f4   : > { %v641_v63 = vrot.slane %v11853_v42, 3  ;;  %8493 = vpow2.f32 %v4358_v60  ;;  %v2853_v24 = vsel %vm11912_vm14, %v2852_v45, %v2848_v6  ;;  %v2874_v41 = vadd.f32 %v11876_v27, %v2873_v43  ;;  %vm11980_vm14 = vmor %vm2875_vm3, %vm2876_vm7 }
 0x2f5   : > { %vm2860_vm6 = vweird.f32 %v11845_v47  ;;  %v1751_v49 = vadd.f32 1.0, %v1623_v2  ;;  %8495 = vpow2.f32 %v4362_v12  ;;  %v2866_v17 = vand.u32 2147483648, %v11845_v47 }
 0x2f6   : > { %v2917_v4 = vsub.f32 1.0, %v2916_v55  ;;  %v11972_v25 = vadd.f32 1e-08, %v1752_v30  ;;  %v4360_v16 = vmul.f32 1.442695, %v4174_v28  ;;  %v2858_v61 = vmul.f32 %v11905_v51, %v2857_v57 }
 0x2f7   : > { %v2902_v53 = vsub.f32 1.0, %v2901_v37  ;;  %v1023_v60 = vsub.f32 %v767_v15, %v11840_v48  ;;  %8497 = vlog2.f32 %v2853_v24  ;;  %v11984_v45 = vadd.f32 1e-08, %v1747_v31 }
 0x2f8   : > { %v769_v2 = vperm.slane %v642_v20, 0  ;;  %v768_v12 = vperm.slane %v641_v63, 0  ;;  %v11986_v43 = vpop.eup %8491  ;;  %v2878_v28 = vsel %vm11980_vm14, %v11876_v27, %v2874_v41  ;;  %vm2861_vm0 = vweird.f32 %v11905_v51  ;;  %v1374_v41 = vpop.xlane.xlu0 %1373 }
 0x2f9   : > { %18402 = vst [vmem:[#allocation74_spill] sm:$0xff] %v11984_v45  ;;  %vm11992_vm10 = vcmp.eq.f32.partialorder %v2864_v22, 8.507059e+37  ;;  %v11996_v14 = vadd.f32 1e-08, %v1751_v49  ;;  %v1151_v57 = vmul.f32 %v1023_v60, %v1023_v60  ;;  %v2918_v6 = vmul.f32 %v11924_v13, %v2917_v4  ;;  %vm12021_vm13 = vmor %vm2860_vm6, %vm2861_vm0 }
 0x2fa   : > { %8499 = vrcp.f32 %v11972_v25  ;;  %v1025_v55 = vsub.f32 %v769_v2, %v11840_v48  ;;  %v1024_v30 = vsub.f32 %v768_v12, %v11840_v48  ;;  %v12002_v37 = vpop.eup %8493  ;;  %v2859_v27 = vadd.f32 %v11905_v51, %v2858_v61 }
 0x2fb   : > { %18405 = vst [vmem:[#allocation75_spill] sm:$0xff] %v12002_v37  ;;  %8501 = vpow2.f32 %v4360_v16  ;;  %v2903_v22 = vmul.f32 %v11932_v9, %v2902_v53  ;;  %vm18406_vm12 = vcmask 261120   ;;  %v12007_v20 = vpop.eup %8495  ;;  %v2867_v63 = vor.u32 1.1754944e-38, %v2866_v17 }
 0x2fc   : > { %v1507_v31 = vsel %vm18406_vm12, %v1151_v57, 0.0  ;;  %18407 = vst [vmem:[#allocation76_spill] sm:$0xff] %v12007_v20  ;;  %8503 = vrcp.f32 %v11984_v45  ;;  %v2931_v24 = vmul.f32 %v11986_v43, %v11930_v0  ;;  %v1153_v49 = vmul.f32 %v1025_v55, %v1025_v55 }
 0x2fd   : > { %1508 = vadd.xlane.f32.xlu0 %v1507_v31  ;;  %v2883_v4 = vsel %vm11961_vm4, %v11934_v18, %v2878_v28  ;;  %vm2920_vm3 = vweird.f32 %v11874_v3  ;;  %8505 = vrcp.f32 %v11996_v14  ;;  %v1152_v53 = vmul.f32 %v1024_v30, %v1024_v30  ;;  %v8498_v61 = vpop.eup %8497  ;;  %vm18410_vm4 = vmmov %vm18406_vm12 }
 0x2fe   : > { %v2919_v16 = vadd.f32 %v11924_v13, %v2918_v6  ;;  %vm2921_vm7 = vweird.f32 %v11924_v13  ;;  %v2926_v18 = vand.u32 2147483648, %v11874_v3  ;;  %v1513_v59 = vsel %vm18410_vm4, %v1153_v49, 0.0  ;;  %vm18411_vm6 = vmmov %vm18410_vm4 }
 0x2ff   : > { %v2863_v60 = vsel %vm12021_vm13, %v11905_v51, %v2859_v27  ;;  %v2904_v33 = vadd.f32 %v11932_v9, %v2903_v22  ;;  %vm2906_vm14 = vweird.f32 %v11932_v9  ;;  %1514 = vadd.xlane.f32.xlu2 %v1513_v59  ;;  %v1510_v47 = vsel %vm18411_vm6, %v1152_v53, 0.0  ;;  %vm12046_vm0 = vmor %vm2920_vm3, %vm2921_vm7 }
 0x300   : > { %v12035_v2 = vpop.eup %8499  ;;  %v2896_v12 = vand.u32 2147483648, %v11984_v45  ;;  %v2924_v28 = vand.u32 2147483647, %v11874_v3  ;;  %v2911_v57 = vand.u32 2147483648, %v11878_v50  ;;  %v2932_v6 = vsub.f32 1.0, %v2931_v24  ;;  %1511 = vadd.xlane.f32.xlu1 %v1510_v47  ;;  %v1377_v47 = vpop.xlane.xlu1 %1376 }
 0x301   : > { %v12040_v55 = vpop.eup %8501  ;;  %v3981_v51 = vmul.f32 0.6931472, %v8498_v61  ;;  %8507 = vlog2.f32 %v2883_v4  ;;  %vm2905_vm12 = vweird.f32 %v11878_v50  ;;  %v2909_v27 = vand.u32 2147483647, %v11878_v50 }
 0x302   : > { %18412 = vst [vmem:[#allocation77_spill] sm:$0xff] %v12040_v55  ;;  %v12052_v22 = vpop.eup %8503  ;;  %v12056_v31 = vsel %vm11992_vm10, %v2867_v63, %v2863_v60  ;;  %v2923_v3 = vsel %vm12046_vm0, %v11924_v13, %v2919_v16  ;;  %v2927_v49 = vor.u32 1.1754944e-38, %v2926_v18  ;;  %vm12064_vm3 = vmor %vm2905_vm12, %vm2906_vm14  ;;  %v2961_v63 = vmul.f32 %v12035_v2, %v11972_v25  ;;  %v1380_v18 = vpop.xlane.xlu2 %1379 }
 0x303   : > { %18415 = vst [vmem:[#allocation78_spill] sm:$0xff] %v12052_v22  ;;  %v12068_v50 = vpop.eup %8505  ;;  %v2908_v15 = vsel %vm12064_vm3, %v11932_v9, %v2904_v33  ;;  %v1625_v53 = vmul.f32 %v9734_v34, %v1374_v41  ;;  %v643_v13 = vrot.slane %v11853_v42, 5  ;;  %v12077_v61 = vor.u32 1.1754944e-38, %v2896_v12  ;;  %v1383_v41 = vpop.xlane.xlu0 %1382  ;;  %vm18423_vm12 = vmmov %vm18411_vm6 }
 0x304   : > { %vm2925_vm10 = vcmp.eq.f32.partialorder %v2924_v28, 8.507059e+37  ;;  %v2912_v17 = vor.u32 1.1754944e-38, %v2911_v57  ;;  %v2933_v16 = vmul.f32 %v11986_v43, %v2932_v6  ;;  %v12080_v59 = vmul.f32 1.2, %v3981_v51 }
 0x305   : > { %18418 = vst [vmem:[#allocation79_spill] sm:$0xff] %v12077_v61  ;;  %v2928_v60 = vsel %vm2925_vm10, %v2927_v49, %v2923_v3  ;;  %vm2910_vm13 = vcmp.eq.f32.partialorder %v2909_v27, 8.507059e+37  ;;  %v770_v9 = vperm.slane %v643_v13, 0  ;;  %v2946_v30 = vmul.f32 %v12068_v50, %v11996_v14  ;;  %v487_v49 = vld [vmem:[#allocation2 + $0x78] sm:$0xff] }
 0x306   : > { %18419 = vst [vmem:[#allocation80_spill] sm:$0xff] %v12080_v59  ;;  %v2913_v33 = vsel %vm2910_vm13, %v2912_v17, %v2908_v15  ;;  %v645_v4 = vrot.slane %v11853_v42, 7  ;;  %v644_v12 = vrot.slane %v11853_v42, 6  ;;  %v12090_v57 = vmul.f32 %v12052_v22, %v11984_v45  ;;  %vm18424_vm13 = vmmov %vm18411_vm6 }
 0x307   : > { %v12086_v28 = vpop.eup %8507  ;;  %vm2935_vm7 = vweird.f32 %v11930_v0  ;;  %v2962_v6 = vsub.f32 1.0, %v2961_v63  ;;  %v1753_v51 = vadd.f32 1.0, %v1625_v53  ;;  %8509 = vlog2.f32 %v2928_v60 }
 0x308   : > { %18420 = vst [vmem:[#allocation81_spill] sm:$0xff] %v12086_v28  ;;  %v2934_v27 = vadd.f32 %v11986_v43, %v2933_v16  ;;  %vm2936_vm4 = vweird.f32 %v11986_v43  ;;  %v1026_v3 = vsub.f32 %v770_v9, %v11840_v48  ;;  %8511 = vlog2.f32 %v2913_v33 }
 0x309   : > { %v2939_v42 = vand.u32 2147483647, %v11930_v0  ;;  %v2941_v15 = vand.u32 2147483648, %v11930_v0  ;;  %v1628_v13 = vmul.f32 %v9734_v34, %v1383_v41  ;;  %v2947_v17 = vsub.f32 1.0, %v2946_v30  ;;  %vm12101_vm14 = vmor %vm2935_vm7, %vm2936_vm4 }
 0x30a   : > { %v1154_v24 = vmul.f32 %v1026_v3, %v1026_v3  ;;  %v772_v20 = vperm.slane %v645_v4, 0  ;;  %v771_v63 = vperm.slane %v644_v12, 0  ;;  %v2963_v16 = vmul.f32 %v12035_v2, %v2962_v6  ;;  %vm18425_vm7 = vmmov %vm18411_vm6 }
 0x30b   : > { %v12106_v60 = vadd.f32 1e-08, %v1753_v51  ;;  %v1626_v9 = vmul.f32 %v9734_v34, %v1377_v47  ;;  %v12110_v33 = vadd.f32 %v11850_v46, %v487_v49  ;;  %v2938_v30 = vsel %vm12101_vm14, %v11986_v43, %v2934_v27  ;;  %v1389_v47 = vpop.xlane.xlu2 %1388  ;;  %v1386_v49 = vpop.xlane.xlu1 %1385 }
 0x30c   : > { %v1516_v41 = vsel %vm18411_vm6, %v1154_v24, 0.0  ;;  %v1028_v0 = vsub.f32 %v772_v20, %v11840_v48  ;;  %v1027_v4 = vsub.f32 %v771_v63, %v11840_v48  ;;  %v2887_v12 = vsub.f32 1.0, %v12090_v57 }
 0x30d   : > { %vm2940_vm0 = vcmp.eq.f32.partialorder %v2939_v42, 8.507059e+37  ;;  %v2942_v6 = vor.u32 1.1754944e-38, %v2941_v15  ;;  %v1756_v51 = vadd.f32 1.0, %v1628_v13  ;;  %1517 = vadd.xlane.f32.xlu0 %v1516_v41  ;;  %523 = vst.msk [vmem:[%s9458_s7 + $0x78] sm:$0xff] %vm18423_vm12, %v12110_v33  ;;  %v8510_v46 = vpop.eup %8509  ;;  %vm2965_vm3 = vweird.f32 %v11972_v25 }
 0x30e   : > { %v2948_v43 = vmul.f32 %v12068_v50, %v2947_v17  ;;  %v1156_v24 = vmul.f32 %v1028_v0, %v1028_v0  ;;  %v1155_v27 = vmul.f32 %v1027_v4, %v1027_v4  ;;  %v8512_v20 = vpop.eup %8511  ;;  %vm2966_vm10 = vweird.f32 %v12035_v2 }
 0x30f   : > { %v2943_v3 = vsel %vm2940_vm0, %v2942_v6, %v2938_v30  ;;  %8513 = vrcp.f32 %v12106_v60  ;;  %v1627_v57 = vmul.f32 %v9734_v34, %v1380_v18  ;;  %v2964_v42 = vadd.f32 %v12035_v2, %v2963_v16  ;;  %vm12142_vm14 = vmor %vm2965_vm3, %vm2966_vm10 }
 0x310   : > { %v1754_v15 = vadd.f32 1.0, %v1626_v9  ;;  %v1522_v13 = vsel %vm18424_vm13, %v1156_v24, 0.0  ;;  %v1519_v63 = vsel %vm18425_vm7, %v1155_v27, 0.0  ;;  %v2969_v17 = vand.u32 2147483647, %v11972_v25 }
 0x311   : > { %v2971_v53 = vand.u32 2147483648, %v11972_v25  ;;  %v12132_v41 = vadd.f32 1e-08, %v1756_v51  ;;  %v1630_v30 = vmul.f32 %v9734_v34, %v1389_v47  ;;  %1523 = vadd.xlane.f32.xlu2 %v1522_v13  ;;  %1520 = vadd.xlane.f32.xlu1 %v1519_v63  ;;  %8515 = vlog2.f32 %v2943_v3  ;;  %v1392_v13 = vpop.xlane.xlu0 %1391 }
 0x312   : > { %v2949_v18 = vadd.f32 %v12068_v50, %v2948_v43  ;;  %vm2951_vm4 = vweird.f32 %v12068_v50  ;;  %v1629_v16 = vmul.f32 %v9734_v34, %v1386_v49  ;;  %vm2950_vm6 = vweird.f32 %v11996_v14 }
 0x313   : > { %v2954_v0 = vand.u32 2147483647, %v11996_v14  ;;  %v2956_v4 = vand.u32 2147483648, %v11996_v14  ;;  %v1755_v6 = vadd.f32 1.0, %v1627_v57  ;;  %vm2891_vm0 = vweird.f32 %v12052_v22  ;;  %vm12157_vm12 = vmor %vm2950_vm6, %vm2951_vm4 }
 0x314   : > { %v3991_v51 = vmul.f32 0.6931472, %v8510_v46  ;;  %v3989_v43 = vmul.f32 0.6931472, %v8512_v20  ;;  %v2968_v47 = vsel %vm12142_vm14, %v12035_v2, %v2964_v42  ;;  %v12153_v25 = vadd.f32 1e-08, %v1754_v15  ;;  %vm18434_vm6 = vmmov %vm18425_vm7 }
 0x315   : > { %v12155_v24 = vpop.eup %8513  ;;  %v2972_v27 = vor.u32 1.1754944e-38, %v2971_v53  ;;  %8517 = vrcp.f32 %v12132_v41  ;;  %v1758_v14 = vadd.f32 1.0, %v1630_v30  ;;  %v773_v57 = vperm.slane %v12110_v33, 0 }
 0x316   : > { %v2888_v46 = vmul.f32 %v12052_v22, %v2887_v12  ;;  %vm2890_vm3 = vweird.f32 %v11984_v45  ;;  %vm2970_vm10 = vcmp.eq.f32.partialorder %v2969_v17, 8.507059e+37  ;;  %v2953_v2 = vsel %vm12157_vm12, %v12068_v50, %v2949_v18 }
 0x317   : > { %v1757_v20 = vadd.f32 1.0, %v1629_v16  ;;  %v2973_v49 = vsel %vm2970_vm10, %v2972_v27, %v2968_v47  ;;  %vm2955_vm13 = vcmp.eq.f32.partialorder %v2954_v0, 8.507059e+37  ;;  %v2957_v42 = vor.u32 1.1754944e-38, %v2956_v4  ;;  %v8516_v63 = vpop.eup %8515  ;;  %vm12201_vm4 = vmor %vm2890_vm3, %vm2891_vm0 }
 0x318   : > { %v12168_v15 = vadd.f32 1e-08, %v1755_v6  ;;  %v4181_v53 = vmul.f32 1.2, %v3991_v51  ;;  %v4180_v30 = vmul.f32 1.2, %v3989_v43  ;;  %v2976_v12 = vmul.f32 %v12155_v24, %v12106_v60  ;;  %vm18437_vm3 = vmmov %vm18434_vm6 }
 0x319   : > { %8519 = vrcp.f32 %v12153_v25  ;;  %v2958_v17 = vsel %vm2955_vm13, %v2957_v42, %v2953_v2  ;;  %v12173_v9 = vadd.f32 1e-08, %v1758_v14  ;;  %v1029_v50 = vsub.f32 %v773_v57, %v11840_v48 }
 0x31a   : > { %v647_v18 = vrot.slane %v12110_v33, 2  ;;  %8521 = vlog2.f32 %v2973_v49  ;;  %v12177_v16 = vadd.f32 1e-08, %v1757_v20  ;;  %v1631_v0 = vmul.f32 %v9734_v34, %v1392_v13 }
 0x31b   : > { %v646_v4 = vrot.slane %v12110_v33, 1  ;;  %v12181_v6 = vpop.eup %8517  ;;  %v3993_v51 = vmul.f32 0.6931472, %v8516_v63  ;;  %8523 = vrcp.f32 %v12168_v15  ;;  %v1157_v43 = vmul.f32 %v1029_v50, %v1029_v50 }
 0x31c   : > { %v775_v47 = vperm.slane %v647_v18, 0  ;;  %v12185_v27 = vadd.f32 %v12052_v22, %v2888_v46  ;;  %v4374_v3 = vmul.f32 1.442695, %v4181_v53  ;;  %8525 = vlog2.f32 %v2958_v17 }
 0x31d   : > { %v2977_v14 = vsub.f32 1.0, %v2976_v12  ;;  %8527 = vrcp.f32 %v12173_v9  ;;  %v1525_v57 = vsel %vm18425_vm7, %v1157_v43, 0.0  ;;  %v774_v20 = vperm.slane %v646_v4, 0 }
 0x31e   : > { %18430 = vst [vmem:[#allocation82_spill] sm:$0xff] %v12185_v27  ;;  %v1031_v2 = vsub.f32 %v775_v47, %v11840_v48  ;;  %v2984_v42 = vand.u32 2147483647, %v12106_v60  ;;  %v3021_v13 = vmul.f32 %v12181_v6, %v12132_v41  ;;  %8529 = vrcp.f32 %v12177_v16  ;;  %1526 = vadd.xlane.f32.xlu0 %v1525_v57  ;;  %v1398_v27 = vpop.xlane.xlu2 %1397 }
 0x31f   : > { %v12190_v49 = vpop.eup %8519  ;;  %v1759_v46 = vadd.f32 1.0, %v1631_v0  ;;  %8531 = vlog2.f32 %v12056_v31  ;;  %v18431_v63 = vmov 0  ;;  %v4372_v53 = vmul.f32 1.442695, %v4180_v30 }
 0x320   : > { %v18432_v63 = vsel %vm12201_vm4, 4294967295, %v18431_v63  ;;  %v4182_v12 = vmul.f32 1.2, %v3993_v51  ;;  %v1159_v17 = vmul.f32 %v1031_v2, %v1031_v2  ;;  %v8522_v50 = vpop.eup %8521  ;;  %8533 = vpow2.f32 %v4374_v3 }
 0x321   : > { %18433 = vst [vmem:[#allocation83_spill] sm:$0xff] %v18432_v63  ;;  %v2978_v31 = vmul.f32 %v12155_v24, %v2977_v14  ;;  %v1030_v0 = vsub.f32 %v774_v20, %v11840_v48  ;;  %v12211_v4 = vpop.eup %8523  ;;  %vm2980_vm14 = vweird.f32 %v12106_v60  ;;  %v2986_v43 = vand.u32 2147483648, %v12106_v60 }
 0x322   : > { %v2991_v30 = vmul.f32 %v12190_v49, %v12153_v25  ;;  %v1531_v51 = vsel %vm18434_vm6, %v1159_v17, 0.0  ;;  %v8526_v47 = vpop.eup %8525  ;;  %vm12218_vm0 = vcmp.eq.f32.partialorder %v2984_v42, 8.507059e+37  ;;  %v3022_v3 = vsub.f32 1.0, %v3021_v13 }
 0x323   : > { %v12222_v14 = vadd.f32 1e-08, %v1759_v46  ;;  %1532 = vadd.xlane.f32.xlu2 %v1531_v51  ;;  %v1158_v2 = vmul.f32 %v1030_v0, %v1030_v0  ;;  %v12224_v20 = vpop.eup %8527  ;;  %8535 = vpow2.f32 %v4372_v53  ;;  %v4376_v18 = vmul.f32 1.442695, %v4182_v12 }
 0x324   : > { %vm2981_vm12 = vweird.f32 %v12155_v24  ;;  %v3016_v55 = vand.u32 2147483648, %v12168_v15  ;;  %v12228_v37 = vpop.eup %8529  ;;  %v2979_v42 = vadd.f32 %v12155_v24, %v2978_v31  ;;  %v12233_v17 = vmul.f32 %v12211_v4, %v12168_v15 }
 0x325   : > { %v3001_v13 = vand.u32 2147483648, %v12153_v25  ;;  %v1528_v46 = vsel %vm18437_vm3, %v1158_v2, 0.0  ;;  %v12237_v0 = vpop.eup %8531  ;;  %v12239_v53 = vmul.f32 0.6931472, %v8522_v50  ;;  %v2987_v12 = vor.u32 1.1754944e-38, %v2986_v43  ;;  %vm12253_vm10 = vmor %vm2980_vm14, %vm2981_vm12 }
 0x326   : > { %18438 = vst [vmem:[#allocation84_spill] sm:$0xff] %v12237_v0  ;;  %v2992_v59 = vsub.f32 1.0, %v2991_v30  ;;  %1529 = vadd.xlane.f32.xlu1 %v1528_v46  ;;  %v12242_v28 = vpop.eup %8533  ;;  %v3023_v31 = vmul.f32 %v12181_v6, %v3022_v3  ;;  %v3051_v61 = vmul.f32 %v12224_v20, %v12173_v9  ;;  %8537 = vrcp.f32 %v12222_v14  ;;  %v1395_v46 = vpop.xlane.xlu1 %1394 }
 0x327   : > { %18439 = vst [vmem:[#allocation85_spill] sm:$0xff] %v12242_v28  ;;  %v648_v2 = vrot.slane %v12110_v33, 3  ;;  %v3995_v22 = vmul.f32 0.6931472, %v8526_v47  ;;  %v12257_v43 = vor.u32 1.1754944e-38, %v3016_v55  ;;  %v3036_v3 = vmul.f32 %v12228_v37, %v12177_v16 }
 0x328   : > { %v2999_v30 = vand.u32 2147483647, %v12153_v25  ;;  %8539 = vpow2.f32 %v4376_v18  ;;  %v2983_v47 = vsel %vm12253_vm10, %v12155_v24, %v2979_v42  ;;  %v12266_v60 = vor.u32 1.1754944e-38, %v3001_v13 }
 0x329   : > { %18442 = vst [vmem:[#allocation86_spill] sm:$0xff] %v12257_v43  ;;  %v12268_v28 = vpop.eup %8535  ;;  %v2993_v55 = vmul.f32 %v12190_v49, %v2992_v59  ;;  %v1633_v43 = vmul.f32 %v9734_v34, %v1398_v27  ;;  %v776_v63 = vperm.slane %v648_v2, 0  ;;  %v650_v0 = vrot.slane %v12110_v33, 5 }
 0x32a   : > { %18443 = vst [vmem:[#allocation87_spill] sm:$0xff] %v12268_v28  ;;  %v3024_v45 = vadd.f32 %v12181_v6, %v3023_v31  ;;  %vm3026_vm13 = vweird.f32 %v12181_v6  ;;  %v3052_v18 = vsub.f32 1.0, %v3051_v61  ;;  %v1632_v24 = vmul.f32 %v9734_v34, %v1395_v46 }
 0x32b   : > { %v4183_v42 = vmul.f32 1.2, %v3995_v22  ;;  %v2988_v13 = vsel %vm12218_vm0, %v2987_v12, %v2983_v47  ;;  %vm2995_vm7 = vweird.f32 %v12153_v25  ;;  %vm2996_vm14 = vweird.f32 %v12190_v49 }
 0x32c   : > { %v3037_v59 = vsub.f32 1.0, %v3036_v3  ;;  %v12280_v27 = vpop.eup %8537  ;;  %vm3025_vm6 = vweird.f32 %v12132_v41  ;;  %v3029_v31 = vand.u32 2147483647, %v12132_v41  ;;  %v3031_v2 = vand.u32 2147483648, %v12132_v41  ;;  %vm12323_vm10 = vmor %vm2995_vm7, %vm2996_vm14 }
 0x32d   : > { %v1032_v61 = vsub.f32 %v776_v63, %v11840_v48  ;;  %v2994_v22 = vadd.f32 %v12190_v49, %v2993_v55  ;;  %vm12287_vm12 = vmor %vm3025_vm6, %vm3026_vm13  ;;  %v1761_v12 = vadd.f32 1.0, %v1633_v43  ;;  %v778_v50 = vperm.slane %v650_v0, 0 }
 0x32e   : > { %v649_v3 = vrot.slane %v12110_v33, 4  ;;  %v12292_v46 = vpop.eup %8539  ;;  %v3028_v47 = vsel %vm12287_vm12, %v12181_v6, %v3024_v45  ;;  %v3053_v41 = vmul.f32 %v12224_v20, %v3052_v18  ;;  %v1760_v51 = vadd.f32 1.0, %v1632_v24 }
 0x32f   : > { %18446 = vst [vmem:[#allocation88_spill] sm:$0xff] %v12292_v46  ;;  %v1160_v63 = vmul.f32 %v1032_v61, %v1032_v61  ;;  %vm12298_vm0 = vcmp.eq.f32.partialorder %v2999_v30, 8.507059e+37  ;;  %v3038_v28 = vmul.f32 %v12228_v37, %v3037_v59  ;;  %v3066_v0 = vmul.f32 %v12280_v27, %v12222_v14 }
 0x330   : > { %v1034_v43 = vsub.f32 %v778_v50, %v11840_v48  ;;  %v777_v46 = vperm.slane %v649_v3, 0  ;;  %vm3030_vm3 = vcmp.eq.f32.partialorder %v3029_v31, 8.507059e+37  ;;  %v3032_v54 = vor.u32 1.1754944e-38, %v3031_v2 }
 0x331   : > { %vm18449_vm13 = vcmask 261120   ;;  %vm3056_vm6 = vweird.f32 %v12224_v20  ;;  %v3061_v6 = vand.u32 2147483648, %v12173_v9  ;;  %v12310_v30 = vadd.f32 1e-08, %v1761_v12 }
 0x332   : > { %v1534_v45 = vsel %vm18449_vm13, %v1160_v63, 0.0  ;;  %v1162_v18 = vmul.f32 %v1034_v43, %v1034_v43  ;;  %v3033_v24 = vsel %vm3030_vm3, %v3032_v54, %v3028_v47  ;;  %v3054_v59 = vadd.f32 %v12224_v20, %v3053_v41  ;;  %v1407_v63 = vpop.xlane.xlu2 %1406 }
 0x333   : > { %1535 = vadd.xlane.f32.xlu0 %v1534_v45  ;;  %vm3041_vm12 = vweird.f32 %v12228_v37  ;;  %v1033_v31 = vsub.f32 %v777_v46, %v11840_v48  ;;  %v3039_v2 = vadd.f32 %v12228_v37, %v3038_v28  ;;  %v3067_v61 = vsub.f32 1.0, %v3066_v0 }
 0x334   : > { %v12316_v57 = vadd.f32 1e-08, %v1760_v51  ;;  %v1540_v50 = vsel %vm18449_vm13, %v1162_v18, 0.0  ;;  %8541 = vlog2.f32 %v2988_v13  ;;  %v3059_v12 = vand.u32 2147483647, %v12173_v9 }
 0x335   : > { %v3046_v3 = vand.u32 2147483648, %v12177_v16  ;;  %1541 = vadd.xlane.f32.xlu2 %v1540_v50  ;;  %v1161_v28 = vmul.f32 %v1033_v31, %v1033_v31  ;;  %v2998_v51 = vsel %vm12323_vm10, %v12190_v49, %v2994_v22  ;;  %vm18452_vm3 = vweird.f32 %v12173_v9 }
 0x336   : > { %vm12336_vm13 = vmor %vm18452_vm3, %vm3056_vm6  ;;  %vm3040_vm7 = vweird.f32 %v12177_v16  ;;  %v3044_v13 = vand.u32 2147483647, %v12177_v16  ;;  %8543 = vrcp.f32 %v12310_v30  ;;  %v18455_v46 = vand.u32 2147483647, %v9983_v21 }
 0x337   : > { %v4378_v49 = vmul.f32 1.442695, %v4183_v42  ;;  %8545 = vlog2.f32 %v3033_v24  ;;  %v3058_v9 = vsel %vm12336_vm13, %v12224_v20, %v3054_v59  ;;  %vm12354_vm10 = vmor %vm3040_vm7, %vm3041_vm12  ;;  %vm18460_vm6 = vcmask 261120  }
 0x338   : > { %vm12345_vm14 = vcmp.eq.f32.partialorder %v18455_v46, 8.507059e+37  ;;  %v1537_v16 = vsel %vm18460_vm6, %v1161_v28, 0.0  ;;  %v3062_v41 = vor.u32 1.1754944e-38, %v3061_v6  ;;  %v3043_v21 = vsel %vm12354_vm10, %v12228_v37, %v3039_v2 }
 0x339   : > { %v3068_v42 = vmul.f32 %v12280_v27, %v3067_v61  ;;  %8547 = vrcp.f32 %v12316_v57  ;;  %1538 = vadd.xlane.f32.xlu1 %v1537_v16  ;;  %v3003_v20 = vsel %vm12298_vm0, %v12266_v60, %v2998_v51  ;;  %vm3060_vm12 = vcmp.eq.f32.partialorder %v3059_v12, 8.507059e+37 }
 0x33a   : > { %v3047_v0 = vor.u32 1.1754944e-38, %v3046_v3  ;;  %v651_v43 = vrot.slane %v12110_v33, 6  ;;  %v3063_v45 = vsel %vm3060_vm12, %v3062_v41, %v3058_v9  ;;  %vm3045_vm3 = vcmp.eq.f32.partialorder %v3044_v13, 8.507059e+37  ;;  %v12370_v18 = vpop.eup %8541 }
 0x33b   : > { %v3074_v6 = vand.u32 2147483647, %v12222_v14  ;;  %v3076_v37 = vand.u32 2147483648, %v12222_v14  ;;  %v12373_v24 = vmul.f32 1.2, %v12239_v53  ;;  %8549 = vpow2.f32 %v4378_v49 }
 0x33c   : > { %v3048_v59 = vsel %vm3045_vm3, %v3047_v0, %v3043_v21  ;;  %v1636_v55 = vmul.f32 %v9734_v34, %v1407_v63  ;;  %v12376_v60 = vpop.eup %8543  ;;  %8551 = vlog2.f32 %v3003_v20  ;;  %v3069_v31 = vadd.f32 %v12280_v27, %v3068_v42  ;;  %v1401_v0 = vpop.xlane.xlu0 %1400 }
 0x33d   : > { %vm3071_vm0 = vweird.f32 %v12280_v27  ;;  %v779_v2 = vperm.slane %v651_v43, 0  ;;  %v8546_v61 = vpop.eup %8545  ;;  %v18461_v50 = vsub.f32 1.0, %v12233_v17  ;;  %8553 = vlog2.f32 %v3063_v45 }
 0x33e   : > { %v3106_v53 = vand.u32 2147483648, %v12310_v30  ;;  %v652_v12 = vrot.slane %v12110_v33, 7  ;;  %8555 = vlog2.f32 %v3048_v59  ;;  %vm3070_vm13 = vweird.f32 %v12222_v14 }
 0x33f   : > { %v12383_v54 = vmul.f32 %v12211_v4, %v18461_v50  ;;  %v12387_v3 = vpop.eup %8547  ;;  %vm12390_vm7 = vcmp.eq.f32.partialorder %v3074_v6, 8.507059e+37  ;;  %v3077_v51 = vor.u32 1.1754944e-38, %v3076_v37  ;;  %vm12394_vm10 = vmor %vm3070_vm13, %vm3071_vm0  ;;  %v3096_v25 = vmul.f32 %v12376_v60, %v12310_v30 }
 0x340   : > { %v1764_v13 = vadd.f32 1.0, %v1636_v55  ;;  %v1035_v33 = vsub.f32 %v779_v2, %v11840_v48  ;;  %v780_v46 = vperm.slane %v652_v12, 0  ;;  %v3073_v14 = vsel %vm12394_vm10, %v12280_v27, %v3069_v31 }
 0x341   : > { %v18466_v49 = vsel %vm10220_vm9, %v10048_v52, %v10148_v35  ;;  %v3871_v22 = vmul.f32 0.6931472, %v9986_v62  ;;  %v3873_v16 = vmul.f32 0.6931472, %v10143_v29  ;;  %v12414_v41 = vpop.eup %8549  ;;  %v4005_v21 = vmul.f32 0.6931472, %v8546_v61 }
 0x342   : > { %v2058_v9 = vsel %vm12345_vm14, %v10140_v19, %v18466_v49  ;;  %18467 = vst [vmem:[#allocation89_spill] sm:$0xff] %v12414_v41  ;;  %v3104_v42 = vand.u32 2147483647, %v12310_v30  ;;  %v12417_v63 = vor.u32 1.1754944e-38, %v3106_v53  ;;  %v3081_v23 = vmul.f32 %v12387_v3, %v12316_v57  ;;  %v12421_v27 = vpop.eup %8551  ;;  %vm18468_vm14 = vmmov %vm18460_vm6  ;;  %v1416_v49 = vpop.xlane.xlu2 %1415 }
 0x343   : > { %v1163_v52 = vmul.f32 %v1035_v33, %v1035_v33  ;;  %v1036_v35 = vsub.f32 %v780_v46, %v11840_v48  ;;  %8557 = vlog2.f32 %v2058_v9  ;;  %v4121_v19 = vmul.f32 1.2, %v3871_v22  ;;  %v8554_v62 = vpop.eup %8553 }
 0x344   : > { %v3078_v29 = vsel %vm12390_vm7, %v3077_v51, %v3073_v14  ;;  %v3097_v47 = vsub.f32 1.0, %v3096_v25  ;;  %v3089_v20 = vand.u32 2147483647, %v12316_v57  ;;  %v12427_v43 = vadd.f32 1e-08, %v1764_v13  ;;  %v8556_v45 = vpop.eup %8555 }
 0x345   : > { %vm3100_vm9 = vweird.f32 %v12310_v30  ;;  %v1543_v6 = vsel %vm18468_vm14, %v1163_v52, 0.0  ;;  %v1164_v37 = vmul.f32 %v1036_v35, %v1036_v35  ;;  %v4122_v59 = vmul.f32 1.2, %v3873_v16  ;;  %v1410_v30 = vpop.xlane.xlu0 %1409 }
 0x346   : > { %v4252_v48 = vmul.f32 1.442695, %v9956_v39  ;;  %v4188_v55 = vmul.f32 1.2, %v4005_v21  ;;  %v3082_v31 = vsub.f32 1.0, %v3081_v23  ;;  %v3091_v2 = vand.u32 2147483648, %v12316_v57  ;;  %1544 = vadd.xlane.f32.xlu0 %v1543_v6 }
 0x347   : > { %v4254_v61 = vmul.f32 1.442695, %v4121_v19  ;;  %v4009_v50 = vmul.f32 0.6931472, %v8554_v62  ;;  %8559 = vlog2.f32 %v3078_v29  ;;  %v1634_v53 = vmul.f32 %v9734_v34, %v1401_v0 }
 0x348   : > { %v1546_v12 = vsel %vm18460_vm6, %v1164_v37, 0.0  ;;  %v4007_v28 = vmul.f32 0.6931472, %v8556_v45  ;;  %v3098_v51 = vmul.f32 %v12376_v60, %v3097_v47  ;;  %vm3101_vm12 = vweird.f32 %v12376_v60 }
 0x349   : > { %1547 = vadd.xlane.f32.xlu1 %v1546_v12  ;;  %8561 = vpow2.f32 %v4252_v48  ;;  %v8558_v39 = vpop.eup %8557  ;;  %v4256_v17 = vmul.f32 1.442695, %v4122_v59  ;;  %v4628_v25 = vlaneseq  ;;  %v4388_v13 = vmul.f32 1.442695, %v4188_v55  ;;  %v1404_v55 = vpop.xlane.xlu1 %1403  ;;  %vm12482_vm14 = vmor %vm3100_vm9, %vm3101_vm12 }
 0x34a   : > { %8563 = vrcp.f32 %v12427_v43  ;;  %v3083_v33 = vmul.f32 %v12387_v3, %v3082_v31  ;;  %v3875_v46 = vmul.f32 0.6931472, %v8558_v39  ;;  %v18469_v14 = vand.u32 2147483647, %v10198_v10 }
 0x34b   : > { %8565 = vpow2.f32 %v4254_v61  ;;  %v4190_v9 = vmul.f32 1.2, %v4009_v50  ;;  %v1762_v22 = vadd.f32 1.0, %v1634_v53  ;;  %v12447_v16 = vand.u32 127, %v4628_v25 }
 0x34c   : > { %vm12443_vm13 = vcmp.eq.f32.partialorder %v18469_v14, 8.507059e+37  ;;  %8567 = vpow2.f32 %v4256_v17  ;;  %v4189_v21 = vmul.f32 1.2, %v4007_v28  ;;  %v3099_v23 = vadd.f32 %v12376_v60, %v3098_v51 }
 0x34d   : > { %vm12450_vm7 = vcmp.eq.f32.partialorder %v3104_v42, 8.507059e+37  ;;  %v4123_v35 = vmul.f32 1.2, %v3875_v46  ;;  %vm17729_vm10 = vcmask 1041409   ;;  %v8560_v19 = vpop.eup %8559  ;;  %v4630_v10 = vperm.slane %v9999_v8, %v12447_v16 }
 0x34e   : > { %v4631_v62 = vperm.slane %v10106_v36, %v12447_v16  ;;  %v4633_v29 = vperm.slane %v10169_v11, %v12447_v16  ;;  %vm17740_vm3 = vcmask 1042434   ;;  %v3084_v47 = vadd.f32 %v12387_v3, %v3083_v33 }
 0x34f   : > { %v12462_v42 = vpop.eup %8561  ;;  %v4258_v0 = vmul.f32 1.442695, %v4123_v35  ;;  %v4632_v45 = vperm.slane %v10095_v26, %v12447_v16  ;;  %vm12469_vm6 = vcmp.eq.f32.partialorder %v3089_v20, 8.507059e+37  ;;  %v3092_v59 = vor.u32 1.1754944e-38, %v3091_v2 }
 0x350   : > { %18474 = vst [vmem:[#allocation90_spill] sm:$0xff] %v12462_v42  ;;  %v12467_v6 = vpop.eup %8563  ;;  %v12473_v48 = vadd.f32 1e-08, %v1762_v22  ;;  %v4759_v31 = vsel %vm17729_vm10, %v4631_v62, %v4630_v10  ;;  %8569 = vpow2.f32 %v4388_v13  ;;  %v4392_v50 = vmul.f32 1.442695, %v4190_v9 }
 0x351   : > { %v12476_v61 = vpop.eup %8565  ;;  %v4761_v20 = vsel %vm17740_vm3, %v4632_v45, %v4759_v31  ;;  %vm4764_vm0 = vcmask 1044484   ;;  %v3103_v12 = vsel %vm12482_vm14, %v12376_v60, %v3099_v23  ;;  %vm18481_vm10 = vweird.f32 %v12387_v3  ;;  %v18492_v45 = vld [vmem:[#allocation15_spill] sm:$0xff] }
 0x352   : > { %18477 = vst [vmem:[#allocation91_spill] sm:$0xff] %v12476_v61  ;;  %v12487_v2 = vpop.eup %8567  ;;  %vm18482_vm4 = vweird.f32 %v12316_v57  ;;  %8571 = vpow2.f32 %v4258_v0  ;;  %v4634_v51 = vperm.slane %v12462_v42, %v12447_v16  ;;  %vm18485_vm9 = vcmask 1043459  }
 0x353   : > { %18480 = vst [vmem:[#allocation92_spill] sm:$0xff] %v12487_v2  ;;  %vm12496_vm2 = vmor %vm18482_vm4, %vm18481_vm10  ;;  %v4763_v39 = vsel %vm18485_vm9, %v4633_v29, %v4761_v20  ;;  %v4390_v17 = vmul.f32 1.442695, %v4189_v21  ;;  %v3141_v25 = vmul.f32 %v12467_v6, %v12427_v43  ;;  %v1635_v57 = vmul.f32 %v9734_v34, %v1404_v55 }
 0x354   : > { %v3088_v60 = vsel %vm12496_vm2, %v12387_v3, %v3084_v47  ;;  %8573 = vrcp.f32 %v12473_v48  ;;  %v4636_v13 = vperm.slane %v12487_v2, %v12447_v16  ;;  %v4765_v33 = vsel %vm4764_vm0, %v4634_v51, %v4763_v39  ;;  %v18523_v47 = vld [vmem:[#allocation18_spill] sm:$0xff] }
 0x355   : > { %vm4766_vm4 = vcmask 1045509   ;;  %v1637_v46 = vmul.f32 %v9734_v34, %v1410_v30  ;;  %v4635_v14 = vperm.slane %v12476_v61, %v12447_v16  ;;  %vm4768_vm12 = vcmask 1046534  }
 0x356   : > { %v18486_v3 = vsel %vm10492_vm11, %v10267_v32, %v10473_v58  ;;  %v12526_v22 = vadd.f32 %v12211_v4, %v12383_v54  ;;  %8575 = vpow2.f32 %v4392_v50  ;;  %v3108_v21 = vsel %vm12450_vm7, %v12417_v63, %v3103_v12  ;;  %v12533_v44 = vpop.eup %8569 }
 0x357   : > { %v2178_v9 = vsel %vm12443_vm13, %v10480_v7, %v18486_v3  ;;  %v3093_v23 = vsel %vm12469_vm6, %v3092_v59, %v3088_v60  ;;  %18487 = vst [vmem:[#allocation93_spill] sm:$0xff] %v12533_v44  ;;  %v3142_v35 = vsub.f32 1.0, %v3141_v25  ;;  %v1763_v32 = vadd.f32 1.0, %v1635_v57  ;;  %v1413_v60 = vpop.xlane.xlu1 %1412 }
 0x358   : > { %v4767_v58 = vsel %vm4766_vm4, %v4635_v14, %v4765_v33  ;;  %8577 = vlog2.f32 %v2178_v9  ;;  %v12536_v7 = vpop.eup %8571  ;;  %v4011_v54 = vmul.f32 0.6931472, %v8560_v19  ;;  %vm4770_vm11 = vcmask 1047559  }
 0x359   : > { %8579 = vpow2.f32 %v4390_v17  ;;  %v4769_v10 = vsel %vm4768_vm12, %v4636_v13, %v4767_v58  ;;  %vm18488_vm2 = vweird.f32 %v12211_v4  ;;  %vm18489_vm13 = vweird.f32 %v12168_v15  ;;  %v18499_v58 = vld [vmem:[#allocation12_spill] sm:$0xff] }
 0x35a   : > { %vm12543_vm7 = vmor %vm18489_vm13, %vm18488_vm2  ;;  %v1765_v52 = vadd.f32 1.0, %v1637_v46  ;;  %v4637_v62 = vperm.slane %v12536_v7, %v12447_v16  ;;  %vm4893_vm10 = vcmask 64512   ;;  %v3887_v29 = vmul.f32 0.6931472, %v10524_v40  ;;  %v12550_v19 = vpop.eup %8573 }
 0x35b   : > { %8581 = vlog2.f32 %v3108_v21  ;;  %v3889_v37 = vmul.f32 0.6931472, %v18492_v45  ;;  %v3143_v59 = vmul.f32 %v12467_v6, %v3142_v35  ;;  %v12559_v55 = vadd.f32 1e-08, %v1763_v32  ;;  %v18498_v35 = vld [vmem:[#allocation16_spill] sm:$0xff] }
 0x35c   : > { %v1639_v31 = vmul.f32 %v9734_v34, %v1416_v49  ;;  %v4771_v40 = vsel %vm4770_vm11, %v4637_v62, %v4769_v10  ;;  %v12563_v50 = vpop.eup %8575  ;;  %v18494_v53 = vand.u32 2147483647, %v10454_v5  ;;  %v4191_v12 = vmul.f32 1.2, %v4011_v54 }
 0x35d   : > { %18493 = vst [vmem:[#allocation15_spill] sm:$0xff] %v12563_v50  ;;  %8583 = vlog2.f32 %v3093_v23  ;;  %v3121_v28 = vand.u32 2147483648, %v12473_v48  ;;  %v4894_v30 = vsel %vm4893_vm10, %v4771_v40, 0.0  ;;  %vm3145_vm6 = vweird.f32 %v12427_v43 }
 0x35e   : > { %vm12567_vm14 = vcmp.eq.f32.partialorder %v18494_v53, 8.507059e+37  ;;  %v8578_v51 = vpop.eup %8577  ;;  %v3149_v39 = vand.u32 2147483647, %v12427_v43  ;;  %v12575_v17 = vadd.f32 1e-08, %v1765_v52  ;;  %4895 = vadd.xlane.f32.xlu2 %v4894_v30  ;;  %v3111_v57 = vmul.f32 %v12550_v19, %v12473_v48 }
 0x35f   : > { %v4129_v5 = vmul.f32 1.2, %v3887_v29  ;;  %v12577_v25 = vpop.eup %8579  ;;  %v3151_v13 = vand.u32 2147483648, %v12427_v43  ;;  %v3891_v33 = vmul.f32 0.6931472, %v8578_v51  ;;  %v3144_v14 = vadd.f32 %v12467_v6, %v3143_v59  ;;  %v18502_v59 = vld [vmem:[#allocation11_spill] sm:$0xff] }
 0x360   : > { %18497 = vst [vmem:[#allocation94_spill] sm:$0xff] %v12577_v25  ;;  %v4130_v46 = vmul.f32 1.2, %v3889_v37  ;;  %vm3146_vm9 = vweird.f32 %v12467_v6  ;;  %8585 = vrcp.f32 %v12559_v55  ;;  %v1767_v3 = vadd.f32 1.0, %v1639_v31 }
 0x361   : > { %v12585_v9 = vpop.eup %8581  ;;  %v1638_v21 = vmul.f32 %v9734_v34, %v1413_v60  ;;  %v4131_v23 = vmul.f32 1.2, %v3891_v33  ;;  %v4268_v32 = vmul.f32 1.442695, %v18498_v35  ;;  %v4639_v54 = vperm.slane %v18499_v58, %v12447_v16  ;;  %vm12596_vm2 = vmor %vm3145_vm6, %vm3146_vm9 }
 0x362   : > { %v4394_v49 = vmul.f32 1.442695, %v4191_v12  ;;  %8587 = vrcp.f32 %v12575_v17  ;;  %v4270_v10 = vmul.f32 1.442695, %v4129_v5  ;;  %v4272_v52 = vmul.f32 1.442695, %v4130_v46 }
 0x363   : > { %v12592_v62 = vpop.eup %8583  ;;  %v3112_v29 = vsub.f32 1.0, %v3111_v57  ;;  %v3152_v37 = vor.u32 1.1754944e-38, %v3151_v13  ;;  %8589 = vpow2.f32 %v4268_v32  ;;  %v4638_v31 = vperm.slane %v18502_v59, %v12447_v16  ;;  %v18503_v12 = vld [vmem:[#allocation14_spill] sm:$0xff]  ;;  %v18505_v57 = vld [vmem:[#allocation21_spill] sm:$0xff]  ;;  %v18508_v46 = vld [vmem:[#allocation24_spill] sm:$0xff] }
 0x364   : > { %v3148_v40 = vsel %vm12596_vm2, %v12467_v6, %v3144_v14  ;;  %8591 = vpow2.f32 %v4270_v10  ;;  %v4274_v53 = vmul.f32 1.442695, %v4131_v23  ;;  %v4640_v30 = vperm.slane %v18503_v12, %v12447_v16  ;;  %v18507_v13 = vld [vmem:[#allocation17_spill] sm:$0xff]  ;;  %v18512_v10 = vld [vmem:[#allocation26_spill] sm:$0xff] }
 0x365   : > { %v12607_v51 = vadd.f32 1e-08, %v1767_v3  ;;  %v1766_v43 = vadd.f32 1.0, %v1638_v21  ;;  %8593 = vpow2.f32 %v4272_v52  ;;  %vm18504_vm13 = vcmask 1041409   ;;  %v18541_v52 = vld [vmem:[#allocation36_spill] sm:$0xff] }
 0x366   : > { %v4772_v60 = vsel %vm18504_vm13, %v4639_v54, %v4638_v31  ;;  %v12610_v5 = vpop.eup %8585  ;;  %vm3150_vm6 = vcmp.eq.f32.partialorder %v3149_v39, 8.507059e+37  ;;  %8595 = vpow2.f32 %v4274_v53  ;;  %v18506_v6 = vsel %vm10723_vm15, %v10513_v38, %v18505_v57  ;;  %v18509_v39 = vld [vmem:[#allocation13_spill] sm:$0xff] }
 0x367   : > { %v2298_v33 = vsel %vm12567_vm14, %v18507_v13, %v18506_v6  ;;  %v3903_v14 = vmul.f32 0.6931472, %v18508_v46  ;;  %8597 = vpow2.f32 %v4394_v49  ;;  %vm3115_vm9 = vweird.f32 %v12473_v48  ;;  %v18510_v38 = vld [vmem:[#allocation25_spill] sm:$0xff] }
 0x368   : > { %v12622_v3 = vor.u32 1.1754944e-38, %v3121_v28  ;;  %v3153_v21 = vsel %vm3150_vm6, %v3152_v37, %v3148_v40  ;;  %v4641_v23 = vperm.slane %v18509_v39, %v12447_v16  ;;  %v12626_v35 = vpop.eup %8587  ;;  %v4773_v1 = vsel %vm17740_vm3, %v4640_v30, %v4772_v60  ;;  %v18516_v37 = vld [vmem:[#allocation22_spill] sm:$0xff] }
 0x369   : > { %v3905_v32 = vmul.f32 0.6931472, %v18510_v38  ;;  %8599 = vlog2.f32 %v2298_v33  ;;  %v4137_v20 = vmul.f32 1.2, %v3903_v14  ;;  %v12630_v54 = vpop.eup %8589  ;;  %v18513_v49 = vand.u32 2147483647, %v18512_v10 }
 0x36a   : > { %18511 = vst [vmem:[#allocation16_spill] sm:$0xff] %v12630_v54  ;;  %v3113_v28 = vmul.f32 %v12550_v19, %v3112_v29  ;;  %8601 = vrcp.f32 %v12607_v51  ;;  %v12640_v45 = vadd.f32 1e-08, %v1766_v43  ;;  %v4284_v31 = vmul.f32 1.442695, %v18516_v37  ;;  %v12643_v40 = vpop.eup %8591 }
 0x36b   : > { %vm12634_vm15 = vcmp.eq.f32.partialorder %v18513_v49, 8.507059e+37  ;;  %18517 = vst [vmem:[#allocation14_spill] sm:$0xff] %v12643_v40  ;;  %vm3116_vm14 = vweird.f32 %v12550_v19  ;;  %v4642_v53 = vperm.slane %v12630_v54, %v12447_v16  ;;  %v4138_v30 = vmul.f32 1.2, %v3905_v32  ;;  %v12648_v57 = vpop.eup %8593  ;;  %v18522_v49 = vld [vmem:[#allocation19_spill] sm:$0xff] }
 0x36c   : > { %v4286_v60 = vmul.f32 1.442695, %v4137_v20  ;;  %18518 = vst [vmem:[#allocation21_spill] sm:$0xff] %v12648_v57  ;;  %8603 = vlog2.f32 %v3153_v21  ;;  %v3156_v29 = vmul.f32 %v12626_v35, %v12575_v17  ;;  %v4643_v43 = vperm.slane %v12643_v40, %v12447_v16  ;;  %v12655_v13 = vpop.eup %8595  ;;  %vm12680_vm13 = vmor %vm3115_vm9, %vm3116_vm14 }
 0x36d   : > { %vm18519_vm2 = vcmask 1043459   ;;  %18520 = vst [vmem:[#allocation17_spill] sm:$0xff] %v12655_v13  ;;  %v3164_v33 = vand.u32 2147483647, %v12575_v17  ;;  %v4644_v46 = vperm.slane %v12648_v57, %v12447_v16  ;;  %8605 = vpow2.f32 %v4284_v31  ;;  %v12661_v38 = vpop.eup %8597 }
 0x36e   : > { %v4774_v6 = vsel %vm18519_vm2, %v4641_v23, %v4773_v1  ;;  %18521 = vst [vmem:[#allocation24_spill] sm:$0xff] %v12661_v38  ;;  %v3114_v21 = vadd.f32 %v12550_v19, %v3113_v28  ;;  %8607 = vrcp.f32 %v12640_v45  ;;  %v4645_v32 = vperm.slane %v12655_v13, %v12447_v16 }
 0x36f   : > { %v4775_v14 = vsel %vm4764_vm0, %v4642_v53, %v4774_v6  ;;  %v8600_v1 = vpop.eup %8599  ;;  %8609 = vpow2.f32 %v4286_v60  ;;  %v4288_v10 = vmul.f32 1.442695, %v4138_v30  ;;  %v4646_v37 = vperm.slane %v18522_v49, %v12447_v16  ;;  %v18654_v49 = vld [vmem:[#allocation81_spill] sm:$0xff] }
 0x370   : > { %v4776_v23 = vsel %vm4766_vm4, %v4643_v43, %v4775_v14  ;;  %v12671_v31 = vpop.eup %8601  ;;  %v3157_v53 = vsub.f32 1.0, %v3156_v29  ;;  %v3907_v6 = vmul.f32 0.6931472, %v8600_v1  ;;  %v4647_v0 = vperm.slane %v18523_v47, %v12447_v16  ;;  %v18529_v14 = vld [vmem:[#allocation20_spill] sm:$0xff]  ;;  %v18534_v43 = vld [vmem:[#allocation31_spill] sm:$0xff] }
 0x371   : > { %v4777_v20 = vsel %vm4768_vm12, %v4644_v46, %v4776_v23  ;;  %v18526_v30 = vand.u32 2147483647, %v12473_v48  ;;  %v3166_v29 = vand.u32 2147483648, %v12575_v17  ;;  %8611 = vpow2.f32 %v4288_v10 }
 0x372   : > { %v4778_v28 = vsel %vm4770_vm11, %v4645_v32, %v4777_v20  ;;  %v4648_v32 = vperm.slane %v18529_v14, %v12447_v16  ;;  %v8604_v23 = vpop.eup %8603  ;;  %v3118_v1 = vsel %vm12680_vm13, %v12550_v19, %v3114_v21  ;;  %vm3160_vm9 = vweird.f32 %v12575_v17  ;;  %v18530_v20 = vld [vmem:[#allocation23_spill] sm:$0xff]  ;;  %v18535_v19 = vld [vmem:[#allocation34_spill] sm:$0xff]  ;;  %v18537_v14 = vld [vmem:[#allocation37_spill] sm:$0xff] }
 0x373   : > { %vm12686_vm6 = vcmp.eq.f32.partialorder %v18526_v30, 8.507059e+37  ;;  %v4897_v46 = vsel %vm4893_vm10, %v4778_v28, 0.0  ;;  %v4139_v48 = vmul.f32 1.2, %v3907_v6  ;;  %v4649_v30 = vperm.slane %v18530_v20, %v12447_v16  ;;  %v12701_v57 = vpop.eup %8605 }
 0x374   : > { %4898 = vadd.xlane.f32.xlu0 %v4897_v46  ;;  %vm18531_vm14 = vcmask 1041409   ;;  %18532 = vst [vmem:[#allocation25_spill] sm:$0xff] %v12701_v57  ;;  %v3186_v10 = vmul.f32 %v12671_v31, %v12607_v51  ;;  %v18536_v21 = vsel %vm11029_vm5, %v18534_v43, %v18535_v19  ;;  %v18538_v46 = vld [vmem:[#allocation30_spill] sm:$0xff]  ;;  %v12715_v13 = vpop.eup %8607  ;;  %v4650_v61 = vperm.slane %v12701_v57, %v12447_v16 }
 0x375   : > { %v4779_v47 = vsel %vm18531_vm14, %v4647_v0, %v4646_v37  ;;  %v2418_v6 = vsel %vm12634_vm15, %v18537_v14, %v18536_v21  ;;  %v3919_v59 = vmul.f32 0.6931472, %v18538_v46  ;;  %v3158_v0 = vmul.f32 %v12626_v35, %v3157_v53  ;;  %v12721_v39 = vpop.eup %8609 }
 0x376   : > { %v4780_v28 = vsel %vm17740_vm3, %v4648_v32, %v4779_v47  ;;  %v4290_v37 = vmul.f32 1.442695, %v4139_v48  ;;  %v18539_v47 = vld [vmem:[#allocation33_spill] sm:$0xff]  ;;  %18540 = vst [vmem:[#allocation26_spill] sm:$0xff] %v12721_v39  ;;  %8613 = vlog2.f32 %v2418_v6  ;;  %v4300_v14 = vmul.f32 1.442695, %v18541_v52 }
 0x377   : > { %v3921_v32 = vmul.f32 0.6931472, %v18539_v47  ;;  %v4781_v43 = vsel %vm18519_vm2, %v4649_v30, %v4780_v28  ;;  %v4145_v19 = vmul.f32 1.2, %v3919_v59  ;;  %vm3161_vm5 = vweird.f32 %v12626_v35  ;;  %v12728_v21 = vpop.eup %8611 }
 0x378   : > { %8615 = vpow2.f32 %v4290_v37  ;;  %v4651_v53 = vperm.slane %v12721_v39, %v12447_v16  ;;  %18542 = vst [vmem:[#allocation22_spill] sm:$0xff] %v12728_v21  ;;  %v3187_v46 = vsub.f32 1.0, %v3186_v10  ;;  %v3171_v47 = vmul.f32 %v12715_v13, %v12640_v45  ;;  %vm12757_vm14 = vmor %vm3160_vm9, %vm3161_vm5 }
 0x379   : > { %v4146_v48 = vmul.f32 1.2, %v3921_v32  ;;  %8617 = vpow2.f32 %v4300_v14  ;;  %v4302_v57 = vmul.f32 1.442695, %v4145_v19  ;;  %v3159_v30 = vadd.f32 %v12626_v35, %v3158_v0  ;;  %v18545_v32 = vld [vmem:[#allocation29_spill] sm:$0xff] }
 0x37a   : > { %v4652_v59 = vperm.slane %v12728_v21, %v12447_v16  ;;  %v4782_v28 = vsel %vm4764_vm0, %v4650_v61, %v4781_v43  ;;  %v4021_v37 = vmul.f32 0.6931472, %v8604_v23  ;;  %vm12736_vm15 = vcmp.eq.f32.partialorder %v3164_v33, 8.507059e+37  ;;  %v18546_v43 = vld [vmem:[#allocation39_spill] sm:$0xff] }
 0x37b   : > { %v4304_v6 = vmul.f32 1.442695, %v4146_v48  ;;  %v4783_v10 = vsel %vm4766_vm4, %v4651_v53, %v4782_v28  ;;  %v4655_v39 = vperm.slane %v18545_v32, %v12447_v16  ;;  %v3123_v0 = vsel %vm12686_vm6, %v12622_v3, %v3118_v1 }
 0x37c   : > { %v3167_v19 = vor.u32 1.1754944e-38, %v3166_v29  ;;  %v3194_v14 = vand.u32 2147483647, %v12607_v51  ;;  %8619 = vpow2.f32 %v4302_v57  ;;  %v8614_v61 = vpop.eup %8613  ;;  %v18547_v23 = vand.u32 2147483647, %v18546_v43  ;;  %v18552_v57 = vld [vmem:[#allocation27_spill] sm:$0xff] }
 0x37d   : > { %v3188_v3 = vmul.f32 %v12671_v31, %v3187_v46  ;;  %v3172_v60 = vsub.f32 1.0, %v3171_v47  ;;  %8621 = vpow2.f32 %v4304_v6  ;;  %v4654_v29 = vperm.slane %v18552_v57, %v12447_v16  ;;  %v18554_v43 = vld [vmem:[#allocation28_spill] sm:$0xff] }
 0x37e   : > { %vm12749_vm13 = vcmp.eq.f32.partialorder %v18547_v23, 8.507059e+37  ;;  %v12764_v1 = vpop.eup %8615  ;;  %v3163_v48 = vsel %vm12757_vm14, %v12626_v35, %v3159_v30  ;;  %v4784_v28 = vsel %vm4768_vm12, %v4652_v59, %v4783_v10  ;;  %v3923_v17 = vmul.f32 0.6931472, %v8614_v61  ;;  %v18556_v6 = vld [vmem:[#allocation32_spill] sm:$0xff] }
 0x37f   : > { %18553 = vst [vmem:[#allocation35_spill] sm:$0xff] %v12764_v1  ;;  %v4656_v23 = vperm.slane %v18554_v43, %v12447_v16  ;;  %v12772_v54 = vpop.eup %8617  ;;  %v4196_v46 = vmul.f32 1.2, %v4021_v37  ;;  %v4653_v47 = vperm.slane %v12764_v1, %v12447_v16  ;;  %v4657_v57 = vperm.slane %v18556_v6, %v12447_v16 }
 0x380   : > { %18555 = vst [vmem:[#allocation31_spill] sm:$0xff] %v12772_v54  ;;  %vm18557_vm6 = vcmask 1041409   ;;  %vm3190_vm9 = vweird.f32 %v12607_v51  ;;  %vm3191_vm2 = vweird.f32 %v12671_v31  ;;  %v3196_v35 = vand.u32 2147483648, %v12607_v51 }
 0x381   : > { %v4786_v11 = vsel %vm18557_vm6, %v4655_v39, %v4654_v29  ;;  %v4147_v30 = vmul.f32 1.2, %v3923_v17  ;;  %v3168_v59 = vsel %vm12736_vm15, %v3167_v19, %v3163_v48  ;;  %v3189_v37 = vadd.f32 %v12671_v31, %v3188_v3  ;;  %v1419_v3 = vpop.xlane.xlu0 %1418  ;;  %vm12804_vm14 = vmor %vm3190_vm9, %vm3191_vm2 }
 0x382   : > { %v3173_v10 = vmul.f32 %v12715_v13, %v3172_v60  ;;  %v4785_v61 = vsel %vm4770_vm11, %v4653_v47, %v4784_v28  ;;  %v12787_v53 = vpop.eup %8619  ;;  %v4658_v43 = vperm.slane %v12772_v54, %v12447_v16  ;;  %v4787_v1 = vsel %vm17740_vm3, %v4656_v23, %v4786_v11  ;;  %v18566_v47 = vld [vmem:[#allocation41_spill] sm:$0xff] }
 0x383   : > { %18558 = vst [vmem:[#allocation34_spill] sm:$0xff] %v12787_v53  ;;  %v4900_v39 = vsel %vm4893_vm10, %v4785_v61, 0.0  ;;  %v4306_v29 = vmul.f32 1.442695, %v4147_v30  ;;  %v12793_v17 = vpop.eup %8621  ;;  %8623 = vlog2.f32 %v3123_v0  ;;  %v4404_v52 = vmul.f32 1.442695, %v4196_v46 }
 0x384   : > { %18559 = vst [vmem:[#allocation37_spill] sm:$0xff] %v12793_v17  ;;  %vm12795_vm5 = vcmp.eq.f32.partialorder %v3194_v14, 8.507059e+37  ;;  %4901 = vadd.xlane.f32.xlu1 %v4900_v39  ;;  %vm18562_vm15 = vcmask 1043459   ;;  %v3197_v11 = vor.u32 1.1754944e-38, %v3196_v35  ;;  %vm3175_vm6 = vweird.f32 %v12640_v45  ;;  %v18567_v35 = vld [vmem:[#allocation45_spill] sm:$0xff]  ;;  %v18570_v61 = vld [vmem:[#allocation51_spill] sm:$0xff] }
 0x385   : > { %v4788_v60 = vsel %vm18562_vm15, %v4657_v57, %v4787_v1  ;;  %vm3176_vm3 = vweird.f32 %v12715_v13  ;;  %8625 = vpow2.f32 %v4306_v29  ;;  %v3193_v0 = vsel %vm12804_vm14, %v12671_v31, %v3189_v37  ;;  %v1425_v57 = vpop.xlane.xlu2 %1424  ;;  %v18571_v29 = vld [vmem:[#allocation44_spill] sm:$0xff] }
 0x386   : > { %8627 = vlog2.f32 %v3168_v59  ;;  %v3174_v14 = vadd.f32 %v12715_v13, %v3173_v10  ;;  %v4659_v51 = vperm.slane %v12787_v53, %v12447_v16  ;;  %v1640_v1 = vmul.f32 %v9734_v34, %v1419_v3  ;;  %v18569_v59 = vld [vmem:[#allocation47_spill] sm:$0xff]  ;;  %v1422_v10 = vpop.xlane.xlu1 %1421 }
 0x387   : > { %v4660_v28 = vperm.slane %v12793_v17, %v12447_v16  ;;  %v4789_v23 = vsel %vm4764_vm0, %v4658_v43, %v4788_v60  ;;  %v18568_v30 = vsel %vm11370_vm8, %v18566_v47, %v18567_v35  ;;  %8629 = vpow2.f32 %v4404_v52  ;;  %vm12837_vm8 = vmor %vm3175_vm6, %vm3176_vm3 }
 0x388   : > { %v2538_v31 = vsel %vm12749_vm13, %v18569_v59, %v18568_v30  ;;  %v3181_v37 = vand.u32 2147483648, %v12640_v45  ;;  %v3935_v39 = vmul.f32 0.6931472, %v18570_v61  ;;  %v3937_v3 = vmul.f32 0.6931472, %v18571_v29 }
 0x389   : > { %v3198_v43 = vsel %vm12795_vm5, %v3197_v11, %v3193_v0  ;;  %v3179_v33 = vand.u32 2147483647, %v12640_v45  ;;  %v1642_v52 = vmul.f32 %v9734_v34, %v1425_v57  ;;  %8631 = vlog2.f32 %v2538_v31  ;;  %v12843_v48 = vpop.eup %8623  ;;  %v18578_v31 = vld [vmem:[#allocation49_spill] sm:$0xff] }
 0x38a   : > { %v3178_v19 = vsel %vm12837_vm8, %v12715_v13, %v3174_v14  ;;  %v4790_v11 = vsel %vm4766_vm4, %v4659_v51, %v4789_v23  ;;  %v4153_v0 = vmul.f32 1.2, %v3935_v39  ;;  %v4154_v46 = vmul.f32 1.2, %v3937_v3 }
 0x38b   : > { %v12849_v47 = vpop.eup %8625  ;;  %v18575_v35 = vand.u32 2147483647, %v11314_v56  ;;  %v1768_v45 = vadd.f32 1.0, %v1640_v1  ;;  %v1641_v57 = vmul.f32 %v9734_v34, %v1422_v10  ;;  %v4791_v59 = vsel %vm4768_vm12, %v4660_v28, %v4790_v11  ;;  %v18579_v1 = vld [vmem:[#allocation40_spill] sm:$0xff] }
 0x38c   : > { %18574 = vst [vmem:[#allocation30_spill] sm:$0xff] %v12849_v47  ;;  %v4316_v61 = vmul.f32 1.442695, %v18578_v31  ;;  %v8628_v13 = vpop.eup %8627  ;;  %v12862_v14 = vmul.f32 %v12610_v5, %v12559_v55  ;;  %8633 = vlog2.f32 %v3198_v43  ;;  %v3182_v51 = vor.u32 1.1754944e-38, %v3181_v37  ;;  %v18588_v31 = vld [vmem:[#allocation56_spill] sm:$0xff] }
 0x38d   : > { %vm12853_vm3 = vcmp.eq.f32.partialorder %v18575_v35, 8.507059e+37  ;;  %v4661_v56 = vperm.slane %v12849_v47, %v12447_v16  ;;  %vm3180_vm13 = vcmp.eq.f32.partialorder %v3179_v33, 8.507059e+37  ;;  %v1770_v23 = vadd.f32 1.0, %v1642_v52  ;;  %v12868_v39 = vpop.eup %8629  ;;  %v18581_v33 = vld [vmem:[#allocation38_spill] sm:$0xff] }
 0x38e   : > { %8635 = vpow2.f32 %v4316_v61  ;;  %v4663_v10 = vperm.slane %v18579_v1, %v12447_v16  ;;  %18580 = vst [vmem:[#allocation33_spill] sm:$0xff] %v12868_v39  ;;  %v3183_v28 = vsel %vm3180_vm13, %v3182_v51, %v3178_v19  ;;  %v4318_v3 = vmul.f32 1.442695, %v4153_v0  ;;  %v18582_v19 = vld [vmem:[#allocation43_spill] sm:$0xff] }
 0x38f   : > { %v4792_v29 = vsel %vm4770_vm11, %v4661_v56, %v4791_v59  ;;  %v4320_v60 = vmul.f32 1.442695, %v4154_v46  ;;  %v8632_v11 = vpop.eup %8631  ;;  %v12871_v35 = vadd.f32 1e-08, %v1768_v45  ;;  %v1769_v37 = vadd.f32 1.0, %v1641_v57  ;;  %v18584_v59 = vld [vmem:[#allocation61_spill] sm:$0xff] }
 0x390   : > { %v4903_v43 = vsel %vm4893_vm10, %v4792_v29, 0.0  ;;  %v4662_v52 = vperm.slane %v18581_v33, %v12447_v16  ;;  %v3939_v61 = vmul.f32 0.6931472, %v8632_v11  ;;  %8637 = vpow2.f32 %v4318_v3  ;;  %v1434_v3 = vpop.xlane.xlu2 %1433 }
 0x391   : > { %4904 = vadd.xlane.f32.xlu2 %v4903_v43  ;;  %v4664_v51 = vperm.slane %v18582_v19, %v12447_v16  ;;  %v3127_v0 = vsub.f32 1.0, %v12862_v14  ;;  %v12880_v46 = vadd.f32 1e-08, %v1770_v23  ;;  %8639 = vpow2.f32 %v4320_v60  ;;  %v18590_v23 = vld [vmem:[#allocation42_spill] sm:$0xff] }
 0x392   : > { %vm18583_vm9 = vcmask 1041409   ;;  %v8634_v57 = vpop.eup %8633  ;;  %v18585_v56 = vand.u32 2147483647, %v18584_v59  ;;  %v4023_v43 = vmul.f32 0.6931472, %v8628_v13  ;;  %8641 = vlog2.f32 %v3183_v28  ;;  %v18594_v59 = vld [vmem:[#allocation57_spill] sm:$0xff]  ;;  %v12930_v28 = vpop.xlane.xlu0 %1427 }
 0x393   : > { %v4793_v45 = vsel %vm18583_vm9, %v4663_v10, %v4662_v52  ;;  %v4155_v11 = vmul.f32 1.2, %v3939_v61  ;;  %v3951_v33 = vmul.f32 0.6931472, %v18588_v31  ;;  %8643 = vrcp.f32 %v12871_v35  ;;  %v18593_v61 = vld [vmem:[#allocation46_spill] sm:$0xff]  ;;  %vm18617_vm14 = vmmov %vm18583_vm9 }
 0x394   : > { %vm12885_vm2 = vcmp.eq.f32.partialorder %v18585_v56, 8.507059e+37  ;;  %v12890_v53 = vpop.eup %8635  ;;  %v12893_v14 = vadd.f32 1e-08, %v1769_v37  ;;  %v4665_v10 = vperm.slane %v18590_v23, %v12447_v16  ;;  %vm18591_vm5 = vcmask 1042434   ;;  %v18596_v56 = vld [vmem:[#allocation50_spill] sm:$0xff]  ;;  %v18597_v37 = vld [vmem:[#allocation59_spill] sm:$0xff] }
 0x395   : > { %18589 = vst [vmem:[#allocation36_spill] sm:$0xff] %v12890_v53  ;;  %v4794_v60 = vsel %vm18591_vm5, %v4664_v51, %v4793_v45  ;;  %v4322_v52 = vmul.f32 1.442695, %v4155_v11  ;;  %v4666_v13 = vperm.slane %v12890_v53, %v12447_v16  ;;  %v18595_v31 = vsel %vm11681_vm1, %v18593_v61, %v18594_v59  ;;  %v18598_v45 = vld [vmem:[#allocation53_spill] sm:$0xff]  ;;  %vm18601_vm1 = vmmov %vm18562_vm15 }
 0x396   : > { %v2658_v1 = vsel %vm12853_vm3, %v18596_v56, %v18595_v31  ;;  %v3953_v17 = vmul.f32 0.6931472, %v18597_v37  ;;  %8645 = vrcp.f32 %v12880_v46  ;;  %v1645_v23 = vmul.f32 %v9734_v34, %v1434_v3  ;;  %v12912_v6 = vpop.eup %8637  ;;  %vm18619_vm6 = vmmov %vm18591_vm5 }
 0x397   : > { %v4161_v51 = vmul.f32 1.2, %v3951_v33  ;;  %v4332_v11 = vmul.f32 1.442695, %v18598_v45  ;;  %18599 = vst [vmem:[#allocation39_spill] sm:$0xff] %v12912_v6  ;;  %8647 = vpow2.f32 %v4322_v52  ;;  %v12915_v59 = vpop.eup %8639  ;;  %v4667_v30 = vperm.slane %v12912_v6, %v12447_v16  ;;  %v18606_v6 = vld [vmem:[#allocation66_spill] sm:$0xff]  ;;  %vm18621_vm8 = vmmov %vm18601_vm1 }
 0x398   : > { %v4027_v53 = vmul.f32 0.6931472, %v8634_v57  ;;  %v4162_v61 = vmul.f32 1.2, %v3953_v17  ;;  %18600 = vst [vmem:[#allocation48_spill] sm:$0xff] %v12915_v59  ;;  %v4795_v31 = vsel %vm18601_vm1, %v4665_v10, %v4794_v60  ;;  %8649 = vlog2.f32 %v2658_v1  ;;  %v8642_v3 = vpop.eup %8641  ;;  %v18602_v60 = vld [vmem:[#allocation54_spill] sm:$0xff]  ;;  %vm18627_vm3 = vmmov %vm18583_vm9 }
 0x399   : > { %v4334_v56 = vmul.f32 1.442695, %v4161_v51  ;;  %v12921_v33 = vmul.f32 0.6931472, %v12592_v62  ;;  %8651 = vrcp.f32 %v12893_v14  ;;  %v4796_v37 = vsel %vm4764_vm0, %v4666_v13, %v4795_v31  ;;  %v12925_v52 = vpop.eup %8643  ;;  %vm18630_vm9 = vmmov %vm18591_vm5 }
 0x39a   : > { %v4336_v57 = vmul.f32 1.442695, %v4162_v61  ;;  %v12928_v17 = vmul.f32 %v12610_v5, %v3127_v0  ;;  %v4197_v45 = vmul.f32 1.2, %v4023_v43  ;;  %v1773_v10 = vadd.f32 1.0, %v1645_v23  ;;  %v18603_v0 = vld [vmem:[#allocation52_spill] sm:$0xff]  ;;  %vm18636_vm5 = vmmov %vm18601_vm1 }
 0x39b   : > { %8653 = vpow2.f32 %v4332_v11  ;;  %v4199_v1 = vmul.f32 1.2, %v4027_v53  ;;  %v4668_v62 = vperm.slane %v12915_v59, %v12447_v16  ;;  %v4670_v51 = vperm.slane %v18602_v60, %v12447_v16  ;;  %v18604_v43 = vld [vmem:[#allocation71_spill] sm:$0xff]  ;;  %v18607_v23 = vld [vmem:[#allocation69_spill] sm:$0xff]  ;;  %v18609_v53 = vld [vmem:[#allocation68_spill] sm:$0xff] }
 0x39c   : > { %8655 = vpow2.f32 %v4334_v56  ;;  %v12936_v13 = vpop.eup %8645  ;;  %v4797_v61 = vsel %vm4766_vm4, %v4667_v30, %v4796_v37  ;;  %v4671_v31 = vperm.slane %v18603_v0, %v12447_v16  ;;  %vm18605_vm15 = vnez %v18604_v43  ;;  %v18610_v56 = vld [vmem:[#allocation65_spill] sm:$0xff]  ;;  %v18612_v30 = vld [vmem:[#allocation55_spill] sm:$0xff]  ;;  %v18613_v0 = vld [vmem:[#allocation72_spill] sm:$0xff] }
 0x39d   : > { %v18608_v11 = vsel %vm18605_vm15, %v18606_v6, %v18607_v23  ;;  %v3967_v19 = vmul.f32 0.6931472, %v18610_v56  ;;  %v12950_v47 = vpop.eup %8647  ;;  %v3201_v60 = vmul.f32 %v12925_v52, %v12871_v35  ;;  %8657 = vpow2.f32 %v4336_v57  ;;  %v18614_v23 = vld [vmem:[#allocation67_spill] sm:$0xff]  ;;  %v1431_v56 = vpop.xlane.xlu1 %1430 }
 0x39e   : > { %v2778_v59 = vsel %vm12885_vm2, %v18609_v53, %v18608_v11  ;;  %18611 = vst [vmem:[#allocation41_spill] sm:$0xff] %v12950_v47  ;;  %v4672_v37 = vperm.slane %v18612_v30, %v12447_v16  ;;  %v3969_v43 = vmul.f32 0.6931472, %v18613_v0  ;;  %v8650_v54 = vpop.eup %8649  ;;  %v12957_v58 = vadd.f32 1e-08, %v1773_v10  ;;  %v18616_v10 = vld [vmem:[#allocation58_spill] sm:$0xff] }
 0x39f   : > { %v4669_v6 = vperm.slane %v12950_v47, %v12447_v16  ;;  %v4169_v29 = vmul.f32 1.2, %v3967_v19  ;;  %v4348_v11 = vmul.f32 1.442695, %v18614_v23  ;;  %v12962_v53 = vpop.eup %8651  ;;  %v4798_v32 = vsel %vm4768_vm12, %v4668_v62, %v4797_v61 }
 0x3a0   : > { %v3955_v57 = vmul.f32 0.6931472, %v8650_v54  ;;  %8659 = vlog2.f32 %v2778_v59  ;;  %v4170_v26 = vmul.f32 1.2, %v3969_v43  ;;  %v4673_v2 = vperm.slane %v18616_v10, %v12447_v16 }
 0x3a1   : > { %v12965_v30 = vpop.eup %8653  ;;  %v4799_v0 = vsel %vm4770_vm11, %v4669_v6, %v4798_v32  ;;  %v4800_v47 = vsel %vm18617_vm14, %v4671_v31, %v4670_v51  ;;  %v4350_v19 = vmul.f32 1.442695, %v4169_v29  ;;  %8661 = vpow2.f32 %v4348_v11  ;;  %v1437_v29 = vpop.xlane.xlu0 %1436 }
 0x3a2   : > { %18615 = vst [vmem:[#allocation45_spill] sm:$0xff] %v12965_v30  ;;  %v12971_v21 = vpop.eup %8655  ;;  %v4906_v23 = vsel %vm4893_vm10, %v4799_v0, 0.0  ;;  %v4163_v20 = vmul.f32 1.2, %v3955_v57  ;;  %v4801_v62 = vsel %vm18619_vm6, %v4672_v37, %v4800_v47  ;;  %v4406_v54 = vmul.f32 1.442695, %v4197_v45 }
 0x3a3   : > { %18618 = vst [vmem:[#allocation47_spill] sm:$0xff] %v12971_v21  ;;  %8663 = vrcp.f32 %v12957_v58  ;;  %v1644_v59 = vmul.f32 %v9734_v34, %v1431_v56  ;;  %4907 = vadd.xlane.f32.xlu0 %v4906_v23  ;;  %v4352_v32 = vmul.f32 1.442695, %v4170_v26  ;;  %v12977_v61 = vpop.eup %8657  ;;  %v4410_v43 = vmul.f32 1.442695, %v4199_v1  ;;  %v18622_v45 = vld [vmem:[#allocation64_spill] sm:$0xff] }
 0x3a4   : > { %18620 = vst [vmem:[#allocation51_spill] sm:$0xff] %v12977_v61  ;;  %v4338_v51 = vmul.f32 1.442695, %v4163_v20  ;;  %v4674_v31 = vperm.slane %v12965_v30, %v12447_v16  ;;  %8665 = vpow2.f32 %v4350_v19  ;;  %v4675_v6 = vperm.slane %v12971_v21, %v12447_v16  ;;  %v18623_v20 = vld [vmem:[#allocation62_spill] sm:$0xff]  ;;  %v18624_v23 = vld [vmem:[#allocation63_spill] sm:$0xff] }
 0x3a5   : > { %v4802_v47 = vsel %vm18621_vm8, %v4673_v2, %v4801_v62  ;;  %8667 = vpow2.f32 %v4352_v32  ;;  %v4679_v37 = vperm.slane %v18622_v45, %v12447_v16  ;;  %v4025_v26 = vmul.f32 0.6931472, %v8642_v3  ;;  %v18626_v30 = vld [vmem:[#allocation70_spill] sm:$0xff] }
 0x3a6   : > { %v8660_v11 = vpop.eup %8659  ;;  %v3202_v56 = vsub.f32 1.0, %v3201_v60  ;;  %8669 = vpow2.f32 %v4338_v51  ;;  %v4678_v1 = vperm.slane %v18623_v20, %v12447_v16  ;;  %v1772_v57 = vadd.f32 1.0, %v1644_v59 }
 0x3a7   : > { %v4676_v0 = vperm.slane %v12977_v61, %v12447_v16  ;;  %v3971_v19 = vmul.f32 0.6931472, %v8660_v11  ;;  %v4680_v2 = vperm.slane %v18624_v23, %v12447_v16  ;;  %v12992_v62 = vpop.eup %8661  ;;  %v4803_v32 = vsel %vm4764_vm0, %v4674_v31, %v4802_v47 }
 0x3a8   : > { %18625 = vst [vmem:[#allocation44_spill] sm:$0xff] %v12992_v62  ;;  %v4681_v3 = vperm.slane %v18626_v30, %v12447_v16  ;;  %v4807_v60 = vsel %vm18627_vm3, %v4679_v37, %v4678_v1  ;;  %v1646_v51 = vmul.f32 %v9734_v34, %v1437_v29  ;;  %8671 = vpow2.f32 %v4406_v54 }
 0x3a9   : > { %v12999_v20 = vpop.eup %8663  ;;  %v3209_v59 = vand.u32 2147483647, %v12871_v35  ;;  %v4804_v11 = vsel %vm4766_vm4, %v4675_v6, %v4803_v32  ;;  %v4171_v21 = vmul.f32 1.2, %v3971_v19  ;;  %8673 = vpow2.f32 %v4410_v43  ;;  %v18632_v32 = vld [vmem:[#allocation74_spill] sm:$0xff] }
 0x3aa   : > { %v13003_v23 = vpop.eup %8665  ;;  %v3203_v31 = vmul.f32 %v12925_v52, %v3202_v56  ;;  %vm3205_vm13 = vweird.f32 %v12871_v35  ;;  %v3231_v47 = vmul.f32 %v12936_v13, %v12880_v46  ;;  %v4198_v29 = vmul.f32 1.2, %v4025_v26 }
 0x3ab   : > { %18628 = vst [vmem:[#allocation49_spill] sm:$0xff] %v13003_v23  ;;  %v13009_v37 = vpop.eup %8667  ;;  %v4354_v1 = vmul.f32 1.442695, %v4171_v21  ;;  %v4682_v54 = vperm.slane %v12992_v62, %v12447_v16  ;;  %v4808_v6 = vsel %vm18630_vm9, %v4680_v2, %v4807_v60  ;;  %v18633_v43 = vand.u32 2147483647, %v18632_v32 }
 0x3ac   : > { %18629 = vst [vmem:[#allocation61_spill] sm:$0xff] %v13009_v37  ;;  %v13014_v19 = vpop.eup %8669  ;;  %v13022_v30 = vadd.f32 1e-08, %v1772_v57  ;;  %v4805_v45 = vsel %vm4768_vm12, %v4676_v0, %v4804_v11  ;;  %v4809_v26 = vsel %vm18636_vm5, %v4681_v3, %v4808_v6  ;;  %v1774_v21 = vadd.f32 1.0, %v1646_v51  ;;  %v1440_v3 = vpop.xlane.xlu1 %1439 }
 0x3ad   : > { %18631 = vst [vmem:[#allocation56_spill] sm:$0xff] %v13014_v19  ;;  %vm13018_vm2 = vcmp.eq.f32.partialorder %v18633_v43, 8.507059e+37  ;;  %vm13026_vm1 = vcmp.eq.f32.partialorder %v3209_v59, 8.507059e+37  ;;  %v3211_v2 = vand.u32 2147483648, %v12871_v35  ;;  %v4677_v60 = vperm.slane %v13014_v19, %v12447_v16 }
 0x3ae   : > { %8675 = vpow2.f32 %v4354_v1  ;;  %v3204_v32 = vadd.f32 %v12925_v52, %v3203_v31  ;;  %vm3206_vm15 = vweird.f32 %v12925_v52  ;;  %v3232_v57 = vsub.f32 1.0, %v3231_v47  ;;  %v13037_v51 = vpop.eup %8671  ;;  %v1443_v31 = vpop.xlane.xlu2 %1442 }
 0x3af   : > { %v4683_v0 = vperm.slane %v13003_v23, %v12447_v16  ;;  %18639 = vst [vmem:[#allocation60_spill] sm:$0xff] %v13037_v51  ;;  %v3276_v59 = vmul.f32 %v12999_v20, %v12957_v58  ;;  %v4806_v11 = vsel %vm4770_vm11, %v4677_v60, %v4805_v45  ;;  %v4684_v6 = vperm.slane %v13009_v37, %v12447_v16  ;;  %v13045_v43 = vpop.eup %8673  ;;  %vm13063_vm14 = vmor %vm3205_vm13, %vm3206_vm15 }
 0x3b0   : > { %v4810_v1 = vsel %vm4764_vm0, %v4682_v54, %v4809_v26  ;;  %18640 = vst [vmem:[#allocation46_spill] sm:$0xff] %v13045_v43  ;;  %v1643_v47 = vmul.f32 %v9734_v34, %v12930_v28  ;;  %8677 = vrcp.f32 %v13022_v30  ;;  %v4909_v23 = vsel %vm4893_vm10, %v4806_v11, 0.0 }
 0x3b1   : > { %v13051_v19 = vadd.f32 1e-08, %v1774_v21  ;;  %v13053_v62 = vmul.f32 1.442695, %v4198_v29  ;;  %v3216_v60 = vmul.f32 %v12962_v53, %v12893_v14  ;;  %4910 = vadd.xlane.f32.xlu1 %v4909_v23  ;;  %v1647_v54 = vmul.f32 %v9734_v34, %v1440_v3 }
 0x3b2   : > { %v3212_v26 = vor.u32 1.1754944e-38, %v3211_v2  ;;  %v4811_v21 = vsel %vm4766_vm4, %v4683_v0, %v4810_v1  ;;  %v1648_v11 = vmul.f32 %v9734_v34, %v1443_v31  ;;  %v3208_v23 = vsel %vm13063_vm14, %v12925_v52, %v3204_v32  ;;  %v18644_v0 = vld [vmem:[#allocation84_spill] sm:$0xff] }
 0x3b3   : > { %v3233_v3 = vmul.f32 %v12936_v13, %v3232_v57  ;;  %v3277_v35 = vsub.f32 1.0, %v3276_v59  ;;  %v4812_v37 = vsel %vm4768_vm12, %v4684_v6, %v4811_v21  ;;  %v1771_v10 = vadd.f32 1.0, %v1643_v47  ;;  %v18648_v59 = vld [vmem:[#allocation83_spill] sm:$0xff]  ;;  %v18650_v6 = vld [vmem:[#allocation78_spill] sm:$0xff] }
 0x3b4   : > { %v13070_v45 = vpop.eup %8675  ;;  %8679 = vrcp.f32 %v13051_v19  ;;  %v3983_v1 = vmul.f32 0.6931472, %v18644_v0  ;;  %v18645_v31 = vand.u32 2147483647, %v12168_v15  ;;  %v3217_v52 = vsub.f32 1.0, %v3216_v60  ;;  %v18651_v47 = vld [vmem:[#allocation82_spill] sm:$0xff] }
 0x3b5   : > { %18643 = vst [vmem:[#allocation57_spill] sm:$0xff] %v13070_v45  ;;  %v4685_v2 = vperm.slane %v13070_v45, %v12447_v16  ;;  %v1775_v57 = vadd.f32 1.0, %v1647_v54  ;;  %vm18649_vm8 = vnez %v18648_v59  ;;  %v18653_v21 = vld [vmem:[#allocation79_spill] sm:$0xff]  ;;  %v3213_v15 = vsel %vm13026_vm1, %v3212_v26, %v3208_v23  ;;  %v18655_v26 = vld [vmem:[#allocation80_spill] sm:$0xff] }
 0x3b6   : > { %vm13083_vm6 = vcmp.eq.f32.partialorder %v18645_v31, 8.507059e+37  ;;  %v18652_v28 = vsel %vm18649_vm8, %v18650_v6, %v18651_v47  ;;  %v13096_v0 = vpop.eup %8677  ;;  %v1776_v60 = vadd.f32 1.0, %v1648_v11  ;;  %v3985_v32 = vmul.f32 0.6931472, %v18654_v49 }
 0x3b7   : > { %v2898_v45 = vsel %vm13018_vm2, %v18653_v21, %v18652_v28  ;;  %v4813_v31 = vsel %vm4770_vm11, %v4685_v2, %v4812_v37  ;;  %v13103_v54 = vadd.f32 %v12936_v13, %v3233_v3  ;;  %v3278_v6 = vmul.f32 %v12999_v20, %v3277_v35 }
 0x3b8   : > { %v4912_v56 = vsel %vm4893_vm10, %v4813_v31, 0.0  ;;  %v13108_v47 = vadd.f32 1e-08, %v1771_v10  ;;  %v3284_v28 = vand.u32 2147483647, %v12957_v58  ;;  %8681 = vlog2.f32 %v2898_v45 }
 0x3b9   : > { %4913 = vadd.xlane.f32.xlu2 %v4912_v56  ;;  %v4177_v61 = vmul.f32 1.2, %v3983_v1  ;;  %8683 = vlog2.f32 %v3213_v15  ;;  %v3261_v49 = vmul.f32 %v13096_v0, %v13022_v30  ;;  %v13113_v37 = vadd.f32 1e-08, %v1775_v57  ;;  %v18658_v57 = vld [vmem:[#allocation75_spill] sm:$0xff] }
 0x3ba   : > { %v4364_v11 = vmul.f32 1.442695, %v18655_v26  ;;  %v13116_v23 = vpop.eup %8679  ;;  %v13119_v3 = vmul.f32 %v12962_v53, %v3217_v52  ;;  %vm3280_vm3 = vweird.f32 %v12957_v58  ;;  %v13122_v10 = vadd.f32 1e-08, %v1776_v60  ;;  %v18663_v26 = vld [vmem:[#allocation86_spill] sm:$0xff] }
 0x3bb   : > { %v4178_v35 = vmul.f32 1.2, %v3985_v32  ;;  %v3279_v45 = vadd.f32 %v12999_v20, %v3278_v6  ;;  %vm3281_vm13 = vweird.f32 %v12999_v20  ;;  %v4366_v2 = vmul.f32 1.442695, %v4177_v61 }
 0x3bc   : > { %8685 = vpow2.f32 %v4364_v11  ;;  %vm13127_vm9 = vcmp.eq.f32.partialorder %v3284_v28, 8.507059e+37  ;;  %v3286_v52 = vand.u32 2147483648, %v12957_v58  ;;  %v4687_v21 = vperm.slane %v18658_v57, %v12447_v16  ;;  %vm13140_vm2 = vmor %vm3280_vm3, %vm3281_vm13  ;;  %v18661_v28 = vld [vmem:[#allocation73_spill] sm:$0xff] }
 0x3bd   : > { %8687 = vrcp.f32 %v13108_v47  ;;  %v3262_v15 = vsub.f32 1.0, %v3261_v49  ;;  %v3269_v32 = vand.u32 2147483647, %v13022_v30  ;;  %v3291_v31 = vmul.f32 %v13116_v23, %v13051_v19 }
 0x3be   : > { %8689 = vrcp.f32 %v13113_v37  ;;  %v8682_v60 = vpop.eup %8681  ;;  %v4368_v56 = vmul.f32 1.442695, %v4178_v35  ;;  %v4686_v61 = vperm.slane %v18661_v28, %v12447_v16  ;;  %v18662_v49 = vsel %vm12543_vm7, %v12211_v4, %v12526_v22  ;;  %v18664_v35 = vld [vmem:[#allocation77_spill] sm:$0xff] }
 0x3bf   : > { %8691 = vrcp.f32 %v13122_v10  ;;  %v3018_v11 = vsel %vm13083_vm6, %v18663_v26, %v18662_v49  ;;  %v13155_v58 = vpop.eup %8683  ;;  %v3283_v59 = vsel %vm13140_vm2, %v12999_v20, %v3279_v45  ;;  %v3987_v57 = vmul.f32 0.6931472, %v8682_v60 }
 0x3c0   : > { %8693 = vpow2.f32 %v4366_v2  ;;  %v4688_v28 = vperm.slane %v18664_v35, %v12447_v16  ;;  %vm18665_vm5 = vcmask 1041409   ;;  %v3999_v42 = vmul.f32 0.6931472, %v12370_v18  ;;  %v18667_v2 = vld [vmem:[#allocation76_spill] sm:$0xff] }
 0x3c1   : > { %v4814_v63 = vsel %vm18665_vm5, %v4687_v21, %v4686_v61  ;;  %v4001_v4 = vmul.f32 0.6931472, %v12421_v27  ;;  %8695 = vlog2.f32 %v3018_v11  ;;  %v3263_v29 = vmul.f32 %v13096_v0, %v3262_v15  ;;  %vm18680_vm3 = vmmov %vm18665_vm5 }
 0x3c2   : > { %v13165_v22 = vpop.eup %8685  ;;  %v3292_v49 = vsub.f32 1.0, %v3291_v31  ;;  %v4179_v26 = vmul.f32 1.2, %v3987_v57  ;;  %v4380_v20 = vmul.f32 1.442695, %v12373_v24  ;;  %8697 = vpow2.f32 %v4368_v56 }
 0x3c3   : > { %18666 = vst [vmem:[#allocation50_spill] sm:$0xff] %v13165_v22  ;;  %v13169_v45 = vpop.eup %8687  ;;  %v4689_v60 = vperm.slane %v18667_v2, %v12447_v16  ;;  %v4185_v21 = vmul.f32 1.2, %v3999_v42  ;;  %v4186_v6 = vmul.f32 1.2, %v4001_v4  ;;  %v3287_v27 = vor.u32 1.1754944e-38, %v3286_v52 }
 0x3c4   : > { %v13173_v18 = vpop.eup %8689  ;;  %v4370_v61 = vmul.f32 1.442695, %v4179_v26  ;;  %vm18668_vm7 = vcmask 1042434   ;;  %8699 = vpow2.f32 %v4380_v20  ;;  %vm3265_vm1 = vweird.f32 %v13022_v30 }
 0x3c5   : > { %v4815_v11 = vsel %vm18668_vm7, %v4688_v28, %v4814_v63  ;;  %v13176_v15 = vpop.eup %8691  ;;  %vm3266_vm15 = vweird.f32 %v13096_v0  ;;  %v3271_v24 = vand.u32 2147483648, %v13022_v30  ;;  %v4690_v57 = vperm.slane %v13165_v22, %v12447_v16  ;;  %v18672_v63 = vld [vmem:[#allocation87_spill] sm:$0xff]  ;;  %vm18681_vm13 = vmmov %vm18668_vm7 }
 0x3c6   : > { %v13183_v42 = vpop.eup %8693  ;;  %v3288_v52 = vsel %vm13127_vm9, %v3287_v27, %v3283_v59  ;;  %v3264_v31 = vadd.f32 %v13096_v0, %v3263_v29  ;;  %vm13188_vm14 = vcmp.eq.f32.partialorder %v3269_v32, 8.507059e+37  ;;  %v4382_v28 = vmul.f32 1.442695, %v4185_v21  ;;  %v13198_v59 = vpop.xlane.xlu0 %1445  ;;  %v18674_v29 = vld [vmem:[#allocation85_spill] sm:$0xff]  ;;  %v18675_v21 = vld [vmem:[#allocation88_spill] sm:$0xff]  ;;  %vm13217_vm8 = vmor %vm3265_vm1, %vm3266_vm15 }
 0x3c7   : > { %18669 = vst [vmem:[#allocation59_spill] sm:$0xff] %v13183_v42  ;;  %v4694_v4 = vperm.slane %v18672_v63, %v12447_v16  ;;  %v8696_v26 = vpop.eup %8695  ;;  %v3293_v20 = vmul.f32 %v13116_v23, %v3292_v49  ;;  %v3306_v2 = vmul.f32 %v13173_v18, %v13113_v37  ;;  %vm18673_vm6 = vcmask 1043459  }
 0x3c8   : > { %v4816_v22 = vsel %vm18673_vm6, %v4689_v60, %v4815_v11  ;;  %v4384_v1 = vmul.f32 1.442695, %v4186_v6  ;;  %8701 = vpow2.f32 %v4370_v61  ;;  %v4003_v32 = vmul.f32 0.6931472, %v8696_v26  ;;  %v13204_v63 = vpop.eup %8697  ;;  %vm18683_vm1 = vmmov %vm18673_vm6 }
 0x3c9   : > { %v4695_v27 = vperm.slane %v18674_v29, %v12447_v16  ;;  %v4696_v35 = vperm.slane %v18675_v21, %v12447_v16  ;;  %18676 = vst [vmem:[#allocation53_spill] sm:$0xff] %v13204_v63  ;;  %v3321_v49 = vmul.f32 %v13176_v15, %v13122_v10  ;;  %v4691_v36 = vperm.slane %v13183_v42, %v12447_v16 }
 0x3ca   : > { %v4817_v60 = vsel %vm4764_vm0, %v4690_v57, %v4816_v22  ;;  %8703 = vpow2.f32 %v4382_v28  ;;  %v13211_v6 = vpop.eup %8699  ;;  %v4187_v11 = vmul.f32 1.2, %v4003_v32  ;;  %v4697_v26 = vperm.slane %v12414_v41, %v12447_v16 }
 0x3cb   : > { %18677 = vst [vmem:[#allocation71_spill] sm:$0xff] %v13211_v6  ;;  %8705 = vpow2.f32 %v4384_v1  ;;  %v4821_v29 = vsel %vm18680_vm3, %v4695_v27, %v4694_v4  ;;  %v3268_v22 = vsel %vm13217_vm8, %v13096_v0, %v3264_v31  ;;  %v3301_v57 = vand.u32 2147483648, %v13051_v19 }
 0x3cc   : > { %v3307_v28 = vsub.f32 1.0, %v3306_v2  ;;  %v4822_v30 = vsel %vm18681_vm13, %v4696_v35, %v4821_v29  ;;  %vm3235_vm9 = vweird.f32 %v12880_v46  ;;  %vm3236_vm2 = vweird.f32 %v12936_v13 }
 0x3cd   : > { %v3294_v1 = vadd.f32 %v13116_v23, %v3293_v20  ;;  %vm3296_vm5 = vweird.f32 %v13116_v23  ;;  %v4692_v4 = vperm.slane %v13204_v63, %v12447_v16  ;;  %v4386_v32 = vmul.f32 1.442695, %v4187_v11 }
 0x3ce   : > { %v3272_v27 = vor.u32 1.1754944e-38, %v3271_v24  ;;  %v3322_v61 = vsub.f32 1.0, %v3321_v49  ;;  %v4818_v0 = vsel %vm4766_vm4, %v4691_v36, %v4817_v60  ;;  %v4698_v2 = vperm.slane %v13211_v6, %v12447_v16  ;;  %v13238_v35 = vpop.eup %8701  ;;  %v13256_v60 = vpop.xlane.xlu2 %1451 }
 0x3cf   : > { %18682 = vst [vmem:[#allocation66_spill] sm:$0xff] %v13238_v35  ;;  %vm3295_vm7 = vweird.f32 %v13051_v19  ;;  %v3299_v31 = vand.u32 2147483647, %v13051_v19  ;;  %8707 = vpow2.f32 %v4386_v32  ;;  %v4823_v20 = vsel %vm18683_vm1, %v4697_v26, %v4822_v30  ;;  %v1455_v6 = vpop.xlane.xlu0 %1454 }
 0x3d0   : > { %v13243_v29 = vpop.eup %8703  ;;  %8709 = vlog2.f32 %v3288_v52  ;;  %v3273_v24 = vsel %vm13188_vm14, %v3272_v27, %v3268_v22  ;;  %vm13249_vm15 = vmor %vm3295_vm7, %vm3296_vm5  ;;  %v3308_v49 = vmul.f32 %v13173_v18, %v3307_v28  ;;  %v4693_v19 = vperm.slane %v13238_v35, %v12447_v16 }
 0x3d1   : > { %18684 = vst [vmem:[#allocation69_spill] sm:$0xff] %v13243_v29  ;;  %v13258_v11 = vpop.eup %8705  ;;  %v3298_v52 = vsel %vm13249_vm15, %v13116_v23, %v3294_v1  ;;  %v3302_v56 = vor.u32 1.1754944e-38, %v3301_v57  ;;  %v4819_v26 = vsel %vm4768_vm12, %v4692_v4, %v4818_v0  ;;  %v4699_v22 = vperm.slane %v13243_v29, %v12447_v16 }
 0x3d2   : > { %18687 = vst [vmem:[#allocation68_spill] sm:$0xff] %v13258_v11  ;;  %v3323_v30 = vmul.f32 %v13176_v15, %v3322_v61  ;;  %v4820_v28 = vsel %vm4770_vm11, %v4693_v19, %v4819_v26  ;;  %v4700_v32 = vperm.slane %v13258_v11, %v12447_v16  ;;  %v4824_v27 = vsel %vm4764_vm0, %v4698_v2, %v4823_v20 }
 0x3d3   : > { %8711 = vlog2.f32 %v3273_v24  ;;  %vm3300_vm14 = vcmp.eq.f32.partialorder %v3299_v31, 8.507059e+37  ;;  %v4915_v23 = vsel %vm4893_vm10, %v4820_v28, 0.0  ;;  %v4825_v57 = vsel %vm4766_vm4, %v4699_v22, %v4824_v27 }
 0x3d4   : > { %vm3220_vm6 = vweird.f32 %v12893_v14  ;;  %v3303_v1 = vsel %vm3300_vm14, %v3302_v56, %v3298_v52  ;;  %vm3325_vm8 = vweird.f32 %v13122_v10  ;;  %v3309_v4 = vadd.f32 %v13173_v18, %v3308_v49  ;;  %4916 = vadd.xlane.f32.xlu0 %v4915_v23  ;;  %v1449_v56 = vpop.xlane.xlu1 %1448  ;;  %vm13309_vm14 = vmor %vm3235_vm9, %vm3236_vm2 }
 0x3d5   : > { %vm3311_vm3 = vweird.f32 %v13173_v18  ;;  %v13277_v61 = vpop.eup %8707  ;;  %vm3310_vm13 = vweird.f32 %v13113_v37  ;;  %v3316_v0 = vand.u32 2147483648, %v13113_v37  ;;  %v4826_v2 = vsel %vm4768_vm12, %v4700_v32, %v4825_v57 }
 0x3d6   : > { %18688 = vst [vmem:[#allocation65_spill] sm:$0xff] %v13277_v61  ;;  %v1652_v31 = vmul.f32 %v9734_v34, %v1455_v6  ;;  %v8710_v20 = vpop.eup %8709  ;;  %v18689_v24 = vand.u32 2147483647, %v12880_v46  ;;  %v3324_v49 = vadd.f32 %v13176_v15, %v3323_v30  ;;  %vm3326_vm7 = vweird.f32 %v13176_v15  ;;  %vm13301_vm15 = vmor %vm3310_vm13, %vm3311_vm3 }
 0x3d7   : > { %v3314_v19 = vand.u32 2147483647, %v13113_v37  ;;  %v4701_v52 = vperm.slane %v13277_v61, %v12447_v16  ;;  %vm3221_vm1 = vweird.f32 %v12962_v53  ;;  %8713 = vlog2.f32 %v3303_v1  ;;  %vm13329_vm9 = vmor %vm3325_vm8, %vm3326_vm7 }
 0x3d8   : > { %vm13285_vm5 = vcmp.eq.f32.partialorder %v18689_v24, 8.507059e+37  ;;  %v3329_v6 = vand.u32 2147483647, %v13122_v10  ;;  %v3331_v26 = vand.u32 2147483648, %v13122_v10  ;;  %v3313_v28 = vsel %vm13301_vm15, %v13173_v18, %v3309_v4  ;;  %vm13350_vm7 = vmor %vm3220_vm6, %vm3221_vm1 }
 0x3d9   : > { %v4827_v32 = vsel %vm4770_vm11, %v4701_v52, %v4826_v2  ;;  %v1649_v37 = vmul.f32 %v9734_v34, %v13198_v59  ;;  %v1780_v27 = vadd.f32 1.0, %v1652_v31  ;;  %v8712_v23 = vpop.eup %8711  ;;  %v3238_v57 = vsel %vm13309_vm14, %v12936_v13, %v13103_v54  ;;  %v1461_v54 = vpop.xlane.xlu2 %1460 }
 0x3da   : > { %v3219_v1 = vadd.f32 %v12962_v53, %v13119_v3  ;;  %v3317_v4 = vor.u32 1.1754944e-38, %v3316_v0  ;;  %v4918_v59 = vsel %vm4893_vm10, %v4827_v32, 0.0  ;;  %v4039_v2 = vmul.f32 0.6931472, %v8710_v20 }
 0x3db   : > { %v3328_v31 = vsel %vm13329_vm9, %v13176_v15, %v3324_v49  ;;  %vm3315_vm2 = vcmp.eq.f32.partialorder %v3314_v19, 8.507059e+37  ;;  %4919 = vadd.xlane.f32.xlu1 %v4918_v59  ;;  %v13337_v13 = vadd.f32 1e-08, %v1780_v27  ;;  %vm3131_vm3 = vweird.f32 %v12610_v5 }
 0x3dc   : > { %v3332_v3 = vor.u32 1.1754944e-38, %v3331_v26  ;;  %v3318_v10 = vsel %vm3315_vm2, %v3317_v4, %v3313_v28  ;;  %v1650_v24 = vmul.f32 %v9734_v34, %v1449_v56  ;;  %v1654_v0 = vmul.f32 %v9734_v34, %v1461_v54 }
 0x3dd   : > { %v4037_v52 = vmul.f32 0.6931472, %v8712_v23  ;;  %vm3330_vm8 = vcmp.eq.f32.partialorder %v3329_v6, 8.507059e+37  ;;  %v1777_v20 = vadd.f32 1.0, %v1649_v37  ;;  %8715 = vrcp.f32 %v13337_v13  ;;  %v8714_v22 = vpop.eup %8713 }
 0x3de   : > { %vm3130_vm13 = vweird.f32 %v12559_v55  ;;  %v18698_v15 = vand.u32 2147483648, %v12880_v46  ;;  %v3246_v56 = vmul.f32 %v13169_v45, %v13108_v47  ;;  %v3333_v6 = vsel %vm3330_vm8, %v3332_v3, %v3328_v31 }
 0x3df   : > { %v1782_v26 = vadd.f32 1.0, %v1654_v0  ;;  %v3223_v30 = vsel %vm13350_vm7, %v12962_v53, %v3219_v1  ;;  %v18701_v46 = vand.u32 2147483647, %v12893_v14  ;;  %v4205_v28 = vmul.f32 1.2, %v4039_v2  ;;  %v1458_v53 = vpop.xlane.xlu1 %1457 }
 0x3e0   : > { %v3242_v49 = vor.u32 1.1754944e-38, %v18698_v15  ;;  %8717 = vlog2.f32 %v3318_v10  ;;  %v18702_v37 = vand.u32 2147483648, %v12893_v14  ;;  %v1778_v23 = vadd.f32 1.0, %v1650_v24 }
 0x3e1   : > { %vm3225_vm15 = vcmp.eq.f32.partialorder %v18701_v46, 8.507059e+37  ;;  %v13365_v18 = vadd.f32 1e-08, %v1782_v26  ;;  %v4204_v4 = vmul.f32 1.2, %v4037_v52  ;;  %8719 = vlog2.f32 %v3333_v6 }
 0x3e2   : > { %v3243_v32 = vsel %vm13285_vm5, %v3242_v49, %v3238_v57  ;;  %v3227_v27 = vor.u32 1.1754944e-38, %v18702_v37  ;;  %v4041_v59 = vmul.f32 0.6931472, %v8714_v22  ;;  %v13367_v31 = vadd.f32 1e-08, %v1777_v20  ;;  %vm13398_vm5 = vmor %vm3130_vm13, %vm3131_vm3 }
 0x3e3   : > { %v3129_v1 = vadd.f32 %v12610_v5, %v12928_v17  ;;  %v18703_v2 = vand.u32 2147483647, %v12559_v55  ;;  %8721 = vpow2.f32 %v13053_v62  ;;  %v3247_v57 = vsub.f32 1.0, %v3246_v56  ;;  %v13378_v54 = vpop.eup %8715 }
 0x3e4   : > { %v3228_v14 = vsel %vm3225_vm15, %v3227_v27, %v3223_v30  ;;  %v4422_v3 = vmul.f32 1.442695, %v4205_v28  ;;  %v1651_v10 = vmul.f32 %v9734_v34, %v13256_v60  ;;  %8723 = vrcp.f32 %v13365_v18 }
 0x3e5   : > { %vm13373_vm6 = vcmp.eq.f32.partialorder %v18703_v2, 8.507059e+37  ;;  %v1653_v17 = vmul.f32 %v9734_v34, %v1458_v53  ;;  %v4029_v24 = vmul.f32 0.6931472, %v13155_v58  ;;  %8725 = vlog2.f32 %v3243_v32 }
 0x3e6   : > { %v13385_v0 = vadd.f32 1e-08, %v1778_v23  ;;  %v3381_v62 = vmul.f32 %v13378_v54, %v13337_v13  ;;  %v8718_v52 = vpop.eup %8717  ;;  %v4420_v20 = vmul.f32 1.442695, %v4204_v4  ;;  %v4206_v22 = vmul.f32 1.2, %v4041_v59  ;;  %v1470_v23 = vpop.xlane.xlu2 %1469 }
 0x3e7   : > { %8727 = vrcp.f32 %v13367_v31  ;;  %v1781_v15 = vadd.f32 1.0, %v1653_v17  ;;  %v4192_v60 = vmul.f32 1.2, %v12921_v33  ;;  %v18706_v49 = vand.u32 2147483648, %v12559_v55  ;;  %v8720_v56 = vpop.eup %8719 }
 0x3e8   : > { %8729 = vlog2.f32 %v3228_v14  ;;  %v3248_v58 = vmul.f32 %v13169_v45, %v3247_v57  ;;  %v1779_v26 = vadd.f32 1.0, %v1651_v10  ;;  %v3382_v30 = vsub.f32 1.0, %v3381_v62 }
 0x3e9   : > { %v3137_v19 = vor.u32 1.1754944e-38, %v18706_v49  ;;  %8731 = vpow2.f32 %v4422_v3  ;;  %v13402_v46 = vadd.f32 1e-08, %v1781_v15  ;;  %v13404_v33 = vpop.eup %8721  ;;  %v3133_v28 = vsel %vm13398_vm5, %v12610_v5, %v3129_v1 }
 0x3ea   : > { %18709 = vst [vmem:[#allocation72_spill] sm:$0xff] %v13404_v33  ;;  %v13409_v32 = vmul.f32 1.2, %v4029_v24  ;;  %v4043_v37 = vmul.f32 0.6931472, %v8718_v52  ;;  %8733 = vrcp.f32 %v13385_v0  ;;  %v13412_v55 = vpop.eup %8723  ;;  %v13419_v53 = vadd.f32 %v13169_v45, %v3248_v58  ;;  %v1464_v58 = vpop.xlane.xlu0 %1463 }
 0x3eb   : > { %8735 = vpow2.f32 %v4420_v20  ;;  %v4424_v4 = vmul.f32 1.442695, %v4206_v22  ;;  %v13416_v59 = vpop.eup %8725  ;;  %v13421_v2 = vmul.f32 0.6931472, %v8720_v56  ;;  %v3411_v5 = vmul.f32 %v13412_v55, %v13365_v18 }
 0x3ec   : > { %8737 = vrcp.f32 %v13402_v46  ;;  %v13428_v14 = vadd.f32 1e-08, %v1779_v26  ;;  %v3383_v57 = vmul.f32 %v13378_v54, %v3382_v30  ;;  %v3138_v3 = vsel %vm13373_vm6, %v3137_v19, %v3133_v28 }
 0x3ed   : > { %v13426_v1 = vpop.eup %8727  ;;  %v4015_v10 = vmul.f32 0.6931472, %v12585_v9  ;;  %v13436_v24 = vmul.f32 1.2, %v4043_v37  ;;  %v3412_v62 = vsub.f32 1.0, %v3411_v5  ;;  %8739 = vlog2.f32 %v3138_v3 }
 0x3ee   : > { %v13434_v17 = vpop.eup %8729  ;;  %v4017_v52 = vmul.f32 0.6931472, %v12843_v48  ;;  %8741 = vpow2.f32 %v4424_v4  ;;  %v3391_v22 = vand.u32 2147483648, %v13337_v13  ;;  %v4396_v49 = vmul.f32 1.442695, %v4192_v60 }
 0x3ef   : > { %v13439_v20 = vpop.eup %8731  ;;  %v4193_v15 = vmul.f32 1.2, %v4015_v10  ;;  %v13446_v9 = vmul.f32 %v13426_v1, %v13367_v31  ;;  %vm3385_vm1 = vweird.f32 %v13337_v13  ;;  %v3389_v19 = vand.u32 2147483647, %v13337_v13 }
 0x3f0   : > { %18710 = vst [vmem:[#allocation67_spill] sm:$0xff] %v13439_v20  ;;  %v13442_v36 = vpop.eup %8733  ;;  %v4194_v48 = vmul.f32 1.2, %v4017_v52  ;;  %v3384_v6 = vadd.f32 %v13378_v54, %v3383_v57  ;;  %vm3386_vm14 = vweird.f32 %v13378_v54  ;;  %8743 = vpow2.f32 %v4396_v49 }
 0x3f1   : > { %v13450_v56 = vpop.eup %8735  ;;  %v4398_v60 = vmul.f32 1.442695, %v4193_v15  ;;  %v3413_v30 = vmul.f32 %v13412_v55, %v3412_v62  ;;  %v4703_v37 = vperm.slane %v12577_v25, %v12447_v16  ;;  %v1655_v4 = vmul.f32 %v9734_v34, %v1464_v58  ;;  %vm13466_vm9 = vmor %vm3385_vm1, %vm3386_vm14 }
 0x3f2   : > { %18711 = vst [vmem:[#allocation74_spill] sm:$0xff] %v13450_v56  ;;  %v13454_v26 = vpop.eup %8737  ;;  %v4400_v28 = vmul.f32 1.442695, %v4194_v48  ;;  %v3351_v5 = vmul.f32 %v13442_v36, %v13385_v0  ;;  %v3392_v3 = vor.u32 1.1754944e-38, %v3391_v22  ;;  %vm3415_vm2 = vweird.f32 %v13365_v18 }
 0x3f3   : > { %v3396_v57 = vmul.f32 %v13454_v26, %v13402_v46  ;;  %8745 = vpow2.f32 %v4398_v60  ;;  %v8740_v10 = vpop.eup %8739  ;;  %v4702_v62 = vperm.slane %v12533_v44, %v12447_v16  ;;  %v1783_v15 = vadd.f32 1.0, %v1655_v4 }
 0x3f4   : > { %8747 = vpow2.f32 %v4400_v28  ;;  %v13473_v49 = vpop.eup %8741  ;;  %v3388_v22 = vsel %vm13466_vm9, %v13378_v54, %v3384_v6  ;;  %vm3416_vm3 = vweird.f32 %v13412_v55  ;;  %v4019_v13 = vmul.f32 0.6931472, %v8740_v10 }
 0x3f5   : > { %18714 = vst [vmem:[#allocation84_spill] sm:$0xff] %v13473_v49  ;;  %v4704_v58 = vperm.slane %v12563_v50, %v12447_v16  ;;  %v3414_v48 = vadd.f32 %v13412_v55, %v3413_v30  ;;  %v4705_v60 = vperm.slane %v12661_v38, %v12447_v16  ;;  %vm18715_vm8 = vcmask 1041409   ;;  %vm13499_vm7 = vmor %vm3415_vm2, %vm3416_vm3 }
 0x3f6   : > { %v4828_v28 = vsel %vm18715_vm8, %v4703_v37, %v4702_v62  ;;  %v13485_v4 = vadd.f32 1e-08, %v1783_v15  ;;  %v13487_v27 = vpop.eup %8743  ;;  %vm3390_vm13 = vcmp.eq.f32.partialorder %v3389_v19, 8.507059e+37  ;;  %v3421_v54 = vand.u32 2147483648, %v13365_v18 }
 0x3f7   : > { %18716 = vst [vmem:[#allocation83_spill] sm:$0xff] %v13487_v27  ;;  %v3397_v6 = vsub.f32 1.0, %v3396_v57  ;;  %v4195_v10 = vmul.f32 1.2, %v4019_v13  ;;  %v3346_v52 = vand.u32 2147483648, %v13367_v31  ;;  %8749 = vrcp.f32 %v13428_v14 }
 0x3f8   : > { %v3393_v30 = vsel %vm3390_vm13, %v3392_v3, %v3388_v22  ;;  %v3419_v50 = vand.u32 2147483647, %v13365_v18  ;;  %v4706_v57 = vperm.slane %v13487_v27, %v12447_v16  ;;  %vm18720_vm15 = vcmask 1042434  }
 0x3f9   : > { %v13493_v61 = vpop.eup %8745  ;;  %v4402_v19 = vmul.f32 1.442695, %v4195_v10  ;;  %v4829_v62 = vsel %vm18720_vm15, %v4704_v58, %v4828_v28  ;;  %v1657_v3 = vmul.f32 %v9734_v34, %v1470_v23  ;;  %v3337_v22 = vsub.f32 1.0, %v13446_v9  ;;  %v1467_v58 = vpop.xlane.xlu1 %1466 }
 0x3fa   : > { %18717 = vst [vmem:[#allocation78_spill] sm:$0xff] %v13493_v61  ;;  %v13507_v15 = vpop.eup %8747  ;;  %v3418_v18 = vsel %vm13499_vm7, %v13412_v55, %v3414_v48  ;;  %vm18722_vm6 = vcmask 1043459   ;;  %8751 = vrcp.f32 %v13485_v4  ;;  %v3352_v10 = vsub.f32 1.0, %v3351_v5 }
 0x3fb   : > { %18721 = vst [vmem:[#allocation82_spill] sm:$0xff] %v13507_v15  ;;  %v4830_v13 = vsel %vm18722_vm6, %v4705_v60, %v4829_v62  ;;  %v3422_v38 = vor.u32 1.1754944e-38, %v3421_v54  ;;  %v3398_v44 = vmul.f32 %v13454_v26, %v3397_v6  ;;  %8753 = vpow2.f32 %v4402_v19 }
 0x3fc   : > { %vm3340_vm5 = vweird.f32 %v13367_v31  ;;  %8755 = vlog2.f32 %v3393_v30  ;;  %vm3420_vm1 = vcmp.eq.f32.partialorder %v3419_v50, 8.507059e+37  ;;  %v4707_v23 = vperm.slane %v13493_v61, %v12447_v16  ;;  %v1479_v30 = vpop.xlane.xlu2 %1478 }
 0x3fd   : > { %v3423_v9 = vsel %vm3420_vm1, %v3422_v38, %v3418_v18  ;;  %v4708_v55 = vperm.slane %v13507_v15, %v12447_v16  ;;  %v4831_v48 = vsel %vm4764_vm0, %v4706_v57, %v4830_v13  ;;  %v1785_v60 = vadd.f32 1.0, %v1657_v3  ;;  %v13522_v5 = vpop.eup %8749 }
 0x3fe   : > { %vm3251_vm14 = vweird.f32 %v13169_v45  ;;  %v4426_v28 = vmul.f32 1.442695, %v13436_v24  ;;  %v3338_v54 = vmul.f32 %v13426_v1, %v3337_v22  ;;  %v3344_v50 = vand.u32 2147483647, %v13367_v31 }
 0x3ff   : > { %v1656_v6 = vmul.f32 %v9734_v34, %v1467_v58  ;;  %v3347_v38 = vor.u32 1.1754944e-38, %v3346_v52  ;;  %v3353_v37 = vmul.f32 %v13442_v36, %v3352_v10  ;;  %v3399_v19 = vadd.f32 %v13454_v26, %v3398_v44 }
 0x400   : > { %vm3401_vm9 = vweird.f32 %v13454_v26  ;;  %v13532_v57 = vpop.eup %8751  ;;  %vm3250_vm2 = vweird.f32 %v13108_v47  ;;  %8757 = vlog2.f32 %v3423_v9  ;;  %vm3400_vm3 = vweird.f32 %v13402_v46 }
 0x401   : > { %v3406_v24 = vand.u32 2147483648, %v13402_v46  ;;  %v4832_v62 = vsel %vm4766_vm4, %v4707_v23, %v4831_v48  ;;  %v13538_v3 = vpop.eup %8753  ;;  %v3404_v52 = vand.u32 2147483647, %v13402_v46  ;;  %v13542_v44 = vadd.f32 1e-08, %v1785_v60  ;;  %vm13549_vm13 = vmor %vm3400_vm3, %vm3401_vm9 }
 0x402   : > { %18723 = vst [vmem:[#allocation79_spill] sm:$0xff] %v13538_v3  ;;  %v4833_v22 = vsel %vm4768_vm12, %v4708_v55, %v4832_v62  ;;  %v1660_v18 = vmul.f32 %v9734_v34, %v1479_v30  ;;  %v8756_v13 = vpop.eup %8755  ;;  %v3339_v10 = vadd.f32 %v13426_v1, %v3338_v54  ;;  %vm3341_vm8 = vweird.f32 %v13426_v1 }
 0x403   : > { %v4709_v46 = vperm.slane %v13538_v3, %v12447_v16  ;;  %v1784_v23 = vadd.f32 1.0, %v1656_v6  ;;  %v3366_v9 = vmul.f32 %v13522_v5, %v13428_v14  ;;  %v3361_v55 = vand.u32 2147483648, %v13385_v0  ;;  %vm13573_vm6 = vmor %vm3340_vm5, %vm3341_vm8 }
 0x404   : > { %v3403_v48 = vsel %vm13549_vm13, %v13454_v26, %v3399_v19  ;;  %v1788_v60 = vadd.f32 1.0, %v1660_v18  ;;  %v18726_v54 = vand.u32 2147483647, %v13108_v47  ;;  %vm3356_vm15 = vweird.f32 %v13442_v36  ;;  %vm13601_vm8 = vmor %vm3250_vm2, %vm3251_vm14 }
 0x405   : > { %v3407_v62 = vor.u32 1.1754944e-38, %v3406_v24  ;;  %v4834_v6 = vsel %vm4770_vm11, %v4709_v46, %v4833_v22  ;;  %v3426_v61 = vmul.f32 %v13532_v57, %v13485_v4  ;;  %v3354_v26 = vadd.f32 %v13442_v36, %v3353_v37 }
 0x406   : > { %vm13563_vm7 = vcmp.eq.f32.partialorder %v18726_v54, 8.507059e+37  ;;  %vm3405_vm1 = vcmp.eq.f32.partialorder %v3404_v52, 8.507059e+37  ;;  %v4921_v19 = vsel %vm4893_vm10, %v4834_v6, 0.0  ;;  %8759 = vrcp.f32 %v13542_v44  ;;  %v8758_v18 = vpop.eup %8757 }
 0x407   : > { %v3343_v24 = vsel %vm13573_vm6, %v13426_v1, %v3339_v10  ;;  %v4053_v22 = vmul.f32 0.6931472, %v8756_v13  ;;  %v3408_v46 = vsel %vm3405_vm1, %v3407_v62, %v3403_v48  ;;  %4922 = vadd.xlane.f32.xlu2 %v4921_v19  ;;  %v13583_v31 = vadd.f32 1e-08, %v1784_v23 }
 0x408   : > { %v3367_v54 = vsub.f32 1.0, %v3366_v9  ;;  %vm3355_vm5 = vweird.f32 %v13385_v0  ;;  %v3359_v37 = vand.u32 2147483647, %v13385_v0  ;;  %v13587_v52 = vadd.f32 1e-08, %v1788_v60 }
 0x409   : > { %v18731_v6 = vand.u32 2147483648, %v13108_v47  ;;  %8761 = vpow2.f32 %v4426_v28  ;;  %vm3345_vm9 = vcmp.eq.f32.partialorder %v3344_v50, 8.507059e+37  ;;  %vm13593_vm3 = vmor %vm3355_vm5, %vm3356_vm15  ;;  %v3427_v13 = vsub.f32 1.0, %v3426_v61  ;;  %v1473_v47 = vpop.xlane.xlu0 %1472 }
 0x40a   : > { %v3348_v10 = vsel %vm3345_vm9, %v3347_v38, %v3343_v24  ;;  %v3358_v28 = vsel %vm13593_vm3, %v13442_v36, %v3354_v26  ;;  %v4057_v50 = vmul.f32 0.6931472, %v8758_v18  ;;  %8763 = vlog2.f32 %v3408_v46 }
 0x40b   : > { %v3257_v15 = vor.u32 1.1754944e-38, %v18731_v6  ;;  %v3253_v61 = vsel %vm13601_vm8, %v13169_v45, %v13419_v53  ;;  %v3362_v23 = vor.u32 1.1754944e-38, %v3361_v55  ;;  %v4212_v9 = vmul.f32 1.2, %v4053_v22 }
 0x40c   : > { %8765 = vrcp.f32 %v13583_v31  ;;  %v13613_v48 = vpop.eup %8759  ;;  %v13616_v38 = vmul.f32 1.2, %v13421_v2  ;;  %v3368_v60 = vmul.f32 %v13522_v5, %v3367_v54  ;;  %vm3360_vm14 = vcmp.eq.f32.partialorder %v3359_v37, 8.507059e+37 }
 0x40d   : > { %8767 = vrcp.f32 %v13587_v52  ;;  %v3363_v36 = vsel %vm3360_vm14, %v3362_v23, %v3358_v28  ;;  %v3428_v62 = vmul.f32 %v13532_v57, %v3427_v13  ;;  %v3434_v45 = vand.u32 2147483647, %v13485_v4 }
 0x40e   : > { %8769 = vlog2.f32 %v3348_v10  ;;  %v4214_v53 = vmul.f32 1.2, %v4057_v50  ;;  %v3436_v55 = vand.u32 2147483648, %v13485_v4  ;;  %v1658_v58 = vmul.f32 %v9734_v34, %v1473_v47 }
 0x40f   : > { %v3258_v2 = vsel %vm13563_vm7, %v3257_v15, %v3253_v61  ;;  %v13626_v26 = vpop.eup %8761  ;;  %v4436_v19 = vmul.f32 1.442695, %v4212_v9  ;;  %v3456_v18 = vmul.f32 %v13613_v48, %v13542_v44  ;;  %v4031_v24 = vmul.f32 0.6931472, %v13434_v17 }
 0x410   : > { %18736 = vst [vmem:[#allocation81_spill] sm:$0xff] %v13626_v26  ;;  %8771 = vlog2.f32 %v3258_v2  ;;  %v8764_v22 = vpop.eup %8763  ;;  %v13632_v46 = vadd.f32 %v13522_v5, %v3368_v60  ;;  %v3429_v15 = vadd.f32 %v13532_v57, %v3428_v62  ;;  %vm3430_vm2 = vweird.f32 %v13485_v4 }
 0x411   : > { %8773 = vlog2.f32 %v3363_v36  ;;  %vm3431_vm13 = vweird.f32 %v13532_v57  ;;  %v3466_v17 = vand.u32 2147483648, %v13542_v44  ;;  %v4440_v1 = vmul.f32 1.442695, %v4214_v53 }
 0x412   : > { %v13636_v30 = vpop.eup %8765  ;;  %vm13644_vm7 = vcmp.eq.f32.partialorder %v3434_v45, 8.507059e+37  ;;  %v1786_v0 = vadd.f32 1.0, %v1658_v58  ;;  %v4033_v10 = vmul.f32 0.6931472, %v13416_v59  ;;  %8775 = vpow2.f32 %v4436_v19  ;;  %vm13651_vm15 = vmor %vm3430_vm2, %vm3431_vm13 }
 0x413   : > { %v13642_v6 = vpop.eup %8767  ;;  %v3437_v50 = vor.u32 1.1754944e-38, %v3436_v55  ;;  %v3457_v61 = vsub.f32 1.0, %v3456_v18  ;;  %v4201_v4 = vmul.f32 1.2, %v4031_v24  ;;  %vm3460_vm6 = vweird.f32 %v13542_v44 }
 0x414   : > { %v13649_v28 = vpop.eup %8769  ;;  %v3464_v9 = vand.u32 2147483647, %v13542_v44  ;;  %v3441_v47 = vmul.f32 %v13636_v30, %v13583_v31  ;;  %v4412_v60 = vmul.f32 1.442695, %v13409_v32  ;;  %v4055_v36 = vmul.f32 0.6931472, %v8764_v22 }
 0x415   : > { %v3433_v62 = vsel %vm13651_vm15, %v13532_v57, %v3429_v15  ;;  %v13663_v45 = vor.u32 1.1754944e-38, %v3466_v17  ;;  %v3501_v53 = vmul.f32 %v13642_v6, %v13587_v52  ;;  %8777 = vpow2.f32 %v4440_v1 }
 0x416   : > { %v8772_v59 = vpop.eup %8771  ;;  %v3449_v58 = vand.u32 2147483647, %v13583_v31  ;;  %v13670_v2 = vadd.f32 1e-08, %v1786_v0  ;;  %v4202_v19 = vmul.f32 1.2, %v4033_v10  ;;  %v3458_v32 = vmul.f32 %v13613_v48, %v3457_v61  ;;  %v1476_v0 = vpop.xlane.xlu1 %1475 }
 0x417   : > { %v13667_v55 = vpop.eup %8773  ;;  %v3451_v18 = vand.u32 2147483648, %v13583_v31  ;;  %v4035_v24 = vmul.f32 0.6931472, %v8772_v59  ;;  %v4414_v22 = vmul.f32 1.442695, %v4201_v4  ;;  %v3438_v57 = vsel %vm13644_vm7, %v3437_v50, %v3433_v62  ;;  %v1482_v4 = vpop.xlane.xlu0 %1481 }
 0x418   : > { %vm3461_vm1 = vweird.f32 %v13613_v48  ;;  %v3442_v15 = vsub.f32 1.0, %v3441_v47  ;;  %8779 = vpow2.f32 %v4412_v60  ;;  %v13677_v17 = vpop.eup %8775  ;;  %v4213_v1 = vmul.f32 1.2, %v4055_v36 }
 0x419   : > { %18741 = vst [vmem:[#allocation80_spill] sm:$0xff] %v13677_v17  ;;  %v3502_v23 = vsub.f32 1.0, %v3501_v53  ;;  %v4203_v37 = vmul.f32 1.2, %v4035_v24  ;;  %8781 = vpow2.f32 %v4414_v22  ;;  %vm13679_vm5 = vcmp.eq.f32.partialorder %v3464_v9, 8.507059e+37  ;;  %vm13710_vm13 = vmor %vm3460_vm6, %vm3461_vm1 }
 0x41a   : > { %vm3445_vm9 = vweird.f32 %v13583_v31  ;;  %8783 = vrcp.f32 %v13670_v2  ;;  %v4416_v13 = vmul.f32 1.442695, %v4202_v19  ;;  %v4710_v50 = vperm.slane %v12868_v39, %v12447_v16 }
 0x41b   : > { %v4711_v61 = vperm.slane %v13037_v51, %v12447_v16  ;;  %8785 = vlog2.f32 %v3438_v57  ;;  %v3459_v47 = vadd.f32 %v13613_v48, %v3458_v32  ;;  %v4418_v60 = vmul.f32 1.442695, %v4203_v37  ;;  %v13692_v59 = vpop.eup %8777 }
 0x41c   : > { %v4712_v9 = vperm.slane %v13404_v33, %v12447_v16  ;;  %18744 = vst [vmem:[#allocation86_spill] sm:$0xff] %v13692_v59  ;;  %v3443_v36 = vmul.f32 %v13636_v30, %v3442_v15  ;;  %v1659_v62 = vmul.f32 %v9734_v34, %v1476_v0  ;;  %v4713_v53 = vperm.slane %v13045_v43, %v12447_v16 }
 0x41d   : > { %vm18745_vm3 = vcmask 1041409   ;;  %vm3370_vm8 = vweird.f32 %v13428_v14  ;;  %vm3371_vm14 = vweird.f32 %v13522_v5  ;;  %v3503_v37 = vmul.f32 %v13642_v6, %v3502_v23 }
 0x41e   : > { %v4835_v19 = vsel %vm18745_vm3, %v4711_v61, %v4710_v50  ;;  %8787 = vpow2.f32 %v4416_v13  ;;  %vm18746_vm2 = vcmask 1042434   ;;  %v1661_v24 = vmul.f32 %v9734_v34, %v1482_v4  ;;  %v13704_v22 = vpop.eup %8779 }
 0x41f   : > { %v4836_v32 = vsel %vm18746_vm2, %v4712_v9, %v4835_v19  ;;  %18747 = vst [vmem:[#allocation95_spill] sm:$0xff] %v13704_v22  ;;  %v4438_v57 = vmul.f32 1.442695, %v4213_v1  ;;  %vm13714_vm7 = vcmp.eq.f32.partialorder %v3449_v58, 8.507059e+37  ;;  %vm3505_vm15 = vweird.f32 %v13587_v52  ;;  %v13720_v13 = vpop.eup %8781 }
 0x420   : > { %v3509_v23 = vand.u32 2147483647, %v13587_v52  ;;  %8789 = vpow2.f32 %v4418_v60  ;;  %18752 = vst [vmem:[#allocation96_spill] sm:$0xff] %v13720_v13  ;;  %v3463_v1 = vsel %vm13710_vm13, %v13613_v48, %v3459_v47  ;;  %vm3446_vm6 = vweird.f32 %v13636_v30  ;;  %v13728_v50 = vpop.eup %8783  ;;  %vm13797_vm13 = vmor %vm3370_vm8, %vm3371_vm14 }
 0x421   : > { %v4714_v44 = vperm.slane %v13704_v22, %v12447_v16  ;;  %v1789_v58 = vadd.f32 1.0, %v1661_v24  ;;  %v3444_v61 = vadd.f32 %v13636_v30, %v3443_v36  ;;  %v1787_v4 = vadd.f32 1.0, %v1659_v62  ;;  %v8786_v19 = vpop.eup %8785  ;;  %v1488_v24 = vpop.xlane.xlu2 %1487  ;;  %vm13750_vm2 = vmor %vm3445_vm9, %vm3446_vm6 }
 0x422   : > { %v4715_v60 = vperm.slane %v13720_v13, %v12447_v16  ;;  %vm18753_vm1 = vcmask 1043459   ;;  %v3504_v15 = vadd.f32 %v13642_v6, %v3503_v37  ;;  %vm3506_vm3 = vweird.f32 %v13642_v6 }
 0x423   : > { %v4837_v9 = vsel %vm18753_vm1, %v4713_v53, %v4836_v32  ;;  %v13737_v47 = vadd.f32 1e-08, %v1789_v58  ;;  %8791 = vpow2.f32 %v4438_v57  ;;  %v3452_v54 = vor.u32 1.1754944e-38, %v3451_v18 }
 0x424   : > { %v4838_v48 = vsel %vm4764_vm0, %v4714_v44, %v4837_v9  ;;  %v3511_v36 = vand.u32 2147483648, %v13587_v52  ;;  %v1663_v62 = vmul.f32 %v9734_v34, %v1488_v24  ;;  %v13741_v43 = vpop.eup %8787  ;;  %v3468_v53 = vsel %vm13679_vm5, %v13663_v45, %v3463_v1  ;;  %vm13767_vm5 = vmor %vm3505_vm15, %vm3506_vm3 }
 0x425   : > { %18754 = vst [vmem:[#allocation97_spill] sm:$0xff] %v13741_v43  ;;  %v3471_v18 = vmul.f32 %v13728_v50, %v13670_v2  ;;  %v4839_v32 = vsel %vm4766_vm4, %v4715_v60, %v4838_v48  ;;  %8793 = vrcp.f32 %v13737_v47  ;;  %v3448_v45 = vsel %vm13750_vm2, %v13636_v30, %v3444_v61  ;;  %v1485_v48 = vpop.xlane.xlu1 %1484 }
 0x426   : > { %v13758_v57 = vpop.eup %8789  ;;  %vm13771_vm9 = vcmp.eq.f32.partialorder %v3509_v23, 8.507059e+37  ;;  %v4716_v1 = vperm.slane %v13741_v43, %v12447_v16  ;;  %v1791_v44 = vadd.f32 1.0, %v1663_v62  ;;  %v4059_v58 = vmul.f32 0.6931472, %v8786_v19 }
 0x427   : > { %18757 = vst [vmem:[#allocation98_spill] sm:$0xff] %v13758_v57  ;;  %v3508_v30 = vsel %vm13767_vm5, %v13642_v6, %v3504_v15  ;;  %v13780_v61 = vadd.f32 1e-08, %v1787_v4  ;;  %v4717_v52 = vperm.slane %v13758_v57, %v12447_v16  ;;  %8795 = vlog2.f32 %v3468_v53 }
 0x428   : > { %v3512_v60 = vor.u32 1.1754944e-38, %v3511_v36  ;;  %v4840_v23 = vsel %vm4768_vm12, %v4716_v1, %v4839_v32  ;;  %v13785_v9 = vadd.f32 1e-08, %v1791_v44  ;;  %v3453_v24 = vsel %vm13714_vm7, %v3452_v54, %v3448_v45 }
 0x429   : > { %v3472_v19 = vsub.f32 1.0, %v3471_v18  ;;  %v4841_v62 = vsel %vm4770_vm11, %v4717_v52, %v4840_v23  ;;  %v1662_v6 = vmul.f32 %v9734_v34, %v1485_v48  ;;  %v13791_v4 = vpop.eup %8791  ;;  %v18765_v36 = vand.u32 2147483647, %v13428_v14  ;;  %v1497_v48 = vpop.xlane.xlu2 %1496 }
 0x42a   : > { %18762 = vst [vmem:[#allocation99_spill] sm:$0xff] %v13791_v4  ;;  %v3513_v54 = vsel %vm13771_vm9, %v3512_v60, %v3508_v30  ;;  %v4924_v53 = vsel %vm4893_vm10, %v4841_v62, 0.0  ;;  %8797 = vrcp.f32 %v13785_v9  ;;  %v3373_v18 = vsel %vm13797_vm13, %v13522_v5, %v13632_v46  ;;  %v1491_v5 = vpop.xlane.xlu0 %1490 }
 0x42b   : > { %vm13803_vm15 = vcmp.eq.f32.partialorder %v18765_v36, 8.507059e+37  ;;  %v8794_v37 = vpop.eup %8793  ;;  %v4215_v32 = vmul.f32 1.2, %v4059_v58  ;;  %8799 = vrcp.f32 %v13780_v61  ;;  %4925 = vadd.xlane.f32.xlu0 %v4924_v53  ;;  %v1790_v45 = vadd.f32 1.0, %v1662_v6 }
 0x42c   : > { %v18768_v31 = vand.u32 2147483648, %v13428_v14  ;;  %8801 = vlog2.f32 %v3453_v24  ;;  %v3479_v10 = vand.u32 2147483647, %v13670_v2  ;;  %v3516_v44 = vmul.f32 %v8794_v37, %v13737_v47 }
 0x42d   : > { %v3473_v30 = vmul.f32 %v13728_v50, %v3472_v19  ;;  %v3481_v52 = vand.u32 2147483648, %v13670_v2  ;;  %8803 = vlog2.f32 %v3513_v54  ;;  %v13822_v60 = vadd.f32 1e-08, %v1790_v45  ;;  %v13824_v46 = vpop.eup %8795 }
 0x42e   : > { %v3377_v1 = vor.u32 1.1754944e-38, %v18768_v31  ;;  %vm3475_vm8 = vweird.f32 %v13670_v2  ;;  %v3517_v58 = vsub.f32 1.0, %v3516_v44  ;;  %v3524_v14 = vand.u32 2147483647, %v13737_v47 }
 0x42f   : > { %v1664_v23 = vmul.f32 %v9734_v34, %v1491_v5  ;;  %v4442_v19 = vmul.f32 1.442695, %v4215_v32  ;;  %vm3476_vm14 = vweird.f32 %v13728_v50  ;;  %v3526_v62 = vand.u32 2147483648, %v13737_v47 }
 0x430   : > { %v3378_v24 = vsel %vm13803_vm15, %v3377_v1, %v3373_v18  ;;  %8805 = vrcp.f32 %v13822_v60  ;;  %v8798_v6 = vpop.eup %8797  ;;  %v3518_v15 = vmul.f32 %v8794_v37, %v3517_v58  ;;  %vm3521_vm7 = vweird.f32 %v8794_v37  ;;  %v1494_v18 = vpop.xlane.xlu1 %1493  ;;  %vm13864_vm13 = vmor %vm3475_vm8, %vm3476_vm14 }
 0x431   : > { %v1792_v36 = vadd.f32 1.0, %v1664_v23  ;;  %v1666_v54 = vmul.f32 %v9734_v34, %v1497_v48  ;;  %v13835_v53 = vpop.eup %8799  ;;  %v3474_v45 = vadd.f32 %v13728_v50, %v3473_v30  ;;  %vm3520_vm6 = vweird.f32 %v13737_v47 }
 0x432   : > { %v3546_v0 = vmul.f32 %v8798_v6, %v13785_v9  ;;  %8807 = vlog2.f32 %v3378_v24  ;;  %v13840_v32 = vpop.eup %8801  ;;  %v3519_v31 = vadd.f32 %v8794_v37, %v3518_v15  ;;  %vm3525_vm1 = vcmp.eq.f32.partialorder %v3524_v14, 8.507059e+37  ;;  %vm3522_vm3 = vmor %vm3520_vm6, %vm3521_vm7 }
 0x433   : > { %v13842_v1 = vadd.f32 1e-08, %v1792_v36  ;;  %v1794_v44 = vadd.f32 1.0, %v1666_v54  ;;  %v8804_v5 = vpop.eup %8803  ;;  %v3527_v58 = vor.u32 1.1754944e-38, %v3526_v62  ;;  %vm3550_vm2 = vweird.f32 %v13785_v9 }
 0x434   : > { %v3547_v23 = vsub.f32 1.0, %v3546_v0  ;;  %v3554_v47 = vand.u32 2147483647, %v13785_v9  ;;  %v3523_v30 = vsel %vm3522_vm3, %v8794_v37, %v3519_v31  ;;  %v3556_v48 = vand.u32 2147483648, %v13785_v9 }
 0x435   : > { %8809 = vrcp.f32 %v13842_v1  ;;  %v1665_v24 = vmul.f32 %v9734_v34, %v1494_v18  ;;  %v3528_v15 = vsel %vm3525_vm1, %v3527_v58, %v3523_v30  ;;  %vm3551_vm5 = vweird.f32 %v8798_v6  ;;  %v1506_v58 = vpop.xlane.xlu2 %1505 }
 0x436   : > { %v13850_v14 = vpop.eup %8805  ;;  %v3548_v36 = vmul.f32 %v8798_v6, %v3547_v23  ;;  %v13852_v54 = vadd.f32 1e-08, %v1794_v44  ;;  %8811 = vpow2.f32 %v4442_v19  ;;  %vm13854_vm9 = vcmp.eq.f32.partialorder %v3479_v10, 8.507059e+37  ;;  %vm3552_vm15 = vmor %vm3550_vm2, %vm3551_vm5 }
 0x437   : > { %v3482_v0 = vor.u32 1.1754944e-38, %v3481_v52  ;;  %v3531_v37 = vmul.f32 %v13850_v14, %v13822_v60  ;;  %v4069_v44 = vmul.f32 0.6931472, %v8804_v5  ;;  %8813 = vlog2.f32 %v3528_v15 }
 0x438   : > { %v8808_v31 = vpop.eup %8807  ;;  %v3549_v10 = vadd.f32 %v8798_v6, %v3548_v36  ;;  %v3557_v52 = vor.u32 1.1754944e-38, %v3556_v48  ;;  %8815 = vrcp.f32 %v13852_v54  ;;  %v1793_v30 = vadd.f32 1.0, %v1665_v24 }
 0x439   : > { %v3532_v23 = vsub.f32 1.0, %v3531_v37  ;;  %v3478_v2 = vsel %vm13864_vm13, %v13728_v50, %v3474_v45  ;;  %v3496_v43 = vand.u32 2147483648, %v13780_v61  ;;  %vm3555_vm8 = vcmp.eq.f32.partialorder %v3554_v47, 8.507059e+37  ;;  %v1500_v50 = vpop.xlane.xlu0 %1499 }
 0x43a   : > { %v3553_v5 = vsel %vm3552_vm15, %v8798_v6, %v3549_v10  ;;  %v1669_v9 = vmul.f32 %v9734_v34, %v1506_v58  ;;  %v4047_v48 = vmul.f32 0.6931472, %v13649_v28  ;;  %vm3536_vm14 = vweird.f32 %v13850_v14 }
 0x43b   : > { %v13876_v19 = vpop.eup %8809  ;;  %v3558_v15 = vsel %vm3555_vm8, %v3557_v52, %v3553_v5  ;;  %v3533_v36 = vmul.f32 %v13850_v14, %v3532_v23  ;;  %v13884_v37 = vadd.f32 1e-08, %v1793_v30  ;;  %v4049_v6 = vmul.f32 0.6931472, %v13667_v55 }
 0x43c   : > { %v3561_v24 = vmul.f32 %v13876_v19, %v13842_v1  ;;  %v13887_v45 = vpop.eup %8811  ;;  %v3483_v47 = vsel %vm13854_vm9, %v3482_v0, %v3478_v2  ;;  %v4220_v18 = vmul.f32 1.2, %v4069_v44  ;;  %v3541_v28 = vand.u32 2147483648, %v13822_v60 }
 0x43d   : > { %18773 = vst [vmem:[#allocation100_spill] sm:$0xff] %v13887_v45  ;;  %v3534_v10 = vadd.f32 %v13850_v14, %v3533_v36  ;;  %v8814_v58 = vpop.eup %8813  ;;  %8817 = vlog2.f32 %v3558_v15  ;;  %vm3535_vm7 = vweird.f32 %v13822_v60  ;;  %v3539_v52 = vand.u32 2147483647, %v13822_v60 }
 0x43e   : > { %v3562_v23 = vsub.f32 1.0, %v3561_v24  ;;  %v13895_v30 = vpop.eup %8815  ;;  %vm13899_vm6 = vmor %vm3535_vm7, %vm3536_vm14  ;;  %v1667_v62 = vmul.f32 %v9734_v34, %v1500_v50  ;;  %v1797_v0 = vadd.f32 1.0, %v1669_v9  ;;  %v4051_v44 = vmul.f32 0.6931472, %v8808_v31  ;;  %v1503_v50 = vpop.xlane.xlu1 %1502 }
 0x43f   : > { %v4428_v2 = vmul.f32 1.442695, %v13616_v38  ;;  %v3538_v5 = vsel %vm13899_vm6, %v13850_v14, %v3534_v10  ;;  %8819 = vrcp.f32 %v13884_v37  ;;  %v4209_v60 = vmul.f32 1.2, %v4047_v48 }
 0x440   : > { %v4210_v15 = vmul.f32 1.2, %v4049_v6  ;;  %8821 = vlog2.f32 %v3483_v47  ;;  %v13909_v36 = vor.u32 1.1754944e-38, %v3496_v43  ;;  %v3542_v24 = vor.u32 1.1754944e-38, %v3541_v28 }
 0x441   : > { %v3563_v39 = vmul.f32 %v13876_v19, %v3562_v23  ;;  %v3486_v9 = vmul.f32 %v13835_v53, %v13780_v61  ;;  %v4071_v31 = vmul.f32 0.6931472, %v8814_v58  ;;  %vm3540_vm1 = vcmp.eq.f32.partialorder %v3539_v52, 8.507059e+37 }
 0x442   : > { %v3591_v38 = vmul.f32 %v13895_v30, %v13852_v54  ;;  %v4452_v14 = vmul.f32 1.442695, %v4220_v18  ;;  %v3543_v10 = vsel %vm3540_vm1, %v3542_v24, %v3538_v5  ;;  %v1795_v55 = vadd.f32 1.0, %v1667_v62 }
 0x443   : > { %v13916_v48 = vadd.f32 1e-08, %v1797_v0  ;;  %v8818_v6 = vpop.eup %8817  ;;  %v4211_v43 = vmul.f32 1.2, %v4051_v44  ;;  %8823 = vpow2.f32 %v4428_v2  ;;  %v4430_v47 = vmul.f32 1.442695, %v4209_v60 }
 0x444   : > { %v4432_v28 = vmul.f32 1.442695, %v4210_v15  ;;  %v3564_v23 = vadd.f32 %v13876_v19, %v3563_v39  ;;  %vm3565_vm3 = vweird.f32 %v13842_v1  ;;  %vm3566_vm2 = vweird.f32 %v13876_v19 }
 0x445   : > { %v1668_v58 = vmul.f32 %v9734_v34, %v1503_v50  ;;  %v13922_v52 = vpop.eup %8819  ;;  %v4221_v18 = vmul.f32 1.2, %v4071_v31  ;;  %8825 = vlog2.f32 %v3543_v10  ;;  %v3571_v62 = vand.u32 2147483648, %v13842_v1  ;;  %vm13938_vm5 = vmor %vm3565_vm3, %vm3566_vm2 }
 0x446   : > { %v3592_v0 = vsub.f32 1.0, %v3591_v38  ;;  %v13925_v5 = vpop.eup %8821  ;;  %v4075_v44 = vmul.f32 0.6931472, %v8818_v6  ;;  %v3569_v2 = vand.u32 2147483647, %v13842_v1  ;;  %8827 = vrcp.f32 %v13916_v48 }
 0x447   : > { %v13928_v60 = vadd.f32 1e-08, %v1795_v55  ;;  %v13932_v39 = vmul.f32 0.6931472, %v13840_v32  ;;  %8829 = vpow2.f32 %v4452_v14  ;;  %v3487_v15 = vsub.f32 1.0, %v3486_v9 }
 0x448   : > { %v4434_v31 = vmul.f32 1.442695, %v4211_v43  ;;  %v3568_v38 = vsel %vm13938_vm5, %v13876_v19, %v3564_v23  ;;  %v3576_v50 = vmul.f32 %v13922_v52, %v13884_v37  ;;  %v1796_v32 = vadd.f32 1.0, %v1668_v58  ;;  %v1509_v43 = vpop.xlane.xlu0 %1508 }
 0x449   : > { %8831 = vpow2.f32 %v4430_v47  ;;  %v13947_v14 = vpop.eup %8823  ;;  %v4454_v9 = vmul.f32 1.442695, %v4221_v18  ;;  %v3572_v10 = vor.u32 1.1754944e-38, %v3571_v62  ;;  %v3593_v1 = vmul.f32 %v13895_v30, %v3592_v0 }
 0x44a   : > { %18778 = vst [vmem:[#allocation101_spill] sm:$0xff] %v13947_v14  ;;  %8833 = vpow2.f32 %v4432_v28  ;;  %v4223_v55 = vmul.f32 1.2, %v4075_v44  ;;  %vm3570_vm9 = vcmp.eq.f32.partialorder %v3569_v2, 8.507059e+37  ;;  %v13951_v6 = vadd.f32 1e-08, %v1796_v32  ;;  %v1515_v28 = vpop.xlane.xlu2 %1514 }
 0x44b   : > { %8835 = vrcp.f32 %v13928_v60  ;;  %v8826_v19 = vpop.eup %8825  ;;  %v13954_v23 = vmul.f32 %v13835_v53, %v3487_v15  ;;  %v3573_v58 = vsel %vm3570_vm9, %v3572_v10, %v3568_v38  ;;  %v4718_v47 = vperm.slane %v13450_v56, %v12447_v16  ;;  %v1512_v56 = vpop.xlane.xlu1 %1511 }
 0x44c   : > { %8837 = vpow2.f32 %v4434_v31  ;;  %v13958_v18 = vpop.eup %8827  ;;  %v3577_v62 = vsub.f32 1.0, %v3576_v50  ;;  %v3646_v0 = vand.u32 2147483648, %v13916_v48  ;;  %v13966_v2 = vadd.f32 %v13895_v30, %v3593_v1 }
 0x44d   : > { %8839 = vrcp.f32 %v13951_v6  ;;  %v13963_v44 = vpop.eup %8829  ;;  %v3636_v24 = vmul.f32 %v13958_v18, %v13916_v48  ;;  %v13973_v38 = vmul.f32 1.442695, %v4223_v55  ;;  %v4073_v50 = vmul.f32 0.6931472, %v8826_v19 }
 0x44e   : > { %18779 = vst [vmem:[#allocation102_spill] sm:$0xff] %v13963_v44  ;;  %8841 = vpow2.f32 %v4454_v9  ;;  %vm3595_vm13 = vweird.f32 %v13852_v54  ;;  %vm3596_vm15 = vweird.f32 %v13895_v30  ;;  %v4719_v32 = vperm.slane %v13439_v20, %v12447_v16 }
 0x44f   : > { %v13971_v31 = vpop.eup %8831  ;;  %8843 = vlog2.f32 %v3573_v58  ;;  %v3637_v10 = vsub.f32 1.0, %v3636_v24  ;;  %vm3640_vm8 = vweird.f32 %v13916_v48  ;;  %v3644_v1 = vand.u32 2147483647, %v13916_v48 }
 0x450   : > { %18780 = vst [vmem:[#allocation103_spill] sm:$0xff] %v13971_v31  ;;  %v13979_v9 = vpop.eup %8833  ;;  %v4720_v55 = vperm.slane %v13473_v49, %v12447_v16  ;;  %v3578_v58 = vmul.f32 %v13922_v52, %v3577_v62  ;;  %vm3641_vm14 = vweird.f32 %v13958_v18  ;;  %v3647_v15 = vor.u32 1.1754944e-38, %v3646_v0  ;;  %v1518_v21 = vpop.xlane.xlu0 %1517 }
 0x451   : > { %18781 = vst [vmem:[#allocation104_spill] sm:$0xff] %v13979_v9  ;;  %v13985_v19 = vpop.eup %8835  ;;  %v4721_v20 = vperm.slane %v13626_v26, %v12447_v16  ;;  %v3638_v24 = vmul.f32 %v13958_v18, %v3637_v10  ;;  %v3629_v22 = vand.u32 2147483647, %v13951_v6  ;;  %v4722_v49 = vperm.slane %v13947_v14, %v12447_v16  ;;  %vm14020_vm2 = vmor %vm3640_vm8, %vm3641_vm14 }
 0x452   : > { %v13991_v57 = vpop.eup %8837  ;;  %v4723_v51 = vperm.slane %v13971_v31, %v12447_v16  ;;  %v4724_v0 = vperm.slane %v13979_v9, %v12447_v16  ;;  %vm18783_vm7 = vcmask 1041409   ;;  %v1670_v26 = vmul.f32 %v9734_v34, %v1509_v43  ;;  %vm14043_vm14 = vmor %vm3595_vm13, %vm3596_vm15 }
 0x453   : > { %18782 = vst [vmem:[#allocation105_spill] sm:$0xff] %v13991_v57  ;;  %v8840_v62 = vpop.eup %8839  ;;  %v4842_v13 = vsel %vm18783_vm7, %v4719_v32, %v4718_v47  ;;  %v1672_v63 = vmul.f32 %v9734_v34, %v1515_v28  ;;  %vm3581_vm6 = vweird.f32 %v13922_v52  ;;  %v3639_v14 = vadd.f32 %v13958_v18, %v3638_v24 }
 0x454   : > { %v14004_v10 = vpop.eup %8841  ;;  %v3621_v33 = vmul.f32 %v8840_v62, %v13951_v6  ;;  %v4725_v31 = vperm.slane %v13991_v57, %v12447_v16  ;;  %vm18785_vm1 = vcmask 1042434   ;;  %vm18786_vm3 = vcmask 1043459  }
 0x455   : > { %18784 = vst [vmem:[#allocation106_spill] sm:$0xff] %v14004_v10  ;;  %v4843_v29 = vsel %vm18785_vm1, %v4720_v55, %v4842_v13  ;;  %v14012_v9 = vpop.eup %8843  ;;  %v1798_v43 = vadd.f32 1.0, %v1670_v26  ;;  %v1800_v32 = vadd.f32 1.0, %v1672_v63  ;;  %v1671_v28 = vmul.f32 %v9734_v34, %v1512_v56 }
 0x456   : > { %v4844_v47 = vsel %vm18786_vm3, %v4721_v20, %v4843_v29  ;;  %v3622_v57 = vsub.f32 1.0, %v3621_v33  ;;  %vm3626_vm5 = vweird.f32 %v8840_v62  ;;  %v3631_v13 = vand.u32 2147483648, %v13951_v6 }
 0x457   : > { %v4845_v55 = vsel %vm4764_vm0, %v4722_v49, %v4844_v47  ;;  %v3643_v63 = vsel %vm14020_vm2, %v13958_v18, %v3639_v14  ;;  %v14030_v20 = vadd.f32 1e-08, %v1798_v43  ;;  %v14032_v56 = vadd.f32 1e-08, %v1800_v32 }
 0x458   : > { %v4846_v29 = vsel %vm4766_vm4, %v4723_v51, %v4845_v55  ;;  %v3623_v26 = vmul.f32 %v8840_v62, %v3622_v57  ;;  %v1799_v3 = vadd.f32 1.0, %v1671_v28  ;;  %v1673_v33 = vmul.f32 %v9734_v34, %v1518_v21 }
 0x459   : > { %v4847_v48 = vsel %vm4768_vm12, %v4724_v0, %v4846_v29  ;;  %vm3645_vm9 = vcmp.eq.f32.partialorder %v3644_v1, 8.507059e+37  ;;  %vm3625_vm8 = vweird.f32 %v13951_v6  ;;  %8845 = vrcp.f32 %v14030_v20 }
 0x45a   : > { %v4848_v49 = vsel %vm4770_vm11, %v4725_v31, %v4847_v48  ;;  %v3648_v57 = vsel %vm3645_vm9, %v3647_v15, %v3643_v63  ;;  %v3624_v14 = vadd.f32 %v8840_v62, %v3623_v26  ;;  %8847 = vrcp.f32 %v14032_v56  ;;  %vm3627_vm7 = vmor %vm3625_vm8, %vm3626_vm5 }
 0x45b   : > { %v4927_v18 = vsel %vm4893_vm10, %v4848_v49, 0.0  ;;  %v4222_v21 = vmul.f32 1.2, %v4073_v50  ;;  %v3598_v6 = vsel %vm14043_vm14, %v13895_v30, %v13966_v2  ;;  %v3579_v31 = vadd.f32 %v13922_v52, %v3578_v58 }
 0x45c   : > { %v3632_v1 = vor.u32 1.1754944e-38, %v3631_v13  ;;  %4928 = vadd.xlane.f32.xlu1 %v4927_v18  ;;  %v3628_v0 = vsel %vm3627_vm7, %v8840_v62, %v3624_v14  ;;  %vm3630_vm13 = vcmp.eq.f32.partialorder %v3629_v22, 8.507059e+37  ;;  %v14055_v15 = vadd.f32 1e-08, %v1799_v3 }
 0x45d   : > { %v1801_v47 = vadd.f32 1.0, %v1673_v33  ;;  %v18791_v43 = vand.u32 2147483648, %v13852_v54  ;;  %v3586_v50 = vand.u32 2147483648, %v13884_v37  ;;  %8849 = vlog2.f32 %v3648_v57 }
 0x45e   : > { %v3633_v28 = vsel %vm3630_vm13, %v3632_v1, %v3628_v0  ;;  %v18792_v30 = vand.u32 2147483647, %v13852_v54  ;;  %vm3580_vm1 = vweird.f32 %v13884_v37  ;;  %v3584_v2 = vand.u32 2147483647, %v13884_v37  ;;  %v1524_v54 = vpop.xlane.xlu2 %1523 }
 0x45f   : > { %v3602_v32 = vor.u32 1.1754944e-38, %v18791_v43  ;;  %8851 = vlog2.f32 %v3633_v28  ;;  %v8846_v58 = vpop.eup %8845  ;;  %v4456_v22 = vmul.f32 1.442695, %v4222_v21  ;;  %vm14066_vm3 = vmor %vm3580_vm1, %vm3581_vm6  ;;  %v14071_v24 = vadd.f32 1e-08, %v1801_v47  ;;  %v1521_v21 = vpop.xlane.xlu1 %1520 }
 0x460   : > { %vm3600_vm15 = vcmp.eq.f32.partialorder %v18792_v30, 8.507059e+37  ;;  %8853 = vrcp.f32 %v14055_v15  ;;  %v14073_v13 = vpop.eup %8847  ;;  %v3583_v37 = vsel %vm14066_vm3, %v13922_v52, %v3579_v31  ;;  %v3651_v55 = vmul.f32 %v8846_v58, %v14030_v20 }
 0x461   : > { %v3603_v3 = vsel %vm3600_vm15, %v3602_v32, %v3598_v6  ;;  %8855 = vpow2.f32 %v13973_v38  ;;  %v3659_v63 = vand.u32 2147483647, %v14030_v20  ;;  %v14082_v29 = vmul.f32 1.2, %v13932_v39  ;;  %v1527_v6 = vpop.xlane.xlu0 %1526 }
 0x462   : > { %v3587_v26 = vor.u32 1.1754944e-38, %v3586_v50  ;;  %v3681_v48 = vmul.f32 %v14073_v13, %v14032_v56  ;;  %8857 = vrcp.f32 %v14071_v24  ;;  %vm3585_vm6 = vcmp.eq.f32.partialorder %v3584_v2, 8.507059e+37 }
 0x463   : > { %8859 = vlog2.f32 %v3603_v3  ;;  %v3652_v38 = vsub.f32 1.0, %v3651_v55  ;;  %v3661_v33 = vand.u32 2147483648, %v14030_v20  ;;  %v8850_v49 = vpop.eup %8849  ;;  %v14090_v52 = vadd.f32 %v13835_v53, %v13954_v23 }
 0x464   : > { %8861 = vpow2.f32 %v4456_v22  ;;  %v14092_v51 = vsel %vm3585_vm6, %v3587_v26, %v3583_v37  ;;  %v14096_v39 = vmul.f32 %v13985_v19, %v13928_v60  ;;  %vm3655_vm2 = vweird.f32 %v14030_v20 }
 0x465   : > { %v8852_v57 = vpop.eup %8851  ;;  %v3653_v14 = vmul.f32 %v8846_v58, %v3652_v38  ;;  %vm3656_vm5 = vweird.f32 %v8846_v58  ;;  %vm14099_vm9 = vcmp.eq.f32.partialorder %v3659_v63, 8.507059e+37  ;;  %v3682_v31 = vsub.f32 1.0, %v3681_v48 }
 0x466   : > { %v8854_v23 = vpop.eup %8853  ;;  %vm3685_vm8 = vweird.f32 %v14032_v56  ;;  %v1675_v47 = vmul.f32 %v9734_v34, %v1524_v54  ;;  %vm3491_vm14 = vweird.f32 %v13835_v53  ;;  %v3662_v50 = vor.u32 1.1754944e-38, %v3661_v33  ;;  %vm3657_vm13 = vmor %vm3655_vm2, %vm3656_vm5 }
 0x467   : > { %v14107_v43 = vpop.eup %8855  ;;  %v3654_v32 = vadd.f32 %v8846_v58, %v3653_v14  ;;  %v3666_v28 = vmul.f32 %v8854_v23, %v14055_v15  ;;  %vm3670_vm7 = vweird.f32 %v14055_v15  ;;  %v4087_v2 = vmul.f32 0.6931472, %v8850_v49  ;;  %v1533_v14 = vpop.xlane.xlu2 %1532 }
 0x468   : > { %18797 = vst [vmem:[#allocation107_spill] sm:$0xff] %v14107_v43  ;;  %v14112_v30 = vpop.eup %8857  ;;  %v3676_v22 = vand.u32 2147483648, %v14055_v15  ;;  %v1674_v3 = vmul.f32 %v9734_v34, %v1521_v21  ;;  %v1676_v62 = vmul.f32 %v9734_v34, %v1527_v6  ;;  %vm3490_vm15 = vweird.f32 %v13780_v61 }
 0x469   : > { %v14120_v54 = vpop.eup %8859  ;;  %v4085_v37 = vmul.f32 0.6931472, %v8852_v57  ;;  %v3658_v55 = vsel %vm3657_vm13, %v8846_v58, %v3654_v32  ;;  %v3667_v63 = vsub.f32 1.0, %v3666_v28  ;;  %v3696_v26 = vmul.f32 %v14112_v30, %v14071_v24  ;;  %vm14165_vm13 = vmor %vm3490_vm15, %vm3491_vm14 }
 0x46a   : > { %v14125_v48 = vpop.eup %8861  ;;  %v3663_v20 = vsel %vm14099_vm9, %v3662_v50, %v3658_v55  ;;  %v3683_v38 = vmul.f32 %v14073_v13, %v3682_v31  ;;  %v3674_v33 = vand.u32 2147483647, %v14055_v15  ;;  %v1803_v49 = vadd.f32 1.0, %v1675_v47 }
 0x46b   : > { %18798 = vst [vmem:[#allocation108_spill] sm:$0xff] %v14125_v48  ;;  %8863 = vlog2.f32 %v3663_v20  ;;  %v3668_v21 = vmul.f32 %v8854_v23, %v3667_v63  ;;  %vm3671_vm1 = vweird.f32 %v8854_v23  ;;  %v3697_v57 = vsub.f32 1.0, %v3696_v26  ;;  %v1530_v63 = vpop.xlane.xlu1 %1529 }
 0x46c   : > { %v4229_v58 = vmul.f32 1.2, %v4087_v2  ;;  %v3677_v6 = vor.u32 1.1754944e-38, %v3676_v22  ;;  %v1802_v32 = vadd.f32 1.0, %v1674_v3  ;;  %v1804_v28 = vadd.f32 1.0, %v1676_v62  ;;  %vm3672_vm2 = vmor %vm3670_vm7, %vm3671_vm1 }
 0x46d   : > { %v4228_v1 = vmul.f32 1.2, %v4085_v37  ;;  %vm3686_vm3 = vweird.f32 %v14073_v13  ;;  %v3669_v0 = vadd.f32 %v8854_v23, %v3668_v21  ;;  %v1678_v18 = vmul.f32 %v9734_v34, %v1533_v14 }
 0x46e   : > { %v18799_v31 = vand.u32 2147483647, %v13780_v61  ;;  %v3684_v47 = vadd.f32 %v14073_v13, %v3683_v38  ;;  %v3698_v2 = vmul.f32 %v14112_v30, %v3697_v57  ;;  %v14143_v22 = vadd.f32 1e-08, %v1802_v32  ;;  %vm14156_vm9 = vmor %vm3685_vm8, %vm3686_vm3 }
 0x46f   : > { %v14145_v3 = vadd.f32 1e-08, %v1804_v28  ;;  %v3673_v62 = vsel %vm3672_vm2, %v8854_v23, %v3669_v0  ;;  %vm3675_vm5 = vcmp.eq.f32.partialorder %v3674_v33, 8.507059e+37  ;;  %v3704_v37 = vand.u32 2147483647, %v14071_v24 }
 0x470   : > { %vm14135_vm6 = vcmp.eq.f32.partialorder %v18799_v31, 8.507059e+37  ;;  %v3706_v55 = vand.u32 2147483648, %v14071_v24  ;;  %v4470_v26 = vmul.f32 1.442695, %v4229_v58  ;;  %v3678_v20 = vsel %vm3675_vm5, %v3677_v6, %v3673_v62  ;;  %v1536_v62 = vpop.xlane.xlu0 %1535 }
 0x471   : > { %v14149_v14 = vadd.f32 1e-08, %v1803_v49  ;;  %8865 = vrcp.f32 %v14143_v22  ;;  %v8864_v15 = vpop.eup %8863  ;;  %v4468_v38 = vmul.f32 1.442695, %v4228_v1  ;;  %vm3701_vm7 = vweird.f32 %v14112_v30 }
 0x472   : > { %8867 = vlog2.f32 %v3678_v20  ;;  %v1806_v0 = vadd.f32 1.0, %v1678_v18  ;;  %v3688_v1 = vsel %vm14156_vm9, %v14073_v13, %v3684_v47  ;;  %v3699_v49 = vadd.f32 %v14112_v30, %v3698_v2 }
 0x473   : > { %8869 = vrcp.f32 %v14145_v3  ;;  %v1677_v21 = vmul.f32 %v9734_v34, %v1530_v63  ;;  %v3493_v57 = vsel %vm14165_vm13, %v13835_v53, %v14090_v52  ;;  %v3607_v61 = vsub.f32 1.0, %v14096_v39 }
 0x474   : > { %8871 = vlog2.f32 %v14092_v51  ;;  %v18806_v58 = vand.u32 2147483648, %v14032_v56  ;;  %v4089_v13 = vmul.f32 0.6931472, %v8864_v15  ;;  %v18807_v32 = vand.u32 2147483647, %v14032_v56 }
 0x475   : > { %8873 = vpow2.f32 %v4470_v26  ;;  %vm3700_vm14 = vweird.f32 %v14071_v24  ;;  %vm14192_vm1 = vcmp.eq.f32.partialorder %v3704_v37, 8.507059e+37  ;;  %v14197_v52 = vadd.f32 1e-08, %v1806_v0 }
 0x476   : > { %v3692_v6 = vor.u32 1.1754944e-38, %v18806_v58  ;;  %vm3690_vm8 = vcmp.eq.f32.partialorder %v18807_v32, 8.507059e+37  ;;  %vm14188_vm15 = vmor %vm3700_vm14, %vm3701_vm7  ;;  %8875 = vrcp.f32 %v14149_v14  ;;  %v3707_v24 = vor.u32 1.1754944e-38, %v3706_v55 }
 0x477   : > { %v14199_v51 = vpop.eup %8865  ;;  %8877 = vpow2.f32 %v4468_v38  ;;  %v3703_v56 = vsel %vm14188_vm15, %v14112_v30, %v3699_v49  ;;  %v1805_v31 = vadd.f32 1.0, %v1677_v21  ;;  %v3498_v37 = vsel %vm14135_vm6, %v13909_v36, %v3493_v57 }
 0x478   : > { %v3693_v28 = vsel %vm3690_vm8, %v3692_v6, %v3688_v1  ;;  %v8868_v47 = vpop.eup %8867  ;;  %v3711_v2 = vmul.f32 %v14199_v51, %v14143_v22  ;;  %8879 = vrcp.f32 %v14197_v52  ;;  %v4230_v26 = vmul.f32 1.2, %v4089_v13 }
 0x479   : > { %v8870_v63 = vpop.eup %8869  ;;  %8881 = vlog2.f32 %v3693_v28  ;;  %v3749_v20 = vand.u32 2147483647, %v14145_v3  ;;  %v3751_v30 = vand.u32 2147483648, %v14145_v3  ;;  %v4091_v15 = vmul.f32 0.6931472, %v8868_v47 }
 0x47a   : > { %v14213_v55 = vpop.eup %8871  ;;  %v14217_v38 = vsel %vm14192_vm1, %v3707_v24, %v3703_v56  ;;  %v3741_v0 = vmul.f32 %v8870_v63, %v14145_v3  ;;  %v3712_v36 = vsub.f32 1.0, %v3711_v2  ;;  %v3779_v33 = vand.u32 2147483647, %v14197_v52 }
 0x47b   : > { %v14221_v50 = vpop.eup %8873  ;;  %v14224_v1 = vadd.f32 1e-08, %v1805_v31  ;;  %8883 = vlog2.f32 %v3498_v37  ;;  %vm3745_vm3 = vweird.f32 %v14145_v3  ;;  %v3781_v57 = vand.u32 2147483648, %v14197_v52 }
 0x47c   : > { %18812 = vst [vmem:[#allocation109_spill] sm:$0xff] %v14221_v50  ;;  %v14226_v49 = vpop.eup %8875  ;;  %v3742_v21 = vsub.f32 1.0, %v3741_v0  ;;  %v4063_v58 = vmul.f32 0.6931472, %v13824_v46  ;;  %v14233_v13 = vmul.f32 1.442695, %v4230_v26  ;;  %vm3746_vm2 = vweird.f32 %v8870_v63 }
 0x47d   : > { %v14231_v6 = vpop.eup %8877  ;;  %vm14235_vm6 = vcmp.eq.f32.partialorder %v3749_v20, 8.507059e+37  ;;  %v3752_v28 = vor.u32 1.1754944e-38, %v3751_v30  ;;  %8885 = vrcp.f32 %v14224_v1  ;;  %vm3775_vm5 = vweird.f32 %v14197_v52  ;;  %vm3747_vm7 = vmor %vm3745_vm3, %vm3746_vm2 }
 0x47e   : > { %18813 = vst [vmem:[#allocation110_spill] sm:$0xff] %v14231_v6  ;;  %v8880_v18 = vpop.eup %8879  ;;  %v3743_v53 = vmul.f32 %v8870_v63, %v3742_v21  ;;  %v4065_v56 = vmul.f32 0.6931472, %v13925_v5  ;;  %v14244_v46 = vmul.f32 1.2, %v4091_v15  ;;  %v3713_v31 = vmul.f32 %v14199_v51, %v3712_v36 }
 0x47f   : > { %v14242_v24 = vpop.eup %8881  ;;  %v3771_v47 = vmul.f32 %v8880_v18, %v14197_v52  ;;  %vm14248_vm9 = vcmp.eq.f32.partialorder %v3779_v33, 8.507059e+37  ;;  %v3782_v26 = vor.u32 1.1754944e-38, %v3781_v57  ;;  %v3764_v20 = vand.u32 2147483647, %v14224_v1 }
 0x480   : > { %v3744_v37 = vadd.f32 %v8870_v63, %v3743_v53  ;;  %v4217_v30 = vmul.f32 1.2, %v4063_v58  ;;  %v3766_v15 = vand.u32 2147483648, %v14224_v1  ;;  %v4218_v21 = vmul.f32 1.2, %v4065_v56 }
 0x481   : > { %v8884_v0 = vpop.eup %8883  ;;  %v3772_v5 = vsub.f32 1.0, %v3771_v47  ;;  %v4444_v36 = vmul.f32 1.442695, %v14082_v29  ;;  %vm3776_vm13 = vweird.f32 %v8880_v18  ;;  %vm3760_vm8 = vweird.f32 %v14224_v1 }
 0x482   : > { %v3748_v33 = vsel %vm3747_vm7, %v8870_v63, %v3744_v37  ;;  %v4067_v53 = vmul.f32 0.6931472, %v8884_v0  ;;  %v4446_v57 = vmul.f32 1.442695, %v4217_v30  ;;  %vm3716_vm14 = vweird.f32 %v14199_v51  ;;  %vm3777_vm3 = vmor %vm3775_vm5, %vm3776_vm13 }
 0x483   : > { %v8886_v23 = vpop.eup %8885  ;;  %v3753_v3 = vsel %vm14235_vm6, %v3752_v28, %v3748_v33  ;;  %v3773_v58 = vmul.f32 %v8880_v18, %v3772_v5  ;;  %8887 = vpow2.f32 %v4444_v36  ;;  %v4448_v47 = vmul.f32 1.442695, %v4218_v21  ;;  %v1542_v5 = vpop.xlane.xlu2 %1541 }
 0x484   : > { %8889 = vlog2.f32 %v3753_v3  ;;  %v3756_v56 = vmul.f32 %v8886_v23, %v14224_v1  ;;  %vm3761_vm15 = vweird.f32 %v8886_v23  ;;  %v4219_v29 = vmul.f32 1.2, %v4067_v53 }
 0x485   : > { %vm3715_vm1 = vweird.f32 %v14143_v22  ;;  %v3774_v63 = vadd.f32 %v8880_v18, %v3773_v58  ;;  %8891 = vpow2.f32 %v4446_v57  ;;  %v4726_v37 = vperm.slane %v13677_v17, %v12447_v16  ;;  %v1539_v57 = vpop.xlane.xlu1 %1538 }
 0x486   : > { %v4727_v30 = vperm.slane %v13791_v4, %v12447_v16  ;;  %v3757_v32 = vsub.f32 1.0, %v3756_v56  ;;  %8893 = vpow2.f32 %v4448_v47  ;;  %v4450_v28 = vmul.f32 1.442695, %v4219_v29  ;;  %vm14311_vm13 = vmor %vm3715_vm1, %vm3716_vm14 }
 0x487   : > { %v4728_v0 = vperm.slane %v13692_v59, %v12447_v16  ;;  %v3778_v21 = vsel %vm3777_vm3, %v8880_v18, %v3774_v63  ;;  %v4729_v36 = vperm.slane %v13887_v45, %v12447_v16  ;;  %vm18818_vm6 = vcmask 1041409  }
 0x488   : > { %v4849_v33 = vsel %vm18818_vm6, %v4727_v30, %v4726_v37  ;;  %v1679_v53 = vmul.f32 %v9734_v34, %v1536_v62  ;;  %v3783_v52 = vsel %vm14248_vm9, %v3782_v26, %v3778_v21  ;;  %v3758_v3 = vmul.f32 %v8886_v23, %v3757_v32  ;;  %vm3762_vm9 = vmor %vm3760_vm8, %vm3761_vm15 }
 0x489   : > { %8895 = vpow2.f32 %v4450_v28  ;;  %vm18819_vm2 = vcmask 1042434   ;;  %v14279_v47 = vpop.eup %8887  ;;  %v3714_v56 = vadd.f32 %v14199_v51, %v3713_v31  ;;  %vm18821_vm5 = vcmask 1043459  }
 0x48a   : > { %v4850_v58 = vsel %vm18819_vm2, %v4728_v0, %v4849_v33  ;;  %18820 = vst [vmem:[#allocation111_spill] sm:$0xff] %v14279_v47  ;;  %v1807_v29 = vadd.f32 1.0, %v1679_v53  ;;  %v1681_v63 = vmul.f32 %v9734_v34, %v1542_v5  ;;  %v8890_v37 = vpop.eup %8889  ;;  %8897 = vlog2.f32 %v3783_v52  ;;  %v1545_v0 = vpop.xlane.xlu0 %1544 }
 0x48b   : > { %v4851_v18 = vsel %vm18821_vm5, %v4729_v36, %v4850_v58  ;;  %v3759_v62 = vadd.f32 %v8886_v23, %v3758_v3  ;;  %v4730_v2 = vperm.slane %v14279_v47, %v12447_v16  ;;  %v1680_v26 = vmul.f32 %v9734_v34, %v1539_v57  ;;  %v14287_v30 = vpop.eup %8891 }
 0x48c   : > { %18822 = vst [vmem:[#allocation112_spill] sm:$0xff] %v14287_v30  ;;  %v4101_v32 = vmul.f32 0.6931472, %v8890_v37  ;;  %vm3765_vm7 = vcmp.eq.f32.partialorder %v3764_v20, 8.507059e+37  ;;  %v3767_v31 = vor.u32 1.1754944e-38, %v3766_v15  ;;  %v14294_v5 = vpop.eup %8893  ;;  %v4731_v36 = vperm.slane %v14287_v30, %v12447_v16 }
 0x48d   : > { %v14292_v28 = vadd.f32 1e-08, %v1807_v29  ;;  %18823 = vst [vmem:[#allocation113_spill] sm:$0xff] %v14294_v5  ;;  %v3763_v21 = vsel %vm3762_vm9, %v8886_v23, %v3759_v62  ;;  %v4852_v33 = vsel %vm4764_vm0, %v4730_v2, %v4851_v18  ;;  %v1809_v53 = vadd.f32 1.0, %v1681_v63 }
 0x48e   : > { %v3768_v57 = vsel %vm3765_vm7, %v3767_v31, %v3763_v21  ;;  %v4732_v52 = vperm.slane %v14294_v5, %v12447_v16  ;;  %v1808_v1 = vadd.f32 1.0, %v1680_v26  ;;  %v3608_v15 = vmul.f32 %v13985_v19, %v3607_v61 }
 0x48f   : > { %8899 = vrcp.f32 %v14292_v28  ;;  %v14302_v20 = vpop.eup %8895  ;;  %v4853_v3 = vsel %vm4766_vm4, %v4731_v36, %v4852_v33  ;;  %v1682_v58 = vmul.f32 %v9734_v34, %v1545_v0  ;;  %v3718_v18 = vsel %vm14311_vm13, %v14199_v51, %v3714_v56 }
 0x490   : > { %18824 = vst [vmem:[#allocation114_spill] sm:$0xff] %v14302_v20  ;;  %8901 = vlog2.f32 %v3768_v57  ;;  %v4236_v39 = vmul.f32 1.2, %v4101_v32  ;;  %v4733_v61 = vperm.slane %v14302_v20, %v12447_v16  ;;  %v4854_v29 = vsel %vm4768_vm12, %v4732_v52, %v4853_v3  ;;  %v8898_v63 = vpop.eup %8897  ;;  %v1548_v52 = vpop.xlane.xlu1 %1547 }
 0x491   : > { %v4474_v37 = vmul.f32 1.442695, %v14244_v46  ;;  %8903 = vlog2.f32 %v14217_v38  ;;  %v18827_v62 = vand.u32 2147483648, %v14143_v22  ;;  %v14327_v26 = vadd.f32 1e-08, %v1809_v53 }
 0x492   : > { %8905 = vpow2.f32 %v14233_v13  ;;  %v18828_v51 = vand.u32 2147483647, %v14143_v22  ;;  %v4855_v56 = vsel %vm4770_vm11, %v4733_v61, %v4854_v29  ;;  %v14333_v32 = vadd.f32 1e-08, %v1808_v1 }
 0x493   : > { %v3722_v2 = vor.u32 1.1754944e-38, %v18827_v62  ;;  %v4930_v0 = vsel %vm4893_vm10, %v4855_v56, 0.0  ;;  %8907 = vrcp.f32 %v14327_v26  ;;  %v1810_v38 = vadd.f32 1.0, %v1682_v58 }
 0x494   : > { %vm3720_vm8 = vcmp.eq.f32.partialorder %v18828_v51, 8.507059e+37  ;;  %v4484_v21 = vmul.f32 1.442695, %v4236_v39  ;;  %v4105_v36 = vmul.f32 0.6931472, %v8898_v63  ;;  %4931 = vadd.xlane.f32.xlu2 %v4930_v0  ;;  %8909 = vrcp.f32 %v14333_v32 }
 0x495   : > { %v3723_v31 = vsel %vm3720_vm8, %v3722_v2, %v3718_v18  ;;  %v8900_v46 = vpop.eup %8899  ;;  %v3794_v33 = vand.u32 2147483647, %v14292_v28  ;;  %8911 = vpow2.f32 %v4474_v37  ;;  %v14343_v1 = vmul.f32 0.6931472, %v14012_v9 }
 0x496   : > { %v8902_v22 = vpop.eup %8901  ;;  %v3786_v57 = vmul.f32 %v8900_v46, %v14292_v28  ;;  %v14346_v23 = vadd.f32 %v13985_v19, %v3608_v15  ;;  %8913 = vlog2.f32 %v3723_v31  ;;  %v3796_v3 = vand.u32 2147483648, %v14292_v28 }
 0x497   : > { %v14349_v58 = vpop.eup %8903  ;;  %v4103_v18 = vmul.f32 0.6931472, %v8902_v22  ;;  %vm3790_vm14 = vweird.f32 %v14292_v28  ;;  %v14352_v61 = vadd.f32 1e-08, %v1810_v38  ;;  %8915 = vpow2.f32 %v4484_v21 }
 0x498   : > { %v3787_v39 = vsub.f32 1.0, %v3786_v57  ;;  %v14354_v29 = vpop.eup %8905  ;;  %v4238_v63 = vmul.f32 1.2, %v4105_v36  ;;  %vm14356_vm15 = vcmp.eq.f32.partialorder %v3794_v33, 8.507059e+37  ;;  %v1683_v15 = vmul.f32 %v9734_v34, %v1548_v52 }
 0x499   : > { %18829 = vst [vmem:[#allocation115_spill] sm:$0xff] %v14354_v29  ;;  %v8908_v37 = vpop.eup %8907  ;;  %vm3791_vm1 = vweird.f32 %v8900_v46  ;;  %v3824_v2 = vand.u32 2147483647, %v14327_v26  ;;  %8917 = vrcp.f32 %v14352_v61  ;;  %v3797_v56 = vor.u32 1.1754944e-38, %v3796_v3 }
 0x49a   : > { %v3788_v62 = vmul.f32 %v8900_v46, %v3787_v39  ;;  %v8910_v51 = vpop.eup %8909  ;;  %v3816_v31 = vmul.f32 %v8908_v37, %v14327_v26  ;;  %vm3820_vm3 = vweird.f32 %v14327_v26  ;;  %v3826_v0 = vand.u32 2147483648, %v14327_v26  ;;  %vm3792_vm2 = vmor %vm3790_vm14, %vm3791_vm1 }
 0x49b   : > { %v14366_v38 = vpop.eup %8911  ;;  %v4237_v21 = vmul.f32 1.2, %v4103_v18  ;;  %v3801_v34 = vmul.f32 %v8910_v51, %v14333_v32  ;;  %vm3805_vm6 = vweird.f32 %v14333_v32  ;;  %v4488_v22 = vmul.f32 1.442695, %v4238_v63 }
 0x49c   : > { %18832 = vst [vmem:[#allocation116_spill] sm:$0xff] %v14366_v38  ;;  %v3789_v36 = vadd.f32 %v8900_v46, %v3788_v62  ;;  %v14370_v33 = vpop.eup %8913  ;;  %v3817_v57 = vsub.f32 1.0, %v3816_v31  ;;  %v3809_v52 = vand.u32 2147483647, %v14333_v32  ;;  %v1811_v3 = vadd.f32 1.0, %v1683_v15 }
 0x49d   : > { %vm14376_vm5 = vcmp.eq.f32.partialorder %v3824_v2, 8.507059e+37  ;;  %v3802_v18 = vsub.f32 1.0, %v3801_v34  ;;  %v3811_v62 = vand.u32 2147483648, %v14333_v32  ;;  %v14381_v53 = vpop.eup %8915  ;;  %vm3611_vm9 = vweird.f32 %v13985_v19  ;;  %v14386_v2 = vpop.xlane.xlu2 %4895 }
 0x49e   : > { %v3793_v39 = vsel %vm3792_vm2, %v8900_v46, %v3789_v36  ;;  %18835 = vst [vmem:[#allocation117_spill] sm:$0xff] %v14381_v53  ;;  %v3818_v63 = vmul.f32 %v8908_v37, %v3817_v57  ;;  %vm3821_vm7 = vweird.f32 %v8908_v37  ;;  %v3827_v31 = vor.u32 1.1754944e-38, %v3826_v0 }
 0x49f   : > { %v3798_v28 = vsel %vm14356_vm15, %v3797_v56, %v3793_v39  ;;  %v8918_v30 = vpop.eup %8917  ;;  %v4486_v15 = vmul.f32 1.442695, %v4237_v21  ;;  %v3803_v46 = vmul.f32 %v8910_v51, %v3802_v18  ;;  %vm3806_vm13 = vweird.f32 %v8910_v51  ;;  %vm3822_vm14 = vmor %vm3820_vm3, %vm3821_vm7 }
 0x4a0   : > { %8919 = vlog2.f32 %v3798_v28  ;;  %vm3610_vm8 = vweird.f32 %v13928_v60  ;;  %v3819_v36 = vadd.f32 %v8908_v37, %v3818_v63  ;;  %v3831_v34 = vmul.f32 %v8918_v30, %v14352_v61  ;;  %vm3807_vm1 = vmor %vm3805_vm6, %vm3806_vm13 }
 0x4a1   : > { %8921 = vpow2.f32 %v4488_v22  ;;  %v14390_v59 = vadd.f32 1e-08, %v1811_v3  ;;  %v3804_v9 = vadd.f32 %v8910_v51, %v3803_v46  ;;  %vm3810_vm15 = vcmp.eq.f32.partialorder %v3809_v52, 8.507059e+37  ;;  %vm14434_vm7 = vmor %vm3610_vm8, %vm3611_vm9 }
 0x4a2   : > { %v3812_v56 = vor.u32 1.1754944e-38, %v3811_v62  ;;  %v3839_v0 = vand.u32 2147483647, %v14352_v61  ;;  %v3823_v21 = vsel %vm3822_vm14, %v8908_v37, %v3819_v36  ;;  %v3832_v57 = vsub.f32 1.0, %v3831_v34 }
 0x4a3   : > { %v3841_v22 = vand.u32 2147483648, %v14352_v61  ;;  %v14399_v39 = vperm.slane %v14386_v2, 0  ;;  %8923 = vpow2.f32 %v4486_v15  ;;  %v3828_v26 = vsel %vm14376_vm5, %v3827_v31, %v3823_v21 }
 0x4a4   : > { %v3808_v3 = vsel %vm3807_vm1, %v8910_v51, %v3804_v9  ;;  %v14404_v52 = vperm.slane %v14386_v2, 1  ;;  %v3833_v62 = vmul.f32 %v8918_v30, %v3832_v57  ;;  %vm3836_vm3 = vweird.f32 %v8918_v30 }
 0x4a5   : > { %v3813_v18 = vsel %vm3810_vm15, %v3812_v56, %v3808_v3  ;;  %8925 = vrcp.f32 %v14390_v59  ;;  %vm3835_vm6 = vweird.f32 %v14352_v61  ;;  %vm14408_vm2 = vcmp.eq.f32.partialorder %v3839_v0, 8.507059e+37 }
 0x4a6   : > { %v8920_v32 = vpop.eup %8919  ;;  %8927 = vlog2.f32 %v3828_v26  ;;  %v14413_v13 = vperm.slane %v14386_v2, 2  ;;  %v3834_v63 = vadd.f32 %v8918_v30, %v3833_v62  ;;  %v14418_v31 = vperm.slane %v14386_v2, 3  ;;  %vm3837_vm5 = vmor %vm3835_vm6, %vm3836_vm3 }
 0x4a7   : > { %v14415_v51 = vpop.eup %8921  ;;  %v4107_v28 = vmul.f32 0.6931472, %v8920_v32  ;;  %8929 = vlog2.f32 %v3813_v18  ;;  %v3842_v15 = vor.u32 1.1754944e-38, %v3841_v22  ;;  %v14421_v46 = vperm.slane %v14386_v2, 4 }
 0x4a8   : > { %18838 = vst [vmem:[#allocation118_spill] sm:$0xff] %v14413_v13  ;;  %8931 = vrcp.f32 %v14399_v39  ;;  %v4079_v61 = vmul.f32 0.6931472, %v14213_v55  ;;  %v3838_v34 = vsel %vm3837_vm5, %v8918_v30, %v3834_v63  ;;  %v4081_v9 = vmul.f32 0.6931472, %v14120_v54 }
 0x4a9   : > { %18839 = vst [vmem:[#allocation119_spill] sm:$0xff] %v14415_v51  ;;  %v4239_v36 = vmul.f32 1.2, %v4107_v28  ;;  %8933 = vrcp.f32 %v14404_v52  ;;  %v14427_v56 = vpop.eup %8923  ;;  %v4224_v0 = vmul.f32 1.2, %v14343_v1  ;;  %v3843_v55 = vsel %vm14408_vm2, %v3842_v15, %v3838_v34 }
 0x4aa   : > { %18840 = vst [vmem:[#allocation120_spill] sm:$0xff] %v14418_v31  ;;  %8935 = vrcp.f32 %v14413_v13  ;;  %v3613_v54 = vsel %vm14434_vm7, %v13985_v19, %v14346_v23  ;;  %v14448_v57 = vperm.slane %v14386_v2, 5  ;;  %v18846_v26 = vand.u32 2147483648, %v13928_v60 }
 0x4ab   : > { %18841 = vst [vmem:[#allocation121_spill] sm:$0xff] %v14421_v46  ;;  %v14441_v30 = vpop.eup %8925  ;;  %v4490_v1 = vmul.f32 1.442695, %v4239_v36  ;;  %8937 = vrcp.f32 %v14418_v31  ;;  %v14456_v18 = vperm.slane %v14386_v2, 6  ;;  %v4225_v62 = vmul.f32 1.2, %v4079_v61  ;;  %v4899_v36 = vpop.xlane.xlu0 %4898 }
 0x4ac   : > { %18842 = vst [vmem:[#allocation122_spill] sm:$0xff] %v14427_v56  ;;  %v14451_v22 = vpop.eup %8927  ;;  %v3617_v3 = vor.u32 1.1754944e-38, %v18846_v26  ;;  %8939 = vlog2.f32 %v3843_v55  ;;  %v18848_v19 = vand.u32 2147483647, %v13928_v60  ;;  %v4226_v23 = vmul.f32 1.2, %v4081_v9 }
 0x4ad   : > { %18845 = vst [vmem:[#allocation123_spill] sm:$0xff] %v14448_v57  ;;  %v14458_v32 = vpop.eup %8929  ;;  %8941 = vrcp.f32 %v14421_v46  ;;  %v14466_v28 = vperm.slane %v14386_v2, 7  ;;  %v4460_v61 = vmul.f32 1.442695, %v4224_v0  ;;  %v4462_v60 = vmul.f32 1.442695, %v4225_v62 }
 0x4ae   : > { %18847 = vst [vmem:[#allocation124_spill] sm:$0xff] %v14456_v18  ;;  %vm3615_vm9 = vcmp.eq.f32.partialorder %v18848_v19, 8.507059e+37  ;;  %v14463_v37 = vpop.eup %8931  ;;  %8943 = vpow2.f32 %v4490_v1  ;;  %v4464_v9 = vmul.f32 1.442695, %v4226_v23  ;;  %v14479_v2 = vperm.slane %v4899_v36, 0 }
 0x4af   : > { %v3618_v63 = vsel %vm3615_vm9, %v3617_v3, %v3613_v54  ;;  %v14468_v15 = vpop.eup %8933  ;;  %8945 = vrcp.f32 %v14448_v57  ;;  %v14483_v0 = vperm.slane %v4899_v36, 1  ;;  %v4735_v26 = vperm.slane %v14004_v10, %v12447_v16 }
 0x4b0   : > { %v14471_v34 = vpop.eup %8935  ;;  %8947 = vrcp.f32 %v14456_v18  ;;  %18851 = vst [vmem:[#allocation127_spill] sm:$0xff] %v14479_v2  ;;  %v14489_v3 = vperm.slane %v4899_v36, 2  ;;  %v14493_v19 = vperm.slane %v4899_v36, 3  ;;  %v4736_v10 = vperm.slane %v14125_v48, %v12447_v16 }
 0x4b1   : > { %18849 = vst [vmem:[#allocation125_spill] sm:$0xff] %v14471_v34  ;;  %v14474_v21 = vpop.eup %8937  ;;  %8949 = vlog2.f32 %v3618_v63  ;;  %v4734_v63 = vperm.slane %v13963_v44, %v12447_v16  ;;  %v14504_v5 = vperm.slane %v4899_v36, 5  ;;  %vm18859_vm13 = vcmask 1041409   ;;  %v4902_v44 = vpop.xlane.xlu1 %4901 }
 0x4b2   : > { %18850 = vst [vmem:[#allocation126_spill] sm:$0xff] %v14474_v21  ;;  %v14476_v55 = vpop.eup %8939  ;;  %8951 = vrcp.f32 %v14466_v28  ;;  %v14510_v20 = vperm.slane %v4899_v36, 6  ;;  %v14515_v4 = vperm.slane %v4899_v36, 7  ;;  %vm18865_vm8 = vcmask 1042434  }
 0x4b3   : > { %v14481_v54 = vpop.eup %8941  ;;  %8953 = vpow2.f32 %v4460_v61  ;;  %18853 = vst [vmem:[#allocation129_spill] sm:$0xff] %v14483_v0  ;;  %v14499_v61 = vperm.slane %v4899_v36, 4  ;;  %v4856_v17 = vsel %vm18859_vm13, %v4735_v26, %v4734_v63  ;;  %v4737_v26 = vperm.slane %v14107_v43, %v12447_v16 }
 0x4b4   : > { %18852 = vst [vmem:[#allocation128_spill] sm:$0xff] %v14481_v54  ;;  %v14485_v1 = vpop.eup %8943  ;;  %8955 = vpow2.f32 %v4462_v60  ;;  %v4857_v63 = vsel %vm18865_vm8, %v4736_v10, %v4856_v17  ;;  %v3726_v43 = vmul.f32 %v14226_v49, %v14149_v14  ;;  %v14541_v17 = vperm.slane %v4902_v44, 2 }
 0x4b5   : > { %18854 = vst [vmem:[#allocation130_spill] sm:$0xff] %v14485_v1  ;;  %v14491_v62 = vpop.eup %8945  ;;  %8957 = vpow2.f32 %v4464_v9  ;;  %vm18873_vm14 = vcmask 1043459   ;;  %vm3730_vm15 = vweird.f32 %v14149_v14  ;;  %vm3731_vm1 = vweird.f32 %v14226_v49 }
 0x4b6   : > { %18855 = vst [vmem:[#allocation131_spill] sm:$0xff] %v14491_v62  ;;  %v14495_v23 = vpop.eup %8947  ;;  %8959 = vrcp.f32 %v14479_v2  ;;  %v3846_v2 = vmul.f32 %v14441_v30, %v14390_v59  ;;  %v4093_v31 = vmul.f32 0.6931472, %v14242_v24  ;;  %v4109_v24 = vmul.f32 0.6931472, %v14458_v32  ;;  %vm14646_vm3 = vmor %vm3730_vm15, %vm3731_vm1 }
 0x4b7   : > { %18856 = vst [vmem:[#allocation132_spill] sm:$0xff] %v14493_v19  ;;  %v8950_v60 = vpop.eup %8949  ;;  %8961 = vrcp.f32 %v14483_v0  ;;  %vm3851_vm6 = vweird.f32 %v14441_v30  ;;  %vm3850_vm5 = vweird.f32 %v14390_v59  ;;  %vm5219_vm9 = vweird.f32 %v14399_v39 }
 0x4b8   : > { %18857 = vst [vmem:[#allocation133_spill] sm:$0xff] %v14495_v23  ;;  %v14507_v9 = vpop.eup %8951  ;;  %v4083_v45 = vmul.f32 0.6931472, %v8950_v60  ;;  %8963 = vrcp.f32 %v14489_v3  ;;  %v14527_v60 = vperm.slane %v4902_v44, 0  ;;  %vm14685_vm7 = vmor %vm3850_vm5, %vm3851_vm6  ;;  %vm5324_vm8 = vweird.f32 %v14466_v28 }
 0x4b9   : > { %18858 = vst [vmem:[#allocation134_spill] sm:$0xff] %v14499_v61  ;;  %v14513_v47 = vpop.eup %8953  ;;  %8965 = vrcp.f32 %v14493_v19  ;;  %v14552_v19 = vperm.slane %v4902_v44, 4  ;;  %vm5220_vm1 = vweird.f32 %v14463_v37  ;;  %vm5234_vm5 = vweird.f32 %v14404_v52 }
 0x4ba   : > { %18860 = vst [vmem:[#allocation135_spill] sm:$0xff] %v14510_v20  ;;  %v14518_v48 = vpop.eup %8955  ;;  %v4227_v35 = vmul.f32 1.2, %v4083_v45  ;;  %8967 = vrcp.f32 %v14499_v61  ;;  %v4738_v11 = vperm.slane %v14513_v47, %v12447_v16  ;;  %v14534_v45 = vperm.slane %v4902_v44, 1 }
 0x4bb   : > { %18861 = vst [vmem:[#allocation136_spill] sm:$0xff] %v14513_v47  ;;  %v14521_v27 = vpop.eup %8957  ;;  %8969 = vrcp.f32 %v14504_v5  ;;  %v4739_v47 = vperm.slane %v14518_v48, %v12447_v16 }
 0x4bc   : > { %18862 = vst [vmem:[#allocation137_spill] sm:$0xff] %v14515_v4  ;;  %v14529_v36 = vpop.eup %8959  ;;  %v4466_v25 = vmul.f32 1.442695, %v4227_v35  ;;  %8971 = vrcp.f32 %v14510_v20  ;;  %v14545_v35 = vperm.slane %v4902_v44, 3  ;;  %v4858_v20 = vsel %vm18873_vm14, %v4737_v26, %v4857_v63 }
 0x4bd   : > { %18863 = vst [vmem:[#allocation138_spill] sm:$0xff] %v14518_v48  ;;  %v14536_v41 = vpop.eup %8961  ;;  %8973 = vrcp.f32 %v14515_v4  ;;  %v14560_v4 = vperm.slane %v4902_v44, 5  ;;  %v3727_v48 = vsub.f32 1.0, %v3726_v43  ;;  %v14565_v26 = vperm.slane %v4902_v44, 6 }
 0x4be   : > { %18864 = vst [vmem:[#allocation139_spill] sm:$0xff] %v14521_v27  ;;  %v14543_v10 = vpop.eup %8963  ;;  %8975 = vpow2.f32 %v4466_v25  ;;  %v4859_v25 = vsel %vm4764_vm0, %v4738_v11, %v4858_v20  ;;  %v4740_v57 = vperm.slane %v14521_v27, %v12447_v16  ;;  %vm18959_vm14 = vcmask 1041409  }
 0x4bf   : > { %18866 = vst [vmem:[#allocation140_spill] sm:$0xff] %v14527_v60  ;;  %v14547_v42 = vpop.eup %8965  ;;  %8977 = vrcp.f32 %v14527_v60  ;;  %v4860_v20 = vsel %vm4766_vm4, %v4739_v47, %v4859_v25 }
 0x4c0   : > { %18867 = vst [vmem:[#allocation141_spill] sm:$0xff] %v14529_v36  ;;  %v14555_v36 = vpop.eup %8967  ;;  %8979 = vrcp.f32 %v14534_v45 }
 0x4c1   : > { %18868 = vst [vmem:[#allocation142_spill] sm:$0xff] %v14534_v45  ;;  %v14563_v62 = vpop.eup %8969  ;;  %8981 = vrcp.f32 %v14541_v17 }
 0x4c2   : > { %18869 = vst [vmem:[#allocation143_spill] sm:$0xff] %v14536_v41  ;;  %v14568_v63 = vpop.eup %8971  ;;  %8983 = vrcp.f32 %v14545_v35 }
 0x4c3   : > { %18870 = vst [vmem:[#allocation144_spill] sm:$0xff] %v14541_v17  ;;  %v14575_v11 = vpop.eup %8973  ;;  %8985 = vrcp.f32 %v14552_v19  ;;  %v3728_v17 = vmul.f32 %v14226_v49, %v3727_v48 }
 0x4c4   : > { %18871 = vst [vmem:[#allocation145_spill] sm:$0xff] %v14545_v35  ;;  %v14581_v45 = vpop.eup %8975  ;;  %8987 = vrcp.f32 %v14560_v4 }
 0x4c5   : > { %18872 = vst [vmem:[#allocation146_spill] sm:$0xff] %v14547_v42  ;;  %v4905_v42 = vpop.xlane.xlu2 %4904  ;;  %v4741_v47 = vperm.slane %v14581_v45, %v12447_v16  ;;  %8989 = vrcp.f32 %v14565_v26 }
 0x4c6   : > { %18874 = vst [vmem:[#allocation147_spill] sm:$0xff] %v14552_v19  ;;  %v14579_v43 = vperm.slane %v4905_v42, 0  ;;  %v14585_v27 = vperm.slane %v4905_v42, 1  ;;  %v14593_v25 = vperm.slane %v4905_v42, 2 }
 0x4c7   : > { %18875 = vst [vmem:[#allocation148_spill] sm:$0xff] %v14555_v36  ;;  %v14572_v36 = vperm.slane %v4902_v44, 7  ;;  %v14587_v44 = vpop.eup %8977 }
 0x4c8   : > { %18876 = vst [vmem:[#allocation149_spill] sm:$0xff] %v14560_v4  ;;  %v14595_v19 = vpop.eup %8979  ;;  %v14600_v4 = vperm.slane %v4905_v42, 3 }
 0x4c9   : > { %18877 = vst [vmem:[#allocation150_spill] sm:$0xff] %v14565_v26  ;;  %8991 = vrcp.f32 %v14572_v36  ;;  %v14602_v61 = vpop.eup %8981  ;;  %v9331_v26 = vmov 0  }
 0x4ca   : > { %18878 = vst [vmem:[#allocation151_spill] sm:$0xff] %v14568_v63  ;;  %v3847_v63 = vsub.f32 1.0, %v3846_v2  ;;  %v4861_v2 = vsel %vm4768_vm12, %v4740_v57, %v4860_v20  ;;  %8993 = vrcp.f32 %v14579_v43  ;;  %v14609_v21 = vpop.eup %8983  ;;  %v14613_v20 = vperm.slane %v4905_v42, 5  ;;  %8191 = vset.pattern.permute.xlu0 %v9331_v26  ;;  %8192 = vset.pattern.permute.xlu1 %v9331_v26 }
 0x4cb   : > { %18879 = vst [vmem:[#allocation152_spill] sm:$0xff] %v14572_v36  ;;  %v4862_v48 = vsel %vm4770_vm11, %v4741_v47, %v4861_v2  ;;  %8995 = vrcp.f32 %v14585_v27  ;;  %v4908_v36 = vpop.xlane.xlu0 %4907  ;;  %v14620_v47 = vadd.f32 %v14226_v49, %v3728_v17  ;;  %v14622_v2 = vperm.slane %v4905_v42, 6  ;;  %8193 = vset.pattern.permute.xlu2 %v9331_v26 }
 0x4cc   : > { %18880 = vst [vmem:[#allocation153_spill] sm:$0xff] %v14575_v11  ;;  %v3736_v11 = vand.u32 2147483648, %v14149_v14  ;;  %v4933_v57 = vsel %vm4893_vm10, %v4862_v48, 0.0  ;;  %8997 = vrcp.f32 %v14593_v25  ;;  %v3734_v48 = vand.u32 2147483647, %v14149_v14 }
 0x4cd   : > { %18881 = vst [vmem:[#allocation154_spill] sm:$0xff] %v14579_v43  ;;  %4934 = vadd.xlane.f32.xlu0 %v4933_v57  ;;  %8999 = vrcp.f32 %v14600_v4  ;;  %v3856_v17 = vand.u32 2147483648, %v14390_v59  ;;  %v14638_v57 = vperm.slane %v4908_v36, 0  ;;  %v14655_v32 = vperm.slane %v4908_v36, 1  ;;  %v4914_v41 = vpop.xlane.xlu2 %4913 }
 0x4ce   : > { %18882 = vst [vmem:[#allocation155_spill] sm:$0xff] %v14581_v45  ;;  %v14606_v45 = vperm.slane %v4905_v42, 4  ;;  %v14628_v43 = vor.u32 1.1754944e-38, %v3736_v11  ;;  %v3733_v14 = vsel %vm14646_vm3, %v14226_v49, %v14620_v47  ;;  %vm14670_vm2 = vcmp.eq.f32.partialorder %v3734_v48, 8.507059e+37 }
 0x4cf   : > { %18883 = vst [vmem:[#allocation156_spill] sm:$0xff] %v14585_v27  ;;  %v14630_v27 = vperm.slane %v4905_v42, 7  ;;  %v14681_v47 = vmul.f32 1.2, %v4109_v24  ;;  %v14689_v48 = vor.u32 1.1754944e-38, %v3856_v17  ;;  %v14707_v17 = vperm.slane %v4908_v36, 7 }
 0x4d0   : > { %18884 = vst [vmem:[#allocation157_spill] sm:$0xff] %v14587_v44  ;;  %9001 = vrcp.f32 %v14606_v45  ;;  %v14735_v34 = vperm.slane %v4914_v41, 0  ;;  %v14742_v13 = vperm.slane %v4914_v41, 2  ;;  %v14746_v35 = vperm.slane %v4914_v41, 4 }
 0x4d1   : > { %18885 = vst [vmem:[#allocation158_spill] sm:$0xff] %v14593_v25  ;;  %9003 = vrcp.f32 %v14613_v20  ;;  %v14755_v26 = vperm.slane %v4914_v41, 7  ;;  %v14763_v18 = vsel %vm14670_vm2, %v14628_v43, %v3733_v14  ;;  %vm5325_vm3 = vweird.f32 %v14507_v9  ;;  %vm5221_vm2 = vmor %vm5219_vm9, %vm5220_vm1 }
 0x4d2   : > { %18886 = vst [vmem:[#allocation159_spill] sm:$0xff] %v14595_v19  ;;  %v3848_v19 = vmul.f32 %v14441_v30, %v3847_v63  ;;  %9005 = vrcp.f32 %v14622_v2  ;;  %vm18971_vm9 = vcmask 1042434   ;;  %vm5369_vm1 = vweird.f32 %v14489_v3 }
 0x4d3   : > { %18887 = vst [vmem:[#allocation160_spill] sm:$0xff] %v14600_v4  ;;  %9007 = vrcp.f32 %v14630_v27 }
 0x4d4   : > { %18888 = vst [vmem:[#allocation161_spill] sm:$0xff] %v14602_v61  ;;  %v14616_v61 = vpop.eup %8985  ;;  %v14651_v11 = vadd.f32 %v14441_v30, %v3848_v19  ;;  %v4911_v19 = vpop.xlane.xlu1 %4910  ;;  %9009 = vrcp.f32 %v14638_v57 }
 0x4d5   : > { %18889 = vst [vmem:[#allocation162_spill] sm:$0xff] %v14606_v45  ;;  %v14625_v63 = vpop.eup %8987  ;;  %9011 = vrcp.f32 %v14655_v32  ;;  %v14717_v24 = vperm.slane %v4911_v19, 2 }
 0x4d6   : > { %18890 = vst [vmem:[#allocation163_spill] sm:$0xff] %v14609_v21  ;;  %v14744_v21 = vperm.slane %v4914_v41, 3 }
 0x4d7   : > { %18891 = vst [vmem:[#allocation164_spill] sm:$0xff] %v14613_v20 }
 0x4d8   : > { %18892 = vst [vmem:[#allocation165_spill] sm:$0xff] %v14616_v61  ;;  %v14633_v61 = vpop.eup %8989 }
 0x4d9   : > { %18893 = vst [vmem:[#allocation166_spill] sm:$0xff] %v14622_v2  ;;  %v14640_v25 = vpop.eup %8991  ;;  %v14691_v2 = vperm.slane %v4908_v36, 4 }
 0x4da   : > { %18894 = vst [vmem:[#allocation167_spill] sm:$0xff] %v14625_v63  ;;  %v14657_v4 = vpop.eup %8993  ;;  %v14666_v63 = vperm.slane %v4908_v36, 2 }
 0x4db   : > { %18895 = vst [vmem:[#allocation168_spill] sm:$0xff] %v14630_v27  ;;  %v14668_v45 = vpop.eup %8995  ;;  %v14702_v27 = vperm.slane %v4908_v36, 6 }
 0x4dc   : > { %18896 = vst [vmem:[#allocation169_spill] sm:$0xff] %v14633_v61  ;;  %v14679_v49 = vpop.eup %8997  ;;  %9013 = vrcp.f32 %v14666_v63  ;;  %v14719_v61 = vperm.slane %v4911_v19, 3 }
 0x4dd   : > { %18897 = vst [vmem:[#allocation170_spill] sm:$0xff] %v14638_v57  ;;  %v14710_v57 = vperm.slane %v4911_v19, 0 }
 0x4de   : > { %18898 = vst [vmem:[#allocation171_spill] sm:$0xff] %v14640_v25  ;;  %v14659_v25 = vmul.f32 1.2, %v4093_v31  ;;  %v14694_v31 = vpop.eup %8999 }
 0x4df   : > { %18901 = vst [vmem:[#allocation172_spill] sm:$0xff] %v14655_v32 }
 0x4e0   : > { %18902 = vst [vmem:[#allocation173_spill] sm:$0xff] %v14657_v4  ;;  %v14677_v4 = vperm.slane %v4908_v36, 3 }
 0x4e1   : > { %18903 = vst [vmem:[#allocation174_spill] sm:$0xff] %v14666_v63  ;;  %v14726_v63 = vperm.slane %v4911_v19, 5 }
 0x4e2   : > { %18904 = vst [vmem:[#allocation175_spill] sm:$0xff] %v14668_v45  ;;  %v14705_v45 = vpop.eup %9001  ;;  %9015 = vrcp.f32 %v14677_v4 }
 0x4e3   : > { %18907 = vst [vmem:[#allocation176_spill] sm:$0xff] %v14677_v4  ;;  %v14714_v0 = vpop.eup %9003  ;;  %9017 = vrcp.f32 %v14691_v2  ;;  %v14733_v4 = vperm.slane %v4911_v19, 7 }
 0x4e4   : > { %18908 = vst [vmem:[#allocation177_spill] sm:$0xff] %v14679_v49  ;;  %v14700_v49 = vperm.slane %v4908_v36, 5  ;;  %v14721_v32 = vpop.eup %9005  ;;  %v14724_v36 = vperm.slane %v4911_v19, 4 }
 0x4e5   : > { %18911 = vst [vmem:[#allocation178_spill] sm:$0xff] %v14691_v2 }
 0x4e6   : > { %18912 = vst [vmem:[#allocation179_spill] sm:$0xff] %v14694_v31  ;;  %v14712_v31 = vperm.slane %v4911_v19, 1  ;;  %9019 = vrcp.f32 %v14700_v49 }
 0x4e7   : > { %18913 = vst [vmem:[#allocation180_spill] sm:$0xff] %v14700_v49  ;;  %9021 = vrcp.f32 %v14702_v27  ;;  %v14753_v49 = vperm.slane %v4914_v41, 6 }
 0x4e8   : > { %18914 = vst [vmem:[#allocation181_spill] sm:$0xff] %v14702_v27  ;;  %9023 = vrcp.f32 %v14707_v17  ;;  %v4920_v27 = vpop.xlane.xlu1 %4919 }
 0x4e9   : > { %18915 = vst [vmem:[#allocation182_spill] sm:$0xff] %v14705_v45  ;;  %v14728_v45 = vperm.slane %v4911_v19, 6  ;;  %v14751_v19 = vperm.slane %v4914_v41, 5  ;;  %9025 = vrcp.f32 %v14710_v57  ;;  %v14801_v1 = vperm.slane %v4920_v27, 3 }
 0x4ea   : > { %18916 = vst [vmem:[#allocation183_spill] sm:$0xff] %v14707_v17  ;;  %v4097_v17 = vmul.f32 0.6931472, %v14370_v33  ;;  %9027 = vrcp.f32 %v14712_v31  ;;  %v14824_v56 = vperm.slane %v4920_v27, 7 }
 0x4eb   : > { %18917 = vst [vmem:[#allocation184_spill] sm:$0xff] %v14710_v57  ;;  %9029 = vrcp.f32 %v14717_v24 }
 0x4ec   : > { %18918 = vst [vmem:[#allocation185_spill] sm:$0xff] %v14712_v31  ;;  %9031 = vrcp.f32 %v14719_v61 }
 0x4ed   : > { %18919 = vst [vmem:[#allocation186_spill] sm:$0xff] %v14714_v0  ;;  %v14730_v0 = vpop.eup %9007  ;;  %9033 = vrcp.f32 %v14724_v36 }
 0x4ee   : > { %18920 = vst [vmem:[#allocation187_spill] sm:$0xff] %v14717_v24  ;;  %v14739_v2 = vpop.eup %9009  ;;  %v14797_v24 = vperm.slane %v4920_v27, 1  ;;  %9035 = vrcp.f32 %v14726_v63 }
 0x4ef   : > { %18921 = vst [vmem:[#allocation188_spill] sm:$0xff] %v14719_v61  ;;  %v14748_v23 = vpop.eup %9011  ;;  %v14806_v61 = vperm.slane %v4920_v27, 4  ;;  %9037 = vrcp.f32 %v14728_v45 }
 0x4f0   : > { %18922 = vst [vmem:[#allocation189_spill] sm:$0xff] %v14721_v32  ;;  %v14737_v32 = vperm.slane %v4914_v41, 1  ;;  %9039 = vrcp.f32 %v14733_v4 }
 0x4f1   : > { %18923 = vst [vmem:[#allocation190_spill] sm:$0xff] %v14724_v36  ;;  %v4742_v36 = vperm.slane %v14231_v6, %v12447_v16  ;;  %9041 = vrcp.f32 %v14735_v34  ;;  %v5330_v6 = vand.u32 2147483648, %v14466_v28 }
 0x4f2   : > { %18924 = vst [vmem:[#allocation191_spill] sm:$0xff] %v14726_v63  ;;  %v14822_v63 = vperm.slane %v4920_v27, 6  ;;  %9043 = vrcp.f32 %v14737_v32 }
 0x4f3   : > { %18925 = vst [vmem:[#allocation192_spill] sm:$0xff] %v14728_v45 }
 0x4f4   : > { %18926 = vst [vmem:[#allocation193_spill] sm:$0xff] %v14730_v0  ;;  %v4917_v0 = vpop.xlane.xlu0 %4916 }
 0x4f5   : > { %18927 = vst [vmem:[#allocation194_spill] sm:$0xff] %v14733_v4  ;;  %v14770_v41 = vperm.slane %v4917_v0, 0  ;;  %v14772_v44 = vperm.slane %v4917_v0, 1  ;;  %v14779_v43 = vperm.slane %v4917_v0, 3  ;;  %v14781_v20 = vperm.slane %v4917_v0, 4 }
 0x4f6   : > { %18928 = vst [vmem:[#allocation195_spill] sm:$0xff] %v14735_v34  ;;  %v14788_v14 = vperm.slane %v4917_v0, 6  ;;  %v14790_v31 = vperm.slane %v4917_v0, 7 }
 0x4f7   : > { %18929 = vst [vmem:[#allocation196_spill] sm:$0xff] %v14737_v32 }
 0x4f8   : > { %18930 = vst [vmem:[#allocation197_spill] sm:$0xff] %v14739_v2  ;;  %v14757_v2 = vpop.eup %9013  ;;  %9045 = vrcp.f32 %v14742_v13 }
 0x4f9   : > { %18931 = vst [vmem:[#allocation198_spill] sm:$0xff] %v14742_v13  ;;  %v14767_v40 = vpop.eup %9015  ;;  %9047 = vrcp.f32 %v14744_v21 }
 0x4fa   : > { %18932 = vst [vmem:[#allocation199_spill] sm:$0xff] %v14748_v23  ;;  %v4095_v23 = vmul.f32 0.6931472, %v14349_v58  ;;  %v14776_v57 = vpop.eup %9017  ;;  %v14783_v58 = vperm.slane %v4917_v0, 5  ;;  %9049 = vrcp.f32 %v14746_v35 }
 0x4fb   : > { %18933 = vst [vmem:[#allocation200_spill] sm:$0xff] %v14751_v19  ;;  %v14785_v33 = vpop.eup %9019  ;;  %9051 = vrcp.f32 %v14751_v19  ;;  %v5365_v19 = vmul.f32 %v14543_v10, %v14489_v3 }
 0x4fc   : > { %18934 = vst [vmem:[#allocation201_spill] sm:$0xff] %v14753_v49  ;;  %v14794_v60 = vpop.eup %9021  ;;  %9053 = vrcp.f32 %v14753_v49  ;;  %v18964_v49 = vand.u32 2147483647, %v14390_v59 }
 0x4fd   : > { %18935 = vst [vmem:[#allocation202_spill] sm:$0xff] %v14757_v2  ;;  %v14774_v2 = vperm.slane %v4917_v0, 2  ;;  %v14803_v51 = vpop.eup %9023  ;;  %v14808_v0 = vperm.slane %v4920_v27, 5  ;;  %9055 = vrcp.f32 %v14755_v26 }
 0x4fe   : > { %18936 = vst [vmem:[#allocation203_spill] sm:$0xff] %v14767_v40  ;;  %v14792_v40 = vperm.slane %v4920_v27, 0  ;;  %v14811_v54 = vpop.eup %9025  ;;  %vm14886_vm6 = vcmp.eq.f32.partialorder %v18964_v49, 8.507059e+37  ;;  %9057 = vrcp.f32 %v14770_v41 }
 0x4ff   : > { %18937 = vst [vmem:[#allocation204_spill] sm:$0xff] %v14770_v41  ;;  %v14819_v46 = vpop.eup %9027  ;;  %9059 = vrcp.f32 %v14772_v44 }
 0x500   : > { %18938 = vst [vmem:[#allocation205_spill] sm:$0xff] %v14772_v44  ;;  %v14829_v45 = vpop.eup %9029  ;;  %9061 = vrcp.f32 %v14774_v2 }
 0x501   : > { %18939 = vst [vmem:[#allocation206_spill] sm:$0xff] %v14776_v57  ;;  %v14799_v57 = vperm.slane %v4920_v27, 2  ;;  %v5215_v27 = vmul.f32 %v14463_v37, %v14399_v39 }
 0x502   : > { %18940 = vst [vmem:[#allocation207_spill] sm:$0xff] %v14779_v43 }
 0x503   : > { %18941 = vst [vmem:[#allocation208_spill] sm:$0xff] %v14785_v33  ;;  %v5223_v33 = vand.u32 2147483647, %v14399_v39 }
 0x504   : > { %18942 = vst [vmem:[#allocation209_spill] sm:$0xff] %v14788_v14 }
 0x505   : > { %18943 = vst [vmem:[#allocation210_spill] sm:$0xff] %v14790_v31  ;;  %vm14840_vm13 = vcmp.eq.f32.partialorder %v5223_v33, 8.507059e+37  ;;  %v4233_v33 = vmul.f32 1.2, %v4095_v23  ;;  %v5230_v23 = vmul.f32 %v14468_v15, %v14404_v52 }
 0x506   : > { %18944 = vst [vmem:[#allocation211_spill] sm:$0xff] %v14794_v60  ;;  %v4743_v60 = vperm.slane %v14221_v50, %v12447_v16  ;;  %v5328_v50 = vand.u32 2147483647, %v14466_v28 }
 0x507   : > { %18945 = vst [vmem:[#allocation212_spill] sm:$0xff] %v14797_v24 }
 0x508   : > { %18946 = vst [vmem:[#allocation213_spill] sm:$0xff] %v14799_v57  ;;  %v4863_v34 = vsel %vm18959_vm14, %v4743_v60, %v4742_v36  ;;  %vm14857_vm15 = vcmp.eq.f32.partialorder %v5328_v50, 8.507059e+37  ;;  %vm14907_vm14 = vmor %vm5324_vm8, %vm5325_vm3  ;;  %vm5235_vm8 = vweird.f32 %v14468_v15 }
 0x509   : > { %18947 = vst [vmem:[#allocation214_spill] sm:$0xff] %v14803_v51  ;;  %v5225_v51 = vand.u32 2147483648, %v14399_v39  ;;  %v5366_v39 = vsub.f32 1.0, %v5365_v19  ;;  %v4745_v19 = vperm.slane %v14366_v38, %v12447_v16  ;;  %v18989_v38 = vand.u32 2147483647, %v14404_v52 }
 0x50a   : > { %18948 = vst [vmem:[#allocation215_spill] sm:$0xff] %v14806_v61 }
 0x50b   : > { %18949 = vst [vmem:[#allocation216_spill] sm:$0xff] %v14808_v0  ;;  %v5367_v44 = vmul.f32 %v14543_v10, %v5366_v39 }
 0x50c   : > { %18950 = vst [vmem:[#allocation217_spill] sm:$0xff] %v14811_v54  ;;  %v14827_v54 = vmul.f32 1.442695, %v14659_v25 }
 0x50d   : > { %18951 = vst [vmem:[#allocation218_spill] sm:$0xff] %v14819_v46  ;;  %v14835_v46 = vpop.eup %9031  ;;  %9063 = vrcp.f32 %v14779_v43  ;;  %v18996_v43 = vld [vmem:[#allocation122_spill] sm:$0xff] }
 0x50e   : > { %18952 = vst [vmem:[#allocation219_spill] sm:$0xff] %v14824_v56  ;;  %v14845_v4 = vpop.eup %9033  ;;  %v4234_v56 = vmul.f32 1.2, %v4097_v17  ;;  %9065 = vrcp.f32 %v14781_v20 }
 0x50f   : > { %18953 = vst [vmem:[#allocation220_spill] sm:$0xff] %v14827_v54  ;;  %v14851_v32 = vpop.eup %9035  ;;  %v5216_v54 = vsub.f32 1.0, %v5215_v27  ;;  %9067 = vrcp.f32 %v14783_v58 }
 0x510   : > { %18954 = vst [vmem:[#allocation221_spill] sm:$0xff] %v14829_v45  ;;  %v5226_v45 = vor.u32 1.1754944e-38, %v5225_v51  ;;  %v14854_v53 = vpop.eup %9037  ;;  %v5331_v51 = vor.u32 1.1754944e-38, %v5330_v6  ;;  %v4744_v6 = vperm.slane %v14354_v29, %v12447_v16  ;;  %9069 = vrcp.f32 %v14788_v14 }
 0x511   : > { %18955 = vst [vmem:[#allocation222_spill] sm:$0xff] %v14835_v46  ;;  %v5320_v46 = vmul.f32 %v14507_v9, %v14466_v28  ;;  %v14861_v60 = vpop.eup %9039  ;;  %v5217_v36 = vmul.f32 %v14463_v37, %v5216_v54  ;;  %v14877_v54 = vmul.f32 1.442695, %v4233_v33  ;;  %9071 = vrcp.f32 %v14790_v31  ;;  %v19007_v31 = vld [vmem:[#allocation140_spill] sm:$0xff] }
 0x512   : > { %18958 = vst [vmem:[#allocation223_spill] sm:$0xff] %v14845_v4  ;;  %v14868_v17 = vpop.eup %9041  ;;  %v4864_v29 = vsel %vm18971_vm9, %v4744_v6, %v4863_v34  ;;  %v14944_v34 = vmul.f32 1.442695, %v4234_v56  ;;  %9073 = vrcp.f32 %v14792_v40 }
 0x513   : > { %v5321_v4 = vsub.f32 1.0, %v5320_v46  ;;  %18962 = vst [vmem:[#allocation224_spill] sm:$0xff] %v14861_v60  ;;  %v14874_v46 = vpop.eup %9043  ;;  %v5218_v27 = vadd.f32 %v14463_v37, %v5217_v36  ;;  %v5231_v36 = vsub.f32 1.0, %v5230_v23  ;;  %9075 = vrcp.f32 %v14797_v24 }
 0x514   : > { %v14882_v60 = vpop.eup %9045  ;;  %9077 = vrcp.f32 %v14799_v57 }
 0x515   : > { %v5322_v50 = vmul.f32 %v14507_v9, %v5321_v4  ;;  %18963 = vst [vmem:[#allocation225_spill] sm:$0xff] %v14882_v60  ;;  %v14899_v59 = vpop.eup %9047  ;;  %v5222_v49 = vsel %vm5221_vm2, %v14463_v37, %v5218_v27  ;;  %v5232_v28 = vmul.f32 %v14468_v15, %v5231_v36  ;;  %9079 = vrcp.f32 %v14801_v1 }
 0x516   : > { %18967 = vst [vmem:[#allocation226_spill] sm:$0xff] %v14899_v59  ;;  %v14912_v23 = vpop.eup %9049  ;;  %v5227_v41 = vsel %vm14840_vm13, %v5226_v45, %v5222_v49  ;;  %v5240_v45 = vand.u32 2147483648, %v14404_v52  ;;  %vm5370_vm13 = vweird.f32 %v14543_v10  ;;  %9081 = vrcp.f32 %v14806_v61 }
 0x517   : > { %v5323_v33 = vadd.f32 %v14507_v9, %v5322_v50  ;;  %v5373_v50 = vand.u32 2147483647, %v14489_v3  ;;  %v14921_v27 = vpop.eup %9051  ;;  %v5228_v60 = vmul.f32 %v9999_v8, %v5227_v41  ;;  %v5368_v41 = vadd.f32 %v14543_v10, %v5367_v44  ;;  %vm14967_vm2 = vmor %vm5369_vm1, %vm5370_vm13 }
 0x518   : > { %18970 = vst [vmem:[#allocation227_spill] sm:$0xff] %v14921_v27  ;;  %v14928_v59 = vpop.eup %9053  ;;  %v14947_v6 = vadd.f32 %v14468_v15, %v5232_v28  ;;  %9083 = vrcp.f32 %v14808_v0  ;;  %vm19006_vm13 = vcmask 1041409  }
 0x519   : > { %v5327_v37 = vsel %vm14907_vm14, %v14507_v9, %v5323_v33  ;;  %v5375_v9 = vand.u32 2147483648, %v14489_v3  ;;  %v14934_v25 = vpop.eup %9055  ;;  %7263 = vperm.xlu0 %8191, %v5228_v60   ;;  %vm14957_vm3 = vcmp.eq.f32.partialorder %v5373_v50, 8.507059e+37  ;;  %v4923_v60 = vpop.xlane.xlu2 %4922  ;;  %v5372_v50 = vsel %vm14967_vm2, %v14543_v10, %v5368_v41  ;;  %vm14993_vm14 = vmor %vm5234_vm5, %vm5235_vm8 }
 0x51a   : > { %v5332_v8 = vsel %vm14857_vm15, %v5331_v51, %v5327_v37  ;;  %v14941_v33 = vpop.eup %9057  ;;  %vm18973_vm15 = vcmask 1043459   ;;  %v14971_v37 = vor.u32 1.1754944e-38, %v5240_v45  ;;  %v5410_v10 = vmul.f32 %v14563_v62, %v14504_v5 }
 0x51b   : > { %18972 = vst [vmem:[#allocation228_spill] sm:$0xff] %v14941_v33  ;;  %v14950_v36 = vpop.eup %9059  ;;  %v14954_v13 = vsel %vm18973_vm15, %v4745_v19, %v4864_v29  ;;  %v5333_v51 = vmul.f32 %v12536_v7, %v5332_v8  ;;  %v5376_v39 = vor.u32 1.1754944e-38, %v5375_v9  ;;  %v18979_v7 = vsel %vm14685_vm7, %v14441_v30, %v14651_v11 }
 0x51c   : > { %v14961_v56 = vpop.eup %9061  ;;  %v14987_v28 = vsel %vm14886_vm6, %v14689_v48, %v18979_v7  ;;  %v4111_v30 = vmul.f32 0.6931472, %v14451_v22  ;;  %v4113_v11 = vmul.f32 0.6931472, %v14476_v55  ;;  %vm5414_vm7 = vweird.f32 %v14504_v5 }
 0x51d   : > { %v14973_v3 = vpop.eup %9063  ;;  %v15012_v29 = vperm.slane %v4923_v60, 0  ;;  %v15014_v9 = vperm.slane %v4923_v60, 1  ;;  %v15017_v45 = vmul.f32 1.442695, %v14681_v47  ;;  %v15022_v55 = vperm.slane %v4923_v60, 2 }
 0x51e   : > { %18978 = vst [vmem:[#allocation229_spill] sm:$0xff] %v14973_v3  ;;  %v14999_v42 = vpop.eup %9065  ;;  %v15024_v8 = vperm.slane %v4923_v60, 3  ;;  %v5377_v41 = vsel %vm14957_vm3, %v5376_v39, %v5372_v50  ;;  %v15031_v7 = vperm.slane %v4923_v60, 4  ;;  %v15033_v47 = vperm.slane %v4923_v60, 5  ;;  %v18995_v3 = vld [vmem:[#allocation220_spill] sm:$0xff] }
 0x51f   : > { %18982 = vst [vmem:[#allocation230_spill] sm:$0xff] %v14999_v42  ;;  %v15009_v4 = vpop.eup %9067  ;;  %v15035_v48 = vperm.slane %v4923_v60, 6  ;;  %vm15039_vm6 = vcmp.eq.f32.partialorder %v18989_v38, 8.507059e+37  ;;  %9085 = vrcp.f32 %v14822_v63  ;;  %v15046_v44 = vperm.slane %v4923_v60, 7  ;;  %v18993_v38 = vld [vmem:[#allocation117_spill] sm:$0xff] }
 0x520   : > { %v15019_v22 = vpop.eup %9069  ;;  %18984 = vst [vmem:[#allocation232_spill] sm:$0xff] %v15022_v55  ;;  %v4241_v39 = vmul.f32 1.2, %v4111_v30  ;;  %9087 = vlog2.f32 %v14763_v18  ;;  %v4242_v14 = vmul.f32 1.2, %v4113_v11  ;;  %v4750_v52 = vperm.slane %v18993_v38, %v12447_v16  ;;  %v18997_v11 = vld [vmem:[#allocation121_spill] sm:$0xff] }
 0x521   : > { %18983 = vst [vmem:[#allocation231_spill] sm:$0xff] %v15019_v22  ;;  %v15028_v49 = vpop.eup %9071  ;;  %7284 = vperm.xlu0 %8191, %v5333_v51   ;;  %v5411_v51 = vsub.f32 1.0, %v5410_v10  ;;  %v5378_v22 = vmul.f32 %v18503_v12, %v5377_v41  ;;  %9089 = vpow2.f32 %v18995_v3  ;;  %v4751_v60 = vperm.slane %v18996_v43, %v12447_v16  ;;  %v18998_v41 = vld [vmem:[#allocation128_spill] sm:$0xff] }
 0x522   : > { %18985 = vst [vmem:[#allocation233_spill] sm:$0xff] %v15024_v8  ;;  %v15043_v24 = vpop.eup %9073  ;;  %vm5415_vm5 = vweird.f32 %v14563_v62  ;;  %9091 = vpow2.f32 %v14877_v54  ;;  %v5418_v12 = vand.u32 2147483647, %v14504_v5  ;;  %v5420_v18 = vand.u32 2147483648, %v14504_v5  ;;  %v19002_v54 = vld [vmem:[#allocation219_spill] sm:$0xff] }
 0x523   : > { %18986 = vst [vmem:[#allocation234_spill] sm:$0xff] %v15028_v49  ;;  %v15048_v50 = vpop.eup %9075  ;;  %v5412_v30 = vmul.f32 %v14563_v62, %v5411_v51  ;;  %v5275_v38 = vmul.f32 %v18998_v41, %v18997_v11  ;;  %9093 = vpow2.f32 %v14944_v34  ;;  %v15071_v3 = vmul.f32 1.442695, %v4241_v39  ;;  %v19000_v51 = vld [vmem:[#allocation119_spill] sm:$0xff]  ;;  %v19003_v49 = vld [vmem:[#allocation130_spill] sm:$0xff]  ;;  %vm15085_vm9 = vmor %vm5414_vm7, %vm5415_vm5 }
 0x524   : > { %18987 = vst [vmem:[#allocation235_spill] sm:$0xff] %v15033_v47  ;;  %v15054_v0 = vpop.eup %9077  ;;  %9095 = vrcp.f32 %v19002_v54  ;;  %v4496_v33 = vmul.f32 1.442695, %v4242_v14  ;;  %v5421_v54 = vor.u32 1.1754944e-38, %v5420_v18  ;;  %vm5419_vm8 = vcmp.eq.f32.partialorder %v5418_v12, 8.507059e+37 }
 0x525   : > { %18988 = vst [vmem:[#allocation236_spill] sm:$0xff] %v15035_v48  ;;  %v15061_v10 = vpop.eup %9079  ;;  %v5276_v39 = vsub.f32 1.0, %v5275_v38  ;;  %9097 = vrcp.f32 %v15012_v29  ;;  %v5285_v38 = vand.u32 2147483648, %v18997_v11  ;;  %vm5280_vm15 = vweird.f32 %v18998_v41 }
 0x526   : > { %18992 = vst [vmem:[#allocation237_spill] sm:$0xff] %v15048_v50  ;;  %v15068_v50 = vpop.eup %9081  ;;  %9099 = vrcp.f32 %v15014_v9  ;;  %vm5279_vm1 = vweird.f32 %v18997_v11  ;;  %vm5459_vm2 = vweird.f32 %v19007_v31 }
 0x527   : > { %18994 = vst [vmem:[#allocation238_spill] sm:$0xff] %v15054_v0  ;;  %v5413_v0 = vadd.f32 %v14563_v62, %v5412_v30  ;;  %v15076_v57 = vpop.eup %9083  ;;  %v15092_v30 = vsel %vm19006_vm13, %v4751_v60, %v4750_v52  ;;  %v5277_v5 = vmul.f32 %v18998_v41, %v5276_v39  ;;  %9101 = vrcp.f32 %v15022_v55  ;;  %vm15134_vm3 = vmor %vm5279_vm1, %vm5280_vm15 }
 0x528   : > { %18999 = vst [vmem:[#allocation220_spill] sm:$0xff] %v15068_v50  ;;  %v15089_v43 = vpop.eup %9085  ;;  %v19008_v50 = vld [vmem:[#allocation157_spill] sm:$0xff]  ;;  %9103 = vrcp.f32 %v15024_v8  ;;  %v5286_v34 = vor.u32 1.1754944e-38, %v5285_v38  ;;  %vm19026_vm13 = vcmask 1043459  }
 0x529   : > { %19001 = vst [vmem:[#allocation121_spill] sm:$0xff] %v15076_v57  ;;  %v5417_v14 = vsel %vm15085_vm9, %v14563_v62, %v5413_v0  ;;  %v5455_v57 = vmul.f32 %v19008_v50, %v19007_v31  ;;  %v9088_v27 = vpop.eup %9087  ;;  %7293 = vperm.xlu0 %8191, %v5378_v22   ;;  %v19010_v62 = vsel %vm14993_vm14, %v14468_v15, %v14947_v6  ;;  %v5283_v15 = vand.u32 2147483647, %v18997_v11 }
 0x52a   : > { %v15102_v42 = vpop.eup %9089  ;;  %v4099_v52 = vmul.f32 0.6931472, %v9088_v27  ;;  %v5242_v0 = vsel %vm15039_vm6, %v14971_v37, %v19010_v62  ;;  %v5422_v22 = vsel %vm5419_vm8, %v5421_v54, %v5417_v14  ;;  %v5278_v12 = vadd.f32 %v18998_v41, %v5277_v5  ;;  %v19014_v37 = vld [vmem:[#allocation14_spill] sm:$0xff] }
 0x52b   : > { %19009 = vst [vmem:[#allocation128_spill] sm:$0xff] %v15102_v42  ;;  %v15113_v60 = vpop.eup %9091  ;;  %v5456_v27 = vsub.f32 1.0, %v5455_v57  ;;  %v4746_v6 = vperm.slane %v15102_v42, %v12447_v16  ;;  %9105 = vrcp.f32 %v15031_v7  ;;  %v5423_v54 = vmul.f32 %v19014_v37, %v5422_v22 }
 0x52c   : > { %19011 = vst [vmem:[#allocation140_spill] sm:$0xff] %v15113_v60  ;;  %v15118_v18 = vpop.eup %9093  ;;  %v4235_v19 = vmul.f32 1.2, %v4099_v52  ;;  %v4747_v39 = vperm.slane %v15113_v60, %v12447_v16  ;;  %9107 = vrcp.f32 %v15033_v47  ;;  %v5282_v38 = vsel %vm15134_vm3, %v18998_v41, %v5278_v12  ;;  %v19018_v12 = vld [vmem:[#allocation124_spill] sm:$0xff] }
 0x52d   : > { %19012 = vst [vmem:[#allocation157_spill] sm:$0xff] %v15118_v18  ;;  %v15123_v61 = vpop.eup %9095  ;;  %v4748_v5 = vperm.slane %v15118_v18, %v12447_v16  ;;  %9109 = vlog2.f32 %v14987_v28  ;;  %v5457_v52 = vmul.f32 %v19008_v50, %v5456_v27  ;;  %vm5460_vm14 = vweird.f32 %v19008_v50  ;;  %v19019_v27 = vld [vmem:[#allocation133_spill] sm:$0xff] }
 0x52e   : > { %19013 = vst [vmem:[#allocation239_spill] sm:$0xff] %v15123_v61  ;;  %v4482_v57 = vmul.f32 1.442695, %v4235_v19  ;;  %v15139_v14 = vpop.eup %9097  ;;  %v5463_v22 = vand.u32 2147483647, %v19007_v31  ;;  %v5465_v19 = vand.u32 2147483648, %v19007_v31  ;;  %v4866_v28 = vsel %vm4764_vm0, %v4746_v6, %v14954_v13  ;;  %vm5461_vm6 = vmor %vm5459_vm2, %vm5460_vm14 }
 0x52f   : > { %v15148_v62 = vpop.eup %9099  ;;  %v5458_v41 = vadd.f32 %v19008_v50, %v5457_v52  ;;  %v5305_v11 = vmul.f32 %v19019_v27, %v19018_v12  ;;  %v4867_v42 = vsel %vm4766_vm4, %v4747_v39, %v4866_v28  ;;  %vm5284_vm7 = vcmp.eq.f32.partialorder %v5283_v15, 8.507059e+37  ;;  %v19024_v31 = vld [vmem:[#allocation9_spill] sm:$0xff]  ;;  %v4926_v52 = vpop.xlane.xlu0 %4925 }
 0x530   : > { %9111 = vpow2.f32 %v4482_v57  ;;  %v15153_v37 = vpop.eup %9101  ;;  %v5466_v60 = vor.u32 1.1754944e-38, %v5465_v19  ;;  %vm5464_vm5 = vcmp.eq.f32.partialorder %v5463_v22, 8.507059e+37  ;;  %vm19023_vm9 = vcmask 1042434   ;;  %v19042_v61 = vld [vmem:[#allocation125_spill] sm:$0xff] }
 0x531   : > { %19017 = vst [vmem:[#allocation14_spill] sm:$0xff] %v15153_v37  ;;  %9113 = vpow2.f32 %v15017_v45  ;;  %7302 = vperm.xlu0 %8191, %v5423_v54   ;;  %v15161_v57 = vpop.eup %9103  ;;  %v5287_v45 = vsel %vm5284_vm7, %v5286_v34, %v5282_v38  ;;  %v5462_v6 = vsel %vm5461_vm6, %v19008_v50, %v5458_v41  ;;  %v15179_v39 = vmul.f32 %v19024_v31, %v5242_v0  ;;  %v19029_v0 = vld [vmem:[#allocation90_spill] sm:$0xff] }
 0x532   : > { %19020 = vst [vmem:[#allocation124_spill] sm:$0xff] %v15161_v57  ;;  %9115 = vpow2.f32 %v15071_v3  ;;  %v15167_v13 = vpop.eup %9105  ;;  %v19022_v3 = vperm.slane %v19000_v51, %v12447_v16  ;;  %v5467_v19 = vsel %vm5464_vm5, %v5466_v60, %v5462_v6  ;;  %v4868_v34 = vsel %vm4768_vm12, %v4748_v5, %v4867_v42  ;;  %v19032_v6 = vld [vmem:[#allocation19_spill] sm:$0xff] }
 0x533   : > { %9117 = vpow2.f32 %v4496_v33  ;;  %v15170_v54 = vpop.eup %9107  ;;  %v19025_v50 = vperm.slane %v19003_v49, %v12447_v16  ;;  %v5306_v22 = vsub.f32 1.0, %v5305_v11  ;;  %vm5310_vm8 = vweird.f32 %v19019_v27  ;;  %v19035_v51 = vld [vmem:[#allocation163_spill] sm:$0xff] }
 0x534   : > { %19021 = vst [vmem:[#allocation133_spill] sm:$0xff] %v15170_v54  ;;  %9119 = vrcp.f32 %v15035_v48  ;;  %v4871_v15 = vsel %vm19023_vm9, %v19022_v3, %v15092_v30  ;;  %v9110_v33 = vpop.eup %9109  ;;  %v15189_v30 = vperm.slane %v4926_v52, 0  ;;  %v15192_v3 = vmul.f32 %v19029_v0, %v5287_v45  ;;  %v19034_v0 = vld [vmem:[#allocation145_spill] sm:$0xff] }
 0x535   : > { %9121 = vrcp.f32 %v15046_v44  ;;  %v4872_v38 = vsel %vm19026_vm13, %v19025_v50, %v4871_v15  ;;  %v4115_v41 = vmul.f32 0.6931472, %v9110_v33  ;;  %v15199_v5 = vperm.slane %v4926_v52, 1 }
 0x536   : > { %v15187_v28 = vpop.eup %9111  ;;  %19028 = vst [vmem:[#allocation240_spill] sm:$0xff] %v15189_v30  ;;  %v5468_v15 = vmul.f32 %v19032_v6, %v5467_v19  ;;  %vm5309_vm15 = vweird.f32 %v19018_v12  ;;  %v5313_v11 = vand.u32 2147483647, %v19018_v12  ;;  %v5315_v50 = vand.u32 2147483648, %v19018_v12 }
 0x537   : > { %19027 = vst [vmem:[#allocation9_spill] sm:$0xff] %v15187_v28  ;;  %v15195_v60 = vpop.eup %9113  ;;  %v4749_v42 = vperm.slane %v15187_v28, %v12447_v16  ;;  %v4243_v33 = vmul.f32 1.2, %v4115_v41  ;;  %v5500_v49 = vmul.f32 %v19035_v51, %v19034_v0  ;;  %v15214_v19 = vperm.slane %v4926_v52, 2  ;;  %vm15261_vm14 = vmor %vm5309_vm15, %vm5310_vm8 }
 0x538   : > { %19030 = vst [vmem:[#allocation90_spill] sm:$0xff] %v15195_v60  ;;  %v15204_v31 = vpop.eup %9115  ;;  %v4754_v45 = vperm.slane %v15195_v60, %v12447_v16  ;;  %v5307_v6 = vmul.f32 %v19019_v27, %v5306_v22  ;;  %vm5504_vm1 = vweird.f32 %v19034_v0  ;;  %v15221_v47 = vperm.slane %v4926_v52, 3 }
 0x539   : > { %19031 = vst [vmem:[#allocation241_spill] sm:$0xff] %v15199_v5  ;;  %v15211_v28 = vpop.eup %9117  ;;  %v4869_v18 = vsel %vm4770_vm11, %v4749_v42, %v4868_v34  ;;  %7311 = vperm.xlu0 %8191, %v5468_v15   ;;  %v4498_v54 = vmul.f32 1.442695, %v4243_v33  ;;  %9123 = vrcp.f32 %v15189_v30  ;;  %v4755_v34 = vperm.slane %v15204_v31, %v12447_v16 }
 0x53a   : > { %19033 = vst [vmem:[#allocation19_spill] sm:$0xff] %v15204_v31  ;;  %v15218_v41 = vpop.eup %9119  ;;  %v4936_v60 = vsel %vm4893_vm10, %v4869_v18, 0.0  ;;  %v15228_v42 = vperm.slane %v4926_v52, 4  ;;  %v15230_v22 = vperm.slane %v4926_v52, 5  ;;  %9125 = vrcp.f32 %v15199_v5  ;;  %v19041_v5 = vld [vmem:[#allocation118_spill] sm:$0xff] }
 0x53b   : > { %19036 = vst [vmem:[#allocation145_spill] sm:$0xff] %v15211_v28  ;;  %v15224_v37 = vpop.eup %9121  ;;  %4937 = vadd.xlane.f32.xlu1 %v4936_v60  ;;  %9127 = vpow2.f32 %v4498_v54  ;;  %v4756_v18 = vperm.slane %v15211_v28, %v12447_v16  ;;  %v4873_v15 = vsel %vm4764_vm0, %v4754_v45, %v4872_v38  ;;  %v5501_v33 = vsub.f32 1.0, %v5500_v49 }
 0x53c   : > { %19037 = vst [vmem:[#allocation163_spill] sm:$0xff] %v15218_v41  ;;  %v15236_v30 = vperm.slane %v4926_v52, 6  ;;  %9129 = vrcp.f32 %v15214_v19  ;;  %v5308_v60 = vadd.f32 %v19019_v27, %v5307_v6  ;;  %v5510_v31 = vand.u32 2147483648, %v19034_v0 }
 0x53d   : > { %19038 = vst [vmem:[#allocation242_spill] sm:$0xff] %v15221_v47  ;;  %v5502_v55 = vmul.f32 %v19035_v51, %v5501_v33  ;;  %vm5505_vm3 = vweird.f32 %v19035_v51  ;;  %v5508_v54 = vand.u32 2147483647, %v19034_v0  ;;  %v5245_v28 = vmul.f32 %v19042_v61, %v19041_v5 }
 0x53e   : > { %19039 = vst [vmem:[#allocation243_spill] sm:$0xff] %v15228_v42  ;;  %v4874_v38 = vsel %vm4766_vm4, %v4755_v34, %v4873_v15  ;;  %v15247_v49 = vperm.slane %v4926_v52, 7  ;;  %9131 = vrcp.f32 %v15221_v47  ;;  %vm15250_vm2 = vcmp.eq.f32.partialorder %v5313_v11, 8.507059e+37  ;;  %vm5506_vm7 = vmor %vm5504_vm1, %vm5505_vm3  ;;  %v19051_v47 = vld [vmem:[#allocation169_spill] sm:$0xff] }
 0x53f   : > { %19040 = vst [vmem:[#allocation244_spill] sm:$0xff] %v15236_v30  ;;  %v15254_v6 = vpop.eup %9123  ;;  %v4875_v33 = vsel %vm4768_vm12, %v4756_v18, %v4874_v38  ;;  %v5316_v52 = vor.u32 1.1754944e-38, %v5315_v50  ;;  %v5503_v34 = vadd.f32 %v19035_v51, %v5502_v55  ;;  %v5246_v15 = vsub.f32 1.0, %v5245_v28  ;;  %v19050_v38 = vld [vmem:[#allocation150_spill] sm:$0xff] }
 0x540   : > { %19043 = vst [vmem:[#allocation118_spill] sm:$0xff] %v15247_v49  ;;  %v15266_v11 = vpop.eup %9125  ;;  %9133 = vrcp.f32 %v15228_v42  ;;  %v5312_v18 = vsel %vm15261_vm14, %v19019_v27, %v5308_v60  ;;  %v5511_v12 = vor.u32 1.1754944e-38, %v5510_v31  ;;  %v5545_v50 = vmul.f32 %v19051_v47, %v19050_v38  ;;  %v19053_v60 = vld [vmem:[#allocation23_spill] sm:$0xff] }
 0x541   : > { %19046 = vst [vmem:[#allocation125_spill] sm:$0xff] %v15254_v6  ;;  %v15278_v6 = vpop.eup %9127  ;;  %9135 = vrcp.f32 %v15230_v22  ;;  %v5507_v55 = vsel %vm5506_vm7, %v19035_v51, %v5503_v34  ;;  %vm5509_vm6 = vcmp.eq.f32.partialorder %v5508_v54, 8.507059e+37  ;;  %v5247_v28 = vmul.f32 %v19042_v61, %v5246_v15 }
 0x542   : > { %19049 = vst [vmem:[#allocation245_spill] sm:$0xff] %v15266_v11  ;;  %v15283_v41 = vpop.eup %9129  ;;  %v4757_v27 = vperm.slane %v15278_v6, %v12447_v16  ;;  %v5512_v0 = vsel %vm5509_vm6, %v5511_v12, %v5507_v55  ;;  %vm5250_vm5 = vweird.f32 %v19042_v61  ;;  %v5253_v31 = vand.u32 2147483647, %v19041_v5  ;;  %v19055_v12 = vld [vmem:[#allocation129_spill] sm:$0xff]  ;;  %v19056_v55 = vld [vmem:[#allocation143_spill] sm:$0xff] }
 0x543   : > { %19052 = vst [vmem:[#allocation150_spill] sm:$0xff] %v15278_v6  ;;  %v5513_v42 = vmul.f32 %v19053_v60, %v5512_v0  ;;  %v5248_v11 = vadd.f32 %v19042_v61, %v5247_v28  ;;  %v5255_v48 = vand.u32 2147483648, %v19041_v5  ;;  %v5546_v51 = vsub.f32 1.0, %v5545_v50 }
 0x544   : > { %v15292_v54 = vpop.eup %9131  ;;  %v4876_v34 = vsel %vm4770_vm11, %v4757_v27, %v4875_v33  ;;  %vm5249_vm9 = vweird.f32 %v19041_v5  ;;  %v5555_v15 = vand.u32 2147483648, %v19050_v38  ;;  %v5350_v6 = vmul.f32 %v19056_v55, %v19055_v12 }
 0x545   : > { %19054 = vst [vmem:[#allocation169_spill] sm:$0xff] %v15292_v54  ;;  %v4939_v57 = vsel %vm4893_vm10, %v4876_v34, 0.0  ;;  %7320 = vperm.xlu0 %8191, %v5513_v42   ;;  %v5547_v0 = vmul.f32 %v19051_v47, %v5546_v51  ;;  %vm5550_vm13 = vweird.f32 %v19051_v47  ;;  %v5553_v50 = vand.u32 2147483647, %v19050_v38  ;;  %vm15310_vm8 = vmor %vm5249_vm9, %vm5250_vm5  ;;  %v19061_v51 = vld [vmem:[#allocation120_spill] sm:$0xff]  ;;  %v19062_v34 = vld [vmem:[#allocation126_spill] sm:$0xff] }
 0x546   : > { %v15303_v28 = vpop.eup %9133  ;;  %4940 = vadd.xlane.f32.xlu2 %v4939_v57  ;;  %9137 = vrcp.f32 %v15236_v30  ;;  %v5317_v5 = vsel %vm15250_vm2, %v5316_v52, %v5312_v18  ;;  %vm5549_vm15 = vweird.f32 %v19050_v38  ;;  %v5351_v42 = vsub.f32 1.0, %v5350_v6  ;;  %v4929_v30 = vpop.xlane.xlu1 %4928 }
 0x547   : > { %19057 = vst [vmem:[#allocation23_spill] sm:$0xff] %v15303_v28  ;;  %v15315_v27 = vpop.eup %9135  ;;  %v5252_v57 = vsel %vm15310_vm8, %v19042_v61, %v5248_v11  ;;  %vm5254_vm1 = vcmp.eq.f32.partialorder %v5253_v31, 8.507059e+37  ;;  %v5256_v60 = vor.u32 1.1754944e-38, %v5255_v48  ;;  %v5548_v45 = vadd.f32 %v19051_v47, %v5547_v0  ;;  %vm5551_vm3 = vmor %vm5549_vm15, %vm5550_vm13  ;;  %v19063_v0 = vld [vmem:[#allocation22_spill] sm:$0xff] }
 0x548   : > { %19060 = vst [vmem:[#allocation129_spill] sm:$0xff] %v15315_v27  ;;  %v5556_v52 = vor.u32 1.1754944e-38, %v5555_v15  ;;  %v5352_v18 = vmul.f32 %v19056_v55, %v5351_v42  ;;  %vm5355_vm2 = vweird.f32 %v19056_v55  ;;  %v5260_v38 = vmul.f32 %v19062_v34, %v19061_v51 }
 0x549   : > { %v5552_v6 = vsel %vm5551_vm3, %v19051_v47, %v5548_v45  ;;  %vm5554_vm14 = vcmp.eq.f32.partialorder %v5553_v50, 8.507059e+37  ;;  %vm5354_vm7 = vweird.f32 %v19055_v12  ;;  %v5360_v61 = vand.u32 2147483648, %v19055_v12  ;;  %v19066_v50 = vld [vmem:[#allocation156_spill] sm:$0xff]  ;;  %v19067_v45 = vld [vmem:[#allocation175_spill] sm:$0xff] }
 0x54a   : > { %v5257_v11 = vsel %vm5254_vm1, %v5256_v60, %v5252_v57  ;;  %v5557_v48 = vsel %vm5554_vm14, %v5556_v52, %v5552_v6  ;;  %v5353_v31 = vadd.f32 %v19056_v55, %v5352_v18  ;;  %v5358_v15 = vand.u32 2147483647, %v19055_v12  ;;  %vm15331_vm6 = vmor %vm5354_vm7, %vm5355_vm2  ;;  %v19069_v57 = vld [vmem:[#allocation92_spill] sm:$0xff] }
 0x54b   : > { %v5558_v33 = vmul.f32 %v19063_v0, %v5557_v48  ;;  %v5261_v54 = vsub.f32 1.0, %v5260_v38  ;;  %v5268_v47 = vand.u32 2147483647, %v19061_v51  ;;  %v5590_v28 = vmul.f32 %v19067_v45, %v19066_v50  ;;  %v19071_v18 = vld [vmem:[#allocation8_spill] sm:$0xff] }
 0x54c   : > { %v15338_v8 = vpop.eup %9137  ;;  %9139 = vrcp.f32 %v15247_v49  ;;  %v15342_v60 = vmul.f32 %v19069_v57, %v5317_v5  ;;  %v5357_v12 = vsel %vm15331_vm6, %v19056_v55, %v5353_v31  ;;  %v15347_v52 = vperm.slane %v4929_v30, 0 }
 0x54d   : > { %19068 = vst [vmem:[#allocation143_spill] sm:$0xff] %v15338_v8  ;;  %v15350_v38 = vmul.f32 %v19071_v18, %v5257_v11  ;;  %7329 = vperm.xlu0 %8191, %v5558_v33   ;;  %v5361_v6 = vor.u32 1.1754944e-38, %v5360_v61  ;;  %vm5264_vm5 = vweird.f32 %v19061_v51  ;;  %vm5265_vm9 = vweird.f32 %v19062_v34 }
 0x54e   : > { %19070 = vst [vmem:[#allocation120_spill] sm:$0xff] %v15347_v52  ;;  %vm5359_vm13 = vcmp.eq.f32.partialorder %v5358_v15, 8.507059e+37  ;;  %v15354_v48 = vperm.slane %v4929_v30, 1  ;;  %v5270_v5 = vand.u32 2147483648, %v19061_v51  ;;  %vm5594_vm8 = vweird.f32 %v19066_v50  ;;  %vm15392_vm3 = vmor %vm5264_vm5, %vm5265_vm9 }
 0x54f   : > { %v5362_v0 = vsel %vm5359_vm13, %v5361_v6, %v5357_v12  ;;  %v15358_v55 = vperm.slane %v4929_v30, 2  ;;  %v5262_v31 = vmul.f32 %v19062_v34, %v5261_v54  ;;  %vm15361_vm15 = vcmp.eq.f32.partialorder %v5268_v47, 8.507059e+37  ;;  %v19077_v54 = vld [vmem:[#allocation134_spill] sm:$0xff]  ;;  %v19078_v47 = vld [vmem:[#allocation148_spill] sm:$0xff] }
 0x550   : > { %19072 = vst [vmem:[#allocation126_spill] sm:$0xff] %v15354_v48  ;;  %v5591_v61 = vsub.f32 1.0, %v5590_v28  ;;  %v15365_v33 = vperm.slane %v4929_v30, 3  ;;  %9141 = vrcp.f32 %v15347_v52  ;;  %v5598_v15 = vand.u32 2147483647, %v19066_v50 }
 0x551   : > { %19073 = vst [vmem:[#allocation22_spill] sm:$0xff] %v15358_v55  ;;  %v5600_v42 = vand.u32 2147483648, %v19066_v50  ;;  %v5263_v57 = vadd.f32 %v19062_v34, %v5262_v31  ;;  %vm5595_vm1 = vweird.f32 %v19067_v45  ;;  %v5395_v18 = vmul.f32 %v19078_v47, %v19077_v54 }
 0x552   : > { %19076 = vst [vmem:[#allocation156_spill] sm:$0xff] %v15365_v33  ;;  %v5592_v12 = vmul.f32 %v19067_v45, %v5591_v61  ;;  %v15375_v6 = vpop.eup %9139  ;;  %v15377_v28 = vperm.slane %v4929_v30, 4  ;;  %v15379_v8 = vperm.slane %v4929_v30, 5  ;;  %v15381_v49 = vperm.slane %v4929_v30, 6  ;;  %vm5596_vm2 = vmor %vm5594_vm8, %vm5595_vm1  ;;  %v19089_v61 = vld [vmem:[#allocation29_spill] sm:$0xff] }
 0x553   : > { %19079 = vst [vmem:[#allocation175_spill] sm:$0xff] %v15375_v6  ;;  %9143 = vrcp.f32 %v15354_v48  ;;  %v15385_v31 = vperm.slane %v4929_v30, 7  ;;  %v5396_v52 = vsub.f32 1.0, %v5395_v18  ;;  %v5271_v48 = vor.u32 1.1754944e-38, %v5270_v5 }
 0x554   : > { %19080 = vst [vmem:[#allocation92_spill] sm:$0xff] %v15377_v28  ;;  %7266 = vperm.xlu1 %8192, %v15179_v39   ;;  %9145 = vrcp.f32 %v15358_v55  ;;  %v5593_v6 = vadd.f32 %v19067_v45, %v5592_v12  ;;  %vm5599_vm14 = vcmp.eq.f32.partialorder %v5598_v15, 8.507059e+37  ;;  %v5601_v39 = vor.u32 1.1754944e-38, %v5600_v42  ;;  %v19088_v15 = vld [vmem:[#allocation131_spill] sm:$0xff] }
 0x555   : > { %19081 = vst [vmem:[#allocation8_spill] sm:$0xff] %v15379_v8  ;;  %9147 = vrcp.f32 %v15365_v33  ;;  %v5267_v30 = vsel %vm15392_vm3, %v19062_v34, %v5263_v57  ;;  %v5397_v55 = vmul.f32 %v19078_v47, %v5396_v52  ;;  %vm5400_vm7 = vweird.f32 %v19078_v47  ;;  %v19087_v33 = vld [vmem:[#allocation123_spill] sm:$0xff]  ;;  %v19091_v57 = vld [vmem:[#allocation12_spill] sm:$0xff] }
 0x556   : > { %19082 = vst [vmem:[#allocation134_spill] sm:$0xff] %v15381_v49  ;;  %v5597_v51 = vsel %vm5596_vm2, %v19067_v45, %v5593_v6  ;;  %v15408_v12 = vpop.eup %9141  ;;  %v5403_v18 = vand.u32 2147483647, %v19077_v54  ;;  %v5405_v50 = vand.u32 2147483648, %v19077_v54  ;;  %v5290_v42 = vmul.f32 %v19088_v15, %v19087_v33 }
 0x557   : > { %19083 = vst [vmem:[#allocation148_spill] sm:$0xff] %v15385_v31  ;;  %v5602_v5 = vsel %vm5599_vm14, %v5601_v39, %v5597_v51  ;;  %9149 = vrcp.f32 %v15377_v28  ;;  %v5398_v45 = vadd.f32 %v19078_v47, %v5397_v55  ;;  %vm5399_vm6 = vweird.f32 %v19077_v54  ;;  %v19095_v54 = vld [vmem:[#allocation162_spill] sm:$0xff]  ;;  %v19099_v51 = vld [vmem:[#allocation137_spill] sm:$0xff] }
 0x558   : > { %19086 = vst [vmem:[#allocation246_spill] sm:$0xff] %v15408_v12  ;;  %v5603_v34 = vmul.f32 %v19089_v61, %v5602_v5  ;;  %v15421_v6 = vmul.f32 %v19091_v57, %v5362_v0  ;;  %9151 = vrcp.f32 %v15379_v8  ;;  %v5272_v39 = vsel %vm15361_vm15, %v5271_v48, %v5267_v30  ;;  %vm15426_vm5 = vmor %vm5399_vm6, %vm5400_vm7  ;;  %v19096_v61 = vld [vmem:[#allocation182_spill] sm:$0xff] }
 0x559   : > { %v15418_v52 = vpop.eup %9143  ;;  %v5291_v28 = vsub.f32 1.0, %v5290_v42  ;;  %9153 = vrcp.f32 %v15381_v49  ;;  %v5402_v0 = vsel %vm15426_vm5, %v19078_v47, %v5398_v45  ;;  %v5406_v55 = vor.u32 1.1754944e-38, %v5405_v50  ;;  %v19098_v42 = vld [vmem:[#allocation10_spill] sm:$0xff] }
 0x55a   : > { %19090 = vst [vmem:[#allocation123_spill] sm:$0xff] %v15418_v52  ;;  %v15430_v5 = vpop.eup %9145  ;;  %7338 = vperm.xlu0 %8191, %v5603_v34   ;;  %v5635_v57 = vmul.f32 %v19096_v61, %v19095_v54  ;;  %9155 = vrcp.f32 %v15385_v31  ;;  %vm5404_vm9 = vcmp.eq.f32.partialorder %v5403_v18, 8.507059e+37  ;;  %v5298_v48 = vand.u32 2147483647, %v19087_v33  ;;  %v19100_v18 = vld [vmem:[#allocation153_spill] sm:$0xff] }
 0x55b   : > { %19094 = vst [vmem:[#allocation131_spill] sm:$0xff] %v15430_v5  ;;  %v15438_v11 = vpop.eup %9147  ;;  %v5300_v30 = vand.u32 2147483648, %v19087_v33  ;;  %v5273_v34 = vmul.f32 %v19098_v42, %v5272_v39  ;;  %v5407_v52 = vsel %vm5404_vm9, %v5406_v55, %v5402_v0  ;;  %v5292_v47 = vmul.f32 %v19088_v15, %v5291_v28  ;;  %v19103_v39 = vld [vmem:[#allocation16_spill] sm:$0xff]  ;;  %v19119_v55 = vld [vmem:[#allocation91_spill] sm:$0xff] }
 0x55c   : > { %19097 = vst [vmem:[#allocation29_spill] sm:$0xff] %v15438_v11  ;;  %7275 = vperm.xlu1 %8192, %v15192_v3   ;;  %v5636_v50 = vsub.f32 1.0, %v5635_v57  ;;  %vm5294_vm13 = vweird.f32 %v19087_v33  ;;  %vm5295_vm8 = vweird.f32 %v19088_v15  ;;  %v5645_v45 = vand.u32 2147483648, %v19095_v54 }
 0x55d   : > { %v5440_v31 = vmul.f32 %v19100_v18, %v19099_v51  ;;  %v15451_v8 = vpop.eup %9149  ;;  %vm5639_vm15 = vweird.f32 %v19095_v54  ;;  %vm5640_vm1 = vweird.f32 %v19096_v61  ;;  %v5643_v3 = vand.u32 2147483647, %v19095_v54  ;;  %vm15490_vm9 = vmor %vm5294_vm13, %vm5295_vm8 }
 0x55e   : > { %19101 = vst [vmem:[#allocation12_spill] sm:$0xff] %v15451_v8  ;;  %v5637_v5 = vmul.f32 %v19096_v61, %v5636_v50  ;;  %v15457_v28 = vpop.eup %9151  ;;  %7269 = vperm.xlu2 %8193, %v15350_v38   ;;  %v15461_v0 = vmul.f32 %v19103_v39, %v5407_v52  ;;  %vm15463_vm3 = vcmp.eq.f32.partialorder %v5298_v48, 8.507059e+37  ;;  %v5301_v57 = vor.u32 1.1754944e-38, %v5300_v30  ;;  %v19106_v50 = vld [vmem:[#allocation127_spill] sm:$0xff]  ;;  %v19107_v8 = vld [vmem:[#allocation141_spill] sm:$0xff]  ;;  %vm5641_vm7 = vmor %vm5639_vm15, %vm5640_vm1 }
 0x55f   : > { %19102 = vst [vmem:[#allocation162_spill] sm:$0xff] %v15457_v28  ;;  %v5441_v42 = vsub.f32 1.0, %v5440_v31  ;;  %v5335_v49 = vmul.f32 %v19107_v8, %v19106_v50  ;;  %v15469_v11 = vpop.eup %9153  ;;  %v5293_v12 = vadd.f32 %v19088_v15, %v5292_v47  ;;  %vm5444_vm2 = vweird.f32 %v19099_v51 }
 0x560   : > { %19108 = vst [vmem:[#allocation182_spill] sm:$0xff] %v15469_v11  ;;  %v5638_v28 = vadd.f32 %v19096_v61, %v5637_v5  ;;  %vm5445_vm14 = vweird.f32 %v19100_v18  ;;  %v15475_v38 = vpop.eup %9155  ;;  %v5646_v31 = vor.u32 1.1754944e-38, %v5645_v45  ;;  %v5450_v48 = vand.u32 2147483648, %v19099_v51 }
 0x561   : > { %19109 = vst [vmem:[#allocation10_spill] sm:$0xff] %v15475_v38  ;;  %v5442_v52 = vmul.f32 %v19100_v18, %v5441_v42  ;;  %v5336_v30 = vsub.f32 1.0, %v5335_v49  ;;  %vm5644_vm6 = vcmp.eq.f32.partialorder %v5643_v3, 8.507059e+37  ;;  %vm5340_vm5 = vweird.f32 %v19107_v8  ;;  %v19112_v42 = vld [vmem:[#allocation168_spill] sm:$0xff]  ;;  %v19114_v38 = vld [vmem:[#allocation31_spill] sm:$0xff]  ;;  %vm15509_vm13 = vmor %vm5444_vm2, %vm5445_vm14 }
 0x562   : > { %v5642_v47 = vsel %vm5641_vm7, %v19096_v61, %v5638_v28  ;;  %v5345_v5 = vand.u32 2147483648, %v19106_v50  ;;  %v19113_v61 = vld [vmem:[#allocation193_spill] sm:$0xff]  ;;  %v5297_v28 = vsel %vm15490_vm9, %v19088_v15, %v5293_v12  ;;  %v5448_v11 = vand.u32 2147483647, %v19099_v51 }
 0x563   : > { %v5647_v45 = vsel %vm5644_vm6, %v5646_v31, %v5642_v47  ;;  %v5443_v39 = vadd.f32 %v19100_v18, %v5442_v52  ;;  %v5337_v49 = vmul.f32 %v19107_v8, %v5336_v30  ;;  %v5680_v3 = vmul.f32 %v19113_v61, %v19112_v42  ;;  %v19117_v30 = vld [vmem:[#allocation144_spill] sm:$0xff]  ;;  %v19118_v47 = vld [vmem:[#allocation161_spill] sm:$0xff] }
 0x564   : > { %7281 = vperm.xlu1 %8192, %v15342_v60   ;;  %v5648_v33 = vmul.f32 %v19114_v38, %v5647_v45  ;;  %v5343_v27 = vand.u32 2147483647, %v19106_v50  ;;  %v5451_v52 = vor.u32 1.1754944e-38, %v5450_v48  ;;  %vm5339_vm8 = vweird.f32 %v19106_v50 }
 0x565   : > { %v5338_v60 = vadd.f32 %v19107_v8, %v5337_v49  ;;  %v5681_v12 = vsub.f32 1.0, %v5680_v3  ;;  %v5447_v15 = vsel %vm15509_vm13, %v19100_v18, %v5443_v39  ;;  %vm5341_vm15 = vmor %vm5339_vm8, %vm5340_vm5  ;;  %v5346_v38 = vor.u32 1.1754944e-38, %v5345_v5 }
 0x566   : > { %7347 = vperm.xlu0 %8191, %v5648_v33   ;;  %v5690_v51 = vand.u32 2147483648, %v19112_v42  ;;  %v5485_v54 = vmul.f32 %v19118_v47, %v19117_v30  ;;  %7272 = vperm.xlu2 %8193, %v5273_v34   ;;  %vm5685_vm1 = vweird.f32 %v19113_v61  ;;  %v5688_v45 = vand.u32 2147483647, %v19112_v42  ;;  %v4932_v34 = vpop.xlane.xlu2 %4931 }
 0x567   : > { %v5342_v48 = vsel %vm5341_vm15, %v19107_v8, %v5338_v60  ;;  %v5682_v50 = vmul.f32 %v19113_v61, %v5681_v12  ;;  %v5302_v18 = vsel %vm15463_vm3, %v5301_v57, %v5297_v28  ;;  %vm5449_vm2 = vcmp.eq.f32.partialorder %v5448_v11, 8.507059e+37  ;;  %v19121_v60 = vld [vmem:[#allocation17_spill] sm:$0xff] }
 0x568   : > { %vm5344_vm14 = vcmp.eq.f32.partialorder %v5343_v27, 8.507059e+37  ;;  %v5486_v5 = vsub.f32 1.0, %v5485_v54  ;;  %v5452_v39 = vsel %vm5449_vm2, %v5451_v52, %v5447_v15  ;;  %vm5684_vm7 = vweird.f32 %v19112_v42  ;;  %v19122_v15 = vld [vmem:[#allocation11_spill] sm:$0xff] }
 0x569   : > { %v5347_v49 = vsel %vm5344_vm14, %v5346_v38, %v5342_v48  ;;  %v5683_v3 = vadd.f32 %v19113_v61, %v5682_v50  ;;  %vm5686_vm6 = vmor %vm5684_vm7, %vm5685_vm1  ;;  %v5691_v8 = vor.u32 1.1754944e-38, %v5690_v51  ;;  %vm5490_vm5 = vweird.f32 %v19118_v47  ;;  %v19123_v51 = vld [vmem:[#allocation30_spill] sm:$0xff] }
 0x56a   : > { %v5487_v33 = vmul.f32 %v19118_v47, %v5486_v5  ;;  %v5495_v31 = vand.u32 2147483648, %v19117_v30  ;;  %v5303_v57 = vmul.f32 %v19119_v55, %v5302_v18  ;;  %vm5689_vm3 = vcmp.eq.f32.partialorder %v5688_v45, 8.507059e+37  ;;  %v19126_v45 = vld [vmem:[#allocation132_spill] sm:$0xff]  ;;  %v19127_v18 = vld [vmem:[#allocation146_spill] sm:$0xff]  ;;  %v19132_v55 = vld [vmem:[#allocation149_spill] sm:$0xff] }
 0x56b   : > { %v5687_v27 = vsel %vm5686_vm6, %v19113_v61, %v5683_v3  ;;  %v5493_v11 = vand.u32 2147483647, %v19117_v30  ;;  %vm5489_vm9 = vweird.f32 %v19117_v30  ;;  %v15540_v52 = vperm.slane %v4932_v34, 0 }
 0x56c   : > { %7290 = vperm.xlu1 %8192, %v15421_v6   ;;  %v5692_v28 = vsel %vm5689_vm3, %v5691_v8, %v5687_v27  ;;  %v5488_v42 = vadd.f32 %v19118_v47, %v5487_v33  ;;  %v15543_v12 = vmul.f32 %v19121_v60, %v5452_v39  ;;  %v5348_v38 = vmul.f32 %v19122_v15, %v5347_v49  ;;  %vm5491_vm13 = vmor %vm5489_vm9, %vm5490_vm5 }
 0x56d   : > { %19120 = vst [vmem:[#allocation137_spill] sm:$0xff] %v15540_v52  ;;  %v5693_v54 = vmul.f32 %v19123_v51, %v5692_v28  ;;  %v15547_v61 = vperm.slane %v4932_v34, 1  ;;  %v5496_v6 = vor.u32 1.1754944e-38, %v5495_v31  ;;  %v15550_v50 = vperm.slane %v4932_v34, 2 }
 0x56e   : > { %v5492_v48 = vsel %vm5491_vm13, %v19118_v47, %v5488_v42  ;;  %v5380_v30 = vmul.f32 %v19127_v18, %v19126_v45  ;;  %7278 = vperm.xlu2 %8193, %v5303_v57   ;;  %vm5494_vm8 = vcmp.eq.f32.partialorder %v5493_v11, 8.507059e+37  ;;  %v15554_v5 = vperm.slane %v4932_v34, 3  ;;  %v19133_v57 = vld [vmem:[#allocation167_spill] sm:$0xff]  ;;  %v19135_v42 = vld [vmem:[#allocation20_spill] sm:$0xff] }
 0x56f   : > { %19124 = vst [vmem:[#allocation153_spill] sm:$0xff] %v15547_v61  ;;  %7356 = vperm.xlu0 %8191, %v5693_v54   ;;  %v15556_v39 = vperm.slane %v4932_v34, 4  ;;  %v15558_v49 = vperm.slane %v4932_v34, 5  ;;  %v5497_v3 = vsel %vm5494_vm8, %v5496_v6, %v5492_v48  ;;  %9157 = vrcp.f32 %v15540_v52  ;;  %v19138_v54 = vld [vmem:[#allocation174_spill] sm:$0xff] }
 0x570   : > { %19125 = vst [vmem:[#allocation16_spill] sm:$0xff] %v15550_v50  ;;  %v5381_v8 = vsub.f32 1.0, %v5380_v30  ;;  %v5388_v47 = vand.u32 2147483647, %v19126_v45  ;;  %v15562_v33 = vperm.slane %v4932_v34, 6  ;;  %9159 = vrcp.f32 %v15547_v61  ;;  %v19139_v48 = vld [vmem:[#allocation202_spill] sm:$0xff] }
 0x571   : > { %19128 = vst [vmem:[#allocation127_spill] sm:$0xff] %v15554_v5  ;;  %v5390_v31 = vand.u32 2147483648, %v19126_v45  ;;  %v5530_v27 = vmul.f32 %v19133_v57, %v19132_v55  ;;  %v15568_v11 = vperm.slane %v4932_v34, 7  ;;  %9161 = vrcp.f32 %v15550_v50  ;;  %v19143_v50 = vld [vmem:[#allocation151_spill] sm:$0xff] }
 0x572   : > { %19129 = vst [vmem:[#allocation141_spill] sm:$0xff] %v15556_v39  ;;  %v5382_v28 = vmul.f32 %v19127_v18, %v5381_v8  ;;  %vm5385_vm15 = vweird.f32 %v19127_v18  ;;  %v15574_v60 = vmul.f32 %v19135_v42, %v5497_v3  ;;  %9163 = vrcp.f32 %v15554_v5 }
 0x573   : > { %19130 = vst [vmem:[#allocation168_spill] sm:$0xff] %v15558_v49  ;;  %vm5384_vm1 = vweird.f32 %v19126_v45  ;;  %v5531_v15 = vsub.f32 1.0, %v5530_v27  ;;  %vm15580_vm2 = vcmp.eq.f32.partialorder %v5388_v47, 8.507059e+37  ;;  %vm5534_vm14 = vweird.f32 %v19132_v55 }
 0x574   : > { %19131 = vst [vmem:[#allocation193_spill] sm:$0xff] %v15562_v33  ;;  %7299 = vperm.xlu1 %8192, %v15461_v0   ;;  %v5383_v51 = vadd.f32 %v19127_v18, %v5382_v28  ;;  %v5725_v6 = vmul.f32 %v19139_v48, %v19138_v54  ;;  %9165 = vrcp.f32 %v15556_v39  ;;  %vm5386_vm7 = vmor %vm5384_vm1, %vm5385_vm15  ;;  %v5391_v30 = vor.u32 1.1754944e-38, %v5390_v31  ;;  %v19151_v39 = vld [vmem:[#allocation173_spill] sm:$0xff] }
 0x575   : > { %19134 = vst [vmem:[#allocation31_spill] sm:$0xff] %v15568_v11  ;;  %v5532_v45 = vmul.f32 %v19133_v57, %v5531_v15  ;;  %v5538_v3 = vand.u32 2147483647, %v19132_v55  ;;  %v15590_v0 = vpop.eup %9157  ;;  %vm5535_vm6 = vweird.f32 %v19133_v57  ;;  %v5540_v47 = vand.u32 2147483648, %v19132_v55  ;;  %v19142_v15 = vld [vmem:[#allocation135_spill] sm:$0xff] }
 0x576   : > { %19140 = vst [vmem:[#allocation144_spill] sm:$0xff] %v15590_v0  ;;  %v5387_v8 = vsel %vm5386_vm7, %v19127_v18, %v5383_v51  ;;  %v5726_v27 = vsub.f32 1.0, %v5725_v6  ;;  %v15595_v28 = vpop.eup %9159  ;;  %7287 = vperm.xlu2 %8193, %v5348_v38   ;;  %9167 = vrcp.f32 %v15558_v49  ;;  %v5735_v42 = vand.u32 2147483648, %v19138_v54  ;;  %vm15631_vm15 = vmor %vm5534_vm14, %vm5535_vm6 }
 0x577   : > { %19141 = vst [vmem:[#allocation161_spill] sm:$0xff] %v15595_v28  ;;  %v5392_v31 = vsel %vm15580_vm2, %v5391_v30, %v5387_v8  ;;  %v5425_v5 = vmul.f32 %v19143_v50, %v19142_v15  ;;  %v15603_v0 = vpop.eup %9161  ;;  %9169 = vrcp.f32 %v15562_v33  ;;  %vm5730_vm5 = vweird.f32 %v19139_v48  ;;  %v19148_v8 = vld [vmem:[#allocation13_spill] sm:$0xff] }
 0x578   : > { %19144 = vst [vmem:[#allocation91_spill] sm:$0xff] %v15603_v0  ;;  %v5727_v18 = vmul.f32 %v19139_v48, %v5726_v27  ;;  %v5733_v38 = vand.u32 2147483647, %v19138_v54  ;;  %v15609_v51 = vpop.eup %9163  ;;  %v5533_v34 = vadd.f32 %v19133_v57, %v5532_v45  ;;  %vm15612_vm3 = vcmp.eq.f32.partialorder %v5538_v3, 8.507059e+37  ;;  %v19150_v3 = vld [vmem:[#allocation154_spill] sm:$0xff] }
 0x579   : > { %19145 = vst [vmem:[#allocation17_spill] sm:$0xff] %v15609_v51  ;;  %vm5729_vm9 = vweird.f32 %v19138_v54  ;;  %v5426_v30 = vsub.f32 1.0, %v5425_v5  ;;  %v5393_v49 = vmul.f32 %v19148_v8, %v5392_v31  ;;  %v5541_v0 = vor.u32 1.1754944e-38, %v5540_v47  ;;  %v19156_v8 = vld [vmem:[#allocation43_spill] sm:$0xff] }
 0x57a   : > { %v5728_v27 = vadd.f32 %v19139_v48, %v5727_v18  ;;  %v5435_v33 = vand.u32 2147483648, %v19142_v15  ;;  %v15620_v52 = vpop.eup %9165  ;;  %vm5731_vm13 = vmor %vm5729_vm9, %vm5730_vm5  ;;  %v5736_v51 = vor.u32 1.1754944e-38, %v5735_v42  ;;  %vm5430_vm8 = vweird.f32 %v19143_v50 }
 0x57b   : > { %19149 = vst [vmem:[#allocation11_spill] sm:$0xff] %v15620_v52  ;;  %v5427_v45 = vmul.f32 %v19143_v50, %v5426_v30  ;;  %v5575_v28 = vmul.f32 %v19151_v39, %v19150_v3  ;;  %vm5734_vm1 = vcmp.eq.f32.partialorder %v5733_v38, 8.507059e+37  ;;  %vm5429_vm2 = vweird.f32 %v19142_v15  ;;  %v19158_v38 = vld [vmem:[#allocation208_spill] sm:$0xff] }
 0x57c   : > { %7308 = vperm.xlu1 %8192, %v15543_v12   ;;  %v5732_v54 = vsel %vm5731_vm13, %v19139_v48, %v5728_v27  ;;  %v5433_v47 = vand.u32 2147483647, %v19142_v15  ;;  %v15638_v31 = vpop.eup %9167  ;;  %v5537_v12 = vsel %vm15631_vm15, %v19133_v57, %v5533_v34  ;;  %vm5431_vm14 = vmor %vm5429_vm2, %vm5430_vm8  ;;  %v5436_v48 = vor.u32 1.1754944e-38, %v5435_v33  ;;  %v19157_v15 = vld [vmem:[#allocation180_spill] sm:$0xff] }
 0x57d   : > { %19154 = vst [vmem:[#allocation30_spill] sm:$0xff] %v15638_v31  ;;  %v5737_v42 = vsel %vm5734_vm1, %v5736_v51, %v5732_v54  ;;  %v5428_v55 = vadd.f32 %v19143_v50, %v5427_v45  ;;  %v5576_v18 = vsub.f32 1.0, %v5575_v28  ;;  %v15644_v30 = vpop.eup %9169  ;;  %vm5580_vm7 = vweird.f32 %v19151_v39 }
 0x57e   : > { %19155 = vst [vmem:[#allocation132_spill] sm:$0xff] %v15644_v30  ;;  %v5738_v52 = vmul.f32 %v19156_v8, %v5737_v42  ;;  %v5770_v27 = vmul.f32 %v19158_v38, %v19157_v15  ;;  %7296 = vperm.xlu2 %8193, %v5393_v49   ;;  %v5583_v28 = vand.u32 2147483647, %v19150_v3  ;;  %v5585_v34 = vand.u32 2147483648, %v19150_v3  ;;  %v19160_v42 = vld [vmem:[#allocation159_spill] sm:$0xff]  ;;  %v19189_v30 = vld [vmem:[#allocation189_spill] sm:$0xff] }
 0x57f   : > { %v5432_v57 = vsel %vm5431_vm14, %v19143_v50, %v5428_v55  ;;  %v5577_v51 = vmul.f32 %v19151_v39, %v5576_v18  ;;  %v5542_v45 = vsel %vm15612_vm3, %v5541_v0, %v5537_v12  ;;  %vm5434_vm6 = vcmp.eq.f32.partialorder %v5433_v47, 8.507059e+37  ;;  %v19159_v50 = vld [vmem:[#allocation142_spill] sm:$0xff]  ;;  %v19163_v12 = vld [vmem:[#allocation21_spill] sm:$0xff] }
 0x580   : > { %7365 = vperm.xlu0 %8191, %v5738_v52   ;;  %vm5579_vm5 = vweird.f32 %v19150_v3  ;;  %v5771_v33 = vsub.f32 1.0, %v5770_v27  ;;  %v5437_v5 = vsel %vm5434_vm6, %v5436_v48, %v5432_v57  ;;  %v5780_v49 = vand.u32 2147483648, %v19157_v15  ;;  %v4935_v57 = vpop.xlane.xlu0 %4934 }
 0x581   : > { %v5578_v54 = vadd.f32 %v19151_v39, %v5577_v51  ;;  %v5470_v55 = vmul.f32 %v19160_v42, %v19159_v50  ;;  %vm15665_vm9 = vmor %vm5579_vm5, %vm5580_vm7  ;;  %vm5774_vm3 = vweird.f32 %v19157_v15  ;;  %vm5775_vm13 = vweird.f32 %v19158_v38 }
 0x582   : > { %v5772_v52 = vmul.f32 %v19158_v38, %v5771_v33  ;;  %v5778_v0 = vand.u32 2147483647, %v19157_v15  ;;  %vm5584_vm8 = vcmp.eq.f32.partialorder %v5583_v28, 8.507059e+37  ;;  %v5586_v3 = vor.u32 1.1754944e-38, %v5585_v34  ;;  %vm5776_vm1 = vmor %vm5774_vm3, %vm5775_vm13  ;;  %v19164_v28 = vld [vmem:[#allocation26_spill] sm:$0xff] }
 0x583   : > { %v5582_v6 = vsel %vm15665_vm9, %v19151_v39, %v5578_v54  ;;  %v5471_v47 = vsub.f32 1.0, %v5470_v55  ;;  %v5438_v8 = vmul.f32 %v19163_v12, %v5437_v5  ;;  %vm5475_vm15 = vweird.f32 %v19160_v42  ;;  %v19171_v12 = vld [vmem:[#allocation179_spill] sm:$0xff] }
 0x584   : > { %7317 = vperm.xlu1 %8192, %v15574_v60   ;;  %v5773_v48 = vadd.f32 %v19158_v38, %v5772_v52  ;;  %v5480_v27 = vand.u32 2147483648, %v19159_v50  ;;  %v5587_v51 = vsel %vm5584_vm8, %v5586_v3, %v5582_v6  ;;  %v5781_v15 = vor.u32 1.1754944e-38, %v5780_v49  ;;  %v19166_v49 = vld [vmem:[#allocation27_spill] sm:$0xff] }
 0x585   : > { %v5472_v33 = vmul.f32 %v19160_v42, %v5471_v47  ;;  %v5478_v39 = vand.u32 2147483647, %v19159_v50  ;;  %9171 = vrcp.f32 %v15568_v11  ;;  %v5543_v60 = vmul.f32 %v19164_v28, %v5542_v45  ;;  %v19167_v52 = vld [vmem:[#allocation39_spill] sm:$0xff]  ;;  %v19170_v47 = vld [vmem:[#allocation160_spill] sm:$0xff]  ;;  %v19193_v11 = vld [vmem:[#allocation54_spill] sm:$0xff] }
 0x586   : > { %v5777_v34 = vsel %vm5776_vm1, %v19158_v38, %v5773_v48  ;;  %vm5779_vm2 = vcmp.eq.f32.partialorder %v5778_v0, 8.507059e+37  ;;  %7305 = vperm.xlu2 %8193, %v5438_v8   ;;  %vm5474_vm14 = vweird.f32 %v19159_v50  ;;  %v15688_v55 = vperm.slane %v4935_v57, 0 }
 0x587   : > { %v5782_v5 = vsel %vm5779_vm2, %v5781_v15, %v5777_v34  ;;  %v5473_v54 = vadd.f32 %v19160_v42, %v5472_v33  ;;  %v5588_v18 = vmul.f32 %v19166_v49, %v5587_v51  ;;  %vm5476_vm7 = vmor %vm5474_vm14, %vm5475_vm15  ;;  %v5481_v3 = vor.u32 1.1754944e-38, %v5480_v27 }
 0x588   : > { %19165 = vst [vmem:[#allocation146_spill] sm:$0xff] %v15688_v55  ;;  %v5783_v6 = vmul.f32 %v19167_v52, %v5782_v5  ;;  %v15694_v45 = vperm.slane %v4935_v57, 1  ;;  %vm5479_vm6 = vcmp.eq.f32.partialorder %v5478_v39, 8.507059e+37  ;;  %v15697_v0 = vperm.slane %v4935_v57, 2  ;;  %v19177_v5 = vld [vmem:[#allocation184_spill] sm:$0xff]  ;;  %v19179_v52 = vld [vmem:[#allocation18_spill] sm:$0xff] }
 0x589   : > { %v5477_v38 = vsel %vm5476_vm7, %v19160_v42, %v5473_v54  ;;  %v5620_v50 = vmul.f32 %v19171_v12, %v19170_v47  ;;  %v15701_v48 = vperm.slane %v4935_v57, 3  ;;  %v15703_v51 = vperm.slane %v4935_v57, 4  ;;  %v19178_v54 = vld [vmem:[#allocation217_spill] sm:$0xff] }
 0x58a   : > { %19168 = vst [vmem:[#allocation149_spill] sm:$0xff] %v15694_v45  ;;  %7374 = vperm.xlu0 %8191, %v5783_v6   ;;  %v5482_v8 = vsel %vm5479_vm6, %v5481_v3, %v5477_v38  ;;  %v15705_v15 = vperm.slane %v4935_v57, 5  ;;  %v15707_v33 = vperm.slane %v4935_v57, 6  ;;  %9173 = vrcp.f32 %v15688_v55 }
 0x58b   : > { %19169 = vst [vmem:[#allocation167_spill] sm:$0xff] %v15697_v0  ;;  %v5621_v27 = vsub.f32 1.0, %v5620_v50  ;;  %v5628_v42 = vand.u32 2147483647, %v19170_v47  ;;  %v15711_v39 = vpop.eup %9171  ;;  %v15713_v28 = vperm.slane %v4935_v57, 7  ;;  %9175 = vrcp.f32 %v15694_v45 }
 0x58c   : > { %19172 = vst [vmem:[#allocation20_spill] sm:$0xff] %v15701_v48  ;;  %7326 = vperm.xlu1 %8192, %v5543_v60   ;;  %v5630_v34 = vand.u32 2147483648, %v19170_v47  ;;  %v5815_v49 = vmul.f32 %v19178_v54, %v19177_v5  ;;  %v5483_v6 = vmul.f32 %v19179_v52, %v5482_v8  ;;  %vm5624_vm5 = vweird.f32 %v19170_v47  ;;  %v19183_v47 = vld [vmem:[#allocation165_spill] sm:$0xff] }
 0x58d   : > { %19173 = vst [vmem:[#allocation174_spill] sm:$0xff] %v15703_v51  ;;  %v5622_v3 = vmul.f32 %v19171_v12, %v5621_v27  ;;  %vm5625_vm9 = vweird.f32 %v19171_v12  ;;  %9177 = vrcp.f32 %v15697_v0  ;;  %v5823_v57 = vand.u32 2147483647, %v19177_v5  ;;  %v19182_v27 = vld [vmem:[#allocation147_spill] sm:$0xff] }
 0x58e   : > { %19174 = vst [vmem:[#allocation202_spill] sm:$0xff] %v15707_v33  ;;  %v5816_v60 = vsub.f32 1.0, %v5815_v49  ;;  %v5825_v38 = vand.u32 2147483648, %v19177_v5  ;;  %7314 = vperm.xlu2 %8193, %v5483_v6   ;;  %9179 = vrcp.f32 %v15701_v48  ;;  %vm15728_vm3 = vcmp.eq.f32.partialorder %v5628_v42, 8.507059e+37  ;;  %vm15734_vm13 = vmor %vm5624_vm5, %vm5625_vm9 }
 0x58f   : > { %19175 = vst [vmem:[#allocation135_spill] sm:$0xff] %v15711_v39  ;;  %v5623_v50 = vadd.f32 %v19171_v12, %v5622_v3  ;;  %v5515_v52 = vmul.f32 %v19183_v47, %v19182_v27  ;;  %v5631_v49 = vor.u32 1.1754944e-38, %v5630_v34  ;;  %vm5819_vm8 = vweird.f32 %v19177_v5  ;;  %v19188_v5 = vld [vmem:[#allocation166_spill] sm:$0xff] }
 0x590   : > { %19176 = vst [vmem:[#allocation151_spill] sm:$0xff] %v15713_v28  ;;  %v5817_v31 = vmul.f32 %v19178_v54, %v5816_v60  ;;  %vm5820_vm15 = vweird.f32 %v19178_v54  ;;  %v15741_v6 = vpop.eup %9173  ;;  %vm5519_vm1 = vweird.f32 %v19182_v27  ;;  %v5525_v48 = vand.u32 2147483648, %v19182_v27 }
 0x591   : > { %19186 = vst [vmem:[#allocation13_spill] sm:$0xff] %v15741_v6  ;;  %v5627_v42 = vsel %vm15734_vm13, %v19171_v12, %v5623_v50  ;;  %v5516_v3 = vsub.f32 1.0, %v5515_v52  ;;  %v15748_v45 = vpop.eup %9175  ;;  %vm5824_vm2 = vcmp.eq.f32.partialorder %v5823_v57, 8.507059e+37  ;;  %v5826_v60 = vor.u32 1.1754944e-38, %v5825_v38  ;;  %vm5821_vm14 = vmor %vm5819_vm8, %vm5820_vm15 }
 0x592   : > { %19187 = vst [vmem:[#allocation154_spill] sm:$0xff] %v15748_v45  ;;  %v5818_v34 = vadd.f32 %v19178_v54, %v5817_v31  ;;  %v5665_v0 = vmul.f32 %v19189_v30, %v19188_v5  ;;  %v5632_v6 = vsel %vm15728_vm3, %v5631_v49, %v5627_v42  ;;  %vm5520_vm7 = vweird.f32 %v19183_v47  ;;  %v19192_v45 = vld [vmem:[#allocation222_spill] sm:$0xff] }
 0x593   : > { %v5517_v55 = vmul.f32 %v19183_v47, %v5516_v3  ;;  %v5523_v12 = vand.u32 2147483647, %v19182_v27  ;;  %v15758_v50 = vpop.eup %9177  ;;  %v5526_v57 = vor.u32 1.1754944e-38, %v5525_v48  ;;  %vm5669_vm6 = vweird.f32 %v19188_v5  ;;  %v19191_v3 = vld [vmem:[#allocation188_spill] sm:$0xff]  ;;  %vm5521_vm5 = vmor %vm5519_vm1, %vm5520_vm7 }
 0x594   : > { %7335 = vperm.xlu1 %8192, %v5588_v18   ;;  %v5822_v31 = vsel %vm5821_vm14, %v19178_v54, %v5818_v34  ;;  %v5666_v38 = vsub.f32 1.0, %v5665_v0  ;;  %v15762_v52 = vpop.eup %9179  ;;  %v5675_v42 = vand.u32 2147483648, %v19188_v5  ;;  %v5860_v39 = vmul.f32 %v19192_v45, %v19191_v3 }
 0x595   : > { %19190 = vst [vmem:[#allocation173_spill] sm:$0xff] %v15762_v52  ;;  %v5827_v8 = vsel %vm5824_vm2, %v5826_v60, %v5822_v31  ;;  %v5518_v49 = vadd.f32 %v19183_v47, %v5517_v55  ;;  %vm5670_vm9 = vweird.f32 %v19189_v30  ;;  %v5673_v0 = vand.u32 2147483647, %v19188_v5  ;;  %v19194_v31 = vld [vmem:[#allocation25_spill] sm:$0xff] }
 0x596   : > { %v5828_v61 = vmul.f32 %v19193_v11, %v5827_v8  ;;  %v5667_v18 = vmul.f32 %v19189_v30, %v5666_v38  ;;  %vm5524_vm3 = vcmp.eq.f32.partialorder %v5523_v12, 8.507059e+37  ;;  %v5676_v54 = vor.u32 1.1754944e-38, %v5675_v42  ;;  %vm5671_vm13 = vmor %vm5669_vm6, %vm5670_vm9  ;;  %v19196_v12 = vld [vmem:[#allocation171_spill] sm:$0xff] }
 0x597   : > { %v5522_v48 = vsel %vm5521_vm5, %v19183_v47, %v5518_v49  ;;  %v5861_v34 = vsub.f32 1.0, %v5860_v39  ;;  %v5868_v11 = vand.u32 2147483647, %v19191_v3  ;;  %v5870_v27 = vand.u32 2147483648, %v19191_v3  ;;  %v19195_v47 = vld [vmem:[#allocation152_spill] sm:$0xff] }
 0x598   : > { %7383 = vperm.xlu0 %8191, %v5828_v61   ;;  %v5527_v60 = vsel %vm5524_vm3, %v5526_v57, %v5522_v48  ;;  %v5668_v55 = vadd.f32 %v19189_v30, %v5667_v18  ;;  %vm5865_vm8 = vweird.f32 %v19192_v45  ;;  %v5560_v39 = vmul.f32 %v19196_v12, %v19195_v47  ;;  %v19197_v61 = vld [vmem:[#allocation32_spill] sm:$0xff] }
 0x599   : > { %v5528_v8 = vmul.f32 %v19194_v31, %v5527_v60  ;;  %v5862_v38 = vmul.f32 %v19192_v45, %v5861_v34  ;;  %v5633_v57 = vmul.f32 %v19197_v61, %v5632_v6  ;;  %vm5674_vm15 = vcmp.eq.f32.partialorder %v5673_v0, 8.507059e+37  ;;  %v19198_v60 = vld [vmem:[#allocation192_spill] sm:$0xff] }
 0x59a   : > { %v5672_v49 = vsel %vm5671_vm13, %v19189_v30, %v5668_v55  ;;  %vm5864_vm1 = vweird.f32 %v19191_v3  ;;  %v5561_v5 = vsub.f32 1.0, %v5560_v39  ;;  %vm5564_vm2 = vweird.f32 %v19195_v47  ;;  %v19201_v61 = vld [vmem:[#allocation172_spill] sm:$0xff] }
 0x59b   : > { %7323 = vperm.xlu2 %8193, %v5528_v8   ;;  %v5677_v42 = vsel %vm5674_vm15, %v5676_v54, %v5672_v49  ;;  %v5863_v18 = vadd.f32 %v19192_v45, %v5862_v38  ;;  %vm5866_vm14 = vmor %vm5864_vm1, %vm5865_vm8  ;;  %vm5869_vm7 = vcmp.eq.f32.partialorder %v5868_v11, 8.507059e+37  ;;  %v5871_v48 = vor.u32 1.1754944e-38, %v5870_v27  ;;  %v19199_v54 = vld [vmem:[#allocation37_spill] sm:$0xff]  ;;  %v19200_v11 = vld [vmem:[#allocation58_spill] sm:$0xff] }
 0x59c   : > { %7344 = vperm.xlu1 %8192, %v5633_v57   ;;  %v5570_v34 = vand.u32 2147483648, %v19195_v47  ;;  %v5905_v6 = vmul.f32 %v14854_v53, %v19198_v60  ;;  %v5562_v3 = vmul.f32 %v19196_v12, %v5561_v5  ;;  %vm5565_vm6 = vweird.f32 %v19196_v12 }
 0x59d   : > { %v5867_v30 = vsel %vm5866_vm14, %v19192_v45, %v5863_v18  ;;  %v5568_v0 = vand.u32 2147483647, %v19195_v47  ;;  %v5678_v55 = vmul.f32 %v19199_v54, %v5677_v42  ;;  %vm5909_vm5 = vweird.f32 %v19198_v60  ;;  %v19202_v45 = vld [vmem:[#allocation199_spill] sm:$0xff]  ;;  %vm5566_vm9 = vmor %vm5564_vm2, %vm5565_vm6 }
 0x59e   : > { %v5872_v31 = vsel %vm5869_vm7, %v5871_v48, %v5867_v30  ;;  %v5906_v8 = vsub.f32 1.0, %v5905_v6  ;;  %v5563_v38 = vadd.f32 %v19196_v12, %v5562_v3  ;;  %v5915_v39 = vand.u32 2147483648, %v19198_v60  ;;  %v19203_v54 = vld [vmem:[#allocation35_spill] sm:$0xff] }
 0x59f   : > { %v5873_v27 = vmul.f32 %v19200_v11, %v5872_v31  ;;  %v5710_v57 = vmul.f32 %v19202_v45, %v19201_v61  ;;  %v5571_v49 = vor.u32 1.1754944e-38, %v5570_v34  ;;  %vm5910_vm3 = vweird.f32 %v14854_v53  ;;  %v15814_v34 = vpop.permute.xlu0 %7263  ;;  %v19205_v11 = vld [vmem:[#allocation177_spill] sm:$0xff] }
 0x5a0   : > { %v5907_v18 = vmul.f32 %v14854_v53, %v5906_v8  ;;  %v5913_v42 = vand.u32 2147483647, %v19198_v60  ;;  %v5567_v5 = vsel %vm5566_vm9, %v19196_v12, %v5563_v38  ;;  %vm5569_vm13 = vcmp.eq.f32.partialorder %v5568_v0, 8.507059e+37  ;;  %vm5911_vm15 = vmor %vm5909_vm5, %vm5910_vm3  ;;  %v19204_v0 = vld [vmem:[#allocation158_spill] sm:$0xff] }
 0x5a1   : > { %7392 = vperm.xlu0 %8191, %v5873_v27   ;;  %v5711_v48 = vsub.f32 1.0, %v5710_v57  ;;  %v5718_v6 = vand.u32 2147483647, %v19201_v61  ;;  %v5572_v30 = vsel %vm5569_vm13, %v5571_v49, %v5567_v5  ;;  %vm5715_vm8 = vweird.f32 %v19202_v45 }
 0x5a2   : > { %v5908_v3 = vadd.f32 %v14854_v53, %v5907_v18  ;;  %v5720_v47 = vand.u32 2147483648, %v19201_v61  ;;  %v5573_v31 = vmul.f32 %v19203_v54, %v5572_v30  ;;  %v5916_v8 = vor.u32 1.1754944e-38, %v5915_v39  ;;  %v19208_v54 = vld [vmem:[#allocation178_spill] sm:$0xff] }
 0x5a3   : > { %v5712_v12 = vmul.f32 %v19202_v45, %v5711_v48  ;;  %v5605_v27 = vmul.f32 %v19205_v11, %v19204_v0  ;;  %9181 = vrcp.f32 %v15703_v51  ;;  %vm5914_vm1 = vcmp.eq.f32.partialorder %v5913_v42, 8.507059e+37  ;;  %v19207_v42 = vld [vmem:[#allocation51_spill] sm:$0xff] }
 0x5a4   : > { %7353 = vperm.xlu1 %8192, %v5678_v55   ;;  %v5912_v38 = vsel %vm5911_vm15, %v14854_v53, %v5908_v3  ;;  %vm5714_vm2 = vweird.f32 %v19201_v61  ;;  %7332 = vperm.xlu2 %8193, %v5573_v31   ;;  %vm5719_vm14 = vcmp.eq.f32.partialorder %v5718_v6, 8.507059e+37  ;;  %v5721_v39 = vor.u32 1.1754944e-38, %v5720_v47  ;;  %v19206_v55 = vld [vmem:[#allocation196_spill] sm:$0xff]  ;;  %v19209_v31 = vld [vmem:[#allocation206_spill] sm:$0xff] }
 0x5a5   : > { %v5917_v57 = vsel %vm5914_vm1, %v5916_v8, %v5912_v38  ;;  %v5713_v49 = vadd.f32 %v19202_v45, %v5712_v12  ;;  %v5606_v60 = vsub.f32 1.0, %v5605_v27  ;;  %vm5716_vm7 = vmor %vm5714_vm2, %vm5715_vm8  ;;  %vm5610_vm6 = vweird.f32 %v19205_v11  ;;  %v19211_v12 = vld [vmem:[#allocation40_spill] sm:$0xff] }
 0x5a6   : > { %v5615_v18 = vand.u32 2147483648, %v19204_v0  ;;  %v5950_v53 = vmul.f32 %v14874_v46, %v19206_v55  ;;  %v5918_v5 = vmul.f32 %v19207_v42, %v5917_v57  ;;  %v5613_v6 = vand.u32 2147483647, %v19204_v0 }
 0x5a7   : > { %v5717_v61 = vsel %vm5716_vm7, %v19202_v45, %v5713_v49  ;;  %v5607_v48 = vmul.f32 %v19205_v11, %v5606_v60  ;;  %9183 = vrcp.f32 %v15705_v15  ;;  %vm5609_vm5 = vweird.f32 %v19204_v0 }
 0x5a8   : > { %v5722_v30 = vsel %vm5719_vm14, %v5721_v39, %v5717_v61  ;;  %v5951_v3 = vsub.f32 1.0, %v5950_v53  ;;  %vm5954_vm9 = vweird.f32 %v19206_v55  ;;  %vm5955_vm3 = vweird.f32 %v14874_v46  ;;  %vm5611_vm13 = vmor %vm5609_vm5, %vm5610_vm6 }
 0x5a9   : > { %7401 = vperm.xlu0 %8191, %v5918_v5   ;;  %v5608_v47 = vadd.f32 %v19205_v11, %v5607_v48  ;;  %v5755_v45 = vmul.f32 %v19209_v31, %v19208_v54  ;;  %v15843_v8 = vpop.eup %9181  ;;  %v5723_v27 = vmul.f32 %v19211_v12, %v5722_v30  ;;  %v5616_v38 = vor.u32 1.1754944e-38, %v5615_v18  ;;  %v15855_v48 = vpop.permute.xlu0 %7284  ;;  %v19212_v18 = vld [vmem:[#allocation28_spill] sm:$0xff]  ;;  %vm15863_vm15 = vmor %vm5954_vm9, %vm5955_vm3 }
 0x5aa   : > { %19210 = vst [vmem:[#allocation43_spill] sm:$0xff] %v15843_v8  ;;  %v5952_v0 = vmul.f32 %v14874_v46, %v5951_v3  ;;  %v5958_v57 = vand.u32 2147483647, %v19206_v55  ;;  %vm5614_vm8 = vcmp.eq.f32.partialorder %v5613_v6, 8.507059e+37  ;;  %v5960_v60 = vand.u32 2147483648, %v19206_v55  ;;  %v19215_v3 = vld [vmem:[#allocation164_spill] sm:$0xff] }
 0x5ab   : > { %v5612_v49 = vsel %vm5611_vm13, %v19205_v11, %v5608_v47  ;;  %v5756_v39 = vsub.f32 1.0, %v5755_v45  ;;  %v5763_v5 = vand.u32 2147483647, %v19208_v54  ;;  %v5765_v61 = vand.u32 2147483648, %v19208_v54  ;;  %v19216_v47 = vld [vmem:[#allocation186_spill] sm:$0xff] }
 0x5ac   : > { %7362 = vperm.xlu1 %8192, %v5723_v27   ;;  %v5617_v53 = vsel %vm5614_vm8, %v5616_v38, %v5612_v49  ;;  %v5953_v42 = vadd.f32 %v14874_v46, %v5952_v0  ;;  %9185 = vrcp.f32 %v15707_v33  ;;  %v5650_v45 = vmul.f32 %v19216_v47, %v19215_v3 }
 0x5ad   : > { %v5618_v30 = vmul.f32 %v19212_v18, %v5617_v53  ;;  %v5757_v6 = vmul.f32 %v19209_v31, %v5756_v39  ;;  %v15870_v12 = vpop.eup %9183  ;;  %9187 = vrcp.f32 %v15713_v28  ;;  %vm5959_vm1 = vcmp.eq.f32.partialorder %v5958_v57, 8.507059e+37  ;;  %v19220_v18 = vld [vmem:[#allocation64_spill] sm:$0xff]  ;;  %v19239_v28 = vld [vmem:[#allocation41_spill] sm:$0xff] }
 0x5ae   : > { %v4938_v27 = vpop.xlane.xlu1 %4937  ;;  %v5957_v55 = vsel %vm15863_vm15, %v14874_v46, %v5953_v42  ;;  %v5961_v0 = vor.u32 1.1754944e-38, %v5960_v60  ;;  %vm5759_vm2 = vweird.f32 %v19208_v54  ;;  %vm5760_vm14 = vweird.f32 %v19209_v31 }
 0x5af   : > { %7341 = vperm.xlu2 %8193, %v5618_v30   ;;  %vm15882_vm7 = vcmp.eq.f32.partialorder %v5763_v5, 8.507059e+37  ;;  %v5766_v53 = vor.u32 1.1754944e-38, %v5765_v61  ;;  %vm5654_vm6 = vweird.f32 %v19215_v3  ;;  %vm5655_vm5 = vweird.f32 %v19216_v47  ;;  %vm5761_vm9 = vmor %vm5759_vm2, %vm5760_vm14 }
 0x5b0   : > { %v15888_v46 = vperm.slane %v4938_v27, 0  ;;  %v5962_v57 = vsel %vm5959_vm1, %v5961_v0, %v5957_v55  ;;  %v5758_v60 = vadd.f32 %v19209_v31, %v5757_v6  ;;  %v5651_v54 = vsub.f32 1.0, %v5650_v45  ;;  %vm5656_vm3 = vmor %vm5654_vm6, %vm5655_vm5 }
 0x5b1   : > { %v15891_v42 = vperm.slane %v4938_v27, 1  ;;  %v5963_v30 = vmul.f32 %v19220_v18, %v5962_v57  ;;  %v5658_v5 = vand.u32 2147483647, %v19215_v3  ;;  %v5660_v11 = vand.u32 2147483648, %v19215_v3  ;;  %v19227_v3 = vld [vmem:[#allocation183_spill] sm:$0xff] }
 0x5b2   : > { %v15896_v61 = vpop.eup %9185  ;;  %v15898_v49 = vperm.slane %v4938_v27, 2  ;;  %v5762_v38 = vsel %vm5761_vm9, %v19209_v31, %v5758_v60  ;;  %v5652_v55 = vmul.f32 %v19216_v47, %v5651_v54  ;;  %v5995_v6 = vmul.f32 %v14912_v23, %v14746_v35  ;;  %v19226_v31 = vld [vmem:[#allocation36_spill] sm:$0xff] }
 0x5b3   : > { %19219 = vst [vmem:[#allocation180_spill] sm:$0xff] %v15891_v42  ;;  %v15904_v45 = vpop.eup %9187  ;;  %v15906_v0 = vperm.slane %v4938_v27, 3  ;;  %v15908_v57 = vperm.slane %v4938_v27, 4  ;;  %v15910_v18 = vperm.slane %v4938_v27, 5  ;;  %7410 = vperm.xlu0 %8191, %v5963_v30   ;;  %9189 = vrcp.f32 %v15888_v46 }
 0x5b4   : > { %19221 = vst [vmem:[#allocation208_spill] sm:$0xff] %v15896_v61  ;;  %v5767_v61 = vsel %vm15882_vm7, %v5766_v53, %v5762_v38  ;;  %v5653_v54 = vadd.f32 %v19216_v47, %v5652_v55  ;;  %v5996_v33 = vsub.f32 1.0, %v5995_v6  ;;  %9191 = vrcp.f32 %v15891_v42  ;;  %v19228_v6 = vld [vmem:[#allocation214_spill] sm:$0xff] }
 0x5b5   : > { %19222 = vst [vmem:[#allocation142_spill] sm:$0xff] %v15898_v49  ;;  %v5768_v60 = vmul.f32 %v19226_v31, %v5767_v61  ;;  %vm5659_vm13 = vcmp.eq.f32.partialorder %v5658_v5, 8.507059e+37  ;;  %v5661_v52 = vor.u32 1.1754944e-38, %v5660_v11  ;;  %vm6000_vm8 = vweird.f32 %v14912_v23  ;;  %v19229_v11 = vld [vmem:[#allocation34_spill] sm:$0xff] }
 0x5b6   : > { %19223 = vst [vmem:[#allocation159_spill] sm:$0xff] %v15904_v45  ;;  %v5657_v38 = vsel %vm5656_vm3, %v19216_v47, %v5653_v54  ;;  %v5997_v39 = vmul.f32 %v14912_v23, %v5996_v33  ;;  %v6003_v53 = vand.u32 2147483647, %v14746_v35  ;;  %v6005_v30 = vand.u32 2147483648, %v14746_v35 }
 0x5b7   : > { %19224 = vst [vmem:[#allocation21_spill] sm:$0xff] %v15908_v57  ;;  %7371 = vperm.xlu1 %8192, %v5768_v60   ;;  %v15927_v61 = vperm.slane %v4938_v27, 6  ;;  %9193 = vrcp.f32 %v15898_v49  ;;  %v5662_v55 = vsel %vm5659_vm13, %v5661_v52, %v5657_v38  ;;  %v5800_v5 = vmul.f32 %v19228_v6, %v19227_v3 }
 0x5b8   : > { %19225 = vst [vmem:[#allocation26_spill] sm:$0xff] %v15910_v18  ;;  %9195 = vrcp.f32 %v15906_v0  ;;  %v5663_v31 = vmul.f32 %v19229_v11, %v5662_v55  ;;  %v5998_v47 = vadd.f32 %v14912_v23, %v5997_v39  ;;  %vm5999_vm15 = vweird.f32 %v14746_v35  ;;  %v19231_v39 = vld [vmem:[#allocation170_spill] sm:$0xff]  ;;  %v19232_v11 = vld [vmem:[#allocation197_spill] sm:$0xff] }
 0x5b9   : > { %v15936_v33 = vperm.slane %v4938_v27, 7  ;;  %9197 = vrcp.f32 %v15908_v57  ;;  %vm6001_vm1 = vmor %vm5999_vm15, %vm6000_vm8  ;;  %v6006_v60 = vor.u32 1.1754944e-38, %v6005_v30  ;;  %v5801_v52 = vsub.f32 1.0, %v5800_v5  ;;  %v15941_v54 = vpop.eup %9189  ;;  %v19234_v5 = vld [vmem:[#allocation44_spill] sm:$0xff] }
 0x5ba   : > { %7350 = vperm.xlu2 %8193, %v5663_v31   ;;  %v6002_v38 = vsel %vm6001_vm1, %v14912_v23, %v5998_v47  ;;  %vm6004_vm2 = vcmp.eq.f32.partialorder %v6003_v53, 8.507059e+37  ;;  %v5810_v55 = vand.u32 2147483648, %v19227_v3  ;;  %v5695_v35 = vmul.f32 %v19232_v11, %v19231_v39  ;;  %v15947_v27 = vpop.eup %9191 }
 0x5bb   : > { %19230 = vst [vmem:[#allocation27_spill] sm:$0xff] %v15936_v33  ;;  %v6007_v42 = vsel %vm6004_vm2, %v6006_v60, %v6002_v38  ;;  %v5802_v57 = vmul.f32 %v19228_v6, %v5801_v52  ;;  %vm5805_vm14 = vweird.f32 %v19228_v6  ;;  %v5808_v30 = vand.u32 2147483647, %v19227_v3 }
 0x5bc   : > { %19233 = vst [vmem:[#allocation39_spill] sm:$0xff] %v15947_v27  ;;  %9199 = vrcp.f32 %v15910_v18  ;;  %v6008_v31 = vmul.f32 %v19234_v5, %v6007_v42  ;;  %vm5804_vm7 = vweird.f32 %v19227_v3  ;;  %v5696_v23 = vsub.f32 1.0, %v5695_v35  ;;  %v15970_v5 = vpop.permute.xlu0 %7293 }
 0x5bd   : > { %v15955_v53 = vpop.eup %9193  ;;  %v5803_v47 = vadd.f32 %v19228_v6, %v5802_v57  ;;  %vm5699_vm6 = vweird.f32 %v19231_v39  ;;  %v5705_v60 = vand.u32 2147483648, %v19231_v39  ;;  %v6040_v52 = vmul.f32 %v14934_v25, %v14755_v26  ;;  %vm5806_vm5 = vmor %vm5804_vm7, %vm5805_vm14 }
 0x5be   : > { %19235 = vst [vmem:[#allocation160_spill] sm:$0xff] %v15955_v53  ;;  %v15962_v38 = vpop.eup %9195  ;;  %7419 = vperm.xlu0 %8191, %v6008_v31   ;;  %v5811_v27 = vor.u32 1.1754944e-38, %v5810_v55  ;;  %v5697_v42 = vmul.f32 %v19232_v11, %v5696_v23  ;;  %vm5700_vm9 = vweird.f32 %v19232_v11  ;;  %v5703_v3 = vand.u32 2147483647, %v19231_v39  ;;  %v19237_v55 = vld [vmem:[#allocation187_spill] sm:$0xff]  ;;  %v19238_v23 = vld [vmem:[#allocation221_spill] sm:$0xff] }
 0x5bf   : > { %v15967_v35 = vpop.eup %9197  ;;  %v5807_v57 = vsel %vm5806_vm5, %v19228_v6, %v5803_v47  ;;  %vm5809_vm3 = vcmp.eq.f32.partialorder %v5808_v30, 8.507059e+37  ;;  %v6041_v18 = vsub.f32 1.0, %v6040_v52  ;;  %v6050_v53 = vand.u32 2147483648, %v14755_v26  ;;  %vm5701_vm8 = vmor %vm5699_vm6, %vm5700_vm9 }
 0x5c0   : > { %19236 = vst [vmem:[#allocation179_spill] sm:$0xff] %v15967_v35  ;;  %v5812_v49 = vsel %vm5809_vm3, %v5811_v27, %v5807_v57  ;;  %v5698_v31 = vadd.f32 %v19232_v11, %v5697_v42  ;;  %vm6045_vm13 = vweird.f32 %v14934_v25  ;;  %v5845_v45 = vmul.f32 %v19238_v23, %v19237_v55  ;;  %v4941_v57 = vpop.xlane.xlu2 %4940 }
 0x5c1   : > { %v5813_v8 = vmul.f32 %v19239_v28, %v5812_v49  ;;  %v5706_v6 = vor.u32 1.1754944e-38, %v5705_v60  ;;  %v6042_v30 = vmul.f32 %v14934_v25, %v6041_v18  ;;  %v6048_v47 = vand.u32 2147483647, %v14755_v26  ;;  %v19241_v60 = vld [vmem:[#allocation38_spill] sm:$0xff] }
 0x5c2   : > { %v15982_v52 = vpop.eup %9199  ;;  %v5702_v27 = vsel %vm5701_vm8, %v19232_v11, %v5698_v31  ;;  %vm5704_vm15 = vcmp.eq.f32.partialorder %v5703_v3, 8.507059e+37  ;;  %vm6044_vm1 = vweird.f32 %v14755_v26  ;;  %v5846_v42 = vsub.f32 1.0, %v5845_v45 }
 0x5c3   : > { %19240 = vst [vmem:[#allocation184_spill] sm:$0xff] %v15982_v52  ;;  %7380 = vperm.xlu1 %8192, %v5813_v8   ;;  %v5707_v35 = vsel %vm5704_vm15, %v5706_v6, %v5702_v27  ;;  %v6043_v28 = vadd.f32 %v14934_v25, %v6042_v30  ;;  %v6051_v49 = vor.u32 1.1754944e-38, %v6050_v53  ;;  %v5855_v39 = vand.u32 2147483648, %v19237_v55  ;;  %vm6046_vm2 = vmor %vm6044_vm1, %vm6045_vm13 }
 0x5c4   : > { %v5708_v18 = vmul.f32 %v19241_v60, %v5707_v35  ;;  %v5847_v52 = vmul.f32 %v19238_v23, %v5846_v42  ;;  %vm5850_vm14 = vweird.f32 %v19238_v23  ;;  %v5853_v26 = vand.u32 2147483647, %v19237_v55  ;;  %v19244_v35 = vld [vmem:[#allocation57_spill] sm:$0xff] }
 0x5c5   : > { %9201 = vrcp.f32 %v15927_v61  ;;  %v6047_v8 = vsel %vm6046_vm2, %v14934_v25, %v6043_v28  ;;  %vm6049_vm7 = vcmp.eq.f32.partialorder %v6048_v47, 8.507059e+37  ;;  %v15996_v45 = vperm.slane %v4941_v57, 0  ;;  %v16014_v28 = vpop.permute.xlu0 %7302 }
 0x5c6   : > { %7359 = vperm.xlu2 %8193, %v5708_v18   ;;  %v6052_v11 = vsel %vm6049_vm7, %v6051_v49, %v6047_v8  ;;  %v5848_v53 = vadd.f32 %v19238_v23, %v5847_v52  ;;  %vm5849_vm6 = vweird.f32 %v19237_v55  ;;  %v16000_v3 = vperm.slane %v4941_v57, 1  ;;  %v7267_v25 = vpop.permute.xlu1 %7266  ;;  %v19248_v49 = vld [vmem:[#allocation176_spill] sm:$0xff]  ;;  %v19250_v18 = vld [vmem:[#allocation55_spill] sm:$0xff] }
 0x5c7   : > { %19242 = vst [vmem:[#allocation217_spill] sm:$0xff] %v15996_v45  ;;  %9203 = vrcp.f32 %v15936_v33  ;;  %v6053_v31 = vmul.f32 %v19244_v35, %v6052_v11  ;;  %vm5851_vm5 = vmor %vm5849_vm6, %vm5850_vm14  ;;  %v5856_v6 = vor.u32 1.1754944e-38, %v5855_v39  ;;  %v16004_v30 = vperm.slane %v4941_v57, 2  ;;  %v19249_v39 = vld [vmem:[#allocation203_spill] sm:$0xff] }
 0x5c8   : > { %19243 = vst [vmem:[#allocation18_spill] sm:$0xff] %v16000_v3  ;;  %v5852_v27 = vsel %vm5851_vm5, %v19238_v23, %v5848_v53  ;;  %vm5854_vm9 = vcmp.eq.f32.partialorder %v5853_v26, 8.507059e+37  ;;  %v16009_v52 = vperm.slane %v4941_v57, 3  ;;  %v16011_v42 = vperm.slane %v4941_v57, 4 }
 0x5c9   : > { %19245 = vst [vmem:[#allocation147_spill] sm:$0xff] %v16004_v30  ;;  %7428 = vperm.xlu0 %8191, %v6053_v31   ;;  %v5857_v55 = vsel %vm5854_vm9, %v5856_v6, %v5852_v27  ;;  %9205 = vrcp.f32 %v15996_v45  ;;  %v5740_v60 = vmul.f32 %v19249_v39, %v19248_v49  ;;  %v16019_v11 = vperm.slane %v4941_v57, 5 }
 0x5ca   : > { %19246 = vst [vmem:[#allocation165_spill] sm:$0xff] %v16009_v52  ;;  %v5858_v8 = vmul.f32 %v19250_v18, %v5857_v55  ;;  %9207 = vrcp.f32 %v16000_v3  ;;  %v7647_v23 = vperm.slane %v7267_v25, %v12447_v16  ;;  %v16025_v53 = vperm.slane %v4941_v57, 6  ;;  %v19252_v55 = vld [vmem:[#allocation191_spill] sm:$0xff] }
 0x5cb   : > { %19247 = vst [vmem:[#allocation166_spill] sm:$0xff] %v16011_v42  ;;  %v16023_v26 = vpop.eup %9201  ;;  %v16027_v35 = vperm.slane %v4941_v57, 7  ;;  %9209 = vrcp.f32 %v16004_v30  ;;  %v5741_v31 = vsub.f32 1.0, %v5740_v60  ;;  %v5750_v27 = vand.u32 2147483648, %v19248_v49 }
 0x5cc   : > { %19251 = vst [vmem:[#allocation189_spill] sm:$0xff] %v16019_v11  ;;  %7389 = vperm.xlu1 %8192, %v5858_v8   ;;  %9211 = vrcp.f32 %v16009_v52  ;;  %v5890_v25 = vmul.f32 %v14851_v32, %v19252_v55  ;;  %vm5745_vm3 = vweird.f32 %v19249_v39  ;;  %v5748_v60 = vand.u32 2147483647, %v19248_v49 }
 0x5cd   : > { %v16036_v18 = vpop.eup %9203  ;;  %9213 = vrcp.f32 %v16011_v42  ;;  %v5742_v57 = vmul.f32 %v19249_v39, %v5741_v31  ;;  %v19254_v8 = vperm.slane %v15814_v34, %v12447_v16  ;;  %vm19255_vm13 = vcmask 1041409  }
 0x5ce   : > { %19253 = vst [vmem:[#allocation188_spill] sm:$0xff] %v16036_v18  ;;  %9215 = vrcp.f32 %v16019_v11  ;;  %vm5744_vm8 = vweird.f32 %v19248_v49  ;;  %v5891_v47 = vsub.f32 1.0, %v5890_v25  ;;  %vm5894_vm15 = vweird.f32 %v19252_v55  ;;  %v7270_v25 = vpop.permute.xlu2 %7269  ;;  %v16069_v51 = vpop.permute.xlu1 %7275 }
 0x5cf   : > { %v7774_v6 = vsel %vm19255_vm13, %v7647_v23, %v19254_v8  ;;  %v16048_v30 = vpop.eup %9205  ;;  %v5743_v18 = vadd.f32 %v19249_v39, %v5742_v57  ;;  %v5900_v31 = vand.u32 2147483648, %v19252_v55  ;;  %v6085_v33 = vmul.f32 %v14961_v56, %v14774_v2  ;;  %vm5746_vm1 = vmor %vm5744_vm8, %vm5745_vm3 }
 0x5d0   : > { %19256 = vst [vmem:[#allocation222_spill] sm:$0xff] %v16048_v30  ;;  %v16055_v11 = vpop.eup %9207  ;;  %v5751_v34 = vor.u32 1.1754944e-38, %v5750_v27  ;;  %v5892_v23 = vmul.f32 %v14851_v32, %v5891_v47  ;;  %vm5895_vm2 = vweird.f32 %v14851_v32  ;;  %v5898_v49 = vand.u32 2147483647, %v19252_v55 }
 0x5d1   : > { %19257 = vst [vmem:[#allocation54_spill] sm:$0xff] %v16055_v11  ;;  %v16060_v8 = vpop.eup %9209  ;;  %v5747_v57 = vsel %vm5746_vm1, %v19249_v39, %v5743_v18  ;;  %vm5749_vm14 = vcmp.eq.f32.partialorder %v5748_v60, 8.507059e+37  ;;  %v6086_v52 = vsub.f32 1.0, %v6085_v33  ;;  %v6093_v30 = vand.u32 2147483647, %v14774_v2  ;;  %vm5896_vm6 = vmor %vm5894_vm15, %vm5895_vm2 }
 0x5d2   : > { %19258 = vst [vmem:[#allocation25_spill] sm:$0xff] %v16060_v8  ;;  %v16064_v45 = vpop.eup %9211  ;;  %v5752_v42 = vsel %vm5749_vm14, %v5751_v34, %v5747_v57  ;;  %v5893_v27 = vadd.f32 %v14851_v32, %v5892_v23  ;;  %vm6090_vm7 = vweird.f32 %v14961_v56  ;;  %v6095_v47 = vand.u32 2147483648, %v14774_v2  ;;  %v19259_v8 = vld [vmem:[#allocation42_spill] sm:$0xff]  ;;  %v19261_v23 = vld [vmem:[#allocation181_spill] sm:$0xff]  ;;  %v19262_v57 = vld [vmem:[#allocation211_spill] sm:$0xff] }
 0x5d3   : > { %v16071_v11 = vpop.eup %9213  ;;  %v5753_v3 = vmul.f32 %v19259_v8, %v5752_v42  ;;  %v5901_v33 = vor.u32 1.1754944e-38, %v5900_v31  ;;  %v6087_v39 = vmul.f32 %v14961_v56, %v6086_v52  ;;  %v7648_v18 = vperm.slane %v7270_v25, %v12447_v16  ;;  %v19263_v31 = vld [vmem:[#allocation47_spill] sm:$0xff] }
 0x5d4   : > { %v16080_v60 = vpop.eup %9215  ;;  %v5897_v34 = vsel %vm5896_vm6, %v14851_v32, %v5893_v27  ;;  %vm5899_vm5 = vcmp.eq.f32.partialorder %v5898_v49, 8.507059e+37  ;;  %vm6089_vm9 = vweird.f32 %v14774_v2  ;;  %v5785_v42 = vmul.f32 %v19262_v57, %v19261_v23  ;;  %v19264_v27 = vld [vmem:[#allocation195_spill] sm:$0xff] }
 0x5d5   : > { %19260 = vst [vmem:[#allocation152_spill] sm:$0xff] %v16080_v60  ;;  %7368 = vperm.xlu2 %8193, %v5753_v3   ;;  %v5902_v8 = vsel %vm5899_vm5, %v5901_v33, %v5897_v34  ;;  %v6088_v55 = vadd.f32 %v14961_v56, %v6087_v39  ;;  %vm6094_vm3 = vcmp.eq.f32.partialorder %v6093_v30, 8.507059e+37  ;;  %v7650_v52 = vperm.slane %v16069_v51, %v12447_v16  ;;  %vm6091_vm13 = vmor %vm6089_vm9, %vm6090_vm7 }
 0x5d6   : > { %v5903_v25 = vmul.f32 %v19263_v31, %v5902_v8  ;;  %v6096_v32 = vor.u32 1.1754944e-38, %v6095_v47  ;;  %v5786_v49 = vsub.f32 1.0, %v5785_v42  ;;  %v5935_v2 = vmul.f32 %v14868_v17, %v19264_v27  ;;  %v19266_v47 = vld [vmem:[#allocation77_spill] sm:$0xff] }
 0x5d7   : > { %v6092_v60 = vsel %vm6091_vm13, %v14961_v56, %v6088_v55  ;;  %vm19265_vm8 = vcmask 1042434   ;;  %v5793_v33 = vand.u32 2147483647, %v19261_v23  ;;  %v5795_v30 = vand.u32 2147483648, %v19261_v23  ;;  %v7273_v55 = vpop.permute.xlu2 %7272 }
 0x5d8   : > { %v7775_v3 = vsel %vm19265_vm8, %v7648_v18, %v7774_v6  ;;  %7398 = vperm.xlu1 %8192, %v5903_v25   ;;  %v6097_v39 = vsel %vm6094_vm3, %v6096_v32, %v6092_v60  ;;  %v5787_v34 = vmul.f32 %v19262_v57, %v5786_v49  ;;  %vm5790_vm15 = vweird.f32 %v19262_v57 }
 0x5d9   : > { %v5936_v8 = vsub.f32 1.0, %v5935_v2  ;;  %v6098_v42 = vmul.f32 %v19266_v47, %v6097_v39  ;;  %vm5789_vm1 = vweird.f32 %v19261_v23  ;;  %v5945_v31 = vand.u32 2147483648, %v19264_v27 }
 0x5da   : > { %v6130_v56 = vmul.f32 %v15009_v4, %v14783_v58  ;;  %v5788_v6 = vadd.f32 %v19262_v57, %v5787_v34  ;;  %vm5940_vm2 = vweird.f32 %v14868_v17  ;;  %v5943_v60 = vand.u32 2147483647, %v19264_v27  ;;  %vm5791_vm14 = vmor %vm5789_vm1, %vm5790_vm15 }
 0x5db   : > { %v5937_v18 = vmul.f32 %v14868_v17, %v5936_v8  ;;  %7437 = vperm.xlu0 %8191, %v6098_v42   ;;  %vm5794_vm7 = vcmp.eq.f32.partialorder %v5793_v33, 8.507059e+37  ;;  %v5796_v25 = vor.u32 1.1754944e-38, %v5795_v30  ;;  %vm5939_vm6 = vweird.f32 %v19264_v27  ;;  %v19267_v33 = vld [vmem:[#allocation48_spill] sm:$0xff]  ;;  %v7282_v42 = vpop.permute.xlu1 %7281 }
 0x5dc   : > { %v6131_v23 = vsub.f32 1.0, %v6130_v56  ;;  %v5792_v32 = vsel %vm5791_vm14, %v19262_v57, %v5788_v6  ;;  %v6138_v2 = vand.u32 2147483647, %v14783_v58  ;;  %v6140_v39 = vand.u32 2147483648, %v14783_v58  ;;  %vm5941_vm5 = vmor %vm5939_vm6, %vm5940_vm2 }
 0x5dd   : > { %v5938_v49 = vadd.f32 %v14868_v17, %v5937_v18  ;;  %v5797_v34 = vsel %vm5794_vm7, %v5796_v25, %v5792_v32  ;;  %v5946_v8 = vor.u32 1.1754944e-38, %v5945_v31  ;;  %vm6135_vm9 = vweird.f32 %v15009_v4  ;;  %v19268_v18 = vld [vmem:[#allocation185_spill] sm:$0xff]  ;;  %v19269_v25 = vld [vmem:[#allocation218_spill] sm:$0xff] }
 0x5de   : > { %v6132_v47 = vmul.f32 %v15009_v4, %v6131_v23  ;;  %v5798_v30 = vmul.f32 %v19267_v33, %v5797_v34  ;;  %vm5944_vm3 = vcmp.eq.f32.partialorder %v5943_v60, 8.507059e+37  ;;  %v7649_v57 = vperm.slane %v7273_v55, %v12447_v16  ;;  %v19270_v23 = vld [vmem:[#allocation62_spill] sm:$0xff] }
 0x5df   : > { %v5942_v27 = vsel %vm5941_vm5, %v14868_v17, %v5938_v49  ;;  %vm6134_vm13 = vweird.f32 %v14783_v58  ;;  %v5830_v31 = vmul.f32 %v19269_v25, %v19268_v18  ;;  %vm6139_vm15 = vcmp.eq.f32.partialorder %v6138_v2, 8.507059e+37  ;;  %v19273_v2 = vld [vmem:[#allocation59_spill] sm:$0xff] }
 0x5e0   : > { %v5947_v56 = vsel %vm5944_vm3, %v5946_v8, %v5942_v27  ;;  %v6133_v6 = vadd.f32 %v15009_v4, %v6132_v47  ;;  %7377 = vperm.xlu2 %8193, %v5798_v30   ;;  %vm6136_vm8 = vmor %vm6134_vm13, %vm6135_vm9  ;;  %v6141_v34 = vor.u32 1.1754944e-38, %v6140_v39  ;;  %v5838_v17 = vand.u32 2147483647, %v19268_v18  ;;  %v19271_v8 = vld [vmem:[#allocation226_spill] sm:$0xff] }
 0x5e1   : > { %v5948_v32 = vmul.f32 %v19270_v23, %v5947_v56  ;;  %v7652_v55 = vperm.slane %v7282_v42, %v12447_v16  ;;  %v5831_v49 = vsub.f32 1.0, %v5830_v31  ;;  %v5980_v47 = vmul.f32 %v19271_v8, %v14744_v21  ;;  %v16135_v42 = vpop.permute.xlu0 %7311 }
 0x5e2   : > { %v6137_v60 = vsel %vm6136_vm8, %v15009_v4, %v6133_v6  ;;  %vm19272_vm1 = vcmask 1043459   ;;  %vm5834_vm2 = vweird.f32 %v19268_v18  ;;  %v5840_v30 = vand.u32 2147483648, %v19268_v18  ;;  %v7279_v6 = vpop.permute.xlu2 %7278 }
 0x5e3   : > { %7407 = vperm.xlu1 %8192, %v5948_v32   ;;  %v6142_v58 = vsel %vm6139_vm15, %v6141_v34, %v6137_v60  ;;  %v7776_v33 = vsel %vm19272_vm1, %v7649_v57, %v7775_v3  ;;  %v5832_v27 = vmul.f32 %v19269_v25, %v5831_v49  ;;  %vm5835_vm14 = vweird.f32 %v19269_v25 }
 0x5e4   : > { %v6143_v39 = vmul.f32 %v19273_v2, %v6142_v58  ;;  %v5981_v4 = vsub.f32 1.0, %v5980_v47  ;;  %vm16137_vm7 = vcmp.eq.f32.partialorder %v5838_v17, 8.507059e+37  ;;  %vm5984_vm6 = vweird.f32 %v14744_v21  ;;  %vm5836_vm9 = vmor %vm5834_vm2, %vm5835_vm14 }
 0x5e5   : > { %v5990_v3 = vand.u32 2147483648, %v14744_v21  ;;  %v6175_v57 = vmul.f32 %v15043_v24, %v14792_v40  ;;  %v5833_v31 = vadd.f32 %v19269_v25, %v5832_v27  ;;  %vm5985_vm5 = vweird.f32 %v19271_v8  ;;  %v19276_v27 = vld [vmem:[#allocation52_spill] sm:$0xff] }
 0x5e6   : > { %7446 = vperm.xlu0 %8191, %v6143_v39   ;;  %v5982_v23 = vmul.f32 %v19271_v8, %v5981_v4  ;;  %v5988_v32 = vand.u32 2147483647, %v14744_v21  ;;  %v5841_v34 = vor.u32 1.1754944e-38, %v5840_v30  ;;  %vm6180_vm3 = vweird.f32 %v15043_v24  ;;  %vm5986_vm13 = vmor %vm5984_vm6, %vm5985_vm5 }
 0x5e7   : > { %v6176_v17 = vsub.f32 1.0, %v6175_v57  ;;  %v6183_v60 = vand.u32 2147483647, %v14792_v40  ;;  %v5837_v49 = vsel %vm5836_vm9, %v19269_v25, %v5833_v31  ;;  %v6185_v58 = vand.u32 2147483648, %v14792_v40  ;;  %v19277_v31 = vld [vmem:[#allocation70_spill] sm:$0xff] }
 0x5e8   : > { %v5983_v47 = vadd.f32 %v19271_v8, %v5982_v23  ;;  %v7651_v2 = vperm.slane %v7279_v6, %v12447_v16  ;;  %v5842_v39 = vsel %vm16137_vm7, %v5841_v34, %v5837_v49  ;;  %v5991_v18 = vor.u32 1.1754944e-38, %v5990_v3  ;;  %v16179_v23 = vpop.permute.xlu1 %7290  ;;  %v19280_v34 = vld [vmem:[#allocation223_spill] sm:$0xff] }
 0x5e9   : > { %v6177_v30 = vmul.f32 %v15043_v24, %v6176_v17  ;;  %v7777_v25 = vsel %vm4764_vm0, %v7650_v52, %v7776_v33  ;;  %v5843_v4 = vmul.f32 %v19276_v27, %v5842_v39  ;;  %vm5989_vm8 = vcmp.eq.f32.partialorder %v5988_v32, 8.507059e+37  ;;  %v19279_v32 = vld [vmem:[#allocation190_spill] sm:$0xff]  ;;  %v16193_v39 = vpop.permute.xlu0 %7320 }
 0x5ea   : > { %v5987_v57 = vsel %vm5986_vm13, %v19271_v8, %v5983_v47  ;;  %v7778_v56 = vsel %vm4766_vm4, %v7651_v2, %v7777_v25  ;;  %vm6179_vm15 = vweird.f32 %v14792_v40  ;;  %v6186_v52 = vor.u32 1.1754944e-38, %v6185_v58  ;;  %v19281_v47 = vld [vmem:[#allocation201_spill] sm:$0xff] }
 0x5eb   : > { %v5992_v6 = vsel %vm5989_vm8, %v5991_v18, %v5987_v57  ;;  %v6178_v21 = vadd.f32 %v15043_v24, %v6177_v30  ;;  %v7779_v3 = vsel %vm4768_vm12, %v7652_v55, %v7778_v56  ;;  %7386 = vperm.xlu2 %8193, %v5843_v4   ;;  %vm6181_vm1 = vmor %vm6179_vm15, %vm6180_vm3  ;;  %v19278_v8 = vperm.slane %v15855_v48, %v12447_v16  ;;  %v19282_v18 = vld [vmem:[#allocation87_spill] sm:$0xff] }
 0x5ec   : > { %v5993_v51 = vmul.f32 %v19277_v31, %v5992_v6  ;;  %v5875_v17 = vmul.f32 %v19280_v34, %v19279_v32  ;;  %9217 = vrcp.f32 %v16025_v53  ;;  %vm6184_vm2 = vcmp.eq.f32.partialorder %v6183_v60, 8.507059e+37  ;;  %v7288_v6 = vpop.permute.xlu2 %7287 }
 0x5ed   : > { %v7780_v33 = vsel %vm4770_vm11, %v19278_v8, %v7779_v3  ;;  %v6182_v40 = vsel %vm6181_vm1, %v15043_v24, %v6178_v21  ;;  %v5883_v55 = vand.u32 2147483647, %v19279_v32  ;;  %9219 = vrcp.f32 %v16027_v35 }
 0x5ee   : > { %7902 = vst.msk [vmem:[%s9463_s22] sm:$0xff] %vm4893_vm10, %v7780_v33  ;;  %7416 = vperm.xlu1 %8192, %v5993_v51   ;;  %v6187_v48 = vsel %vm6184_vm2, %v6186_v52, %v6182_v40  ;;  %v5876_v49 = vsub.f32 1.0, %v5875_v17  ;;  %v6025_v58 = vmul.f32 %v14928_v59, %v19281_v47  ;;  %v7662_v2 = vperm.slane %v16135_v42, %v12447_v16 }
 0x5ef   : > { %v6188_v24 = vmul.f32 %v19282_v18, %v6187_v48  ;;  %v7655_v60 = vperm.slane %v16179_v23, %v12447_v16  ;;  %v5885_v30 = vand.u32 2147483648, %v19279_v32  ;;  %vm5879_vm14 = vweird.f32 %v19279_v32  ;;  %v19285_v18 = vld [vmem:[#allocation45_spill] sm:$0xff] }
 0x5f0   : > { %v5877_v25 = vmul.f32 %v19280_v34, %v5876_v49  ;;  %vm5880_vm7 = vweird.f32 %v19280_v34  ;;  %v6026_v27 = vsub.f32 1.0, %v6025_v58  ;;  %vm16202_vm6 = vcmp.eq.f32.partialorder %v5883_v55, 8.507059e+37 }
 0x5f1   : > { %7455 = vperm.xlu0 %8191, %v6188_v24   ;;  %vm6029_vm5 = vweird.f32 %v19281_v47  ;;  %v6035_v57 = vand.u32 2147483648, %v19281_v47  ;;  %v6220_v56 = vmul.f32 %v15061_v10, %v14801_v1  ;;  %vm6030_vm9 = vweird.f32 %v14928_v59  ;;  %vm5881_vm3 = vmor %vm5879_vm14, %vm5880_vm7 }
 0x5f2   : > { %v5878_v21 = vadd.f32 %v19280_v34, %v5877_v25  ;;  %v6027_v3 = vmul.f32 %v14928_v59, %v6026_v27  ;;  %v6033_v31 = vand.u32 2147483647, %v19281_v47  ;;  %v16214_v51 = vpop.eup %9217  ;;  %v5886_v52 = vor.u32 1.1754944e-38, %v5885_v30  ;;  %vm6031_vm15 = vmor %vm6029_vm5, %vm6030_vm9  ;;  %v19286_v30 = vld [vmem:[#allocation194_spill] sm:$0xff]  ;;  %v19287_v25 = vld [vmem:[#allocation224_spill] sm:$0xff] }
 0x5f3   : > { %v6221_v8 = vsub.f32 1.0, %v6220_v56  ;;  %vm6224_vm13 = vweird.f32 %v14801_v1  ;;  %v6228_v33 = vand.u32 2147483647, %v14801_v1  ;;  %v16218_v23 = vpop.eup %9219  ;;  %vm6225_vm8 = vweird.f32 %v15061_v10 }
 0x5f4   : > { %v5882_v32 = vsel %vm5881_vm3, %v19280_v34, %v5878_v21  ;;  %v6028_v17 = vadd.f32 %v14928_v59, %v6027_v3  ;;  %v6230_v40 = vand.u32 2147483648, %v14801_v1  ;;  %v6036_v48 = vor.u32 1.1754944e-38, %v6035_v57  ;;  %v19288_v57 = vld [vmem:[#allocation61_spill] sm:$0xff]  ;;  %vm6226_vm14 = vmor %vm6224_vm13, %vm6225_vm8 }
 0x5f5   : > { %v5887_v55 = vsel %vm16202_vm6, %v5886_v52, %v5882_v32  ;;  %v6222_v49 = vmul.f32 %v15061_v10, %v6221_v8  ;;  %v7654_v58 = vperm.slane %v7288_v6, %v12447_v16  ;;  %vm6034_vm1 = vcmp.eq.f32.partialorder %v6033_v31, 8.507059e+37  ;;  %v16245_v52 = vpop.permute.xlu0 %7329 }
 0x5f6   : > { %v5888_v24 = vmul.f32 %v19285_v18, %v5887_v55  ;;  %v6032_v34 = vsel %vm6031_vm15, %v14928_v59, %v6028_v17  ;;  %v5920_v27 = vmul.f32 %v19287_v25, %v19286_v30  ;;  %vm6229_vm2 = vcmp.eq.f32.partialorder %v6228_v33, 8.507059e+37  ;;  %v16241_v59 = vpop.permute.xlu1 %7299  ;;  %v19290_v55 = vld [vmem:[#allocation89_spill] sm:$0xff]  ;;  %v7297_v18 = vpop.permute.xlu2 %7296 }
 0x5f7   : > { %v6037_v56 = vsel %vm6034_vm1, %v6036_v48, %v6032_v34  ;;  %v6223_v4 = vadd.f32 %v15061_v10, %v6222_v49  ;;  %v5928_v47 = vand.u32 2147483647, %v19286_v30  ;;  %v6231_v6 = vor.u32 1.1754944e-38, %v6230_v40 }
 0x5f8   : > { %7395 = vperm.xlu2 %8193, %v5888_v24   ;;  %v6038_v21 = vmul.f32 %v19288_v57, %v6037_v56  ;;  %v5921_v3 = vsub.f32 1.0, %v5920_v27  ;;  %v6265_v31 = vmul.f32 %v15089_v43, %v14822_v63  ;;  %vm19289_vm7 = vcmask 1041409  }
 0x5f9   : > { %v6227_v8 = vsel %vm6226_vm14, %v15061_v10, %v6223_v4  ;;  %v7781_v33 = vsel %vm19289_vm7, %v7655_v60, %v7654_v58  ;;  %vm5924_vm6 = vweird.f32 %v19286_v30  ;;  %v5930_v32 = vand.u32 2147483648, %v19286_v30  ;;  %v19293_v60 = vld [vmem:[#allocation205_spill] sm:$0xff] }
 0x5fa   : > { %7425 = vperm.xlu1 %8192, %v6038_v21   ;;  %v6232_v1 = vsel %vm6229_vm2, %v6231_v6, %v6227_v8  ;;  %v5922_v17 = vmul.f32 %v19287_v25, %v5921_v3  ;;  %vm5925_vm5 = vweird.f32 %v19287_v25  ;;  %v6266_v40 = vsub.f32 1.0, %v6265_v31 }
 0x5fb   : > { %v6233_v48 = vmul.f32 %v19290_v55, %v6232_v1  ;;  %vm16254_vm9 = vcmp.eq.f32.partialorder %v5928_v47, 8.507059e+37  ;;  %v6275_v10 = vand.u32 2147483648, %v14822_v63  ;;  %v6070_v58 = vmul.f32 %v14950_v36, %v19293_v60  ;;  %vm5926_vm13 = vmor %vm5924_vm6, %vm5925_vm5 }
 0x5fc   : > { %v5923_v24 = vadd.f32 %v19287_v25, %v5922_v17  ;;  %v6267_v34 = vmul.f32 %v15089_v43, %v6266_v40  ;;  %vm6270_vm3 = vweird.f32 %v15089_v43  ;;  %v6273_v27 = vand.u32 2147483647, %v14822_v63 }
 0x5fd   : > { %7464 = vperm.xlu0 %8191, %v6233_v48   ;;  %v5931_v56 = vor.u32 1.1754944e-38, %v5930_v32  ;;  %vm6269_vm8 = vweird.f32 %v14822_v63  ;;  %v6071_v4 = vsub.f32 1.0, %v6070_v58  ;;  %v6078_v47 = vand.u32 2147483647, %v19293_v60  ;;  %v19294_v32 = vld [vmem:[#allocation56_spill] sm:$0xff]  ;;  %v19298_v58 = vld [vmem:[#allocation198_spill] sm:$0xff] }
 0x5fe   : > { %v5927_v57 = vsel %vm5926_vm13, %v19287_v25, %v5923_v24  ;;  %v6268_v21 = vadd.f32 %v15089_v43, %v6267_v34  ;;  %v6080_v6 = vand.u32 2147483648, %v19293_v60  ;;  %v7657_v3 = vperm.slane %v7297_v18, %v12447_v16  ;;  %vm6271_vm15 = vmor %vm6269_vm8, %vm6270_vm3  ;;  %v16290_v24 = vpop.permute.xlu0 %7338  ;;  %v19300_v34 = vld [vmem:[#allocation68_spill] sm:$0xff] }
 0x5ff   : > { %v5932_v31 = vsel %vm16254_vm9, %v5931_v56, %v5927_v57  ;;  %v6276_v30 = vor.u32 1.1754944e-38, %v6275_v10  ;;  %v6072_v8 = vmul.f32 %v14950_v36, %v6071_v4  ;;  %vm6075_vm1 = vweird.f32 %v14950_v36  ;;  %v7309_v10 = vpop.permute.xlu1 %7308 }
 0x600   : > { %v7658_v63 = vperm.slane %v16241_v59, %v12447_v16  ;;  %v5933_v25 = vmul.f32 %v19294_v32, %v5932_v31  ;;  %v6272_v1 = vsel %vm6271_vm15, %v15089_v43, %v6268_v21  ;;  %vm6274_vm2 = vcmp.eq.f32.partialorder %v6273_v27, 8.507059e+37  ;;  %v19299_v43 = vld [vmem:[#allocation225_spill] sm:$0xff]  ;;  %v19301_v21 = vld [vmem:[#allocation75_spill] sm:$0xff] }
 0x601   : > { %v6277_v17 = vsel %vm6274_vm2, %v6276_v30, %v6272_v1  ;;  %v6073_v40 = vadd.f32 %v14950_v36, %v6072_v8  ;;  %vm6074_vm14 = vweird.f32 %v19293_v60  ;;  %v19295_v55 = vperm.slane %v15970_v5, %v12447_v16  ;;  %v7306_v8 = vpop.permute.xlu2 %7305  ;;  %v19304_v1 = vld [vmem:[#allocation230_spill] sm:$0xff] }
 0x602   : > { %vm19296_vm7 = vcmask 1042434   ;;  %7404 = vperm.xlu2 %8193, %v5933_v25   ;;  %vm6076_vm6 = vmor %vm6074_vm14, %vm6075_vm1  ;;  %vm6079_vm5 = vcmp.eq.f32.partialorder %v6078_v47, 8.507059e+37  ;;  %v6081_v49 = vor.u32 1.1754944e-38, %v6080_v6  ;;  %vm19297_vm9 = vcmask 1043459  }
 0x603   : > { %v7782_v48 = vsel %vm19296_vm7, %v19295_v55, %v7781_v33  ;;  %v5965_v18 = vmul.f32 %v19299_v43, %v19298_v58  ;;  %v6278_v27 = vmul.f32 %v19300_v34, %v6277_v17  ;;  %v6077_v60 = vsel %vm6076_vm6, %v14950_v36, %v6073_v40 }
 0x604   : > { %v7783_v59 = vsel %vm19297_vm9, %v7657_v3, %v7782_v48  ;;  %v5973_v5 = vand.u32 2147483647, %v19298_v58  ;;  %v5975_v33 = vand.u32 2147483648, %v19298_v58  ;;  %v7665_v56 = vperm.slane %v16193_v39, %v12447_v16 }
 0x605   : > { %v6082_v4 = vsel %vm6079_vm5, %v6081_v49, %v6077_v60  ;;  %v5966_v47 = vsub.f32 1.0, %v5965_v18  ;;  %v6310_v57 = vmul.f32 %v15148_v62, %v15014_v9  ;;  %7473 = vperm.xlu0 %8191, %v6278_v27   ;;  %v7784_v3 = vsel %vm4764_vm0, %v7658_v63, %v7783_v59 }
 0x606   : > { %v6083_v6 = vmul.f32 %v19301_v21, %v6082_v4  ;;  %v7661_v31 = vperm.slane %v7309_v10, %v12447_v16  ;;  %vm5969_vm3 = vweird.f32 %v19298_v58  ;;  %vm5970_vm13 = vweird.f32 %v19299_v43 }
 0x607   : > { %v5967_v36 = vmul.f32 %v19299_v43, %v5966_v47  ;;  %v6311_v30 = vsub.f32 1.0, %v6310_v57  ;;  %vm6314_vm8 = vweird.f32 %v15014_v9  ;;  %vm16307_vm15 = vcmp.eq.f32.partialorder %v5973_v5, 8.507059e+37  ;;  %vm5971_vm2 = vmor %vm5969_vm3, %vm5970_vm13  ;;  %v19306_v47 = vld [vmem:[#allocation63_spill] sm:$0xff] }
 0x608   : > { %7434 = vperm.xlu1 %8192, %v6083_v6   ;;  %v5976_v25 = vor.u32 1.1754944e-38, %v5975_v33  ;;  %v6320_v63 = vand.u32 2147483648, %v15014_v9  ;;  %v6115_v17 = vmul.f32 %v19304_v1, %v14781_v20  ;;  %vm6315_vm1 = vweird.f32 %v15148_v62  ;;  %v16339_v6 = vpop.permute.xlu0 %7347 }
 0x609   : > { %v5968_v40 = vadd.f32 %v19299_v43, %v5967_v36  ;;  %v6312_v55 = vmul.f32 %v15148_v62, %v6311_v30  ;;  %v6318_v48 = vand.u32 2147483647, %v15014_v9  ;;  %vm6120_vm14 = vweird.f32 %v19304_v1  ;;  %vm6316_vm7 = vmor %vm6314_vm8, %vm6315_vm1  ;;  %v16345_v9 = vpop.permute.xlu1 %7317  ;;  %v19307_v30 = vld [vmem:[#allocation200_spill] sm:$0xff] }
 0x60a   : > { %v6116_v49 = vsub.f32 1.0, %v6115_v17  ;;  %v6123_v59 = vand.u32 2147483647, %v14781_v20  ;;  %v7660_v10 = vperm.slane %v7306_v8, %v12447_v16  ;;  %v6125_v27 = vand.u32 2147483648, %v14781_v20  ;;  %v19308_v8 = vld [vmem:[#allocation227_spill] sm:$0xff] }
 0x60b   : > { %v5972_v18 = vsel %vm5971_vm2, %v19299_v43, %v5968_v40  ;;  %v6313_v34 = vadd.f32 %v15148_v62, %v6312_v55  ;;  %v19305_v60 = vperm.slane %v16014_v28, %v12447_v16  ;;  %v6321_v33 = vor.u32 1.1754944e-38, %v6320_v63 }
 0x60c   : > { %v5977_v5 = vsel %vm16307_vm15, %v5976_v25, %v5972_v18  ;;  %v6117_v4 = vmul.f32 %v19304_v1, %v6116_v49  ;;  %vm6319_vm6 = vcmp.eq.f32.partialorder %v6318_v48, 8.507059e+37  ;;  %vm6119_vm5 = vweird.f32 %v14781_v20  ;;  %v19309_v25 = vld [vmem:[#allocation94_spill] sm:$0xff] }
 0x60d   : > { %v7785_v58 = vsel %vm4766_vm4, %v19305_v60, %v7784_v3  ;;  %v5978_v57 = vmul.f32 %v19306_v47, %v5977_v5  ;;  %v6317_v21 = vsel %vm6316_vm7, %v15148_v62, %v6313_v34  ;;  %v6010_v32 = vmul.f32 %v19308_v8, %v19307_v30  ;;  %vm6121_vm9 = vmor %vm6119_vm5, %vm6120_vm14  ;;  %v19310_v34 = vld [vmem:[#allocation50_spill] sm:$0xff] }
 0x60e   : > { %v7786_v43 = vsel %vm4768_vm12, %v7660_v10, %v7785_v58  ;;  %v6322_v3 = vsel %vm6319_vm6, %v6321_v33, %v6317_v21  ;;  %v6118_v36 = vadd.f32 %v19304_v1, %v6117_v4  ;;  %v7668_v62 = vperm.slane %v16245_v52, %v12447_v16  ;;  %v19311_v5 = vld [vmem:[#allocation210_spill] sm:$0xff]  ;;  %v19333_v52 = vld [vmem:[#allocation209_spill] sm:$0xff] }
 0x60f   : > { %v7787_v28 = vsel %vm4770_vm11, %v7661_v31, %v7786_v43  ;;  %v7671_v31 = vperm.slane %v16290_v24, %v12447_v16  ;;  %7413 = vperm.xlu2 %8193, %v5978_v57   ;;  %v6323_v63 = vmul.f32 %v19309_v25, %v6322_v3  ;;  %v6126_v20 = vor.u32 1.1754944e-38, %v6125_v27  ;;  %v19312_v33 = vld [vmem:[#allocation234_spill] sm:$0xff] }
 0x610   : > { %7903 = vst.msk [vmem:[%s9463_s22 + $0x8] sm:$0xff] %vm4893_vm10, %v7787_v28  ;;  %v6122_v17 = vsel %vm6121_vm9, %v19304_v1, %v6118_v36  ;;  %vm6124_vm3 = vcmp.eq.f32.partialorder %v6123_v59, 8.507059e+37  ;;  %v6011_v40 = vsub.f32 1.0, %v6010_v32  ;;  %v6355_v55 = vmul.f32 %v15167_v13, %v15031_v7  ;;  %v7315_v59 = vpop.permute.xlu2 %7314 }
 0x611   : > { %v7674_v48 = vperm.slane %v16339_v6, %v12447_v16  ;;  %7482 = vperm.xlu0 %8191, %v6323_v63   ;;  %v6127_v49 = vsel %vm6124_vm3, %v6126_v20, %v6122_v17  ;;  %v6018_v10 = vand.u32 2147483647, %v19307_v30  ;;  %v6020_v18 = vand.u32 2147483648, %v19307_v30 }
 0x612   : > { %v6128_v60 = vmul.f32 %v19310_v34, %v6127_v49  ;;  %v6012_v27 = vmul.f32 %v19308_v8, %v6011_v40  ;;  %vm6015_vm13 = vweird.f32 %v19308_v8  ;;  %v6356_v1 = vsub.f32 1.0, %v6355_v55  ;;  %v19313_v40 = vld [vmem:[#allocation49_spill] sm:$0xff]  ;;  %v19315_v34 = vld [vmem:[#allocation204_spill] sm:$0xff] }
 0x613   : > { %vm6014_vm8 = vweird.f32 %v19307_v30  ;;  %vm6359_vm15 = vweird.f32 %v15031_v7  ;;  %v6365_v58 = vand.u32 2147483648, %v15031_v7  ;;  %v6160_v4 = vmul.f32 %v19312_v33, %v19311_v5 }
 0x614   : > { %7443 = vperm.xlu1 %8192, %v6128_v60   ;;  %v6013_v43 = vadd.f32 %v19308_v8, %v6012_v27  ;;  %v6357_v47 = vmul.f32 %v15167_v13, %v6356_v1  ;;  %vm6360_vm1 = vweird.f32 %v15167_v13  ;;  %v6363_v57 = vand.u32 2147483647, %v15031_v7  ;;  %vm6016_vm2 = vmor %vm6014_vm8, %vm6015_vm13  ;;  %v19316_v60 = vld [vmem:[#allocation228_spill] sm:$0xff] }
 0x615   : > { %vm6019_vm14 = vcmp.eq.f32.partialorder %v6018_v10, 8.507059e+37  ;;  %v6021_v21 = vor.u32 1.1754944e-38, %v6020_v18  ;;  %v6161_v28 = vsub.f32 1.0, %v6160_v4  ;;  %v7663_v3 = vperm.slane %v7315_v59, %v12447_v16  ;;  %vm6361_vm6 = vmor %vm6359_vm15, %vm6360_vm1 }
 0x616   : > { %v6017_v36 = vsel %vm6016_vm2, %v19308_v8, %v6013_v43  ;;  %v6358_v30 = vadd.f32 %v15167_v13, %v6357_v47  ;;  %vm6165_vm7 = vweird.f32 %v19312_v33  ;;  %v6170_v32 = vand.u32 2147483648, %v19311_v5  ;;  %v16387_v8 = vpop.permute.xlu1 %7326 }
 0x617   : > { %v6022_v25 = vsel %vm6019_vm14, %v6021_v21, %v6017_v36  ;;  %v6366_v63 = vor.u32 1.1754944e-38, %v6365_v58  ;;  %v6162_v20 = vmul.f32 %v19312_v33, %v6161_v28  ;;  %v6168_v17 = vand.u32 2147483647, %v19311_v5  ;;  %v19319_v21 = vld [vmem:[#allocation66_spill] sm:$0xff] }
 0x618   : > { %v6023_v55 = vmul.f32 %v19313_v40, %v6022_v25  ;;  %v6362_v49 = vsel %vm6361_vm6, %v15167_v13, %v6358_v30  ;;  %vm6364_vm5 = vcmp.eq.f32.partialorder %v6363_v57, 8.507059e+37  ;;  %vm6164_vm9 = vweird.f32 %v19311_v5  ;;  %v19317_v13 = vld [vmem:[#allocation83_spill] sm:$0xff]  ;;  %v7324_v57 = vpop.permute.xlu2 %7323  ;;  %v19323_v25 = vld [vmem:[#allocation238_spill] sm:$0xff] }
 0x619   : > { %v6367_v10 = vsel %vm6364_vm5, %v6366_v63, %v6362_v49  ;;  %v6163_v18 = vadd.f32 %v19312_v33, %v6162_v20  ;;  %vm19314_vm3 = vcmask 1041409   ;;  %v6055_v27 = vmul.f32 %v19316_v60, %v19315_v34  ;;  %vm6166_vm13 = vmor %vm6164_vm9, %vm6165_vm7 }
 0x61a   : > { %v7788_v7 = vsel %vm19314_vm3, %v7663_v3, %v7662_v2  ;;  %v7664_v1 = vperm.slane %v16345_v9, %v12447_v16  ;;  %7422 = vperm.xlu2 %8193, %v6023_v55   ;;  %v6368_v59 = vmul.f32 %v19317_v13, %v6367_v10  ;;  %v6171_v58 = vor.u32 1.1754944e-38, %v6170_v32  ;;  %v19322_v32 = vld [vmem:[#allocation213_spill] sm:$0xff] }
 0x61b   : > { %v6063_v5 = vand.u32 2147483647, %v19315_v34  ;;  %v6167_v4 = vsel %vm6166_vm13, %v19312_v33, %v6163_v18  ;;  %vm6169_vm8 = vcmp.eq.f32.partialorder %v6168_v17, 8.507059e+37  ;;  %v6056_v42 = vsub.f32 1.0, %v6055_v27 }
 0x61c   : > { %v6400_v2 = vmul.f32 %v15224_v37, %v15046_v44  ;;  %7491 = vperm.xlu0 %8191, %v6368_v59   ;;  %v6172_v43 = vsel %vm6169_vm8, %v6171_v58, %v6167_v4  ;;  %vm19318_vm15 = vcmask 1042434   ;;  %vm6059_vm1 = vweird.f32 %v19315_v34 }
 0x61d   : > { %v7789_v9 = vsel %vm19318_vm15, %v7664_v1, %v7788_v7  ;;  %v6065_v47 = vand.u32 2147483648, %v19315_v34  ;;  %v6173_v28 = vmul.f32 %v19319_v21, %v6172_v43  ;;  %v6057_v3 = vmul.f32 %v19316_v60, %v6056_v42 }
 0x61e   : > { %vm6060_vm2 = vweird.f32 %v19316_v60  ;;  %v6401_v33 = vsub.f32 1.0, %v6400_v2  ;;  %vm16411_vm14 = vcmp.eq.f32.partialorder %v6063_v5, 8.507059e+37  ;;  %vm6404_vm7 = vweird.f32 %v15046_v44  ;;  %v16437_v58 = vpop.permute.xlu1 %7335 }
 0x61f   : > { %v6410_v30 = vand.u32 2147483648, %v15046_v44  ;;  %v6205_v63 = vmul.f32 %v19323_v25, %v19322_v32  ;;  %7452 = vperm.xlu1 %8192, %v6173_v28   ;;  %v6058_v20 = vadd.f32 %v19316_v60, %v6057_v3  ;;  %vm6405_vm6 = vweird.f32 %v15224_v37  ;;  %vm6061_vm5 = vmor %vm6059_vm1, %vm6060_vm2  ;;  %v19328_v3 = vld [vmem:[#allocation79_spill] sm:$0xff] }
 0x620   : > { %v6402_v17 = vmul.f32 %v15224_v37, %v6401_v33  ;;  %v6408_v40 = vand.u32 2147483647, %v15046_v44  ;;  %v6066_v55 = vor.u32 1.1754944e-38, %v6065_v47  ;;  %vm6209_vm9 = vweird.f32 %v19322_v32  ;;  %vm6406_vm3 = vmor %vm6404_vm7, %vm6405_vm6  ;;  %v19326_v47 = vld [vmem:[#allocation207_spill] sm:$0xff] }
 0x621   : > { %v6206_v49 = vsub.f32 1.0, %v6205_v63  ;;  %v7666_v10 = vperm.slane %v7324_v57, %v12447_v16  ;;  %v6062_v18 = vsel %vm6061_vm5, %v19316_v60, %v6058_v20  ;;  %v6213_v27 = vand.u32 2147483647, %v19322_v32  ;;  %v19324_v60 = vld [vmem:[#allocation73_spill] sm:$0xff] }
 0x622   : > { %v6403_v7 = vadd.f32 %v15224_v37, %v6402_v17  ;;  %v6215_v1 = vand.u32 2147483648, %v19322_v32  ;;  %v6067_v13 = vsel %vm16411_vm14, %v6066_v55, %v6062_v18  ;;  %v6411_v34 = vor.u32 1.1754944e-38, %v6410_v30  ;;  %v19327_v57 = vld [vmem:[#allocation229_spill] sm:$0xff]  ;;  %v7333_v30 = vpop.permute.xlu2 %7332  ;;  %v19329_v17 = vld [vmem:[#allocation216_spill] sm:$0xff]  ;;  %v16462_v55 = vpop.permute.xlu0 %7356 }
 0x623   : > { %v6207_v59 = vmul.f32 %v19323_v25, %v6206_v49  ;;  %vm6210_vm13 = vweird.f32 %v19323_v25  ;;  %v6068_v5 = vmul.f32 %v19324_v60, %v6067_v13  ;;  %vm6409_vm8 = vcmp.eq.f32.partialorder %v6408_v40, 8.507059e+37  ;;  %v19330_v32 = vld [vmem:[#allocation121_spill] sm:$0xff]  ;;  %v19331_v49 = vld [vmem:[#allocation88_spill] sm:$0xff] }
 0x624   : > { %v6407_v4 = vsel %vm6406_vm3, %v15224_v37, %v6403_v7  ;;  %vm19325_vm15 = vcmask 1043459   ;;  %v6100_v21 = vmul.f32 %v19327_v57, %v19326_v47  ;;  %v7667_v28 = vperm.slane %v16387_v8, %v12447_v16  ;;  %vm6211_vm1 = vmor %vm6209_vm9, %vm6210_vm13 }
 0x625   : > { %v7790_v42 = vsel %vm19325_vm15, %v7665_v56, %v7789_v9  ;;  %v6412_v2 = vsel %vm6409_vm8, %v6411_v34, %v6407_v4  ;;  %v6208_v44 = vadd.f32 %v19323_v25, %v6207_v59  ;;  %7431 = vperm.xlu2 %8193, %v6068_v5   ;;  %vm6214_vm2 = vcmp.eq.f32.partialorder %v6213_v27, 8.507059e+37 }
 0x626   : > { %v7791_v43 = vsel %vm4764_vm0, %v7666_v10, %v7790_v42  ;;  %v6413_v37 = vmul.f32 %v19328_v3, %v6412_v2  ;;  %v6216_v39 = vor.u32 1.1754944e-38, %v6215_v1  ;;  %v6101_v9 = vsub.f32 1.0, %v6100_v21  ;;  %v16481_v2 = vpop.permute.xlu1 %7344 }
 0x627   : > { %v6212_v56 = vsel %vm6211_vm1, %v19323_v25, %v6208_v44  ;;  %v6108_v33 = vand.u32 2147483647, %v19326_v47  ;;  %v6110_v36 = vand.u32 2147483648, %v19326_v47  ;;  %v7792_v8 = vsel %vm4766_vm4, %v7667_v28, %v7791_v43 }
 0x628   : > { %7500 = vperm.xlu0 %8191, %v6413_v37   ;;  %v6217_v63 = vsel %vm6214_vm2, %v6216_v39, %v6212_v56  ;;  %v7670_v20 = vperm.slane %v16437_v58, %v12447_v16  ;;  %v6250_v40 = vmul.f32 %v19330_v32, %v19329_v17  ;;  %v6102_v10 = vmul.f32 %v19327_v57, %v6101_v9 }
 0x629   : > { %v6218_v25 = vmul.f32 %v19331_v49, %v6217_v63  ;;  %vm6104_vm14 = vweird.f32 %v19326_v47  ;;  %vm6105_vm7 = vweird.f32 %v19327_v57  ;;  %vm6254_vm6 = vweird.f32 %v19329_v17 }
 0x62a   : > { %v6251_v18 = vsub.f32 1.0, %v6250_v40  ;;  %vm6255_vm5 = vweird.f32 %v19330_v32  ;;  %v6445_v7 = vmul.f32 %v15283_v41, %v15214_v19  ;;  %v6103_v27 = vadd.f32 %v19327_v57, %v6102_v10  ;;  %vm6106_vm3 = vmor %vm6104_vm14, %vm6105_vm7  ;;  %v7342_v63 = vpop.permute.xlu2 %7341  ;;  %v16509_v49 = vpop.permute.xlu0 %7365 }
 0x62b   : > { %7461 = vperm.xlu1 %8192, %v6218_v25   ;;  %vm6109_vm9 = vcmp.eq.f32.partialorder %v6108_v33, 8.507059e+37  ;;  %v6111_v1 = vor.u32 1.1754944e-38, %v6110_v36  ;;  %v6260_v13 = vand.u32 2147483648, %v19329_v17  ;;  %v6258_v59 = vand.u32 2147483647, %v19329_v17  ;;  %vm6256_vm8 = vmor %vm6254_vm6, %vm6255_vm5 }
 0x62c   : > { %v6252_v34 = vmul.f32 %v19330_v32, %v6251_v18  ;;  %v6446_v58 = vsub.f32 1.0, %v6445_v7  ;;  %vm6450_vm13 = vweird.f32 %v15283_v41  ;;  %v6107_v60 = vsel %vm6106_vm3, %v19327_v57, %v6103_v27  ;;  %v19332_v57 = vld [vmem:[#allocation76_spill] sm:$0xff] }
 0x62d   : > { %v6453_v5 = vand.u32 2147483647, %v15214_v19  ;;  %v6455_v4 = vand.u32 2147483648, %v15214_v19  ;;  %v7669_v42 = vperm.slane %v7333_v30, %v12447_v16  ;;  %v6112_v44 = vsel %vm6109_vm9, %v6111_v1, %v6107_v60  ;;  %v19337_v27 = vld [vmem:[#allocation72_spill] sm:$0xff] }
 0x62e   : > { %v6253_v43 = vadd.f32 %v19330_v32, %v6252_v34  ;;  %v6447_v47 = vmul.f32 %v15283_v41, %v6446_v58  ;;  %v7793_v21 = vsel %vm4768_vm12, %v7668_v62, %v7792_v8  ;;  %v6113_v28 = vmul.f32 %v19332_v57, %v6112_v44  ;;  %v19334_v62 = vld [vmem:[#allocation231_spill] sm:$0xff]  ;;  %v19335_v8 = vld [vmem:[#allocation69_spill] sm:$0xff] }
 0x62f   : > { %v6261_v3 = vor.u32 1.1754944e-38, %v6260_v13  ;;  %vm6449_vm15 = vweird.f32 %v15214_v19  ;;  %v7794_v37 = vsel %vm4770_vm11, %v7669_v42, %v7793_v21  ;;  %vm6259_vm1 = vcmp.eq.f32.partialorder %v6258_v59, 8.507059e+37 }
 0x630   : > { %v6257_v39 = vsel %vm6256_vm8, %v19330_v32, %v6253_v43  ;;  %v6448_v56 = vadd.f32 %v15283_v41, %v6447_v47  ;;  %7904 = vst.msk [vmem:[%s9463_s22 + $0x10] sm:$0xff] %vm4893_vm10, %v7794_v37  ;;  %v6145_v9 = vmul.f32 %v19334_v62, %v19333_v52  ;;  %v7677_v33 = vperm.slane %v16462_v55, %v12447_v16  ;;  %vm6451_vm2 = vmor %vm6449_vm15, %vm6450_vm13  ;;  %v19341_v37 = vld [vmem:[#allocation53_spill] sm:$0xff]  ;;  %v19358_v55 = vld [vmem:[#allocation236_spill] sm:$0xff] }
 0x631   : > { %7440 = vperm.xlu2 %8193, %v6113_v28   ;;  %v6262_v36 = vsel %vm6259_vm1, %v6261_v3, %v6257_v39  ;;  %v6456_v19 = vor.u32 1.1754944e-38, %v6455_v4  ;;  %v6153_v30 = vand.u32 2147483647, %v19333_v52  ;;  %vm6454_vm14 = vcmp.eq.f32.partialorder %v6453_v5, 8.507059e+37 }
 0x632   : > { %v6263_v17 = vmul.f32 %v19335_v8, %v6262_v36  ;;  %v6452_v32 = vsel %vm6451_vm2, %v15283_v41, %v6448_v56  ;;  %v6146_v40 = vsub.f32 1.0, %v6145_v9  ;;  %vm19336_vm7 = vcmask 1041409   ;;  %v19343_v36 = vld [vmem:[#allocation212_spill] sm:$0xff] }
 0x633   : > { %v7795_v25 = vsel %vm19336_vm7, %v7671_v31, %v7670_v20  ;;  %v6457_v10 = vsel %vm6454_vm14, %v6456_v19, %v6452_v32  ;;  %v6155_v18 = vand.u32 2147483648, %v19333_v52  ;;  %v6295_v7 = vmul.f32 %v15139_v14, %v15012_v29  ;;  %v19340_v20 = vld [vmem:[#allocation129_spill] sm:$0xff]  ;;  %v16557_v32 = vpop.permute.xlu0 %7374 }
 0x634   : > { %7470 = vperm.xlu1 %8192, %v6263_v17   ;;  %v6458_v1 = vmul.f32 %v19337_v27, %v6457_v10  ;;  %v7673_v41 = vperm.slane %v16481_v2, %v12447_v16  ;;  %v6147_v13 = vmul.f32 %v19334_v62, %v6146_v40  ;;  %vm6150_vm6 = vweird.f32 %v19334_v62  ;;  %v16536_v2 = vpop.permute.xlu1 %7353  ;;  %v19344_v19 = vld [vmem:[#allocation237_spill] sm:$0xff] }
 0x635   : > { %vm6149_vm5 = vweird.f32 %v19333_v52  ;;  %vm16524_vm9 = vcmp.eq.f32.partialorder %v6153_v30, 8.507059e+37  ;;  %v6296_v31 = vsub.f32 1.0, %v6295_v7  ;;  %v6490_v34 = vmul.f32 %v19340_v20, %v15230_v22 }
 0x636   : > { %7509 = vperm.xlu0 %8191, %v6458_v1   ;;  %v6148_v59 = vadd.f32 %v19334_v62, %v6147_v13  ;;  %vm6299_vm3 = vweird.f32 %v15012_v29  ;;  %v6303_v58 = vand.u32 2147483647, %v15012_v29  ;;  %v6305_v60 = vand.u32 2147483648, %v15012_v29  ;;  %vm6151_vm13 = vmor %vm6149_vm5, %vm6150_vm6  ;;  %v19347_v1 = vld [vmem:[#allocation233_spill] sm:$0xff]  ;;  %v19348_v13 = vld [vmem:[#allocation124_spill] sm:$0xff] }
 0x637   : > { %v6156_v5 = vor.u32 1.1754944e-38, %v6155_v18  ;;  %v6297_v4 = vmul.f32 %v15139_v14, %v6296_v31  ;;  %vm6300_vm8 = vweird.f32 %v15139_v14  ;;  %v6491_v42 = vsub.f32 1.0, %v6490_v34  ;;  %v19349_v31 = vld [vmem:[#allocation96_spill] sm:$0xff] }
 0x638   : > { %v6152_v44 = vsel %vm6151_vm13, %v19334_v62, %v6148_v59  ;;  %v6498_v43 = vand.u32 2147483647, %v15230_v22  ;;  %v6500_v47 = vand.u32 2147483648, %v15230_v22  ;;  %v7672_v21 = vperm.slane %v7342_v63, %v12447_v16  ;;  %vm6301_vm1 = vmor %vm6299_vm3, %vm6300_vm8  ;;  %v7351_v63 = vpop.permute.xlu2 %7350 }
 0x639   : > { %v6157_v57 = vsel %vm16524_vm9, %v6156_v5, %v6152_v44  ;;  %v6298_v28 = vadd.f32 %v15139_v14, %v6297_v4  ;;  %v6492_v3 = vmul.f32 %v19340_v20, %v6491_v42  ;;  %vm6495_vm15 = vweird.f32 %v19340_v20 }
 0x63a   : > { %v6158_v39 = vmul.f32 %v19341_v37, %v6157_v57  ;;  %vm6304_vm2 = vcmp.eq.f32.partialorder %v6303_v58, 8.507059e+37  ;;  %v6306_v56 = vor.u32 1.1754944e-38, %v6305_v60  ;;  %vm6494_vm14 = vweird.f32 %v15230_v22  ;;  %v19345_v22 = vld [vmem:[#allocation93_spill] sm:$0xff]  ;;  %v19352_v58 = vld [vmem:[#allocation120_spill] sm:$0xff]  ;;  %v19353_v60 = vld [vmem:[#allocation246_spill] sm:$0xff] }
 0x63b   : > { %v6302_v52 = vsel %vm6301_vm1, %v15139_v14, %v6298_v28  ;;  %v6493_v62 = vadd.f32 %v19340_v20, %v6492_v3  ;;  %vm19342_vm7 = vcmask 1042434   ;;  %v6190_v30 = vmul.f32 %v19344_v19, %v19343_v36  ;;  %vm6496_vm6 = vmor %vm6494_vm14, %vm6495_vm15 }
 0x63c   : > { %v7796_v9 = vsel %vm19342_vm7, %v7672_v21, %v7795_v25  ;;  %7449 = vperm.xlu2 %8193, %v6158_v39   ;;  %v6307_v8 = vsel %vm6304_vm2, %v6306_v56, %v6302_v52  ;;  %vm6499_vm5 = vcmp.eq.f32.partialorder %v6498_v43, 8.507059e+37  ;;  %v6501_v29 = vor.u32 1.1754944e-38, %v6500_v47  ;;  %v16581_v44 = vpop.permute.xlu1 %7362 }
 0x63d   : > { %v6198_v17 = vand.u32 2147483647, %v19343_v36  ;;  %v6308_v40 = vmul.f32 %v19345_v22, %v6307_v8  ;;  %v6497_v14 = vsel %vm6496_vm6, %v19340_v20, %v6493_v62  ;;  %v6191_v10 = vsub.f32 1.0, %v6190_v30 }
 0x63e   : > { %v6200_v25 = vand.u32 2147483648, %v19343_v36  ;;  %v6502_v18 = vsel %vm6499_vm5, %v6501_v29, %v6497_v14  ;;  %vm19346_vm9 = vcmask 1043459   ;;  %v7676_v27 = vperm.slane %v16536_v2, %v12447_v16  ;;  %v16610_v29 = vpop.permute.xlu0 %7383  ;;  %v19355_v14 = vld [vmem:[#allocation215_spill] sm:$0xff] }
 0x63f   : > { %v7797_v7 = vsel %vm19346_vm9, %v7673_v41, %v7796_v9  ;;  %v6340_v24 = vmul.f32 %v19348_v13, %v19347_v1  ;;  %7479 = vperm.xlu1 %8192, %v6308_v40   ;;  %v6503_v34 = vmul.f32 %v19349_v31, %v6502_v18  ;;  %v6192_v59 = vmul.f32 %v19344_v19, %v6191_v10  ;;  %v19354_v9 = vld [vmem:[#allocation85_spill] sm:$0xff]  ;;  %v19356_v10 = vld [vmem:[#allocation220_spill] sm:$0xff] }
 0x640   : > { %vm6194_vm3 = vweird.f32 %v19343_v36  ;;  %vm6195_vm13 = vweird.f32 %v19344_v19  ;;  %vm16571_vm8 = vcmp.eq.f32.partialorder %v6198_v17, 8.507059e+37  ;;  %vm6344_vm15 = vweird.f32 %v19347_v1 }
 0x641   : > { %v6341_v41 = vsub.f32 1.0, %v6340_v24  ;;  %v6535_v5 = vmul.f32 %v19353_v60, %v19352_v58  ;;  %7518 = vperm.xlu0 %8191, %v6503_v34   ;;  %v6193_v4 = vadd.f32 %v19344_v19, %v6192_v59  ;;  %v6201_v42 = vor.u32 1.1754944e-38, %v6200_v25  ;;  %vm6196_vm2 = vmor %vm6194_vm3, %vm6195_vm13  ;;  %v19359_v34 = vld [vmem:[#allocation163_spill] sm:$0xff] }
 0x642   : > { %vm6345_vm1 = vweird.f32 %v19348_v13  ;;  %v6350_v2 = vand.u32 2147483648, %v19347_v1  ;;  %v6348_v47 = vand.u32 2147483647, %v19347_v1  ;;  %vm6540_vm14 = vweird.f32 %v19353_v60 }
 0x643   : > { %v6342_v43 = vmul.f32 %v19348_v13, %v6341_v41  ;;  %v6536_v21 = vsub.f32 1.0, %v6535_v5  ;;  %v6197_v57 = vsel %vm6196_vm2, %v19344_v19, %v6193_v4  ;;  %v6543_v28 = vand.u32 2147483647, %v19352_v58  ;;  %vm6346_vm7 = vmor %vm6344_vm15, %vm6345_vm1  ;;  %v19360_v41 = vld [vmem:[#allocation74_spill] sm:$0xff] }
 0x644   : > { %v6545_v3 = vand.u32 2147483648, %v19352_v58  ;;  %v7675_v37 = vperm.slane %v7351_v63, %v12447_v16  ;;  %v6202_v39 = vsel %vm16571_vm8, %v6201_v42, %v6197_v57  ;;  %v7798_v62 = vsel %vm4764_vm0, %v7674_v48, %v7797_v7  ;;  %v16605_v63 = vpop.permute.xlu2 %7359  ;;  %v19357_v7 = vld [vmem:[#allocation24_spill] sm:$0xff]  ;;  %v19362_v57 = vld [vmem:[#allocation29_spill] sm:$0xff] }
 0x645   : > { %v6343_v56 = vadd.f32 %v19348_v13, %v6342_v43  ;;  %v6537_v52 = vmul.f32 %v19353_v60, %v6536_v21  ;;  %v6203_v36 = vmul.f32 %v19354_v9, %v6202_v39  ;;  %v6351_v19 = vor.u32 1.1754944e-38, %v6350_v2  ;;  %v16639_v2 = vpop.permute.xlu1 %7371  ;;  %v19361_v21 = vld [vmem:[#allocation156_spill] sm:$0xff] }
 0x646   : > { %vm6539_vm6 = vweird.f32 %v19352_v58  ;;  %v7799_v30 = vsel %vm4766_vm4, %v7675_v37, %v7798_v62  ;;  %vm6349_vm5 = vcmp.eq.f32.partialorder %v6348_v47, 8.507059e+37  ;;  %v6546_v22 = vor.u32 1.1754944e-38, %v6545_v3 }
 0x647   : > { %v6347_v8 = vsel %vm6346_vm7, %v19348_v13, %v6343_v56  ;;  %v6538_v6 = vadd.f32 %v19353_v60, %v6537_v52  ;;  %v7800_v48 = vsel %vm4768_vm12, %v7676_v27, %v7799_v30  ;;  %7458 = vperm.xlu2 %8193, %v6203_v36   ;;  %vm6541_vm9 = vmor %vm6539_vm6, %vm6540_vm14  ;;  %v6235_v25 = vmul.f32 %v19356_v10, %v19355_v14 }
 0x648   : > { %v6352_v17 = vsel %vm6349_vm5, %v6351_v19, %v6347_v8  ;;  %v7801_v40 = vsel %vm4770_vm11, %v7677_v33, %v7800_v48  ;;  %v7680_v18 = vperm.slane %v16509_v49, %v12447_v16  ;;  %vm6544_vm3 = vcmp.eq.f32.partialorder %v6543_v28, 8.507059e+37  ;;  %v19378_v49 = vld [vmem:[#allocation104_spill] sm:$0xff] }
 0x649   : > { %v6353_v27 = vmul.f32 %v19357_v7, %v6352_v17  ;;  %v6542_v1 = vsel %vm6541_vm9, %v19353_v60, %v6538_v6  ;;  %7905 = vst.msk [vmem:[%s9463_s22 + $0x18] sm:$0xff] %vm4893_vm10, %v7801_v40  ;;  %v6236_v24 = vsub.f32 1.0, %v6235_v25  ;;  %v6243_v31 = vand.u32 2147483647, %v19355_v14  ;;  %v19363_v6 = vld [vmem:[#allocation71_spill] sm:$0xff] }
 0x64a   : > { %v6547_v13 = vsel %vm6544_vm3, %v6546_v22, %v6542_v1  ;;  %v6385_v33 = vmul.f32 %v19359_v34, %v19358_v55  ;;  %v7683_v59 = vperm.slane %v16557_v32, %v12447_v16  ;;  %v7686_v20 = vperm.slane %v16610_v29, %v12447_v16  ;;  %v19364_v40 = vld [vmem:[#allocation219_spill] sm:$0xff] }
 0x64b   : > { %7488 = vperm.xlu1 %8192, %v6353_v27   ;;  %v6548_v58 = vmul.f32 %v19360_v41, %v6547_v13  ;;  %v6245_v60 = vand.u32 2147483648, %v19355_v14  ;;  %v7679_v5 = vperm.slane %v16581_v44, %v12447_v16  ;;  %v6237_v4 = vmul.f32 %v19356_v10, %v6236_v24  ;;  %v19366_v27 = vld [vmem:[#allocation82_spill] sm:$0xff] }
 0x64c   : > { %vm6240_vm13 = vweird.f32 %v19356_v10  ;;  %v6386_v42 = vsub.f32 1.0, %v6385_v33  ;;  %vm6239_vm8 = vweird.f32 %v19355_v14  ;;  %v6393_v43 = vand.u32 2147483647, %v19358_v55  ;;  %v16655_v36 = vpop.permute.xlu2 %7368  ;;  %v19365_v14 = vld [vmem:[#allocation239_spill] sm:$0xff]  ;;  %v19367_v41 = vld [vmem:[#allocation134_spill] sm:$0xff] }
 0x64d   : > { %7527 = vperm.xlu0 %8191, %v6548_v58   ;;  %v6395_v47 = vand.u32 2147483648, %v19358_v55  ;;  %v6580_v28 = vmul.f32 %v19362_v57, %v19361_v21  ;;  %v6238_v3 = vadd.f32 %v19356_v10, %v6237_v4  ;;  %vm6244_vm15 = vcmp.eq.f32.partialorder %v6243_v31, 8.507059e+37  ;;  %vm6241_vm2 = vmor %vm6239_vm8, %vm6240_vm13  ;;  %v16671_v31 = vpop.permute.xlu0 %7392  ;;  %v19368_v58 = vld [vmem:[#allocation182_spill] sm:$0xff] }
 0x64e   : > { %v6387_v44 = vmul.f32 %v19359_v34, %v6386_v42  ;;  %vm6390_vm1 = vweird.f32 %v19359_v34  ;;  %v6246_v37 = vor.u32 1.1754944e-38, %v6245_v60  ;;  %vm6389_vm14 = vweird.f32 %v19358_v55 }
 0x64f   : > { %v6581_v39 = vsub.f32 1.0, %v6580_v28  ;;  %v6588_v56 = vand.u32 2147483647, %v19361_v21  ;;  %v6242_v52 = vsel %vm6241_vm2, %v19356_v10, %v6238_v3  ;;  %vm6585_vm7 = vweird.f32 %v19362_v57  ;;  %vm6391_vm6 = vmor %vm6389_vm14, %vm6390_vm1 }
 0x650   : > { %v6388_v62 = vadd.f32 %v19359_v34, %v6387_v44  ;;  %v6590_v9 = vand.u32 2147483648, %v19361_v21  ;;  %v6247_v19 = vsel %vm6244_vm15, %v6246_v37, %v6242_v52  ;;  %vm6394_vm5 = vcmp.eq.f32.partialorder %v6393_v43, 8.507059e+37  ;;  %v19372_v44 = vld [vmem:[#allocation245_spill] sm:$0xff] }
 0x651   : > { %v6396_v30 = vor.u32 1.1754944e-38, %v6395_v47  ;;  %v6582_v8 = vmul.f32 %v19362_v57, %v6581_v39  ;;  %v6248_v48 = vmul.f32 %v19363_v6, %v6247_v19  ;;  %v7678_v22 = vperm.slane %v16605_v63, %v12447_v16  ;;  %v19370_v47 = vld [vmem:[#allocation81_spill] sm:$0xff] }
 0x652   : > { %v6392_v17 = vsel %vm6391_vm6, %v19359_v34, %v6388_v62  ;;  %v6280_v10 = vmul.f32 %v19365_v14, %v19364_v40  ;;  %vm6584_vm9 = vweird.f32 %v19361_v21  ;;  %vm6589_vm3 = vcmp.eq.f32.partialorder %v6588_v56, 8.507059e+37 }
 0x653   : > { %v6397_v25 = vsel %vm6394_vm5, %v6396_v30, %v6392_v17  ;;  %v6583_v7 = vadd.f32 %v19362_v57, %v6582_v8  ;;  %7467 = vperm.xlu2 %8193, %v6248_v48   ;;  %vm6586_vm13 = vmor %vm6584_vm9, %vm6585_vm7  ;;  %v6591_v13 = vor.u32 1.1754944e-38, %v6590_v9  ;;  %v7682_v24 = vperm.slane %v16639_v2, %v12447_v16  ;;  %v16681_v2 = vpop.permute.xlu1 %7380 }
 0x654   : > { %v6398_v1 = vmul.f32 %v19366_v27, %v6397_v25  ;;  %v6281_v63 = vsub.f32 1.0, %v6280_v10  ;;  %v6288_v34 = vand.u32 2147483647, %v19364_v40  ;;  %v6290_v33 = vand.u32 2147483648, %v19364_v40  ;;  %v16697_v8 = vpop.permute.xlu2 %7377 }
 0x655   : > { %v6587_v55 = vsel %vm6586_vm13, %v19362_v57, %v6583_v7  ;;  %v6625_v60 = vmul.f32 %v19368_v58, %v19367_v41  ;;  %vm19369_vm8 = vcmask 1041409   ;;  %vm6285_vm15 = vweird.f32 %v19365_v14 }
 0x656   : > { %7497 = vperm.xlu1 %8192, %v6398_v1   ;;  %v6592_v4 = vsel %vm6589_vm3, %v6591_v13, %v6587_v55  ;;  %v7802_v42 = vsel %vm19369_vm8, %v7679_v5, %v7678_v22  ;;  %v6282_v43 = vmul.f32 %v19365_v14, %v6281_v63  ;;  %vm6284_vm1 = vweird.f32 %v19364_v40  ;;  %v19371_v5 = vld [vmem:[#allocation241_spill] sm:$0xff]  ;;  %v19376_v13 = vld [vmem:[#allocation232_spill] sm:$0xff]  ;;  %v19377_v63 = vld [vmem:[#allocation14_spill] sm:$0xff] }
 0x657   : > { %v6593_v21 = vmul.f32 %v19370_v47, %v6592_v4  ;;  %v6626_v57 = vsub.f32 1.0, %v6625_v60  ;;  %vm6629_vm2 = vweird.f32 %v19367_v41  ;;  %vm6630_vm14 = vweird.f32 %v19368_v58  ;;  %vm6286_vm7 = vmor %vm6284_vm1, %vm6285_vm15  ;;  %v19373_v22 = vld [vmem:[#allocation65_spill] sm:$0xff] }
 0x658   : > { %v6283_v28 = vadd.f32 %v19365_v14, %v6282_v43  ;;  %v6635_v3 = vand.u32 2147483648, %v19367_v41  ;;  %v6430_v37 = vmul.f32 %v19372_v44, %v19371_v5  ;;  %vm6289_vm6 = vcmp.eq.f32.partialorder %v6288_v34, 8.507059e+37  ;;  %vm6631_vm9 = vmor %vm6629_vm2, %vm6630_vm14  ;;  %v16718_v34 = vpop.permute.xlu0 %7401  ;;  %v19379_v43 = vld [vmem:[#allocation153_spill] sm:$0xff] }
 0x659   : > { %7536 = vperm.xlu0 %8191, %v6593_v21   ;;  %v6291_v39 = vor.u32 1.1754944e-38, %v6290_v33  ;;  %v6627_v56 = vmul.f32 %v19368_v58, %v6626_v57  ;;  %v6633_v52 = vand.u32 2147483647, %v19367_v41  ;;  %v6438_v19 = vand.u32 2147483647, %v19371_v5  ;;  %v19380_v47 = vld [vmem:[#allocation161_spill] sm:$0xff] }
 0x65a   : > { %v6287_v62 = vsel %vm6286_vm7, %v19365_v14, %v6283_v28  ;;  %v6431_v9 = vsub.f32 1.0, %v6430_v37  ;;  %v7681_v30 = vperm.slane %v16655_v36, %v12447_v16  ;;  %vm6435_vm5 = vweird.f32 %v19372_v44 }
 0x65b   : > { %v6292_v6 = vsel %vm6289_vm6, %v6291_v39, %v6287_v62  ;;  %v6628_v48 = vadd.f32 %v19368_v58, %v6627_v56  ;;  %v6440_v17 = vand.u32 2147483648, %v19371_v5  ;;  %v6636_v14 = vor.u32 1.1754944e-38, %v6635_v3  ;;  %v16729_v57 = vpop.permute.xlu1 %7389  ;;  %v19384_v62 = vld [vmem:[#allocation243_spill] sm:$0xff] }
 0x65c   : > { %v6293_v40 = vmul.f32 %v19373_v22, %v6292_v6  ;;  %v6432_v10 = vmul.f32 %v19372_v44, %v6431_v9  ;;  %vm19374_vm3 = vcmask 1042434   ;;  %vm6634_vm13 = vcmp.eq.f32.partialorder %v6633_v52, 8.507059e+37 }
 0x65d   : > { %v7803_v36 = vsel %vm19374_vm3, %v7680_v18, %v7802_v42  ;;  %v6632_v25 = vsel %vm6631_vm9, %v19368_v58, %v6628_v48  ;;  %vm6434_vm8 = vweird.f32 %v19371_v5  ;;  %vm19375_vm15 = vcmask 1043459   ;;  %v19381_v5 = vld [vmem:[#allocation60_spill] sm:$0xff]  ;;  %v16749_v48 = vpop.permute.xlu2 %7386 }
 0x65e   : > { %v7804_v7 = vsel %vm19375_vm15, %v7681_v30, %v7803_v36  ;;  %7476 = vperm.xlu2 %8193, %v6293_v40   ;;  %v6637_v27 = vsel %vm6634_vm13, %v6636_v14, %v6632_v25  ;;  %v6433_v1 = vadd.f32 %v19372_v44, %v6432_v10  ;;  %vm6439_vm1 = vcmp.eq.f32.partialorder %v6438_v19, 8.507059e+37  ;;  %vm6436_vm2 = vmor %vm6434_vm8, %vm6435_vm5 }
 0x65f   : > { %v6325_v55 = vmul.f32 %v19377_v63, %v19376_v13  ;;  %v6638_v33 = vmul.f32 %v19378_v49, %v6637_v27  ;;  %v6441_v18 = vor.u32 1.1754944e-38, %v6440_v17  ;;  %v6333_v41 = vand.u32 2147483647, %v19376_v13 }
 0x660   : > { %v6335_v58 = vand.u32 2147483648, %v19376_v13  ;;  %v6437_v60 = vsel %vm6436_vm2, %v19372_v44, %v6433_v1  ;;  %v7805_v4 = vsel %vm4764_vm0, %v7682_v24, %v7804_v7  ;;  %v6670_v21 = vmul.f32 %v19380_v47, %v19379_v43  ;;  %v16775_v49 = vpop.permute.xlu0 %7410 }
 0x661   : > { %v6326_v42 = vsub.f32 1.0, %v6325_v55  ;;  %7545 = vperm.xlu0 %8191, %v6638_v33   ;;  %v6442_v28 = vsel %vm6439_vm1, %v6441_v18, %v6437_v60  ;;  %v7685_v3 = vperm.slane %v16681_v2, %v12447_v16  ;;  %vm6329_vm14 = vweird.f32 %v19376_v13  ;;  %v19385_v2 = vld [vmem:[#allocation23_spill] sm:$0xff] }
 0x662   : > { %vm6330_vm7 = vweird.f32 %v19377_v63  ;;  %v6443_v37 = vmul.f32 %v19381_v5, %v6442_v28  ;;  %v6671_v24 = vsub.f32 1.0, %v6670_v21  ;;  %vm6674_vm6 = vweird.f32 %v19379_v43  ;;  %v19386_v13 = vld [vmem:[#allocation15_spill] sm:$0xff]  ;;  %v19390_v5 = vld [vmem:[#allocation141_spill] sm:$0xff] }
 0x663   : > { %v6327_v44 = vmul.f32 %v19377_v63, %v6326_v42  ;;  %vm16738_vm5 = vcmp.eq.f32.partialorder %v6333_v41, 8.507059e+37  ;;  %v6336_v56 = vor.u32 1.1754944e-38, %v6335_v58  ;;  %v6680_v52 = vand.u32 2147483648, %v19379_v43  ;;  %vm6331_vm3 = vmor %vm6329_vm14, %vm6330_vm7  ;;  %v19387_v18 = vld [vmem:[#allocation235_spill] sm:$0xff]  ;;  %v19388_v41 = vld [vmem:[#allocation133_spill] sm:$0xff]  ;;  %v16789_v21 = vpop.permute.xlu1 %7398 }
 0x664   : > { %v6475_v9 = vmul.f32 %v19385_v2, %v19384_v62  ;;  %7506 = vperm.xlu1 %8192, %v6443_v37   ;;  %v6672_v30 = vmul.f32 %v19380_v47, %v6671_v24  ;;  %vm6675_vm9 = vweird.f32 %v19380_v47  ;;  %v6678_v6 = vand.u32 2147483647, %v19379_v43  ;;  %v19391_v37 = vld [vmem:[#allocation11_spill] sm:$0xff] }
 0x665   : > { %v6328_v19 = vadd.f32 %v19377_v63, %v6327_v44  ;;  %vm6480_vm13 = vweird.f32 %v19385_v2  ;;  %v6483_v22 = vand.u32 2147483647, %v19384_v62  ;;  %v7684_v40 = vperm.slane %v16697_v8, %v12447_v16  ;;  %vm6676_vm8 = vmor %vm6674_vm6, %vm6675_vm9 }
 0x666   : > { %v6476_v17 = vsub.f32 1.0, %v6475_v9  ;;  %v6673_v10 = vadd.f32 %v19380_v47, %v6672_v30  ;;  %v6485_v36 = vand.u32 2147483648, %v19384_v62  ;;  %v7806_v25 = vsel %vm4766_vm4, %v7683_v59, %v7805_v4  ;;  %v19389_v4 = vld [vmem:[#allocation99_spill] sm:$0xff] }
 0x667   : > { %v6332_v14 = vsel %vm6331_vm3, %v19377_v63, %v6328_v19  ;;  %v6681_v27 = vor.u32 1.1754944e-38, %v6680_v52  ;;  %v7807_v1 = vsel %vm4768_vm12, %v7684_v40, %v7806_v25  ;;  %vm6679_vm15 = vcmp.eq.f32.partialorder %v6678_v6, 8.507059e+37 }
 0x668   : > { %v6337_v7 = vsel %vm16738_vm5, %v6336_v56, %v6332_v14  ;;  %v6477_v8 = vmul.f32 %v19385_v2, %v6476_v17  ;;  %v6677_v55 = vsel %vm6676_vm8, %v19380_v47, %v6673_v10  ;;  %v7808_v32 = vsel %vm4770_vm11, %v7685_v3, %v7807_v1  ;;  %v19395_v17 = vld [vmem:[#allocation118_spill] sm:$0xff]  ;;  %v16810_v14 = vpop.permute.xlu2 %7395 }
 0x669   : > { %v6338_v63 = vmul.f32 %v19386_v13, %v6337_v7  ;;  %v6682_v59 = vsel %vm6679_vm15, %v6681_v27, %v6677_v55  ;;  %vm6479_vm1 = vweird.f32 %v19384_v62  ;;  %7906 = vst.msk [vmem:[%s9463_s22 + $0x20] sm:$0xff] %vm4893_vm10, %v7808_v32  ;;  %v6370_v58 = vmul.f32 %v19388_v41, %v19387_v18  ;;  %v19392_v62 = vld [vmem:[#allocation95_spill] sm:$0xff] }
 0x66a   : > { %v6478_v33 = vadd.f32 %v19385_v2, %v6477_v8  ;;  %v7689_v60 = vperm.slane %v16671_v31, %v12447_v16  ;;  %v6683_v42 = vmul.f32 %v19389_v4, %v6682_v59  ;;  %vm6481_vm2 = vmor %vm6479_vm1, %vm6480_vm13  ;;  %v6486_v43 = vor.u32 1.1754944e-38, %v6485_v36  ;;  %v16830_v4 = vpop.permute.xlu0 %7419 }
 0x66b   : > { %7485 = vperm.xlu2 %8193, %v6338_v63   ;;  %v6378_v47 = vand.u32 2147483647, %v19387_v18  ;;  %vm6484_vm14 = vcmp.eq.f32.partialorder %v6483_v22, 8.507059e+37  ;;  %v6371_v3 = vsub.f32 1.0, %v6370_v58  ;;  %v6715_v44 = vmul.f32 %v19391_v37, %v19390_v5  ;;  %v19396_v22 = vld [vmem:[#allocation175_spill] sm:$0xff] }
 0x66c   : > { %v6482_v28 = vsel %vm6481_vm2, %v19385_v2, %v6478_v33  ;;  %v7692_v24 = vperm.slane %v16718_v34, %v12447_v16  ;;  %v7695_v39 = vperm.slane %v16775_v49, %v12447_v16  ;;  %7554 = vperm.xlu0 %8191, %v6683_v42   ;;  %v6380_v52 = vand.u32 2147483648, %v19387_v18 }
 0x66d   : > { %v6487_v56 = vsel %vm6484_vm14, %v6486_v43, %v6482_v28  ;;  %v6372_v19 = vmul.f32 %v19388_v41, %v6371_v3  ;;  %vm6375_vm7 = vweird.f32 %v19388_v41  ;;  %v6716_v2 = vsub.f32 1.0, %v6715_v44  ;;  %v19400_v28 = vld [vmem:[#allocation125_spill] sm:$0xff]  ;;  %v19401_v44 = vld [vmem:[#allocation111_spill] sm:$0xff] }
 0x66e   : > { %v6488_v9 = vmul.f32 %v19392_v62, %v6487_v56  ;;  %vm6374_vm6 = vweird.f32 %v19387_v18  ;;  %vm16803_vm5 = vcmp.eq.f32.partialorder %v6378_v47, 8.507059e+37  ;;  %v6725_v6 = vand.u32 2147483648, %v19390_v5  ;;  %v19397_v18 = vld [vmem:[#allocation78_spill] sm:$0xff]  ;;  %v19399_v47 = vld [vmem:[#allocation240_spill] sm:$0xff] }
 0x66f   : > { %v6520_v40 = vmul.f32 %v19396_v22, %v19395_v17  ;;  %v6373_v10 = vadd.f32 %v19388_v41, %v6372_v19  ;;  %v6717_v36 = vmul.f32 %v19391_v37, %v6716_v2  ;;  %vm6720_vm9 = vweird.f32 %v19391_v37  ;;  %vm6376_vm3 = vmor %vm6374_vm6, %vm6375_vm7  ;;  %v19403_v19 = vld [vmem:[#allocation135_spill] sm:$0xff] }
 0x670   : > { %7515 = vperm.xlu1 %8192, %v6488_v9   ;;  %v6723_v25 = vand.u32 2147483647, %v19390_v5  ;;  %v6381_v7 = vor.u32 1.1754944e-38, %v6380_v52  ;;  %vm6719_vm13 = vweird.f32 %v19390_v5  ;;  %vm6525_vm8 = vweird.f32 %v19396_v22  ;;  %v16839_v5 = vpop.permute.xlu1 %7407  ;;  %v19402_v9 = vld [vmem:[#allocation31_spill] sm:$0xff] }
 0x671   : > { %v6521_v27 = vsub.f32 1.0, %v6520_v40  ;;  %v6377_v8 = vsel %vm6376_vm3, %v19388_v41, %v6373_v10  ;;  %v6718_v1 = vadd.f32 %v19391_v37, %v6717_v36  ;;  %v6530_v13 = vand.u32 2147483648, %v19395_v17  ;;  %vm6721_vm15 = vmor %vm6719_vm13, %vm6720_vm9  ;;  %v19405_v40 = vld [vmem:[#allocation98_spill] sm:$0xff] }
 0x672   : > { %v7687_v63 = vperm.slane %v16749_v48, %v12447_v16  ;;  %v6382_v55 = vsel %vm16803_vm5, %v6381_v7, %v6377_v8  ;;  %v6726_v32 = vor.u32 1.1754944e-38, %v6725_v6  ;;  %v6528_v33 = vand.u32 2147483647, %v19395_v17  ;;  %v19408_v8 = vld [vmem:[#allocation22_spill] sm:$0xff]  ;;  %v19415_v7 = vld [vmem:[#allocation8_spill] sm:$0xff] }
 0x673   : > { %v6522_v59 = vmul.f32 %v19396_v22, %v6521_v27  ;;  %v6383_v58 = vmul.f32 %v19397_v18, %v6382_v55  ;;  %v6722_v41 = vsel %vm6721_vm15, %v19391_v37, %v6718_v1  ;;  %vm6724_vm1 = vcmp.eq.f32.partialorder %v6723_v25, 8.507059e+37  ;;  %v16857_v25 = vpop.permute.xlu2 %7404  ;;  %v19409_v1 = vld [vmem:[#allocation131_spill] sm:$0xff] }
 0x674   : > { %vm6524_vm2 = vweird.f32 %v19395_v17  ;;  %v6727_v42 = vsel %vm6724_vm1, %v6726_v32, %v6722_v41  ;;  %vm19398_vm14 = vcmask 1041409   ;;  %v6415_v3 = vmul.f32 %v19400_v28, %v19399_v47 }
 0x675   : > { %v6523_v48 = vadd.f32 %v19396_v22, %v6522_v59  ;;  %v7809_v43 = vsel %vm19398_vm14, %v7687_v63, %v7686_v20  ;;  %v7688_v37 = vperm.slane %v16729_v57, %v12447_v16  ;;  %7494 = vperm.xlu2 %8193, %v6383_v58   ;;  %v6728_v56 = vmul.f32 %v19401_v44, %v6727_v42  ;;  %vm6526_vm7 = vmor %vm6524_vm2, %vm6525_vm8 }
 0x676   : > { %v6531_v52 = vor.u32 1.1754944e-38, %v6530_v13  ;;  %v6423_v62 = vand.u32 2147483647, %v19399_v47  ;;  %vm6529_vm6 = vcmp.eq.f32.partialorder %v6528_v33, 8.507059e+37  ;;  %v6416_v20 = vsub.f32 1.0, %v6415_v3 }
 0x677   : > { %v6527_v29 = vsel %vm6526_vm7, %v19396_v22, %v6523_v48  ;;  %v6760_v2 = vmul.f32 %v19403_v19, %v19402_v9  ;;  %v7698_v30 = vperm.slane %v16830_v4, %v12447_v16  ;;  %7563 = vperm.xlu0 %8191, %v6728_v56   ;;  %vm19404_vm5 = vcmask 1042434  }
 0x678   : > { %v6532_v57 = vsel %vm6529_vm6, %v6531_v52, %v6527_v29  ;;  %v7810_v6 = vsel %vm19404_vm5, %v7688_v37, %v7809_v43  ;;  %v6425_v17 = vand.u32 2147483648, %v19399_v47  ;;  %v6417_v36 = vmul.f32 %v19400_v28, %v6416_v20  ;;  %v16886_v52 = vpop.permute.xlu1 %7416 }
 0x679   : > { %v6533_v10 = vmul.f32 %v19405_v40, %v6532_v57  ;;  %vm6420_vm9 = vweird.f32 %v19400_v28  ;;  %v6761_v22 = vsub.f32 1.0, %v6760_v2  ;;  %vm6419_vm3 = vweird.f32 %v19399_v47  ;;  %v19413_v57 = vld [vmem:[#allocation242_spill] sm:$0xff] }
 0x67a   : > { %vm16860_vm13 = vcmp.eq.f32.partialorder %v6423_v62, 8.507059e+37  ;;  %v6770_v27 = vand.u32 2147483648, %v19402_v9  ;;  %v6565_v13 = vmul.f32 %v19409_v1, %v19408_v8  ;;  %v6418_v63 = vadd.f32 %v19400_v28, %v6417_v36  ;;  %vm6421_vm15 = vmor %vm6419_vm3, %vm6420_vm9 }
 0x67b   : > { %7524 = vperm.xlu1 %8192, %v6533_v10   ;;  %v6762_v55 = vmul.f32 %v19403_v19, %v6761_v22  ;;  %vm6765_vm8 = vweird.f32 %v19403_v19  ;;  %v6768_v32 = vand.u32 2147483647, %v19402_v9  ;;  %v6426_v59 = vor.u32 1.1754944e-38, %v6425_v17  ;;  %v19414_v17 = vld [vmem:[#allocation169_spill] sm:$0xff] }
 0x67c   : > { %vm6764_vm1 = vweird.f32 %v19402_v9  ;;  %v6566_v33 = vsub.f32 1.0, %v6565_v13  ;;  %vm6570_vm2 = vweird.f32 %v19409_v1  ;;  %v6422_v18 = vsel %vm6421_vm15, %v19400_v28, %v6418_v63  ;;  %v19410_v28 = vld [vmem:[#allocation33_spill] sm:$0xff]  ;;  %v16909_v13 = vpop.permute.xlu2 %7413  ;;  %v19417_v63 = vld [vmem:[#allocation84_spill] sm:$0xff] }
 0x67d   : > { %v6763_v58 = vadd.f32 %v19403_v19, %v6762_v55  ;;  %v6575_v41 = vand.u32 2147483648, %v19408_v8  ;;  %v7690_v42 = vperm.slane %v16810_v14, %v12447_v16  ;;  %v6427_v48 = vsel %vm16860_vm13, %v6426_v59, %v6422_v18  ;;  %vm6766_vm14 = vmor %vm6764_vm1, %vm6765_vm8  ;;  %v16888_v14 = vpop.permute.xlu0 %7428 }
 0x67e   : > { %v6771_v43 = vor.u32 1.1754944e-38, %v6770_v27  ;;  %v6567_v47 = vmul.f32 %v19409_v1, %v6566_v33  ;;  %v6573_v3 = vand.u32 2147483647, %v19408_v8  ;;  %v7691_v37 = vperm.slane %v16789_v21, %v12447_v16  ;;  %v19412_v21 = vld [vmem:[#allocation114_spill] sm:$0xff] }
 0x67f   : > { %v6428_v44 = vmul.f32 %v19410_v28, %v6427_v48  ;;  %v6767_v56 = vsel %vm6766_vm14, %v19403_v19, %v6763_v58  ;;  %vm6769_vm7 = vcmp.eq.f32.partialorder %v6768_v32, 8.507059e+37  ;;  %vm6569_vm6 = vweird.f32 %v19408_v8  ;;  %v19416_v27 = vld [vmem:[#allocation162_spill] sm:$0xff] }
 0x680   : > { %v6772_v62 = vsel %vm6769_vm7, %v6771_v43, %v6767_v56  ;;  %v6568_v29 = vadd.f32 %v19409_v1, %v6567_v47  ;;  %vm19411_vm5 = vcmask 1043459   ;;  %vm6571_vm9 = vmor %vm6569_vm6, %vm6570_vm2  ;;  %v6576_v19 = vor.u32 1.1754944e-38, %v6575_v41 }
 0x681   : > { %v7811_v20 = vsel %vm19411_vm5, %v7689_v60, %v7810_v6  ;;  %7503 = vperm.xlu2 %8193, %v6428_v44   ;;  %v6773_v9 = vmul.f32 %v19412_v21, %v6772_v62  ;;  %v6460_v40 = vmul.f32 %v19414_v17, %v19413_v57  ;;  %vm6574_vm3 = vcmp.eq.f32.partialorder %v6573_v3, 8.507059e+37 }
 0x682   : > { %v7812_v2 = vsel %vm4764_vm0, %v7690_v42, %v7811_v20  ;;  %v6572_v10 = vsel %vm6571_vm9, %v19409_v1, %v6568_v29  ;;  %v6468_v36 = vand.u32 2147483647, %v19413_v57  ;;  %v6470_v31 = vand.u32 2147483648, %v19413_v57  ;;  %v19420_v42 = vld [vmem:[#allocation167_spill] sm:$0xff]  ;;  %v16941_v20 = vpop.permute.xlu1 %7425 }
 0x683   : > { %v7701_v60 = vperm.slane %v16888_v14, %v12447_v16  ;;  %7572 = vperm.xlu0 %8191, %v6773_v9   ;;  %v6577_v6 = vsel %vm6574_vm3, %v6576_v19, %v6572_v10  ;;  %v6461_v22 = vsub.f32 1.0, %v6460_v40  ;;  %v6610_v8 = vmul.f32 %v19416_v27, %v19415_v7  ;;  %v19423_v40 = vld [vmem:[#allocation143_spill] sm:$0xff] }
 0x684   : > { %v6578_v55 = vmul.f32 %v19417_v63, %v6577_v6  ;;  %v7813_v1 = vsel %vm4766_vm4, %v7691_v37, %v7812_v2  ;;  %v7694_v32 = vperm.slane %v16839_v5, %v12447_v16  ;;  %vm6464_vm13 = vweird.f32 %v19413_v57  ;;  %v19421_v57 = vld [vmem:[#allocation46_spill] sm:$0xff]  ;;  %v16966_v63 = vpop.permute.xlu2 %7422 }
 0x685   : > { %v6462_v59 = vmul.f32 %v19414_v17, %v6461_v22  ;;  %vm6465_vm8 = vweird.f32 %v19414_v17  ;;  %v6611_v33 = vsub.f32 1.0, %v6610_v8  ;;  %vm6614_vm15 = vweird.f32 %v19415_v7  ;;  %v16949_v2 = vpop.permute.xlu0 %7437  ;;  %v19425_v22 = vld [vmem:[#allocation103_spill] sm:$0xff] }
 0x686   : > { %7533 = vperm.xlu1 %8192, %v6578_v55   ;;  %vm16919_vm1 = vcmp.eq.f32.partialorder %v6468_v36, 8.507059e+37  ;;  %v6471_v58 = vor.u32 1.1754944e-38, %v6470_v31  ;;  %v6620_v41 = vand.u32 2147483648, %v19415_v7  ;;  %v6805_v5 = vmul.f32 %v15758_v50, %v19420_v42  ;;  %vm6466_vm14 = vmor %vm6464_vm13, %vm6465_vm8 }
 0x687   : > { %v6463_v48 = vadd.f32 %v19414_v17, %v6462_v59  ;;  %v6612_v43 = vmul.f32 %v19416_v27, %v6611_v33  ;;  %vm6615_vm2 = vweird.f32 %v19416_v27  ;;  %v6618_v47 = vand.u32 2147483647, %v19415_v7 }
 0x688   : > { %v6806_v3 = vsub.f32 1.0, %v6805_v5  ;;  %vm6810_vm7 = vweird.f32 %v15758_v50  ;;  %v6813_v37 = vand.u32 2147483647, %v19420_v42  ;;  %v7693_v28 = vperm.slane %v16857_v25, %v12447_v16  ;;  %vm6616_vm6 = vmor %vm6614_vm15, %vm6615_vm2 }
 0x689   : > { %v6467_v44 = vsel %vm6466_vm14, %v19414_v17, %v6463_v48  ;;  %v6613_v56 = vadd.f32 %v19416_v27, %v6612_v43  ;;  %v6815_v62 = vand.u32 2147483648, %v19420_v42  ;;  %v7814_v29 = vsel %vm4768_vm12, %v7692_v24, %v7813_v1  ;;  %v19422_v24 = vld [vmem:[#allocation244_spill] sm:$0xff]  ;;  %v19426_v1 = vld [vmem:[#allocation137_spill] sm:$0xff] }
 0x68a   : > { %v6472_v21 = vsel %vm16919_vm1, %v6471_v58, %v6467_v44  ;;  %v6621_v25 = vor.u32 1.1754944e-38, %v6620_v41  ;;  %v6807_v9 = vmul.f32 %v15758_v50, %v6806_v3  ;;  %v7815_v19 = vsel %vm4770_vm11, %v7693_v28, %v7814_v29  ;;  %v19428_v41 = vld [vmem:[#allocation108_spill] sm:$0xff] }
 0x68b   : > { %v6473_v17 = vmul.f32 %v19421_v57, %v6472_v21  ;;  %v6617_v34 = vsel %vm6616_vm6, %v19416_v27, %v6613_v56  ;;  %vm6619_vm5 = vcmp.eq.f32.partialorder %v6618_v47, 8.507059e+37  ;;  %7907 = vst.msk [vmem:[%s9463_s22 + $0x28] sm:$0xff] %vm4893_vm10, %v7815_v19  ;;  %v6505_v10 = vmul.f32 %v19423_v40, %v19422_v24  ;;  %v19429_v19 = vld [vmem:[#allocation97_spill] sm:$0xff] }
 0x68c   : > { %vm19424_vm9 = vcmask 1041409   ;;  %v6622_v31 = vsel %vm6619_vm5, %v6621_v25, %v6617_v34  ;;  %v6808_v6 = vadd.f32 %v15758_v50, %v6807_v9  ;;  %vm6809_vm3 = vweird.f32 %v19420_v42 }
 0x68d   : > { %v7816_v36 = vsel %vm19424_vm9, %v7695_v39, %v7694_v32  ;;  %7512 = vperm.xlu2 %8193, %v6473_v17   ;;  %v6623_v7 = vmul.f32 %v19425_v22, %v6622_v31  ;;  %vm6811_vm13 = vmor %vm6809_vm3, %vm6810_vm7  ;;  %vm6814_vm8 = vcmp.eq.f32.partialorder %v6813_v37, 8.507059e+37  ;;  %v6816_v27 = vor.u32 1.1754944e-38, %v6815_v62  ;;  %v19427_v32 = vld [vmem:[#allocation144_spill] sm:$0xff]  ;;  %v16991_v62 = vpop.permute.xlu1 %7434  ;;  %v16996_v9 = vpop.permute.xlu0 %7446 }
 0x68e   : > { %v6506_v8 = vsub.f32 1.0, %v6505_v10  ;;  %v6812_v49 = vsel %vm6811_vm13, %v15758_v50, %v6808_v6  ;;  %v6513_v39 = vand.u32 2147483647, %v19422_v24  ;;  %v6515_v55 = vand.u32 2147483648, %v19422_v24  ;;  %v19432_v10 = vld [vmem:[#allocation123_spill] sm:$0xff] }
 0x68f   : > { %v6655_v59 = vmul.f32 %v19427_v32, %v19426_v1  ;;  %7542 = vperm.xlu1 %8192, %v6623_v7   ;;  %v6817_v33 = vsel %vm6814_vm8, %v6816_v27, %v6812_v49  ;;  %v7697_v18 = vperm.slane %v16886_v52, %v12447_v16  ;;  %vm6510_vm15 = vweird.f32 %v19423_v40  ;;  %v17012_v27 = vpop.permute.xlu2 %7431 }
 0x690   : > { %v6507_v58 = vmul.f32 %v19423_v40, %v6506_v8  ;;  %v6818_v42 = vmul.f32 %v19428_v41, %v6817_v33  ;;  %vm6509_vm1 = vweird.f32 %v19422_v24  ;;  %vm6659_vm2 = vweird.f32 %v19426_v1  ;;  %v19433_v8 = vld [vmem:[#allocation80_spill] sm:$0xff]  ;;  %v19435_v33 = vld [vmem:[#allocation127_spill] sm:$0xff] }
 0x691   : > { %v6656_v50 = vsub.f32 1.0, %v6655_v59  ;;  %vm6660_vm14 = vweird.f32 %v19427_v32  ;;  %v6665_v48 = vand.u32 2147483648, %v19426_v1  ;;  %v6850_v52 = vmul.f32 %v15870_v12, %v15705_v15  ;;  %vm6511_vm7 = vmor %vm6509_vm1, %vm6510_vm15 }
 0x692   : > { %v6508_v5 = vadd.f32 %v19423_v40, %v6507_v58  ;;  %7581 = vperm.xlu0 %8191, %v6818_v42   ;;  %vm6514_vm6 = vcmp.eq.f32.partialorder %v6513_v39, 8.507059e+37  ;;  %v6516_v43 = vor.u32 1.1754944e-38, %v6515_v55  ;;  %v6663_v3 = vand.u32 2147483647, %v19426_v1  ;;  %vm6661_vm9 = vmor %vm6659_vm2, %vm6660_vm14  ;;  %v19436_v58 = vld [vmem:[#allocation17_spill] sm:$0xff] }
 0x693   : > { %v6657_v47 = vmul.f32 %v19427_v32, %v6656_v50  ;;  %v6851_v28 = vsub.f32 1.0, %v6850_v52  ;;  %v6858_v44 = vand.u32 2147483647, %v15705_v15  ;;  %v7696_v56 = vperm.slane %v16909_v13, %v12447_v16 }
 0x694   : > { %v6512_v37 = vsel %vm6511_vm7, %v19423_v40, %v6508_v5  ;;  %vm6854_vm5 = vweird.f32 %v15705_v15  ;;  %v6860_v25 = vand.u32 2147483648, %v15705_v15  ;;  %v6666_v17 = vor.u32 1.1754944e-38, %v6665_v48  ;;  %v19431_v40 = vld [vmem:[#allocation126_spill] sm:$0xff] }
 0x695   : > { %v6517_v29 = vsel %vm6514_vm6, %v6516_v43, %v6512_v37  ;;  %v6658_v21 = vadd.f32 %v19427_v32, %v6657_v47  ;;  %v6852_v13 = vmul.f32 %v15870_v12, %v6851_v28  ;;  %vm6855_vm3 = vweird.f32 %v15870_v12  ;;  %v19437_v15 = vld [vmem:[#allocation138_spill] sm:$0xff] }
 0x696   : > { %v6518_v57 = vmul.f32 %v19429_v19, %v6517_v29  ;;  %vm6664_vm13 = vcmp.eq.f32.partialorder %v6663_v3, 8.507059e+37  ;;  %vm19430_vm8 = vcmask 1042434   ;;  %v6550_v31 = vmul.f32 %v19432_v10, %v19431_v40  ;;  %vm6856_vm1 = vmor %vm6854_vm5, %vm6855_vm3  ;;  %v17036_v3 = vpop.permute.xlu1 %7443  ;;  %v17041_v29 = vpop.permute.xlu0 %7455 }
 0x697   : > { %v6662_v34 = vsel %vm6661_vm9, %v19427_v32, %v6658_v21  ;;  %v7817_v24 = vsel %vm19430_vm8, %v7696_v56, %v7816_v36  ;;  %v6853_v22 = vadd.f32 %v15870_v12, %v6852_v13  ;;  %vm6859_vm15 = vcmp.eq.f32.partialorder %v6858_v44, 8.507059e+37 }
 0x698   : > { %7521 = vperm.xlu2 %8193, %v6518_v57   ;;  %v6667_v6 = vsel %vm6664_vm13, %v6666_v17, %v6662_v34  ;;  %v7700_v7 = vperm.slane %v16941_v20, %v12447_v16  ;;  %v6861_v39 = vor.u32 1.1754944e-38, %v6860_v25  ;;  %v6551_v36 = vsub.f32 1.0, %v6550_v31  ;;  %v19438_v17 = vld [vmem:[#allocation67_spill] sm:$0xff] }
 0x699   : > { %v6668_v49 = vmul.f32 %v19433_v8, %v6667_v6  ;;  %v6558_v55 = vand.u32 2147483647, %v19431_v40  ;;  %v6857_v1 = vsel %vm6856_vm1, %v15870_v12, %v6853_v22  ;;  %vm19434_vm2 = vcmask 1043459   ;;  %v19439_v22 = vld [vmem:[#allocation92_spill] sm:$0xff] }
 0x69a   : > { %v7818_v32 = vsel %vm19434_vm2, %v7697_v18, %v7817_v24  ;;  %v6560_v59 = vand.u32 2147483648, %v19431_v40  ;;  %v6700_v20 = vmul.f32 %v19436_v58, %v19435_v33  ;;  %v6862_v41 = vsel %vm6859_vm15, %v6861_v39, %v6857_v1  ;;  %v19440_v8 = vld [vmem:[#allocation12_spill] sm:$0xff]  ;;  %v19442_v1 = vld [vmem:[#allocation193_spill] sm:$0xff] }
 0x69b   : > { %7551 = vperm.xlu1 %8192, %v6668_v49   ;;  %v6552_v42 = vmul.f32 %v19432_v10, %v6551_v36  ;;  %vm6554_vm14 = vweird.f32 %v19431_v40  ;;  %vm6555_vm7 = vweird.f32 %v19432_v10  ;;  %v6863_v50 = vmul.f32 %v19437_v15, %v6862_v41 }
 0x69c   : > { %v6701_v5 = vsub.f32 1.0, %v6700_v20  ;;  %vm6704_vm6 = vweird.f32 %v19435_v33  ;;  %v6710_v12 = vand.u32 2147483648, %v19435_v33  ;;  %vm6559_vm5 = vcmp.eq.f32.partialorder %v6558_v55, 8.507059e+37  ;;  %vm6556_vm3 = vmor %vm6554_vm14, %vm6555_vm7 }
 0x69d   : > { %v6553_v18 = vadd.f32 %v19432_v10, %v6552_v42  ;;  %vm6705_vm9 = vweird.f32 %v19436_v58  ;;  %v6895_v48 = vmul.f32 %v15941_v54, %v15888_v46  ;;  %7590 = vperm.xlu0 %8191, %v6863_v50   ;;  %v6561_v52 = vor.u32 1.1754944e-38, %v6560_v59  ;;  %v19444_v42 = vld [vmem:[#allocation110_spill] sm:$0xff] }
 0x69e   : > { %v6702_v43 = vmul.f32 %v19436_v58, %v6701_v5  ;;  %v6708_v47 = vand.u32 2147483647, %v19435_v33  ;;  %vm6900_vm13 = vweird.f32 %v15941_v54  ;;  %v6711_v28 = vor.u32 1.1754944e-38, %v6710_v12  ;;  %vm6706_vm8 = vmor %vm6704_vm6, %vm6705_vm9 }
 0x69f   : > { %v6557_v37 = vsel %vm6556_vm3, %v19432_v10, %v6553_v18  ;;  %v6896_v44 = vsub.f32 1.0, %v6895_v48  ;;  %v7699_v56 = vperm.slane %v16966_v63, %v12447_v16  ;;  %v6905_v19 = vand.u32 2147483648, %v15888_v46  ;;  %v17094_v48 = vpop.permute.xlu1 %7452 }
 0x6a0   : > { %v6562_v21 = vsel %vm6559_vm5, %v6561_v52, %v6557_v37  ;;  %v6703_v25 = vadd.f32 %v19436_v58, %v6702_v43  ;;  %v7819_v57 = vsel %vm4764_vm0, %v7698_v30, %v7818_v32  ;;  %v6903_v34 = vand.u32 2147483647, %v15888_v46  ;;  %v17060_v30 = vpop.permute.xlu2 %7440  ;;  %v19443_v32 = vld [vmem:[#allocation132_spill] sm:$0xff]  ;;  %v17100_v37 = vpop.permute.xlu0 %7464 }
 0x6a1   : > { %v6563_v13 = vmul.f32 %v19438_v17, %v6562_v21  ;;  %v6897_v63 = vmul.f32 %v15941_v54, %v6896_v44  ;;  %v7820_v24 = vsel %vm4766_vm4, %v7699_v56, %v7819_v57  ;;  %vm6709_vm15 = vcmp.eq.f32.partialorder %v6708_v47, 8.507059e+37 }
 0x6a2   : > { %v6707_v40 = vsel %vm6706_vm8, %v19436_v58, %v6703_v25  ;;  %vm6899_vm1 = vweird.f32 %v15888_v46  ;;  %v7821_v4 = vsel %vm4768_vm12, %v7700_v7, %v7820_v24  ;;  %v6595_v49 = vmul.f32 %v19440_v8, %v19439_v22  ;;  %v19441_v7 = vld [vmem:[#allocation100_spill] sm:$0xff] }
 0x6a3   : > { %7530 = vperm.xlu2 %8193, %v6563_v13   ;;  %v6712_v10 = vsel %vm6709_vm15, %v6711_v28, %v6707_v40  ;;  %v6898_v31 = vadd.f32 %v15941_v54, %v6897_v63  ;;  %v7822_v6 = vsel %vm4770_vm11, %v7701_v60, %v7821_v4  ;;  %v7704_v39 = vperm.slane %v16949_v2, %v12447_v16  ;;  %vm6901_vm2 = vmor %vm6899_vm1, %vm6900_vm13  ;;  %v19445_v63 = vld [vmem:[#allocation101_spill] sm:$0xff] }
 0x6a4   : > { %v7707_v46 = vperm.slane %v16996_v9, %v12447_v16  ;;  %v6713_v36 = vmul.f32 %v19441_v7, %v6712_v10  ;;  %v6906_v55 = vor.u32 1.1754944e-38, %v6905_v19  ;;  %7908 = vst.msk [vmem:[%s9463_s22 + $0x30] sm:$0xff] %vm4893_vm10, %v7822_v6  ;;  %vm6904_vm14 = vcmp.eq.f32.partialorder %v6903_v34, 8.507059e+37  ;;  %v19447_v6 = vld [vmem:[#allocation10_spill] sm:$0xff] }
 0x6a5   : > { %v6902_v14 = vsel %vm6901_vm2, %v15941_v54, %v6898_v31  ;;  %v6596_v60 = vsub.f32 1.0, %v6595_v49  ;;  %v6745_v59 = vmul.f32 %v19443_v32, %v19442_v1  ;;  %v7710_v33 = vperm.slane %v17041_v29, %v12447_v16  ;;  %v19446_v31 = vld [vmem:[#allocation148_spill] sm:$0xff]  ;;  %v19469_v9 = vld [vmem:[#allocation122_spill] sm:$0xff] }
 0x6a6   : > { %7560 = vperm.xlu1 %8192, %v6713_v36   ;;  %v6907_v58 = vsel %vm6904_vm14, %v6906_v55, %v6902_v14  ;;  %v6603_v20 = vand.u32 2147483647, %v19439_v22  ;;  %v6605_v41 = vand.u32 2147483648, %v19439_v22  ;;  %vm6600_vm7 = vweird.f32 %v19440_v8 }
 0x6a7   : > { %v6908_v15 = vmul.f32 %v19444_v42, %v6907_v58  ;;  %v6597_v50 = vmul.f32 %v19440_v8, %v6596_v60  ;;  %v6746_v54 = vsub.f32 1.0, %v6745_v59  ;;  %v7703_v5 = vperm.slane %v16991_v62, %v12447_v16  ;;  %v19450_v59 = vld [vmem:[#allocation116_spill] sm:$0xff] }
 0x6a8   : > { %vm6599_vm6 = vweird.f32 %v19439_v22  ;;  %v6755_v12 = vand.u32 2147483648, %v19442_v1  ;;  %v6940_v18 = vmul.f32 %v15962_v38, %v15906_v0  ;;  %vm6750_vm5 = vweird.f32 %v19443_v32  ;;  %v17109_v13 = vpop.permute.xlu2 %7449 }
 0x6a9   : > { %7599 = vperm.xlu0 %8191, %v6908_v15   ;;  %v6598_v52 = vadd.f32 %v19440_v8, %v6597_v50  ;;  %v6747_v43 = vmul.f32 %v19443_v32, %v6746_v54  ;;  %v6753_v47 = vand.u32 2147483647, %v19442_v1  ;;  %vm6601_vm9 = vmor %vm6599_vm6, %vm6600_vm7  ;;  %vm6604_vm3 = vcmp.eq.f32.partialorder %v6603_v20, 8.507059e+37  ;;  %v19453_v15 = vld [vmem:[#allocation149_spill] sm:$0xff]  ;;  %v19454_v50 = vld [vmem:[#allocation154_spill] sm:$0xff] }
 0x6aa   : > { %v6606_v62 = vor.u32 1.1754944e-38, %v6605_v41  ;;  %vm6749_vm13 = vweird.f32 %v19442_v1  ;;  %v6941_v28 = vsub.f32 1.0, %v6940_v18  ;;  %v6948_v21 = vand.u32 2147483647, %v15906_v0 }
 0x6ab   : > { %v6602_v44 = vsel %vm6601_vm9, %v19440_v8, %v6598_v52  ;;  %v6748_v56 = vadd.f32 %v19443_v32, %v6747_v43  ;;  %v6950_v25 = vand.u32 2147483648, %v15906_v0  ;;  %vm6751_vm8 = vmor %vm6749_vm13, %vm6750_vm5  ;;  %v6756_v57 = vor.u32 1.1754944e-38, %v6755_v12  ;;  %v19448_v8 = vld [vmem:[#allocation113_spill] sm:$0xff] }
 0x6ac   : > { %v6607_v19 = vsel %vm6604_vm3, %v6606_v62, %v6602_v44  ;;  %v6942_v17 = vmul.f32 %v15962_v38, %v6941_v28  ;;  %vm6945_vm15 = vweird.f32 %v15962_v38  ;;  %vm6754_vm1 = vcmp.eq.f32.partialorder %v6753_v47, 8.507059e+37 }
 0x6ad   : > { %v6608_v34 = vmul.f32 %v19445_v63, %v6607_v19  ;;  %v6752_v24 = vsel %vm6751_vm8, %v19443_v32, %v6748_v56  ;;  %v7702_v40 = vperm.slane %v17012_v27, %v12447_v16  ;;  %vm6944_vm2 = vweird.f32 %v15906_v0  ;;  %v19456_v63 = vld [vmem:[#allocation105_spill] sm:$0xff] }
 0x6ae   : > { %v6757_v4 = vsel %vm6754_vm1, %v6756_v57, %v6752_v24  ;;  %v6943_v10 = vadd.f32 %v15962_v38, %v6942_v17  ;;  %v6640_v22 = vmul.f32 %v19447_v6, %v19446_v31  ;;  %vm6946_vm14 = vmor %vm6944_vm2, %vm6945_vm15  ;;  %vm6949_vm7 = vcmp.eq.f32.partialorder %v6948_v21, 8.507059e+37 }
 0x6af   : > { %7539 = vperm.xlu2 %8193, %v6608_v34   ;;  %v6758_v49 = vmul.f32 %v19448_v8, %v6757_v4  ;;  %v6951_v7 = vor.u32 1.1754944e-38, %v6950_v25  ;;  %v6648_v36 = vand.u32 2147483647, %v19446_v31  ;;  %v7706_v27 = vperm.slane %v17036_v3, %v12447_v16  ;;  %v17132_v3 = vpop.permute.xlu1 %7461 }
 0x6b0   : > { %v6947_v55 = vsel %vm6946_vm14, %v15962_v38, %v6943_v10  ;;  %v6641_v14 = vsub.f32 1.0, %v6640_v22  ;;  %v6985_v0 = vmul.f32 %v16023_v26, %v15927_v61  ;;  %vm19449_vm6 = vcmask 1041409   ;;  %v17157_v25 = vpop.permute.xlu2 %7458  ;;  %v19460_v22 = vld [vmem:[#allocation157_spill] sm:$0xff] }
 0x6b1   : > { %7569 = vperm.xlu1 %8192, %v6758_v49   ;;  %v6952_v60 = vsel %vm6949_vm7, %v6951_v7, %v6947_v55  ;;  %v7823_v1 = vsel %vm19449_vm6, %v7703_v5, %v7702_v40  ;;  %vm6644_vm5 = vweird.f32 %v19446_v31  ;;  %v6650_v32 = vand.u32 2147483648, %v19446_v31  ;;  %v17142_v5 = vpop.permute.xlu0 %7473  ;;  %v19459_v31 = vld [vmem:[#allocation91_spill] sm:$0xff]  ;;  %v19462_v55 = vld [vmem:[#allocation54_spill] sm:$0xff] }
 0x6b2   : > { %v6953_v58 = vmul.f32 %v19450_v59, %v6952_v60  ;;  %v6642_v20 = vmul.f32 %v19447_v6, %v6641_v14  ;;  %vm6645_vm9 = vweird.f32 %v19447_v6  ;;  %v6986_v38 = vsub.f32 1.0, %v6985_v0  ;;  %v19463_v59 = vld [vmem:[#allocation106_spill] sm:$0xff] }
 0x6b3   : > { %vm17134_vm3 = vcmp.eq.f32.partialorder %v6648_v36, 8.507059e+37  ;;  %vm6989_vm13 = vweird.f32 %v15927_v61  ;;  %v6995_v42 = vand.u32 2147483648, %v15927_v61  ;;  %v6790_v54 = vmul.f32 %v19454_v50, %v19453_v15  ;;  %vm6646_vm15 = vmor %vm6644_vm5, %vm6645_vm9  ;;  %v19461_v36 = vld [vmem:[#allocation18_spill] sm:$0xff] }
 0x6b4   : > { %7608 = vperm.xlu0 %8191, %v6953_v58   ;;  %v6643_v12 = vadd.f32 %v19447_v6, %v6642_v20  ;;  %v6987_v18 = vmul.f32 %v16023_v26, %v6986_v38  ;;  %vm6990_vm8 = vweird.f32 %v16023_v26  ;;  %v6993_v52 = vand.u32 2147483647, %v15927_v61  ;;  %v19458_v61 = vld [vmem:[#allocation16_spill] sm:$0xff] }
 0x6b5   : > { %v6651_v43 = vor.u32 1.1754944e-38, %v6650_v32  ;;  %v6791_v47 = vsub.f32 1.0, %v6790_v54  ;;  %vm6795_vm1 = vweird.f32 %v19454_v50  ;;  %v7705_v62 = vperm.slane %v17060_v30, %v12447_v16  ;;  %vm6991_vm2 = vmor %vm6989_vm13, %vm6990_vm8 }
 0x6b6   : > { %v6647_v28 = vsel %vm6646_vm15, %v19447_v6, %v6643_v12  ;;  %v6988_v44 = vadd.f32 %v16023_v26, %v6987_v18  ;;  %v6798_v56 = vand.u32 2147483647, %v19453_v15  ;;  %v6800_v21 = vand.u32 2147483648, %v19453_v15 }
 0x6b7   : > { %v6652_v19 = vsel %vm17134_vm3, %v6651_v43, %v6647_v28  ;;  %v6996_v57 = vor.u32 1.1754944e-38, %v6995_v42  ;;  %v6792_v17 = vmul.f32 %v19454_v50, %v6791_v47  ;;  %vm19455_vm14 = vcmask 1042434   ;;  %v17187_v32 = vpop.permute.xlu1 %7470  ;;  %v19466_v42 = vld [vmem:[#allocation174_spill] sm:$0xff] }
 0x6b8   : > { %v7824_v30 = vsel %vm19455_vm14, %v7704_v39, %v7823_v1  ;;  %v6653_v34 = vmul.f32 %v19456_v63, %v6652_v19  ;;  %v6992_v24 = vsel %vm6991_vm2, %v16023_v26, %v6988_v44  ;;  %vm6994_vm7 = vcmp.eq.f32.partialorder %v6993_v52, 8.507059e+37  ;;  %v19468_v63 = vld [vmem:[#allocation86_spill] sm:$0xff] }
 0x6b9   : > { %vm19457_vm6 = vcmask 1043459   ;;  %v6997_v4 = vsel %vm6994_vm7, %v6996_v57, %v6992_v24  ;;  %v6793_v10 = vadd.f32 %v19454_v50, %v6792_v17  ;;  %vm6794_vm5 = vweird.f32 %v19453_v15  ;;  %v17192_v38 = vpop.permute.xlu0 %7482  ;;  %v19467_v15 = vld [vmem:[#allocation43_spill] sm:$0xff] }
 0x6ba   : > { %v7825_v40 = vsel %vm19457_vm6, %v7705_v62, %v7824_v30  ;;  %v6685_v6 = vmul.f32 %v19459_v31, %v19458_v61  ;;  %7548 = vperm.xlu2 %8193, %v6653_v34   ;;  %v6998_v2 = vmul.f32 %v19460_v22, %v6997_v4  ;;  %vm6796_vm9 = vmor %vm6794_vm5, %vm6795_vm1  ;;  %vm6799_vm3 = vcmp.eq.f32.partialorder %v6798_v56, 8.507059e+37  ;;  %v17210_v62 = vpop.permute.xlu2 %7467  ;;  %v19471_v22 = vld [vmem:[#allocation30_spill] sm:$0xff] }
 0x6bb   : > { %v6801_v39 = vor.u32 1.1754944e-38, %v6800_v21  ;;  %v6693_v26 = vand.u32 2147483647, %v19458_v61  ;;  %v6797_v8 = vsel %vm6796_vm9, %v19454_v50, %v6793_v10  ;;  %v7826_v49 = vsel %vm4764_vm0, %v7706_v27, %v7825_v40 }
 0x6bc   : > { %v6686_v7 = vsub.f32 1.0, %v6685_v6  ;;  %v7030_v14 = vmul.f32 %v19462_v55, %v19461_v36  ;;  %7617 = vperm.xlu0 %8191, %v6998_v2   ;;  %v7709_v60 = vperm.slane %v17094_v48, %v12447_v16  ;;  %vm6689_vm13 = vweird.f32 %v19458_v61  ;;  %v19470_v6 = vld [vmem:[#allocation168_spill] sm:$0xff] }
 0x6bd   : > { %v6802_v0 = vsel %vm6799_vm3, %v6801_v39, %v6797_v8  ;;  %v6695_v1 = vand.u32 2147483648, %v19458_v61  ;;  %vm6690_vm8 = vweird.f32 %v19459_v31  ;;  %vm17194_vm15 = vcmp.eq.f32.partialorder %v6693_v26, 8.507059e+37  ;;  %v19472_v8 = vld [vmem:[#allocation166_spill] sm:$0xff] }
 0x6be   : > { %v6803_v58 = vmul.f32 %v19463_v59, %v6802_v0  ;;  %v6687_v20 = vmul.f32 %v19459_v31, %v6686_v7  ;;  %v7031_v27 = vsub.f32 1.0, %v7030_v14  ;;  %vm7034_vm1 = vweird.f32 %v19461_v36  ;;  %vm6691_vm14 = vmor %vm6689_vm13, %vm6690_vm8  ;;  %v19473_v59 = vld [vmem:[#allocation136_spill] sm:$0xff] }
 0x6bf   : > { %v7040_v48 = vand.u32 2147483648, %v19461_v36  ;;  %v6835_v50 = vmul.f32 %v19467_v15, %v19466_v42  ;;  %vm7035_vm2 = vweird.f32 %v19462_v55  ;;  %v7038_v18 = vand.u32 2147483647, %v19461_v36  ;;  %v17246_v7 = vpop.permute.xlu1 %7479 }
 0x6c0   : > { %7578 = vperm.xlu1 %8192, %v6803_v58   ;;  %v6688_v54 = vadd.f32 %v19459_v31, %v6687_v20  ;;  %v7032_v12 = vmul.f32 %v19462_v55, %v7031_v27  ;;  %v6696_v52 = vor.u32 1.1754944e-38, %v6695_v1  ;;  %vm6840_vm7 = vweird.f32 %v19467_v15  ;;  %vm7036_vm6 = vmor %vm7034_vm1, %vm7035_vm2 }
 0x6c1   : > { %v6836_v43 = vsub.f32 1.0, %v6835_v50  ;;  %v6843_v47 = vand.u32 2147483647, %v19466_v42  ;;  %v6845_v56 = vand.u32 2147483648, %v19466_v42  ;;  %v7708_v21 = vperm.slane %v17109_v13, %v12447_v16  ;;  %v17252_v1 = vpop.permute.xlu0 %7491 }
 0x6c2   : > { %v6692_v28 = vsel %vm6691_vm14, %v19459_v31, %v6688_v54  ;;  %v7033_v44 = vadd.f32 %v19462_v55, %v7032_v12  ;;  %v7041_v57 = vor.u32 1.1754944e-38, %v7040_v48  ;;  %v7827_v30 = vsel %vm4766_vm4, %v7707_v46, %v7826_v49  ;;  %v19474_v48 = vld [vmem:[#allocation151_spill] sm:$0xff]  ;;  %v17261_v50 = vpop.permute.xlu2 %7476 }
 0x6c3   : > { %v6697_v19 = vsel %vm17194_vm15, %v6696_v52, %v6692_v28  ;;  %v6837_v17 = vmul.f32 %v19467_v15, %v6836_v43  ;;  %vm7039_vm5 = vcmp.eq.f32.partialorder %v7038_v18, 8.507059e+37  ;;  %v7828_v13 = vsel %vm4768_vm12, %v7708_v21, %v7827_v30 }
 0x6c4   : > { %v6698_v34 = vmul.f32 %v19468_v63, %v6697_v19  ;;  %v7037_v24 = vsel %vm7036_vm6, %v19462_v55, %v7033_v44  ;;  %vm6839_vm9 = vweird.f32 %v19466_v42  ;;  %v7829_v10 = vsel %vm4770_vm11, %v7709_v60, %v7828_v13  ;;  %v19475_v42 = vld [vmem:[#allocation159_spill] sm:$0xff] }
 0x6c5   : > { %v7042_v40 = vsel %vm7039_vm5, %v7041_v57, %v7037_v24  ;;  %v6838_v4 = vadd.f32 %v19467_v15, %v6837_v17  ;;  %v7713_v61 = vperm.slane %v17100_v37, %v12447_v16  ;;  %vm6841_vm3 = vmor %vm6839_vm9, %vm6840_vm7  ;;  %v6846_v31 = vor.u32 1.1754944e-38, %v6845_v56  ;;  %7909 = vst.msk [vmem:[%s9463_s22 + $0x38] sm:$0xff] %vm4893_vm10, %v7829_v10 }
 0x6c6   : > { %7557 = vperm.xlu2 %8193, %v6698_v34   ;;  %v7043_v46 = vmul.f32 %v19469_v9, %v7042_v40  ;;  %v6730_v2 = vmul.f32 %v19471_v22, %v19470_v6  ;;  %v7716_v39 = vperm.slane %v17142_v5, %v12447_v16  ;;  %vm6844_vm13 = vcmp.eq.f32.partialorder %v6843_v47, 8.507059e+37  ;;  %v19476_v34 = vld [vmem:[#allocation112_spill] sm:$0xff]  ;;  %v19477_v40 = vld [vmem:[#allocation90_spill] sm:$0xff] }
 0x6c7   : > { %v6842_v26 = vsel %vm6841_vm3, %v19467_v15, %v6838_v4  ;;  %v7075_v49 = vmul.f32 %v16071_v11, %v19472_v8  ;;  %v6738_v14 = vand.u32 2147483647, %v19470_v6  ;;  %v6740_v0 = vand.u32 2147483648, %v19470_v6 }
 0x6c8   : > { %7626 = vperm.xlu0 %8191, %v7043_v46   ;;  %v6847_v36 = vsel %vm6844_vm13, %v6846_v31, %v6842_v26  ;;  %v6731_v55 = vsub.f32 1.0, %v6730_v2  ;;  %v7719_v60 = vperm.slane %v17192_v38, %v12447_v16  ;;  %vm6734_vm8 = vweird.f32 %v19470_v6  ;;  %v19480_v46 = vld [vmem:[#allocation13_spill] sm:$0xff]  ;;  %v17293_v6 = vpop.permute.xlu1 %7488 }
 0x6c9   : > { %v6848_v58 = vmul.f32 %v19473_v59, %v6847_v36  ;;  %v7076_v20 = vsub.f32 1.0, %v7075_v49  ;;  %vm6735_vm15 = vweird.f32 %v19471_v22  ;;  %v7085_v41 = vand.u32 2147483648, %v19472_v8  ;;  %v17302_v29 = vpop.permute.xlu0 %7500 }
 0x6ca   : > { %v6732_v27 = vmul.f32 %v19471_v22, %v6731_v55  ;;  %v6880_v15 = vmul.f32 %v19475_v42, %v19474_v48  ;;  %vm7079_vm1 = vweird.f32 %v19472_v8  ;;  %vm7080_vm2 = vweird.f32 %v16071_v11  ;;  %vm6736_vm7 = vmor %vm6734_vm8, %vm6735_vm15 }
 0x6cb   : > { %7587 = vperm.xlu1 %8192, %v6848_v58   ;;  %v7077_v54 = vmul.f32 %v16071_v11, %v7076_v20  ;;  %v7083_v12 = vand.u32 2147483647, %v19472_v8  ;;  %vm6739_vm14 = vcmp.eq.f32.partialorder %v6738_v14, 8.507059e+37  ;;  %v6741_v52 = vor.u32 1.1754944e-38, %v6740_v0  ;;  %vm7081_vm5 = vmor %vm7079_vm1, %vm7080_vm2  ;;  %v17300_v8 = vpop.permute.xlu2 %7485  ;;  %v19481_v14 = vld [vmem:[#allocation155_spill] sm:$0xff] }
 0x6cc   : > { %v6733_v18 = vadd.f32 %v19471_v22, %v6732_v27  ;;  %v6881_v43 = vsub.f32 1.0, %v6880_v15  ;;  %vm6885_vm6 = vweird.f32 %v19475_v42  ;;  %v6890_v28 = vand.u32 2147483648, %v19474_v48  ;;  %v19483_v27 = vld [vmem:[#allocation142_spill] sm:$0xff] }
 0x6cd   : > { %v7078_v47 = vadd.f32 %v16071_v11, %v7077_v54  ;;  %v7711_v44 = vperm.slane %v17157_v25, %v12447_v16  ;;  %v7086_v21 = vor.u32 1.1754944e-38, %v7085_v41  ;;  %v6888_v57 = vand.u32 2147483647, %v19474_v48  ;;  %v19484_v41 = vld [vmem:[#allocation160_spill] sm:$0xff] }
 0x6ce   : > { %v6737_v56 = vsel %vm6736_vm7, %v19471_v22, %v6733_v18  ;;  %v6882_v19 = vmul.f32 %v19475_v42, %v6881_v43  ;;  %v7722_v17 = vperm.slane %v17252_v1, %v12447_v16  ;;  %vm7084_vm9 = vcmp.eq.f32.partialorder %v7083_v12, 8.507059e+37  ;;  %v19509_v1 = vld [vmem:[#allocation109_spill] sm:$0xff] }
 0x6cf   : > { %v6742_v30 = vsel %vm6739_vm14, %v6741_v52, %v6737_v56  ;;  %v7082_v63 = vsel %vm7081_vm5, %v16071_v11, %v7078_v47  ;;  %vm6884_vm3 = vweird.f32 %v19474_v48  ;;  %v6891_v10 = vor.u32 1.1754944e-38, %v6890_v28  ;;  %v19479_v11 = vld [vmem:[#allocation146_spill] sm:$0xff] }
 0x6d0   : > { %v6743_v24 = vmul.f32 %v19476_v34, %v6742_v30  ;;  %v7087_v13 = vsel %vm7084_vm9, %v7086_v21, %v7082_v63  ;;  %v6883_v25 = vadd.f32 %v19475_v42, %v6882_v19  ;;  %vm6886_vm13 = vmor %vm6884_vm3, %vm6885_vm6  ;;  %vm19478_vm8 = vcmask 1041409   ;;  %v19485_v30 = vld [vmem:[#allocation102_spill] sm:$0xff] }
 0x6d1   : > { %v7088_v4 = vmul.f32 %v19477_v40, %v7087_v13  ;;  %v7830_v9 = vsel %vm19478_vm8, %v7711_v44, %v7710_v33  ;;  %v6775_v31 = vmul.f32 %v19480_v46, %v19479_v11  ;;  %v7712_v22 = vperm.slane %v17132_v3, %v12447_v16  ;;  %v17339_v13 = vpop.permute.xlu1 %7497 }
 0x6d2   : > { %7566 = vperm.xlu2 %8193, %v6743_v24   ;;  %v6887_v2 = vsel %vm6886_vm13, %v19475_v42, %v6883_v25  ;;  %vm6889_vm15 = vcmp.eq.f32.partialorder %v6888_v57, 8.507059e+37  ;;  %v7120_v26 = vmul.f32 %v16218_v23, %v16027_v35  ;;  %v6783_v36 = vand.u32 2147483647, %v19479_v11  ;;  %v19487_v25 = vld [vmem:[#allocation150_spill] sm:$0xff] }
 0x6d3   : > { %7635 = vperm.xlu0 %8191, %v7088_v4   ;;  %v6892_v33 = vsel %vm6889_vm15, %v6891_v10, %v6887_v2  ;;  %v6776_v49 = vsub.f32 1.0, %v6775_v31  ;;  %v6785_v55 = vand.u32 2147483648, %v19479_v11  ;;  %vm19482_vm1 = vcmask 1042434   ;;  %v17331_v57 = vpop.permute.xlu2 %7494  ;;  %v19488_v10 = vld [vmem:[#allocation20_spill] sm:$0xff]  ;;  %v17349_v31 = vpop.permute.xlu0 %7509 }
 0x6d4   : > { %v6893_v3 = vmul.f32 %v19481_v14, %v6892_v33  ;;  %v7831_v0 = vsel %vm19482_vm1, %v7712_v22, %v7830_v9  ;;  %vm6779_vm2 = vweird.f32 %v19479_v11  ;;  %v7121_v59 = vsub.f32 1.0, %v7120_v26  ;;  %v19489_v9 = vld [vmem:[#allocation173_spill] sm:$0xff]  ;;  %v19490_v33 = vld [vmem:[#allocation26_spill] sm:$0xff] }
 0x6d5   : > { %v6777_v58 = vmul.f32 %v19480_v46, %v6776_v49  ;;  %vm6780_vm14 = vweird.f32 %v19480_v46  ;;  %v7130_v20 = vand.u32 2147483648, %v16027_v35  ;;  %v6925_v48 = vmul.f32 %v19484_v41, %v19483_v27  ;;  %v19491_v49 = vld [vmem:[#allocation184_spill] sm:$0xff] }
 0x6d6   : > { %7596 = vperm.xlu1 %8192, %v6893_v3   ;;  %v7122_v42 = vmul.f32 %v16218_v23, %v7121_v59  ;;  %vm7124_vm7 = vweird.f32 %v16027_v35  ;;  %vm7125_vm6 = vweird.f32 %v16218_v23  ;;  %v7128_v15 = vand.u32 2147483647, %v16027_v35  ;;  %vm6781_vm9 = vmor %vm6779_vm2, %vm6780_vm14 }
 0x6d7   : > { %v6778_v54 = vadd.f32 %v19480_v46, %v6777_v58  ;;  %vm6784_vm5 = vcmp.eq.f32.partialorder %v6783_v36, 8.507059e+37  ;;  %v6786_v12 = vor.u32 1.1754944e-38, %v6785_v55  ;;  %v6926_v18 = vsub.f32 1.0, %v6925_v48  ;;  %vm7126_vm13 = vmor %vm7124_vm7, %vm7125_vm6  ;;  %v19492_v55 = vld [vmem:[#allocation115_spill] sm:$0xff] }
 0x6d8   : > { %v7123_v52 = vadd.f32 %v16218_v23, %v7122_v42  ;;  %vm6930_vm3 = vweird.f32 %v19484_v41  ;;  %v6935_v43 = vand.u32 2147483648, %v19483_v27  ;;  %v7714_v47 = vperm.slane %v17210_v62, %v12447_v16 }
 0x6d9   : > { %v6782_v28 = vsel %vm6781_vm9, %v19480_v46, %v6778_v54  ;;  %v7131_v35 = vor.u32 1.1754944e-38, %v7130_v20  ;;  %v6927_v44 = vmul.f32 %v19484_v41, %v6926_v18  ;;  %v6933_v56 = vand.u32 2147483647, %v19483_v27 }
 0x6da   : > { %v6787_v21 = vsel %vm6784_vm5, %v6786_v12, %v6782_v28  ;;  %v7127_v19 = vsel %vm7126_vm13, %v16218_v23, %v7123_v52  ;;  %vm7129_vm8 = vcmp.eq.f32.partialorder %v7128_v15, 8.507059e+37  ;;  %vm6929_vm15 = vweird.f32 %v19483_v27  ;;  %v19494_v12 = vld [vmem:[#allocation202_spill] sm:$0xff]  ;;  %v19496_v28 = vld [vmem:[#allocation217_spill] sm:$0xff] }
 0x6db   : > { %v6788_v63 = vmul.f32 %v19485_v30, %v6787_v21  ;;  %v7132_v34 = vsel %vm7129_vm8, %v7131_v35, %v7127_v19  ;;  %v6928_v62 = vadd.f32 %v19484_v41, %v6927_v44  ;;  %vm19486_vm1 = vcmask 1043459   ;;  %vm6931_vm2 = vmor %vm6929_vm15, %vm6930_vm3  ;;  %v19497_v35 = vld [vmem:[#allocation222_spill] sm:$0xff]  ;;  %v19498_v21 = vld [vmem:[#allocation107_spill] sm:$0xff] }
 0x6dc   : > { %v7832_v24 = vsel %vm19486_vm1, %v7713_v61, %v7831_v0  ;;  %v7133_v40 = vmul.f32 %v19487_v25, %v7132_v34  ;;  %v6936_v23 = vor.u32 1.1754944e-38, %v6935_v43  ;;  %v6820_v11 = vmul.f32 %v19489_v9, %v19488_v10 }
 0x6dd   : > { %v7833_v4 = vsel %vm4764_vm0, %v7714_v47, %v7832_v24  ;;  %v7715_v46 = vperm.slane %v17187_v32, %v12447_v16  ;;  %7575 = vperm.xlu2 %8193, %v6788_v63   ;;  %v6932_v37 = vsel %vm6931_vm2, %v19484_v41, %v6928_v62  ;;  %vm6934_vm14 = vcmp.eq.f32.partialorder %v6933_v56, 8.507059e+37  ;;  %v17392_v56 = vpop.permute.xlu1 %7506  ;;  %v17398_v62 = vpop.permute.xlu0 %7518 }
 0x6de   : > { %v7718_v61 = vperm.slane %v17246_v7, %v12447_v16  ;;  %v7725_v22 = vperm.slane %v17302_v29, %v12447_v16  ;;  %7644 = vperm.xlu0 %8191, %v7133_v40   ;;  %v6937_v2 = vsel %vm6934_vm14, %v6936_v23, %v6932_v37  ;;  %v6821_v26 = vsub.f32 1.0, %v6820_v11  ;;  %v19499_v23 = vld [vmem:[#allocation140_spill] sm:$0xff] }
 0x6df   : > { %v6970_v36 = vmul.f32 %v19491_v49, %v19490_v33  ;;  %v6938_v32 = vmul.f32 %v19492_v55, %v6937_v2  ;;  %v7834_v14 = vsel %vm4766_vm4, %v7715_v46, %v7833_v4  ;;  %v6828_v3 = vand.u32 2147483647, %v19488_v10 }
 0x6e0   : > { %v6830_v0 = vand.u32 2147483648, %v19488_v10  ;;  %v6822_v59 = vmul.f32 %v19489_v9, %v6821_v26  ;;  %vm6825_vm7 = vweird.f32 %v19489_v9  ;;  %v6978_v58 = vand.u32 2147483647, %v19490_v33  ;;  %v19500_v26 = vld [vmem:[#allocation180_spill] sm:$0xff] }
 0x6e1   : > { %v6971_v7 = vsub.f32 1.0, %v6970_v36  ;;  %7605 = vperm.xlu1 %8192, %v6938_v32   ;;  %vm19493_vm6 = vcmask 1041409   ;;  %vm6824_vm5 = vweird.f32 %v19488_v10  ;;  %v6980_v27 = vand.u32 2147483648, %v19490_v33 }
 0x6e2   : > { %v7837_v20 = vsel %vm19493_vm6, %v7719_v60, %v7718_v61  ;;  %v7717_v41 = vperm.slane %v17261_v50, %v12447_v16  ;;  %v6823_v48 = vadd.f32 %v19489_v9, %v6822_v59  ;;  %vm6975_vm9 = vweird.f32 %v19491_v49  ;;  %v17380_v60 = vpop.permute.xlu2 %7503  ;;  %vm6826_vm3 = vmor %vm6824_vm5, %vm6825_vm7  ;;  %v19495_v50 = vld [vmem:[#allocation208_spill] sm:$0xff] }
 0x6e3   : > { %v6972_v42 = vmul.f32 %v19491_v49, %v6971_v7  ;;  %v7835_v38 = vsel %vm4768_vm12, %v7716_v39, %v7834_v14  ;;  %vm6829_vm13 = vcmp.eq.f32.partialorder %v6828_v3, 8.507059e+37  ;;  %v6831_v15 = vor.u32 1.1754944e-38, %v6830_v0 }
 0x6e4   : > { %v7836_v54 = vsel %vm4770_vm11, %v7717_v41, %v7835_v38  ;;  %v6865_v18 = vmul.f32 %v19495_v50, %v19494_v12  ;;  %v6827_v52 = vsel %vm6826_vm3, %v19489_v9, %v6823_v48  ;;  %vm6974_vm8 = vweird.f32 %v19490_v33  ;;  %v19501_v33 = vld [vmem:[#allocation39_spill] sm:$0xff] }
 0x6e5   : > { %v6973_v43 = vadd.f32 %v19491_v49, %v6972_v42  ;;  %vm6979_vm15 = vcmp.eq.f32.partialorder %v6978_v58, 8.507059e+37  ;;  %7910 = vst.msk [vmem:[%s9463_s22 + $0x40] sm:$0xff] %vm4893_vm10, %v7836_v54  ;;  %v6832_v5 = vsel %vm6829_vm13, %v6831_v15, %v6827_v52  ;;  %vm6976_vm1 = vmor %vm6974_vm8, %vm6975_vm9  ;;  %v6981_v39 = vor.u32 1.1754944e-38, %v6980_v27  ;;  %v19503_v58 = vld [vmem:[#allocation139_spill] sm:$0xff]  ;;  %v19504_v42 = vld [vmem:[#allocation165_spill] sm:$0xff] }
 0x6e6   : > { %v6866_v47 = vsub.f32 1.0, %v6865_v18  ;;  %v7015_v44 = vmul.f32 %v19497_v35, %v19496_v28  ;;  %v6833_v19 = vmul.f32 %v19498_v21, %v6832_v5  ;;  %v6873_v63 = vand.u32 2147483647, %v19494_v12 }
 0x6e7   : > { %v6977_v30 = vsel %vm6976_vm1, %v19491_v49, %v6973_v43  ;;  %v6875_v34 = vand.u32 2147483648, %v19494_v12  ;;  %vm6870_vm2 = vweird.f32 %v19495_v50  ;;  %vm6869_vm14 = vweird.f32 %v19494_v12  ;;  %v17435_v12 = vpop.permute.xlu1 %7515 }
 0x6e8   : > { %v6982_v24 = vsel %vm6979_vm15, %v6981_v39, %v6977_v30  ;;  %v6867_v25 = vmul.f32 %v19495_v50, %v6866_v47  ;;  %v7016_v40 = vsub.f32 1.0, %v7015_v44  ;;  %7584 = vperm.xlu2 %8193, %v6833_v19   ;;  %v7023_v10 = vand.u32 2147483647, %v19496_v28  ;;  %vm6871_vm6 = vmor %vm6869_vm14, %vm6870_vm2  ;;  %v17440_v39 = vpop.permute.xlu0 %7527 }
 0x6e9   : > { %v6983_v4 = vmul.f32 %v19499_v23, %v6982_v24  ;;  %v7025_v9 = vand.u32 2147483648, %v19496_v28  ;;  %vm7020_vm7 = vweird.f32 %v19497_v35  ;;  %v7720_v37 = vperm.slane %v17300_v8, %v12447_v16 }
 0x6ea   : > { %v6868_v11 = vadd.f32 %v19495_v50, %v6867_v25  ;;  %v7017_v46 = vmul.f32 %v19497_v35, %v7016_v40  ;;  %v7721_v61 = vperm.slane %v17293_v6, %v12447_v16  ;;  %vm6874_vm5 = vcmp.eq.f32.partialorder %v6873_v63, 8.507059e+37  ;;  %v17419_v6 = vpop.permute.xlu2 %7512  ;;  %v19507_v63 = vld [vmem:[#allocation21_spill] sm:$0xff] }
 0x6eb   : > { %7614 = vperm.xlu1 %8192, %v6983_v4   ;;  %v6876_v2 = vor.u32 1.1754944e-38, %v6875_v34  ;;  %v6910_v49 = vmul.f32 %v19501_v33, %v19500_v26  ;;  %vm7019_vm9 = vweird.f32 %v19496_v28  ;;  %vm7024_vm3 = vcmp.eq.f32.partialorder %v7023_v10, 8.507059e+37 }
 0x6ec   : > { %v6872_v36 = vsel %vm6871_vm6, %v19495_v50, %v6868_v11  ;;  %v7018_v55 = vadd.f32 %v19497_v35, %v7017_v46  ;;  %vm7021_vm13 = vmor %vm7019_vm9, %vm7020_vm7  ;;  %v7026_v8 = vor.u32 1.1754944e-38, %v7025_v9  ;;  %vm19502_vm8 = vcmask 1042434   ;;  %v19506_v50 = vld [vmem:[#allocation117_spill] sm:$0xff] }
 0x6ed   : > { %v6877_v32 = vsel %vm6874_vm5, %v6876_v2, %v6872_v36  ;;  %v7838_v14 = vsel %vm19502_vm8, %v7720_v37, %v7837_v20  ;;  %v6911_v3 = vsub.f32 1.0, %v6910_v49  ;;  %vm6915_vm15 = vweird.f32 %v19501_v33 }
 0x6ee   : > { %v7022_v0 = vsel %vm7021_vm13, %v19497_v35, %v7018_v55  ;;  %v6918_v59 = vand.u32 2147483647, %v19500_v26  ;;  %v6920_v7 = vand.u32 2147483648, %v19500_v26  ;;  %v6878_v27 = vmul.f32 %v19503_v58, %v6877_v32  ;;  %v19526_v58 = vld [vmem:[#allocation119_spill] sm:$0xff] }
 0x6ef   : > { %v7027_v41 = vsel %vm7024_vm3, %v7026_v8, %v7022_v0  ;;  %v6912_v48 = vmul.f32 %v19501_v33, %v6911_v3  ;;  %v7060_v38 = vmul.f32 %v16064_v45, %v19504_v42  ;;  %v7728_v20 = vperm.slane %v17349_v31, %v12447_v16  ;;  %v7525_v55 = vpop.permute.xlu1 %7524  ;;  %v19512_v3 = vld [vmem:[#allocation188_spill] sm:$0xff] }
 0x6f0   : > { %vm19505_vm1 = vcmask 1043459   ;;  %v7724_v54 = vperm.slane %v17339_v13, %v12447_v16  ;;  %vm6914_vm2 = vweird.f32 %v19500_v26  ;;  %7593 = vperm.xlu2 %8193, %v6878_v27   ;;  %v7028_v18 = vmul.f32 %v19506_v50, %v7027_v41 }
 0x6f1   : > { %v7839_v15 = vsel %vm19505_vm1, %v7721_v61, %v7838_v14  ;;  %v6913_v52 = vadd.f32 %v19501_v33, %v6912_v48  ;;  %v7061_v43 = vsub.f32 1.0, %v7060_v38  ;;  %v7068_v5 = vand.u32 2147483647, %v19504_v42  ;;  %vm6916_vm14 = vmor %vm6914_vm2, %vm6915_vm15  ;;  %v19511_v14 = vld [vmem:[#allocation27_spill] sm:$0xff] }
 0x6f2   : > { %vm6919_vm7 = vcmp.eq.f32.partialorder %v6918_v59, 8.507059e+37  ;;  %v6921_v47 = vor.u32 1.1754944e-38, %v6920_v7  ;;  %v7070_v13 = vand.u32 2147483648, %v19504_v42  ;;  %v7723_v28 = vperm.slane %v17331_v57, %v12447_v16  ;;  %v19508_v57 = vld [vmem:[#allocation179_spill] sm:$0xff]  ;;  %v17474_v37 = vpop.permute.xlu2 %7521  ;;  %v17490_v59 = vpop.permute.xlu0 %7536 }
 0x6f3   : > { %7623 = vperm.xlu1 %8192, %v7028_v18   ;;  %v6917_v35 = vsel %vm6916_vm14, %v19501_v33, %v6913_v52  ;;  %v7062_v44 = vmul.f32 %v16064_v45, %v7061_v43  ;;  %vm7065_vm6 = vweird.f32 %v16064_v45  ;;  %v7840_v21 = vsel %vm4764_vm0, %v7722_v17, %v7839_v15 }
 0x6f4   : > { %v6922_v19 = vsel %vm6919_vm7, %v6921_v47, %v6917_v35  ;;  %vm7064_vm5 = vweird.f32 %v19504_v42  ;;  %v7841_v30 = vsel %vm4766_vm4, %v7723_v28, %v7840_v21  ;;  %v6955_v34 = vmul.f32 %v19508_v57, %v19507_v63  ;;  %v19520_v35 = vld [vmem:[#allocation147_spill] sm:$0xff] }
 0x6f5   : > { %v7063_v24 = vadd.f32 %v16064_v45, %v7062_v44  ;;  %vm7069_vm9 = vcmp.eq.f32.partialorder %v7068_v5, 8.507059e+37  ;;  %v7842_v25 = vsel %vm4768_vm12, %v7724_v54, %v7841_v30  ;;  %v7727_v40 = vperm.slane %v17392_v56, %v12447_v16  ;;  %vm7066_vm3 = vmor %vm7064_vm5, %vm7065_vm6  ;;  %v19521_v44 = vld [vmem:[#allocation25_spill] sm:$0xff] }
 0x6f6   : > { %v6923_v23 = vmul.f32 %v19509_v1, %v6922_v19  ;;  %v7071_v17 = vor.u32 1.1754944e-38, %v7070_v13  ;;  %v7843_v4 = vsel %vm4770_vm11, %v7725_v22, %v7842_v25  ;;  %v6956_v10 = vsub.f32 1.0, %v6955_v34 }
 0x6f7   : > { %v7067_v9 = vsel %vm7066_vm3, %v16064_v45, %v7063_v24  ;;  %7911 = vst.msk [vmem:[%s9463_s22 + $0x48] sm:$0xff] %vm4893_vm10, %v7843_v4  ;;  %v6963_v11 = vand.u32 2147483647, %v19507_v63  ;;  %v6965_v46 = vand.u32 2147483648, %v19507_v63  ;;  %v7105_v56 = vmul.f32 %v16214_v51, %v16025_v53  ;;  %v19510_v45 = vld [vmem:[#allocation130_spill] sm:$0xff] }
 0x6f8   : > { %v7072_v61 = vsel %vm7069_vm9, %v7071_v17, %v7067_v9  ;;  %v6957_v2 = vmul.f32 %v19508_v57, %v6956_v10  ;;  %vm6959_vm13 = vweird.f32 %v19507_v63  ;;  %vm6960_vm8 = vweird.f32 %v19508_v57  ;;  %7602 = vperm.xlu2 %8193, %v6923_v23   ;;  %v19522_v10 = vld [vmem:[#allocation189_spill] sm:$0xff]  ;;  %v19523_v9 = vld [vmem:[#allocation152_spill] sm:$0xff] }
 0x6f9   : > { %v7073_v29 = vmul.f32 %v19510_v45, %v7072_v61  ;;  %v7106_v22 = vsub.f32 1.0, %v7105_v56  ;;  %v7113_v26 = vand.u32 2147483647, %v16025_v53  ;;  %v7115_v33 = vand.u32 2147483648, %v16025_v53  ;;  %vm6961_vm2 = vmor %vm6959_vm13, %vm6960_vm8 }
 0x6fa   : > { %v6958_v49 = vadd.f32 %v19508_v57, %v6957_v2  ;;  %vm7109_vm15 = vweird.f32 %v16025_v53  ;;  %vm7110_vm1 = vweird.f32 %v16214_v51  ;;  %v7726_v36 = vperm.slane %v17380_v60, %v12447_v16  ;;  %v7546_v23 = vpop.permute.xlu0 %7545 }
 0x6fb   : > { %7632 = vperm.xlu1 %8192, %v7073_v29   ;;  %vm6964_vm14 = vcmp.eq.f32.partialorder %v6963_v11, 8.507059e+37  ;;  %v6966_v32 = vor.u32 1.1754944e-38, %v6965_v46  ;;  %v7107_v8 = vmul.f32 %v16214_v51, %v7106_v22  ;;  %v7000_v0 = vmul.f32 %v19512_v3, %v19511_v14  ;;  %vm7111_vm5 = vmor %vm7109_vm15, %vm7110_vm1  ;;  %v19524_v46 = vld [vmem:[#allocation9_spill] sm:$0xff] }
 0x6fc   : > { %v6962_v7 = vsel %vm6961_vm2, %v19508_v57, %v6958_v49  ;;  %vm17493_vm7 = vcmp.eq.f32.partialorder %v7113_v26, 8.507059e+37  ;;  %vm19515_vm6 = vcmask 1041409   ;;  %v7730_v27 = vperm.slane %v17435_v12, %v12447_v16  ;;  %v19516_v12 = vld [vmem:[#allocation128_spill] sm:$0xff] }
 0x6fd   : > { %v7844_v60 = vsel %vm19515_vm6, %v7727_v40, %v7726_v36  ;;  %v6967_v41 = vsel %vm6964_vm14, %v6966_v32, %v6962_v7  ;;  %v7108_v48 = vadd.f32 %v16214_v51, %v7107_v8  ;;  %v7116_v42 = vor.u32 1.1754944e-38, %v7115_v33  ;;  %v7531_v31 = vpop.permute.xlu2 %7530  ;;  %v7534_v40 = vpop.permute.xlu1 %7533 }
 0x6fe   : > { %v7001_v38 = vsub.f32 1.0, %v7000_v0  ;;  %vm7005_vm9 = vweird.f32 %v19512_v3  ;;  %v7008_v15 = vand.u32 2147483647, %v19511_v14  ;;  %v7010_v54 = vand.u32 2147483648, %v19511_v14 }
 0x6ff   : > { %v7729_v50 = vperm.slane %v17419_v6, %v12447_v16  ;;  %v6968_v18 = vmul.f32 %v19516_v12, %v6967_v41  ;;  %v7112_v52 = vsel %vm7111_vm5, %v16214_v51, %v7108_v48  ;;  %vm19517_vm3 = vcmask 1042434   ;;  %v19519_v6 = vld [vmem:[#allocation145_spill] sm:$0xff] }
 0x700   : > { %v7002_v43 = vmul.f32 %v19512_v3, %v7001_v38  ;;  %v7845_v53 = vsel %vm19517_vm3, %v7728_v20, %v7844_v60  ;;  %v7117_v5 = vsel %vm17493_vm7, %v7116_v42, %v7112_v52  ;;  %vm7004_vm13 = vweird.f32 %v19511_v14  ;;  %v19528_v52 = vld [vmem:[#allocation19_spill] sm:$0xff] }
 0x701   : > { %vm19518_vm8 = vcmask 1043459   ;;  %7611 = vperm.xlu2 %8193, %v6968_v18   ;;  %v7118_v13 = vmul.f32 %v19519_v6, %v7117_v5  ;;  %v7045_v21 = vmul.f32 %v19521_v44, %v19520_v35  ;;  %v7731_v20 = vperm.slane %v17398_v62, %v12447_v16  ;;  %vm7006_vm15 = vmor %vm7004_vm13, %vm7005_vm9 }
 0x702   : > { %v7846_v47 = vsel %vm19518_vm8, %v7729_v50, %v7845_v53  ;;  %v7003_v28 = vadd.f32 %v19512_v3, %v7002_v43  ;;  %v7011_v19 = vor.u32 1.1754944e-38, %v7010_v54  ;;  %vm7009_vm1 = vcmp.eq.f32.partialorder %v7008_v15, 8.507059e+37  ;;  %v7555_v41 = vpop.permute.xlu0 %7554 }
 0x703   : > { %v7847_v51 = vsel %vm4764_vm0, %v7730_v27, %v7846_v47  ;;  %7641 = vperm.xlu1 %8192, %v7118_v13   ;;  %v7046_v63 = vsub.f32 1.0, %v7045_v21  ;;  %v7732_v57 = vperm.slane %v17474_v37, %v12447_v16  ;;  %v7733_v24 = vperm.slane %v7525_v55, %v12447_v16 }
 0x704   : > { %v7007_v30 = vsel %vm7006_vm15, %v19512_v3, %v7003_v28  ;;  %v7848_v25 = vsel %vm4766_vm4, %v7731_v20, %v7847_v51  ;;  %vm7050_vm2 = vweird.f32 %v19521_v44  ;;  %vm7049_vm14 = vweird.f32 %v19520_v35 }
 0x705   : > { %v7012_v34 = vsel %vm7009_vm1, %v7011_v19, %v7007_v30  ;;  %v7047_v62 = vmul.f32 %v19521_v44, %v7046_v63  ;;  %v7849_v1 = vsel %vm4768_vm12, %v7732_v57, %v7848_v25  ;;  %v7055_v17 = vand.u32 2147483648, %v19520_v35  ;;  %vm7051_vm7 = vmor %vm7049_vm14, %vm7050_vm2  ;;  %v7543_v3 = vpop.permute.xlu1 %7542 }
 0x706   : > { %v7850_v4 = vsel %vm4770_vm11, %v7733_v24, %v7849_v1  ;;  %v7090_v11 = vmul.f32 %v19523_v9, %v19522_v10  ;;  %v7013_v56 = vmul.f32 %v19524_v46, %v7012_v34  ;;  %v7053_v61 = vand.u32 2147483647, %v19520_v35  ;;  %vm19530_vm14 = vmmov %vm19517_vm3 }
 0x707   : > { %v7048_v37 = vadd.f32 %v19521_v44, %v7047_v62  ;;  %7912 = vst.msk [vmem:[%s9463_s22 + $0x50] sm:$0xff] %vm4893_vm10, %v7850_v4  ;;  %v7735_v2 = vperm.slane %v7531_v31, %v12447_v16  ;;  %v7734_v29 = vperm.slane %v17440_v39, %v12447_v16  ;;  %v7056_v26 = vor.u32 1.1754944e-38, %v7055_v17 }
 0x708   : > { %v7091_v45 = vsub.f32 1.0, %v7090_v11  ;;  %vm7054_vm6 = vcmp.eq.f32.partialorder %v7053_v61, 8.507059e+37  ;;  %vm19525_vm5 = vcmask 1041409   ;;  %v7736_v32 = vperm.slane %v7534_v40, %v12447_v16 }
 0x709   : > { %7620 = vperm.xlu2 %8193, %v7013_v56   ;;  %v7052_v22 = vsel %vm7051_vm7, %v19521_v44, %v7048_v37  ;;  %v7851_v49 = vsel %vm19525_vm5, %v7735_v2, %v7734_v29  ;;  %v7540_v36 = vpop.permute.xlu2 %7539  ;;  %vm7095_vm9 = vweird.f32 %v19523_v9  ;;  %v7100_v14 = vand.u32 2147483648, %v19522_v10  ;;  %vm19529_vm2 = vmmov %vm19525_vm5 }
 0x70a   : > { %v7092_v33 = vmul.f32 %v19523_v9, %v7091_v45  ;;  %v7057_v55 = vsel %vm7054_vm6, %v7056_v26, %v7052_v22  ;;  %v7852_v39 = vsel %vm19517_vm3, %v7736_v32, %v7851_v49  ;;  %v7738_v0 = vperm.slane %v7540_v36, %v12447_v16  ;;  %v7564_v13 = vpop.permute.xlu0 %7563  ;;  %vm19532_vm6 = vmmov %vm19529_vm2 }
 0x70b   : > { %v7737_v7 = vperm.slane %v17490_v59, %v12447_v16  ;;  %v7058_v60 = vmul.f32 %v19526_v58, %v7057_v55  ;;  %vm7094_vm13 = vweird.f32 %v19522_v10  ;;  %v7098_v27 = vand.u32 2147483647, %v19522_v10  ;;  %vm19533_vm5 = vmmov %vm19517_vm3 }
 0x70c   : > { %v7093_v8 = vadd.f32 %v19523_v9, %v7092_v33  ;;  %vm7096_vm8 = vmor %vm7094_vm13, %vm7095_vm9  ;;  %vm19527_vm15 = vcmask 1043459   ;;  %v7101_v38 = vor.u32 1.1754944e-38, %v7100_v14  ;;  %v7739_v59 = vperm.slane %v7543_v3, %v12447_v16 }
 0x70d   : > { %v7853_v42 = vsel %vm19527_vm15, %v7737_v7, %v7852_v39  ;;  %vm7099_vm1 = vcmp.eq.f32.partialorder %v7098_v27, 8.507059e+37  ;;  %v7740_v12 = vperm.slane %v7546_v23, %v12447_v16  ;;  %v7552_v5 = vpop.permute.xlu1 %7551  ;;  %v7743_v31 = vperm.slane %v7555_v41, %v12447_v16  ;;  %vm19531_vm7 = vmmov %vm19527_vm15 }
 0x70e   : > { %v7097_v48 = vsel %vm7096_vm8, %v19523_v9, %v7093_v8  ;;  %v7854_v15 = vsel %vm4764_vm0, %v7738_v0, %v7853_v42  ;;  %v7742_v44 = vperm.slane %v7552_v5, %v12447_v16  ;;  %v7746_v34 = vperm.slane %v7564_v13, %v12447_v16  ;;  %vm19534_vm9 = vmmov %vm19531_vm7 }
 0x70f   : > { %v7102_v54 = vsel %vm7099_vm1, %v7101_v38, %v7097_v48  ;;  %v7855_v50 = vsel %vm4766_vm4, %v7739_v59, %v7854_v15  ;;  %vm19535_vm3 = vmmov %vm19529_vm2 }
 0x710   : > { %v7103_v43 = vmul.f32 %v19528_v52, %v7102_v54  ;;  %v7856_v47 = vsel %vm4768_vm12, %v7740_v12, %v7855_v50  ;;  %v7858_v20 = vsel %vm19529_vm2, %v7743_v31, %v7742_v44  ;;  %vm19536_vm13 = vmmov %vm19533_vm5 }
 0x711   : > { %7629 = vperm.xlu2 %8193, %v7058_v60   ;;  %vm19537_vm8 = vmmov %vm19531_vm7 }
 0x712   : > { %v7573_v35 = vpop.permute.xlu0 %7572  ;;  %vm19538_vm15 = vmmov %vm19529_vm2 }
 0x713   : > { %v7749_v23 = vperm.slane %v7573_v35, %v12447_v16  ;;  %vm19539_vm1 = vmmov %vm19533_vm5 }
 0x714   : > { %v7549_v18 = vpop.permute.xlu2 %7548  ;;  %vm19540_vm2 = vmmov %vm19531_vm7 }
 0x715   : > { %v7741_v53 = vperm.slane %v7549_v18, %v12447_v16 }
 0x717   : > { %v7857_v6 = vsel %vm4770_vm11, %v7741_v53, %v7856_v47 }
 0x718   : > { %7913 = vst.msk [vmem:[%s9463_s22 + $0x58] sm:$0xff] %vm4893_vm10, %v7857_v6  ;;  %v7561_v28 = vpop.permute.xlu1 %7560 }
 0x719   : > { %7638 = vperm.xlu2 %8193, %v7103_v43   ;;  %v7745_v30 = vperm.slane %v7561_v28, %v12447_v16 }
 0x71a   : > { %v7582_v25 = vpop.permute.xlu0 %7581 }
 0x71b   : > { %v7752_v22 = vperm.slane %v7582_v25, %v12447_v16 }
 0x720   : > { %v7558_v51 = vpop.permute.xlu2 %7557 }
 0x721   : > { %v7744_v21 = vperm.slane %v7558_v51, %v12447_v16 }
 0x722   : > { %v7591_v11 = vpop.permute.xlu0 %7590 }
 0x723   : > { %v7859_v19 = vsel %vm19530_vm14, %v7744_v21, %v7858_v20  ;;  %v7570_v57 = vpop.permute.xlu1 %7569  ;;  %v7755_v8 = vperm.slane %v7591_v11, %v12447_v16 }
 0x724   : > { %v7860_v63 = vsel %vm19531_vm7, %v7745_v30, %v7859_v19  ;;  %v7748_v62 = vperm.slane %v7570_v57, %v12447_v16 }
 0x725   : > { %v7861_v1 = vsel %vm4764_vm0, %v7746_v34, %v7860_v63 }
 0x72a   : > { %v7600_v2 = vpop.permute.xlu0 %7599 }
 0x72b   : > { %v7758_v42 = vperm.slane %v7600_v2, %v12447_v16 }
 0x72c   : > { %v7567_v24 = vpop.permute.xlu2 %7566 }
 0x72d   : > { %v7747_v40 = vperm.slane %v7567_v24, %v12447_v16 }
 0x72f   : > { %v7862_v17 = vsel %vm4766_vm4, %v7747_v40, %v7861_v1 }
 0x730   : > { %v7863_v4 = vsel %vm4768_vm12, %v7748_v62, %v7862_v17 }
 0x731   : > { %v7864_v10 = vsel %vm4770_vm11, %v7749_v23, %v7863_v4 }
 0x732   : > { %7914 = vst.msk [vmem:[%s9463_s22 + $0x60] sm:$0xff] %vm4893_vm10, %v7864_v10  ;;  %v7579_v9 = vpop.permute.xlu1 %7578  ;;  %v7609_v39 = vpop.permute.xlu0 %7608 }
 0x733   : > { %v7751_v61 = vperm.slane %v7579_v9, %v12447_v16  ;;  %v7761_v12 = vperm.slane %v7609_v39, %v12447_v16 }
 0x737   : > { %v7576_v46 = vpop.permute.xlu2 %7575 }
 0x738   : > { %v7750_v56 = vperm.slane %v7576_v46, %v12447_v16 }
 0x73a   : > { %v7865_v45 = vsel %vm19532_vm6, %v7751_v61, %v7750_v56  ;;  %v7618_v38 = vpop.permute.xlu0 %7617 }
 0x73b   : > { %v7866_v33 = vsel %vm19533_vm5, %v7752_v22, %v7865_v45  ;;  %v7764_v13 = vperm.slane %v7618_v38, %v12447_v16 }
 0x73d   : > { %v7588_v37 = vpop.permute.xlu1 %7587 }
 0x73e   : > { %v7754_v36 = vperm.slane %v7588_v37, %v12447_v16 }
 0x742   : > { %v7585_v29 = vpop.permute.xlu2 %7584  ;;  %v7627_v5 = vpop.permute.xlu0 %7626 }
 0x743   : > { %v7753_v26 = vperm.slane %v7585_v29, %v12447_v16  ;;  %v7767_v30 = vperm.slane %v7627_v5, %v12447_v16 }
 0x745   : > { %v7867_v49 = vsel %vm19534_vm9, %v7753_v26, %v7866_v33 }
 0x746   : > { %v7868_v55 = vsel %vm4764_vm0, %v7754_v36, %v7867_v49 }
 0x747   : > { %v7869_v7 = vsel %vm4766_vm4, %v7755_v8, %v7868_v55 }
 0x748   : > { %v7597_v32 = vpop.permute.xlu1 %7596 }
 0x749   : > { %v7757_v0 = vperm.slane %v7597_v32, %v12447_v16 }
 0x74a   : > { %v7594_v14 = vpop.permute.xlu2 %7593  ;;  %v7636_v31 = vpop.permute.xlu0 %7635 }
 0x74b   : > { %v7756_v3 = vperm.slane %v7594_v14, %v12447_v16  ;;  %v7770_v62 = vperm.slane %v7636_v31, %v12447_v16 }
 0x74d   : > { %v7870_v58 = vsel %vm4768_vm12, %v7756_v3, %v7869_v7 }
 0x74e   : > { %v7871_v60 = vsel %vm4770_vm11, %v7757_v0, %v7870_v58 }
 0x74f   : > { %7915 = vst.msk [vmem:[%s9463_s22 + $0x68] sm:$0xff] %vm4893_vm10, %v7871_v60 }
 0x752   : > { %v7603_v27 = vpop.permute.xlu2 %7602  ;;  %v7645_v23 = vpop.permute.xlu0 %7644 }
 0x753   : > { %v7606_v41 = vpop.permute.xlu1 %7605  ;;  %v7759_v48 = vperm.slane %v7603_v27, %v12447_v16  ;;  %v7773_v46 = vperm.slane %v7645_v23, %v12447_v16 }
 0x754   : > { %v7760_v59 = vperm.slane %v7606_v41, %v12447_v16 }
 0x755   : > { %v7872_v15 = vsel %vm19535_vm3, %v7759_v48, %v7758_v42 }
 0x756   : > { %v7873_v54 = vsel %vm19536_vm13, %v7760_v59, %v7872_v15 }
 0x757   : > { %v7874_v43 = vsel %vm19537_vm8, %v7761_v12, %v7873_v54 }
 0x75b   : > { %v7612_v50 = vpop.permute.xlu2 %7611 }
 0x75c   : > { %v7762_v18 = vperm.slane %v7612_v50, %v12447_v16 }
 0x75d   : > { %v7615_v52 = vpop.permute.xlu1 %7614 }
 0x75e   : > { %v7875_v53 = vsel %vm4764_vm0, %v7762_v18, %v7874_v43  ;;  %v7763_v47 = vperm.slane %v7615_v52, %v12447_v16 }
 0x760   : > { %v7876_v6 = vsel %vm4766_vm4, %v7763_v47, %v7875_v53 }
 0x761   : > { %v7877_v44 = vsel %vm4768_vm12, %v7764_v13, %v7876_v6 }
 0x763   : > { %v7621_v28 = vpop.permute.xlu2 %7620 }
 0x764   : > { %v7765_v51 = vperm.slane %v7621_v28, %v12447_v16 }
 0x765   : > { %v7624_v35 = vpop.permute.xlu1 %7623 }
 0x766   : > { %v7878_v21 = vsel %vm4770_vm11, %v7765_v51, %v7877_v44  ;;  %v7766_v20 = vperm.slane %v7624_v35, %v12447_v16 }
 0x767   : > { %7916 = vst.msk [vmem:[%s9463_s22 + $0x70] sm:$0xff] %vm4893_vm10, %v7878_v21 }
 0x768   : > { %v7879_v34 = vsel %vm19538_vm15, %v7767_v30, %v7766_v20 }
 0x76b   : > { %v7630_v19 = vpop.permute.xlu2 %7629 }
 0x76c   : > { %v7768_v63 = vperm.slane %v7630_v19, %v12447_v16 }
 0x76d   : > { %v7633_v57 = vpop.permute.xlu1 %7632 }
 0x76e   : > { %v7880_v24 = vsel %vm19539_vm1, %v7768_v63, %v7879_v34  ;;  %v7769_v25 = vperm.slane %v7633_v57, %v12447_v16 }
 0x770   : > { %v7881_v40 = vsel %vm19540_vm2, %v7769_v25, %v7880_v24 }
 0x771   : > { %v7882_v10 = vsel %vm4764_vm0, %v7770_v62, %v7881_v40 }
 0x773   : > { %v7639_v1 = vpop.permute.xlu2 %7638 }
 0x774   : > { %v7771_v17 = vperm.slane %v7639_v1, %v12447_v16 }
 0x775   : > { %v7642_v4 = vpop.permute.xlu1 %7641 }
 0x776   : > { %v7772_v9 = vperm.slane %v7642_v4, %v12447_v16  ;;  %v7883_v11 = vsel %vm4766_vm4, %v7771_v17, %v7882_v10 }
 0x778   : > { %v7884_v56 = vsel %vm4768_vm12, %v7772_v9, %v7883_v11 }
 0x779   : > { %v7885_v37 = vsel %vm4770_vm11, %v7773_v46, %v7884_v56 }
 0x77a   : > { %7917 = vst.msk [vmem:[%s9463_s22 + $0x78] sm:$0xff] %vm4893_vm10, %v7885_v37 }
 0x77b PF: > { %s19_s25 = sadd.s32 1, %s9324_s25   ;;  %s19541_s7 = sld [smem:[#allocation6_spill]] }
 0x77c   : > { %p16_p4 = scmp.ge.s32.totalorder %s19_s25, 18   ;;  %s19542_s11 = sld [smem:[#allocation7_spill]] }
 0x77d   : > { %s19543_s18 = smov %s9300_s19  ;;  %s19544_s19 = smov %s9304_s20 }
 0x77e   : > { %s19545_s20 = smov %s9429_s13  ;;  %s19546_s21 = smov %s9316_s23 }
 0x77f   : > { %s19547_s22 = smov %s9320_s24  ;;  %18 = sbr.rel (!%p16_p4) target bundleno = 5 (0x5), region = 99 }
 0x781   : > { %s19548_s23 = smov %s19541_s7 }
 0x782   : > { %s19549_s24 = smov %s19542_s11 }
 0x784   :  { %7957 = vsyncpa [#allocation4], 1 }
 0x785   :  { %7959 = vsyncpa [#allocation4 + $0x1], 1 }

</bundles_post_ra>
